<compile_context>
chip_gen: v5e
topology: v5e:2x2
jax: 0.10.0
libtpu: 0.0.40
codegen_flags: <defaults>
</compile_context>

<pallas_src>
import functools

import jax
import jax.numpy as jnp
from jax.experimental import pallas as pl
from jax.experimental.pallas import tpu as pltpu


# ----------------------------------------------------------------------------
# Fused forward kernel: one grid step == one batch element.
# ----------------------------------------------------------------------------
def _conv_simple_kernel(
    patches_ref,                        # (1, 3*PH, K1) conv1 im2col rows, phase-ordered
    w1_ref, b1_ref,                     # (K1, 32), (1, 32)
    w2_ref, b2_ref,                     # (K2, 32, 32), (1, 32)
    pool1_ref,                          # (55, 331)
    w3_ref, b3_ref, w4_ref, b4_ref,     # (3, 32, 64), (1, 64), (3, 64, 64), (1, 64)
    pool2_ref,                          # (27, 55)
    w5_ref, b5_ref, w6_ref, b6_ref,     # (3, 64, 256), (1, 256), (3, 256, 256), (1, 256)
    pool3_ref,                          # (13, 27)
    wl1_ref, bl1_ref,                   # (13, 256, 128), (1, 128)
    wl2_ref, bl2_ref,                   # (128, 5), (1, 5)
    logits_ref, xx_ref,                 # outputs: (1, 1, 5), (1, 1, 128)
    pad_ref,                            # VMEM scratch (64, 256): zero-padded conv inputs
    *, zero_rows,
):
    f32 = jnp.float32
    PH = patches_ref.shape[1] // 3                      # rows per conv2-input phase
    L2 = pool1_ref.shape[1]                             # conv2 output length (331)
    L2p, L4p, L6p = pool1_ref.shape[0], pool2_ref.shape[0], pool3_ref.shape[0]

    # --- conv1 + ReLU, evaluated directly at the phase-ordered positions conv2 reads ---
    a1 = jnp.dot(patches_ref[0], w1_ref[...], preferred_element_type=f32) + b1_ref[...]
    a1 = jnp.maximum(a1, 0.0)                           # (3*PH, 32), (pos, channel) layout
    # Rows that represent conv2's zero padding (not real conv1 outputs) -> 0.
    rid = jax.lax.broadcasted_iota(jnp.int32, (3 * PH, 1), 0)
    drop = rid == zero_rows[0]
    for rr in zero_rows[1:]:
        drop = drop | (rid == rr)
    a1 = jnp.where(drop, 0.0, a1)

    # --- conv2 (stride 3, K=10) + ReLU via phase decomposition k = 3q + r ---
    acc = jnp.zeros((L2, w2_ref.shape[2]), f32)
    for k in range(w2_ref.shape[0]):
        q, r = k // 3, k % 3
        tap = a1[r * PH + q: r * PH + q + L2, :]        # contiguous static slice of phase r
        acc = acc + jnp.dot(tap, w2_ref[k], preferred_element_type=f32)
    x = jnp.maximum(acc + b2_ref[...], 0.0)             # (331, 32)

    # --- pool1 (AvgPool1d k=2 stride=6) as a constant-matrix matmul on the MXU ---
    x = jnp.dot(pool1_ref[...], x, preferred_element_type=f32)          # (55, 32)

    # --- generic stride-1 / pad-1 / K=3 conv + ReLU: taps read from the padded scratch ---
    def conv3_relu(inp, w_ref, b_ref, L):
        cin, cout = w_ref.shape[1], w_ref.shape[2]
        zero_row = jnp.zeros((1, cin), f32)
        pad_ref[0:1, 0:cin] = zero_row                  # left pad row
        pad_ref[L + 1:L + 2, 0:cin] = zero_row          # right pad row
        pad_ref[1:L + 1, 0:cin] = inp
        acc = jnp.zeros((L, cout), f32)
        for k in range(w_ref.shape[0]):
            acc = acc + jnp.dot(pad_ref[k:k + L, 0:cin], w_ref[k],
                                preferred_element_type=f32)
        return jnp.maximum(acc + b_ref[...], 0.0)

    x = conv3_relu(x, w3_ref, b3_ref, L2p)                               # (55, 64)
    x = conv3_relu(x, w4_ref, b4_ref, L2p)                               # (55, 64)
    x = jnp.dot(pool2_ref[...], x, preferred_element_type=f32)           # (27, 64)
    x = conv3_relu(x, w5_ref, b5_ref, L4p)                               # (27, 256)
    x = conv3_relu(x, w6_ref, b6_ref, L4p)                               # (27, 256)
    x = jnp.dot(pool3_ref[...], x, preferred_element_type=f32)           # (13, 256)

    # --- linear1 + ReLU: PyTorch's (B, C*L) flatten order is folded into wl1's (L,C,H) layout ---
    H = wl1_ref.shape[2]
    acc = jnp.zeros((1, H), f32)
    for l in range(L6p):
        acc = acc + jnp.dot(x[l:l + 1, :], wl1_ref[l], preferred_element_type=f32)
    xx = jnp.maximum(acc + bl1_ref[...], 0.0)                            # (1, 128)

    # --- linear2 ---
    logits = jnp.dot(xx, wl2_ref[...], preferred_element_type=f32) + bl2_ref[...]   # (1, 5)

    xx_ref[...] = xx[None]
    logits_ref[...] = logits[None]


# ----------------------------------------------------------------------------
# Wrapper: tiny XLA-side prep (one gather + a few weight transposes) + one pallas_call.
# ----------------------------------------------------------------------------
def conv_simple_forward(params, x):
    """ConvSimple.forward (eval mode). x: (B, 1, L) float32 NCL.  Returns (logits, features)."""
    B, c_in, L = x.shape
    assert c_in == 1

    w1, b1 = params["conv1"]; w2, b2 = params["conv2"]
    w3, b3 = params["conv3"]; w4, b4 = params["conv4"]
    w5, b5 = params["conv5"]; w6, b6 = params["conv6"]
    wl1, bl1 = params["linear1"]; wl2, bl2 = params["linear2"]

    K1, K2 = w1.shape[2], w2.shape[2]               # 10, 10
    C6 = w6.shape[0]                                # 256
    H, n_cls = wl1.shape[1], wl2.shape[1]           # 128, 5

    # floor-mode conv / pool output lengths (static Python ints)
    L1 = (L + 2 - K1) // 3 + 1                      # conv1 (stride 3, pad 1)
    L2 = (L1 + 2 - K2) // 3 + 1                     # conv2 (stride 3, pad 1)
    L2p = (L2 - 2) // 6 + 1                         # pool1 (k=2, stride 6)
    L4p = (L2p - 2) // 2 + 1                        # pool2 (k=2, stride 2)
    L6p = (L4p - 2) // 2 + 1                        # pool_avg (k=2, stride 2)
    assert wl1.shape[0] == C6 * L6p, "input length inconsistent with linear1 fan-in"

    PH = L2 + (K2 - 1) // 3                         # rows per conv2-input phase (334)

    # conv1 im2col rows, ordered by the three stride-3 phases of conv2's zero-padded input.
    xpad = jnp.pad(x[:, 0, :], ((0, 0), (1, 1)))                          # (B, L+2)
    m = jnp.arange(PH)
    pos, zero_rows = [], []
    for r in range(3):
        j = 3 * m + r                               # index into conv2's padded input
        pos.append(jnp.where((j >= 1) & (j <= L1), j - 1, 0))
        zero_rows += [r * PH + mm for mm in range(PH) if not (1 <= 3 * mm + r <= L1)]
    pos = jnp.concatenate(pos)                                            # (3*PH,)
    idx = 3 * pos[:, None] + jnp.arange(K1)[None, :]                      # (3*PH, K1)
    patches = xpad[:, idx]                                                # (B, 3*PH, K1)

    taps = lambda w: jnp.transpose(w, (2, 1, 0))    # (C_out, C_in, K) -> (K, C_in, C_out)
    row = lambda v: v[None, :]
    w1m = jnp.transpose(w1[:, 0, :])                                      # (K1, 32)
    wl1r = jnp.transpose(wl1.reshape(C6, L6p, H), (1, 0, 2))              # (13, 256, 128)

    def pool_matrix(L_in, stride):
        L_out = (L_in - 2) // stride + 1
        rr = jnp.arange(L_out)[:, None]
        cc = jnp.arange(L_in)[None, :]
        return ((cc == rr * stride) | (cc == rr * stride + 1)).astype(jnp.float32) * 0.5

    operands = [
        patches,
        w1m, row(b1), taps(w2), row(b2), pool_matrix(L2, 6),
        taps(w3), row(b3), taps(w4), row(b4), pool_matrix(L2p, 2),
        taps(w5), row(b5), taps(w6), row(b6), pool_matrix(L4p, 2),
        wl1r, row(bl1), wl2, row(bl2),
    ]

    def full_spec(a):                               # whole array VMEM-resident for all grid steps
        nd = a.ndim
        return pl.BlockSpec(a.shape, lambda b, _nd=nd: (0,) * _nd)

    in_specs = [pl.BlockSpec((1, 3 * PH, K1), lambda b: (b, 0, 0))]
    in_specs += [full_spec(a) for a in operands[1:]]

    out_shape = (
        jax.ShapeDtypeStruct((B, 1, n_cls), jnp.float32),
        jax.ShapeDtypeStruct((B, 1, H), jnp.float32),
    )
    out_specs = (
        pl.BlockSpec((1, 1, n_cls), lambda b: (b, 0, 0)),
        pl.BlockSpec((1, 1, H), lambda b: (b, 0, 0)),
    )

    pad_rows = ((max(L2p, L4p) + 2 + 7) // 8) * 8   # 64 rows: largest padded conv3..conv6 input

    kernel = functools.partial(_conv_simple_kernel, zero_rows=tuple(zero_rows))
    logits, feats = pl.pallas_call(
        kernel,
        grid=(B,),                                  # one grid step per batch element
        in_specs=in_specs,
        out_specs=out_specs,
        out_shape=out_shape,
        scratch_shapes=[pltpu.VMEM((pad_rows, C6), jnp.float32)],
        compiler_params=pltpu.CompilerParams(
            dimension_semantics=("parallel",),      # v7x: split the batch over its 2 TensorCores
            vmem_limit_bytes=48 * 1024 * 1024,
        ),
    )(*operands)

    return logits[:, 0, :], feats[:, 0, :]


# ----------------------------------------------------------------------------
# Parameter init (deterministic; PyTorch-like uniform(-1/sqrt(fan_in), 1/sqrt(fan_in)))
# ----------------------------------------------------------------------------
def _init_conv(key, c_out, c_in, k):
    bound = 1.0 / jnp.sqrt(c_in * k)
    kw, kb = jax.random.split(key)
    w = jax.random.uniform(kw, (c_out, c_in, k), jnp.float32, -bound, bound)
    b = jax.random.uniform(kb, (c_out,), jnp.float32, -bound, bound)
    return w, b


def _init_linear(key, n_in, n_out):
    bound = 1.0 / jnp.sqrt(n_in)
    kw, kb = jax.random.split(key)
    w = jax.random.uniform(kw, (n_in, n_out), jnp.float32, -bound, bound)
    b = jax.random.uniform(kb, (n_out,), jnp.float32, -bound, bound)
    return w, b


def init_params(key):
    keys = jax.random.split(key, 8)
    return {
        "conv1": _init_conv(keys[0], 32, 1, 10),
        "conv2": _init_conv(keys[1], 32, 32, 10),
        "conv3": _init_conv(keys[2], 64, 32, 3),
        "conv4": _init_conv(keys[3], 64, 64, 3),
        "conv5": _init_conv(keys[4], 256, 64, 3),
        "conv6": _init_conv(keys[5], 256, 256, 3),
        "linear1": _init_linear(keys[6], 3328, 128),
        "linear2": _init_linear(keys[7], 128, 5),
    }


# ----------------------------------------------------------------------------
# Plain-XLA reference of the same module (used only for a sanity check in main).
# ----------------------------------------------------------------------------
def _reference_forward(params, x):
    prec = jax.lax.Precision.HIGHEST

    def conv(h, wb, stride, pad):
        w, b = wb
        y = jax.lax.conv_general_dilated(
            h, w, window_strides=(stride,), padding=[(pad, pad)],
            dimension_numbers=("NCH", "OIH", "NCH"), precision=prec)
        return y + b[None, :, None]

    def avgpool(h, stride):
        L_out = (h.shape[-1] - 2) // stride + 1
        i = jnp.arange(L_out) * stride
        return 0.5 * (h[:, :, i] + h[:, :, i + 1])

    h = jax.nn.relu(conv(x, params["conv1"], 3, 1))
    h = jax.nn.relu(conv(h, params["conv2"], 3, 1))
    h = avgpool(h, 6)
    h = jax.nn.relu(conv(h, params["conv3"], 1, 1))
    h = jax.nn.relu(conv(h, params["conv4"], 1, 1))
    h = avgpool(h, 2)
    h = jax.nn.relu(conv(h, params["conv5"], 1, 1))
    h = jax.nn.relu(conv(h, params["conv6"], 1, 1))
    h = avgpool(h, 2)
    h = h.reshape(h.shape[0], -1)
    w1, b1 = params["linear1"]
    w2, b2 = params["linear2"]
    xx = jax.nn.relu(jnp.dot(h, w1, precision=prec) + b1)
    logits = jnp.dot(xx, w2, precision=prec) + b2
    return logits, xx


def _assert_close(got, want, name):
    err = float(jnp.max(jnp.abs(got - want)))
    tol = 5e-2 * float(jnp.max(jnp.abs(want))) + 1e-5
    assert err <= tol, f"{name}: max|diff|={err:.3e} exceeds tol={tol:.3e}"


if __name__ == "__main__":
    key = jax.random.PRNGKey(0)
    k_param, k_x = jax.random.split(key)
    params = init_params(k_param)

    # Input length 3000 -> final feature length 13 -> 256*13 = 3328 (= linear1 fan-in).
    B, L = 2, 3000
    x = jax.random.normal(k_x, (B, 1, L), dtype=jnp.float32)

    logits, feats = jax.jit(conv_simple_forward)(params, x)
    jax.block_until_ready((logits, feats))
    assert logits.shape == (B, 5) and feats.shape == (B, 128)

    # Sanity check against a plain-XLA implementation of the same forward pass.
    ref_logits, ref_feats = jax.jit(_reference_forward)(params, x)
    jax.block_until_ready((ref_logits, ref_feats))
    _assert_close(feats, ref_feats, "features")
    _assert_close(logits, ref_logits, "logits")

    print("KERNEL_OK")
</pallas_src>

<mosaic_0001>
module attributes {stable_mosaic.version = 11 : i64} {
  func.func @_conv_simple_kernel(%arg0: i32, %arg1: memref<1x1002x10xf32, #tpu.memory_space<vmem>>, %arg2: memref<10x32xf32, #tpu.memory_space<vmem>>, %arg3: memref<1x32xf32, #tpu.memory_space<vmem>>, %arg4: memref<10x32x32xf32, #tpu.memory_space<vmem>>, %arg5: memref<1x32xf32, #tpu.memory_space<vmem>>, %arg6: memref<55x331xf32, #tpu.memory_space<vmem>>, %arg7: memref<3x32x64xf32, #tpu.memory_space<vmem>>, %arg8: memref<1x64xf32, #tpu.memory_space<vmem>>, %arg9: memref<3x64x64xf32, #tpu.memory_space<vmem>>, %arg10: memref<1x64xf32, #tpu.memory_space<vmem>>, %arg11: memref<27x55xf32, #tpu.memory_space<vmem>>, %arg12: memref<3x64x256xf32, #tpu.memory_space<vmem>>, %arg13: memref<1x256xf32, #tpu.memory_space<vmem>>, %arg14: memref<3x256x256xf32, #tpu.memory_space<vmem>>, %arg15: memref<1x256xf32, #tpu.memory_space<vmem>>, %arg16: memref<13x27xf32, #tpu.memory_space<vmem>>, %arg17: memref<13x256x128xf32, #tpu.memory_space<vmem>>, %arg18: memref<1x128xf32, #tpu.memory_space<vmem>>, %arg19: memref<128x5xf32, #tpu.memory_space<vmem>>, %arg20: memref<1x5xf32, #tpu.memory_space<vmem>>, %arg21: memref<1x1x5xf32, #tpu.memory_space<vmem>>, %arg22: memref<1x1x128xf32, #tpu.memory_space<vmem>>, %arg23: memref<64x256xf32, #tpu.memory_space<vmem>>) attributes {dimension_semantics = [#tpu.dimension_semantics<parallel>], iteration_bounds = array<i64: 2>, scalar_prefetch = 0 : i64, scratch_operands = 1 : i64, tpu.core_type = #tpu.core_type<tc>, window_params = [{transform_indices = @transform_0, window_bounds = array<i64: 1, 1002, 10>}, {pipeline_mode = #tpu.pipeline_mode<synchronous>, transform_indices = @transform_1, window_bounds = array<i64: 10, 32>}, {pipeline_mode = #tpu.pipeline_mode<synchronous>, transform_indices = @transform_2, window_bounds = array<i64: 1, 32>}, {pipeline_mode = #tpu.pipeline_mode<synchronous>, transform_indices = @transform_3, window_bounds = array<i64: 10, 32, 32>}, {pipeline_mode = #tpu.pipeline_mode<synchronous>, transform_indices = @transform_4, window_bounds = array<i64: 1, 32>}, {pipeline_mode = #tpu.pipeline_mode<synchronous>, transform_indices = @transform_5, window_bounds = array<i64: 55, 331>}, {pipeline_mode = #tpu.pipeline_mode<synchronous>, transform_indices = @transform_6, window_bounds = array<i64: 3, 32, 64>}, {pipeline_mode = #tpu.pipeline_mode<synchronous>, transform_indices = @transform_7, window_bounds = array<i64: 1, 64>}, {pipeline_mode = #tpu.pipeline_mode<synchronous>, transform_indices = @transform_8, window_bounds = array<i64: 3, 64, 64>}, {pipeline_mode = #tpu.pipeline_mode<synchronous>, transform_indices = @transform_9, window_bounds = array<i64: 1, 64>}, {pipeline_mode = #tpu.pipeline_mode<synchronous>, transform_indices = @transform_10, window_bounds = array<i64: 27, 55>}, {pipeline_mode = #tpu.pipeline_mode<synchronous>, transform_indices = @transform_11, window_bounds = array<i64: 3, 64, 256>}, {pipeline_mode = #tpu.pipeline_mode<synchronous>, transform_indices = @transform_12, window_bounds = array<i64: 1, 256>}, {pipeline_mode = #tpu.pipeline_mode<synchronous>, transform_indices = @transform_13, window_bounds = array<i64: 3, 256, 256>}, {pipeline_mode = #tpu.pipeline_mode<synchronous>, transform_indices = @transform_14, window_bounds = array<i64: 1, 256>}, {pipeline_mode = #tpu.pipeline_mode<synchronous>, transform_indices = @transform_15, window_bounds = array<i64: 13, 27>}, {pipeline_mode = #tpu.pipeline_mode<synchronous>, transform_indices = @transform_16, window_bounds = array<i64: 13, 256, 128>}, {pipeline_mode = #tpu.pipeline_mode<synchronous>, transform_indices = @transform_17, window_bounds = array<i64: 1, 128>}, {pipeline_mode = #tpu.pipeline_mode<synchronous>, transform_indices = @transform_18, window_bounds = array<i64: 128, 5>}, {pipeline_mode = #tpu.pipeline_mode<synchronous>, transform_indices = @transform_19, window_bounds = array<i64: 1, 5>}, {transform_indices = @transform_20, window_bounds = array<i64: 1, 1, 5>}, {transform_indices = @transform_21, window_bounds = array<i64: 1, 1, 128>}]} {
    %c0 = arith.constant 0 : index
    %c0_0 = arith.constant 0 : index
    %c0_1 = arith.constant 0 : index
    %0 = vector.load %arg1[%c0, %c0_0, %c0_1] : memref<1x1002x10xf32, #tpu.memory_space<vmem>>, vector<1x1002x10xf32>
    %1 = vector.shape_cast %0 : vector<1x1002x10xf32> to vector<1002x10xf32>
    %c0_2 = arith.constant 0 : index
    %c0_3 = arith.constant 0 : index
    %2 = vector.load %arg2[%c0_2, %c0_3] : memref<10x32xf32, #tpu.memory_space<vmem>>, vector<10x32xf32>
    %cst = arith.constant dense<0.000000e+00> : vector<1002x32xf32>
    %3 = tpu.matmul %1, %2, %cst {dimension_numbers = #tpu.dot_dimension_numbers<[1], [0], [0], [1], [0, 0, 1, 1], [], []>} : vector<1002x10xf32>, vector<10x32xf32>, vector<1002x32xf32> -> vector<1002x32xf32>
    %c0_4 = arith.constant 0 : index
    %c0_5 = arith.constant 0 : index
    %4 = vector.load %arg3[%c0_4, %c0_5] : memref<1x32xf32, #tpu.memory_space<vmem>>, vector<1x32xf32>
    %5 = vector.broadcast %4 : vector<1x32xf32> to vector<1002x32xf32>
    %6 = arith.addf %3, %5 : vector<1002x32xf32>
    %cst_6 = arith.constant 0.000000e+00 : f32
    %7 = vector.broadcast %cst_6 : f32 to vector<1002x32xf32>
    %8 = arith.maximumf %6, %7 : vector<1002x32xf32>
    %9 = tpu.iota {dimensions = array<i32: 0>} : vector<1002x1xi32>
    %c0_i32 = arith.constant 0 : i32
    %10 = vector.broadcast %c0_i32 : i32 to vector<1002x1xi32>
    %11 = arith.cmpi eq, %9, %10 : vector<1002x1xi32>
    %c333_i32 = arith.constant 333 : i32
    %12 = vector.broadcast %c333_i32 : i32 to vector<1002x1xi32>
    %13 = arith.cmpi eq, %9, %12 : vector<1002x1xi32>
    %14 = arith.ori %11, %13 : vector<1002x1xi1>
    %c667_i32 = arith.constant 667 : i32
    %15 = vector.broadcast %c667_i32 : i32 to vector<1002x1xi32>
    %16 = arith.cmpi eq, %9, %15 : vector<1002x1xi32>
    %17 = arith.ori %14, %16 : vector<1002x1xi1>
    %c1001_i32 = arith.constant 1001 : i32
    %18 = vector.broadcast %c1001_i32 : i32 to vector<1002x1xi32>
    %19 = arith.cmpi eq, %9, %18 : vector<1002x1xi32>
    %20 = arith.ori %17, %19 : vector<1002x1xi1>
    %cst_7 = arith.constant 0.000000e+00 : f32
    %21 = vector.shape_cast %20 : vector<1002x1xi1> to vector<1002x1xi1>
    %22 = vector.broadcast %21 : vector<1002x1xi1> to vector<1002x32xi1>
    %23 = vector.broadcast %cst_7 : f32 to vector<1002x32xf32>
    %24 = arith.select %22, %23, %8 : vector<1002x32xi1>, vector<1002x32xf32>
    %cst_8 = arith.constant 0.000000e+00 : f32
    %25 = vector.broadcast %cst_8 : f32 to vector<331x32xf32>
    %26 = vector.extract_strided_slice %24 {offsets = [0, 0], sizes = [331, 32], strides = [1, 1]} : vector<1002x32xf32> to vector<331x32xf32>
    %c0_9 = arith.constant 0 : index
    %c0_10 = arith.constant 0 : index
    %c0_11 = arith.constant 0 : index
    %27 = vector.load %arg4[%c0_9, %c0_10, %c0_11] : memref<10x32x32xf32, #tpu.memory_space<vmem>>, vector<1x32x32xf32>
    %28 = vector.shape_cast %27 : vector<1x32x32xf32> to vector<32x32xf32>
    %cst_12 = arith.constant dense<0.000000e+00> : vector<331x32xf32>
    %29 = tpu.matmul %26, %28, %cst_12 {dimension_numbers = #tpu.dot_dimension_numbers<[1], [0], [0], [1], [0, 0, 1, 1], [], []>} : vector<331x32xf32>, vector<32x32xf32>, vector<331x32xf32> -> vector<331x32xf32>
    %30 = arith.addf %25, %29 : vector<331x32xf32>
    %31 = vector.extract_strided_slice %24 {offsets = [334, 0], sizes = [331, 32], strides = [1, 1]} : vector<1002x32xf32> to vector<331x32xf32>
    %c1 = arith.constant 1 : index
    %c0_13 = arith.constant 0 : index
    %c0_14 = arith.constant 0 : index
    %32 = vector.load %arg4[%c1, %c0_13, %c0_14] : memref<10x32x32xf32, #tpu.memory_space<vmem>>, vector<1x32x32xf32>
    %33 = vector.shape_cast %32 : vector<1x32x32xf32> to vector<32x32xf32>
    %cst_15 = arith.constant dense<0.000000e+00> : vector<331x32xf32>
    %34 = tpu.matmul %31, %33, %cst_15 {dimension_numbers = #tpu.dot_dimension_numbers<[1], [0], [0], [1], [0, 0, 1, 1], [], []>} : vector<331x32xf32>, vector<32x32xf32>, vector<331x32xf32> -> vector<331x32xf32>
    %35 = arith.addf %30, %34 : vector<331x32xf32>
    %36 = vector.extract_strided_slice %24 {offsets = [668, 0], sizes = [331, 32], strides = [1, 1]} : vector<1002x32xf32> to vector<331x32xf32>
    %c2 = arith.constant 2 : index
    %c0_16 = arith.constant 0 : index
    %c0_17 = arith.constant 0 : index
    %37 = vector.load %arg4[%c2, %c0_16, %c0_17] : memref<10x32x32xf32, #tpu.memory_space<vmem>>, vector<1x32x32xf32>
    %38 = vector.shape_cast %37 : vector<1x32x32xf32> to vector<32x32xf32>
    %cst_18 = arith.constant dense<0.000000e+00> : vector<331x32xf32>
    %39 = tpu.matmul %36, %38, %cst_18 {dimension_numbers = #tpu.dot_dimension_numbers<[1], [0], [0], [1], [0, 0, 1, 1], [], []>} : vector<331x32xf32>, vector<32x32xf32>, vector<331x32xf32> -> vector<331x32xf32>
    %40 = arith.addf %35, %39 : vector<331x32xf32>
    %41 = vector.extract_strided_slice %24 {offsets = [1, 0], sizes = [331, 32], strides = [1, 1]} : vector<1002x32xf32> to vector<331x32xf32>
    %c3 = arith.constant 3 : index
    %c0_19 = arith.constant 0 : index
    %c0_20 = arith.constant 0 : index
    %42 = vector.load %arg4[%c3, %c0_19, %c0_20] : memref<10x32x32xf32, #tpu.memory_space<vmem>>, vector<1x32x32xf32>
    %43 = vector.shape_cast %42 : vector<1x32x32xf32> to vector<32x32xf32>
    %cst_21 = arith.constant dense<0.000000e+00> : vector<331x32xf32>
    %44 = tpu.matmul %41, %43, %cst_21 {dimension_numbers = #tpu.dot_dimension_numbers<[1], [0], [0], [1], [0, 0, 1, 1], [], []>} : vector<331x32xf32>, vector<32x32xf32>, vector<331x32xf32> -> vector<331x32xf32>
    %45 = arith.addf %40, %44 : vector<331x32xf32>
    %46 = vector.extract_strided_slice %24 {offsets = [335, 0], sizes = [331, 32], strides = [1, 1]} : vector<1002x32xf32> to vector<331x32xf32>
    %c4 = arith.constant 4 : index
    %c0_22 = arith.constant 0 : index
    %c0_23 = arith.constant 0 : index
    %47 = vector.load %arg4[%c4, %c0_22, %c0_23] : memref<10x32x32xf32, #tpu.memory_space<vmem>>, vector<1x32x32xf32>
    %48 = vector.shape_cast %47 : vector<1x32x32xf32> to vector<32x32xf32>
    %cst_24 = arith.constant dense<0.000000e+00> : vector<331x32xf32>
    %49 = tpu.matmul %46, %48, %cst_24 {dimension_numbers = #tpu.dot_dimension_numbers<[1], [0], [0], [1], [0, 0, 1, 1], [], []>} : vector<331x32xf32>, vector<32x32xf32>, vector<331x32xf32> -> vector<331x32xf32>
    %50 = arith.addf %45, %49 : vector<331x32xf32>
    %51 = vector.extract_strided_slice %24 {offsets = [669, 0], sizes = [331, 32], strides = [1, 1]} : vector<1002x32xf32> to vector<331x32xf32>
    %c5 = arith.constant 5 : index
    %c0_25 = arith.constant 0 : index
    %c0_26 = arith.constant 0 : index
    %52 = vector.load %arg4[%c5, %c0_25, %c0_26] : memref<10x32x32xf32, #tpu.memory_space<vmem>>, vector<1x32x32xf32>
    %53 = vector.shape_cast %52 : vector<1x32x32xf32> to vector<32x32xf32>
    %cst_27 = arith.constant dense<0.000000e+00> : vector<331x32xf32>
    %54 = tpu.matmul %51, %53, %cst_27 {dimension_numbers = #tpu.dot_dimension_numbers<[1], [0], [0], [1], [0, 0, 1, 1], [], []>} : vector<331x32xf32>, vector<32x32xf32>, vector<331x32xf32> -> vector<331x32xf32>
    %55 = arith.addf %50, %54 : vector<331x32xf32>
    %56 = vector.extract_strided_slice %24 {offsets = [2, 0], sizes = [331, 32], strides = [1, 1]} : vector<1002x32xf32> to vector<331x32xf32>
    %c6 = arith.constant 6 : index
    %c0_28 = arith.constant 0 : index
    %c0_29 = arith.constant 0 : index
    %57 = vector.load %arg4[%c6, %c0_28, %c0_29] : memref<10x32x32xf32, #tpu.memory_space<vmem>>, vector<1x32x32xf32>
    %58 = vector.shape_cast %57 : vector<1x32x32xf32> to vector<32x32xf32>
    %cst_30 = arith.constant dense<0.000000e+00> : vector<331x32xf32>
    %59 = tpu.matmul %56, %58, %cst_30 {dimension_numbers = #tpu.dot_dimension_numbers<[1], [0], [0], [1], [0, 0, 1, 1], [], []>} : vector<331x32xf32>, vector<32x32xf32>, vector<331x32xf32> -> vector<331x32xf32>
    %60 = arith.addf %55, %59 : vector<331x32xf32>
    %61 = vector.extract_strided_slice %24 {offsets = [336, 0], sizes = [331, 32], strides = [1, 1]} : vector<1002x32xf32> to vector<331x32xf32>
    %c7 = arith.constant 7 : index
    %c0_31 = arith.constant 0 : index
    %c0_32 = arith.constant 0 : index
    %62 = vector.load %arg4[%c7, %c0_31, %c0_32] : memref<10x32x32xf32, #tpu.memory_space<vmem>>, vector<1x32x32xf32>
    %63 = vector.shape_cast %62 : vector<1x32x32xf32> to vector<32x32xf32>
    %cst_33 = arith.constant dense<0.000000e+00> : vector<331x32xf32>
    %64 = tpu.matmul %61, %63, %cst_33 {dimension_numbers = #tpu.dot_dimension_numbers<[1], [0], [0], [1], [0, 0, 1, 1], [], []>} : vector<331x32xf32>, vector<32x32xf32>, vector<331x32xf32> -> vector<331x32xf32>
    %65 = arith.addf %60, %64 : vector<331x32xf32>
    %66 = vector.extract_strided_slice %24 {offsets = [670, 0], sizes = [331, 32], strides = [1, 1]} : vector<1002x32xf32> to vector<331x32xf32>
    %c8 = arith.constant 8 : index
    %c0_34 = arith.constant 0 : index
    %c0_35 = arith.constant 0 : index
    %67 = vector.load %arg4[%c8, %c0_34, %c0_35] : memref<10x32x32xf32, #tpu.memory_space<vmem>>, vector<1x32x32xf32>
    %68 = vector.shape_cast %67 : vector<1x32x32xf32> to vector<32x32xf32>
    %cst_36 = arith.constant dense<0.000000e+00> : vector<331x32xf32>
    %69 = tpu.matmul %66, %68, %cst_36 {dimension_numbers = #tpu.dot_dimension_numbers<[1], [0], [0], [1], [0, 0, 1, 1], [], []>} : vector<331x32xf32>, vector<32x32xf32>, vector<331x32xf32> -> vector<331x32xf32>
    %70 = arith.addf %65, %69 : vector<331x32xf32>
    %71 = vector.extract_strided_slice %24 {offsets = [3, 0], sizes = [331, 32], strides = [1, 1]} : vector<1002x32xf32> to vector<331x32xf32>
    %c9 = arith.constant 9 : index
    %c0_37 = arith.constant 0 : index
    %c0_38 = arith.constant 0 : index
    %72 = vector.load %arg4[%c9, %c0_37, %c0_38] : memref<10x32x32xf32, #tpu.memory_space<vmem>>, vector<1x32x32xf32>
    %73 = vector.shape_cast %72 : vector<1x32x32xf32> to vector<32x32xf32>
    %cst_39 = arith.constant dense<0.000000e+00> : vector<331x32xf32>
    %74 = tpu.matmul %71, %73, %cst_39 {dimension_numbers = #tpu.dot_dimension_numbers<[1], [0], [0], [1], [0, 0, 1, 1], [], []>} : vector<331x32xf32>, vector<32x32xf32>, vector<331x32xf32> -> vector<331x32xf32>
    %75 = arith.addf %70, %74 : vector<331x32xf32>
    %c0_40 = arith.constant 0 : index
    %c0_41 = arith.constant 0 : index
    %76 = vector.load %arg5[%c0_40, %c0_41] : memref<1x32xf32, #tpu.memory_space<vmem>>, vector<1x32xf32>
    %77 = vector.broadcast %76 : vector<1x32xf32> to vector<331x32xf32>
    %78 = arith.addf %75, %77 : vector<331x32xf32>
    %cst_42 = arith.constant 0.000000e+00 : f32
    %79 = vector.broadcast %cst_42 : f32 to vector<331x32xf32>
    %80 = arith.maximumf %78, %79 : vector<331x32xf32>
    %c0_43 = arith.constant 0 : index
    %c0_44 = arith.constant 0 : index
    %81 = vector.load %arg6[%c0_43, %c0_44] : memref<55x331xf32, #tpu.memory_space<vmem>>, vector<55x331xf32>
    %cst_45 = arith.constant dense<0.000000e+00> : vector<55x32xf32>
    %82 = tpu.matmul %81, %80, %cst_45 {dimension_numbers = #tpu.dot_dimension_numbers<[1], [0], [0], [1], [0, 0, 1, 1], [], []>} : vector<55x331xf32>, vector<331x32xf32>, vector<55x32xf32> -> vector<55x32xf32>
    %cst_46 = arith.constant 0.000000e+00 : f32
    %83 = vector.broadcast %cst_46 : f32 to vector<1x32xf32>
    %c0_47 = arith.constant 0 : index
    %c0_48 = arith.constant 0 : index
    %84 = vector.load %arg23[%c0_47, %c0_48] : memref<64x256xf32, #tpu.memory_space<vmem>>, vector<1x32xf32>
    tpu.vector_store %arg23[%c0_47, %c0_48], %83 {strides = array<i32>} : memref<64x256xf32, #tpu.memory_space<vmem>>, vector<1x32xf32>,
    %c56 = arith.constant 56 : index
    %c0_49 = arith.constant 0 : index
    %85 = vector.load %arg23[%c56, %c0_49] : memref<64x256xf32, #tpu.memory_space<vmem>>, vector<1x32xf32>
    tpu.vector_store %arg23[%c56, %c0_49], %83 {strides = array<i32>} : memref<64x256xf32, #tpu.memory_space<vmem>>, vector<1x32xf32>,
    %c1_50 = arith.constant 1 : index
    %c0_51 = arith.constant 0 : index
    %86 = vector.load %arg23[%c1_50, %c0_51] : memref<64x256xf32, #tpu.memory_space<vmem>>, vector<55x32xf32>
    tpu.vector_store %arg23[%c1_50, %c0_51], %82 {strides = array<i32>} : memref<64x256xf32, #tpu.memory_space<vmem>>, vector<55x32xf32>,
    %cst_52 = arith.constant 0.000000e+00 : f32
    %87 = vector.broadcast %cst_52 : f32 to vector<55x64xf32>
    %c0_53 = arith.constant 0 : index
    %c0_54 = arith.constant 0 : index
    %88 = vector.load %arg23[%c0_53, %c0_54] : memref<64x256xf32, #tpu.memory_space<vmem>>, vector<55x32xf32>
    %c0_55 = arith.constant 0 : index
    %c0_56 = arith.constant 0 : index
    %c0_57 = arith.constant 0 : index
    %89 = vector.load %arg7[%c0_55, %c0_56, %c0_57] : memref<3x32x64xf32, #tpu.memory_space<vmem>>, vector<1x32x64xf32>
    %90 = vector.shape_cast %89 : vector<1x32x64xf32> to vector<32x64xf32>
    %cst_58 = arith.constant dense<0.000000e+00> : vector<55x64xf32>
    %91 = tpu.matmul %88, %90, %cst_58 {dimension_numbers = #tpu.dot_dimension_numbers<[1], [0], [0], [1], [0, 0, 1, 1], [], []>} : vector<55x32xf32>, vector<32x64xf32>, vector<55x64xf32> -> vector<55x64xf32>
    %92 = arith.addf %87, %91 : vector<55x64xf32>
    %c1_59 = arith.constant 1 : index
    %c0_60 = arith.constant 0 : index
    %93 = vector.load %arg23[%c1_59, %c0_60] : memref<64x256xf32, #tpu.memory_space<vmem>>, vector<55x32xf32>
    %c1_61 = arith.constant 1 : index
    %c0_62 = arith.constant 0 : index
    %c0_63 = arith.constant 0 : index
    %94 = vector.load %arg7[%c1_61, %c0_62, %c0_63] : memref<3x32x64xf32, #tpu.memory_space<vmem>>, vector<1x32x64xf32>
    %95 = vector.shape_cast %94 : vector<1x32x64xf32> to vector<32x64xf32>
    %cst_64 = arith.constant dense<0.000000e+00> : vector<55x64xf32>
    %96 = tpu.matmul %93, %95, %cst_64 {dimension_numbers = #tpu.dot_dimension_numbers<[1], [0], [0], [1], [0, 0, 1, 1], [], []>} : vector<55x32xf32>, vector<32x64xf32>, vector<55x64xf32> -> vector<55x64xf32>
    %97 = arith.addf %92, %96 : vector<55x64xf32>
    %c2_65 = arith.constant 2 : index
    %c0_66 = arith.constant 0 : index
    %98 = vector.load %arg23[%c2_65, %c0_66] : memref<64x256xf32, #tpu.memory_space<vmem>>, vector<55x32xf32>
    %c2_67 = arith.constant 2 : index
    %c0_68 = arith.constant 0 : index
    %c0_69 = arith.constant 0 : index
    %99 = vector.load %arg7[%c2_67, %c0_68, %c0_69] : memref<3x32x64xf32, #tpu.memory_space<vmem>>, vector<1x32x64xf32>
    %100 = vector.shape_cast %99 : vector<1x32x64xf32> to vector<32x64xf32>
    %cst_70 = arith.constant dense<0.000000e+00> : vector<55x64xf32>
    %101 = tpu.matmul %98, %100, %cst_70 {dimension_numbers = #tpu.dot_dimension_numbers<[1], [0], [0], [1], [0, 0, 1, 1], [], []>} : vector<55x32xf32>, vector<32x64xf32>, vector<55x64xf32> -> vector<55x64xf32>
    %102 = arith.addf %97, %101 : vector<55x64xf32>
    %c0_71 = arith.constant 0 : index
    %c0_72 = arith.constant 0 : index
    %103 = vector.load %arg8[%c0_71, %c0_72] : memref<1x64xf32, #tpu.memory_space<vmem>>, vector<1x64xf32>
    %104 = vector.broadcast %103 : vector<1x64xf32> to vector<55x64xf32>
    %105 = arith.addf %102, %104 : vector<55x64xf32>
    %cst_73 = arith.constant 0.000000e+00 : f32
    %106 = vector.broadcast %cst_73 : f32 to vector<55x64xf32>
    %107 = arith.maximumf %105, %106 : vector<55x64xf32>
    %cst_74 = arith.constant 0.000000e+00 : f32
    %108 = vector.broadcast %cst_74 : f32 to vector<1x64xf32>
    %c0_75 = arith.constant 0 : index
    %c0_76 = arith.constant 0 : index
    %109 = vector.load %arg23[%c0_75, %c0_76] : memref<64x256xf32, #tpu.memory_space<vmem>>, vector<1x64xf32>
    tpu.vector_store %arg23[%c0_75, %c0_76], %108 {strides = array<i32>} : memref<64x256xf32, #tpu.memory_space<vmem>>, vector<1x64xf32>,
    %c56_77 = arith.constant 56 : index
    %c0_78 = arith.constant 0 : index
    %110 = vector.load %arg23[%c56_77, %c0_78] : memref<64x256xf32, #tpu.memory_space<vmem>>, vector<1x64xf32>
    tpu.vector_store %arg23[%c56_77, %c0_78], %108 {strides = array<i32>} : memref<64x256xf32, #tpu.memory_space<vmem>>, vector<1x64xf32>,
    %c1_79 = arith.constant 1 : index
    %c0_80 = arith.constant 0 : index
    %111 = vector.load %arg23[%c1_79, %c0_80] : memref<64x256xf32, #tpu.memory_space<vmem>>, vector<55x64xf32>
    tpu.vector_store %arg23[%c1_79, %c0_80], %107 {strides = array<i32>} : memref<64x256xf32, #tpu.memory_space<vmem>>, vector<55x64xf32>,
    %cst_81 = arith.constant 0.000000e+00 : f32
    %112 = vector.broadcast %cst_81 : f32 to vector<55x64xf32>
    %c0_82 = arith.constant 0 : index
    %c0_83 = arith.constant 0 : index
    %113 = vector.load %arg23[%c0_82, %c0_83] : memref<64x256xf32, #tpu.memory_space<vmem>>, vector<55x64xf32>
    %c0_84 = arith.constant 0 : index
    %c0_85 = arith.constant 0 : index
    %c0_86 = arith.constant 0 : index
    %114 = vector.load %arg9[%c0_84, %c0_85, %c0_86] : memref<3x64x64xf32, #tpu.memory_space<vmem>>, vector<1x64x64xf32>
    %115 = vector.shape_cast %114 : vector<1x64x64xf32> to vector<64x64xf32>
    %cst_87 = arith.constant dense<0.000000e+00> : vector<55x64xf32>
    %116 = tpu.matmul %113, %115, %cst_87 {dimension_numbers = #tpu.dot_dimension_numbers<[1], [0], [0], [1], [0, 0, 1, 1], [], []>} : vector<55x64xf32>, vector<64x64xf32>, vector<55x64xf32> -> vector<55x64xf32>
    %117 = arith.addf %112, %116 : vector<55x64xf32>
    %c1_88 = arith.constant 1 : index
    %c0_89 = arith.constant 0 : index
    %118 = vector.load %arg23[%c1_88, %c0_89] : memref<64x256xf32, #tpu.memory_space<vmem>>, vector<55x64xf32>
    %c1_90 = arith.constant 1 : index
    %c0_91 = arith.constant 0 : index
    %c0_92 = arith.constant 0 : index
    %119 = vector.load %arg9[%c1_90, %c0_91, %c0_92] : memref<3x64x64xf32, #tpu.memory_space<vmem>>, vector<1x64x64xf32>
    %120 = vector.shape_cast %119 : vector<1x64x64xf32> to vector<64x64xf32>
    %cst_93 = arith.constant dense<0.000000e+00> : vector<55x64xf32>
    %121 = tpu.matmul %118, %120, %cst_93 {dimension_numbers = #tpu.dot_dimension_numbers<[1], [0], [0], [1], [0, 0, 1, 1], [], []>} : vector<55x64xf32>, vector<64x64xf32>, vector<55x64xf32> -> vector<55x64xf32>
    %122 = arith.addf %117, %121 : vector<55x64xf32>
    %c2_94 = arith.constant 2 : index
    %c0_95 = arith.constant 0 : index
    %123 = vector.load %arg23[%c2_94, %c0_95] : memref<64x256xf32, #tpu.memory_space<vmem>>, vector<55x64xf32>
    %c2_96 = arith.constant 2 : index
    %c0_97 = arith.constant 0 : index
    %c0_98 = arith.constant 0 : index
    %124 = vector.load %arg9[%c2_96, %c0_97, %c0_98] : memref<3x64x64xf32, #tpu.memory_space<vmem>>, vector<1x64x64xf32>
    %125 = vector.shape_cast %124 : vector<1x64x64xf32> to vector<64x64xf32>
    %cst_99 = arith.constant dense<0.000000e+00> : vector<55x64xf32>
    %126 = tpu.matmul %123, %125, %cst_99 {dimension_numbers = #tpu.dot_dimension_numbers<[1], [0], [0], [1], [0, 0, 1, 1], [], []>} : vector<55x64xf32>, vector<64x64xf32>, vector<55x64xf32> -> vector<55x64xf32>
    %127 = arith.addf %122, %126 : vector<55x64xf32>
    %c0_100 = arith.constant 0 : index
    %c0_101 = arith.constant 0 : index
    %128 = vector.load %arg10[%c0_100, %c0_101] : memref<1x64xf32, #tpu.memory_space<vmem>>, vector<1x64xf32>
    %129 = vector.broadcast %128 : vector<1x64xf32> to vector<55x64xf32>
    %130 = arith.addf %127, %129 : vector<55x64xf32>
    %cst_102 = arith.constant 0.000000e+00 : f32
    %131 = vector.broadcast %cst_102 : f32 to vector<55x64xf32>
    %132 = arith.maximumf %130, %131 : vector<55x64xf32>
    %c0_103 = arith.constant 0 : index
    %c0_104 = arith.constant 0 : index
    %133 = vector.load %arg11[%c0_103, %c0_104] : memref<27x55xf32, #tpu.memory_space<vmem>>, vector<27x55xf32>
    %cst_105 = arith.constant dense<0.000000e+00> : vector<27x64xf32>
    %134 = tpu.matmul %133, %132, %cst_105 {dimension_numbers = #tpu.dot_dimension_numbers<[1], [0], [0], [1], [0, 0, 1, 1], [], []>} : vector<27x55xf32>, vector<55x64xf32>, vector<27x64xf32> -> vector<27x64xf32>
    %cst_106 = arith.constant 0.000000e+00 : f32
    %135 = vector.broadcast %cst_106 : f32 to vector<1x64xf32>
    %c0_107 = arith.constant 0 : index
    %c0_108 = arith.constant 0 : index
    %136 = vector.load %arg23[%c0_107, %c0_108] : memref<64x256xf32, #tpu.memory_space<vmem>>, vector<1x64xf32>
    tpu.vector_store %arg23[%c0_107, %c0_108], %135 {strides = array<i32>} : memref<64x256xf32, #tpu.memory_space<vmem>>, vector<1x64xf32>,
    %c28 = arith.constant 28 : index
    %c0_109 = arith.constant 0 : index
    %137 = vector.load %arg23[%c28, %c0_109] : memref<64x256xf32, #tpu.memory_space<vmem>>, vector<1x64xf32>
    tpu.vector_store %arg23[%c28, %c0_109], %135 {strides = array<i32>} : memref<64x256xf32, #tpu.memory_space<vmem>>, vector<1x64xf32>,
    %c1_110 = arith.constant 1 : index
    %c0_111 = arith.constant 0 : index
    %138 = vector.load %arg23[%c1_110, %c0_111] : memref<64x256xf32, #tpu.memory_space<vmem>>, vector<27x64xf32>
    tpu.vector_store %arg23[%c1_110, %c0_111], %134 {strides = array<i32>} : memref<64x256xf32, #tpu.memory_space<vmem>>, vector<27x64xf32>,
    %cst_112 = arith.constant 0.000000e+00 : f32
    %139 = vector.broadcast %cst_112 : f32 to vector<27x256xf32>
    %c0_113 = arith.constant 0 : index
    %c0_114 = arith.constant 0 : index
    %140 = vector.load %arg23[%c0_113, %c0_114] : memref<64x256xf32, #tpu.memory_space<vmem>>, vector<27x64xf32>
    %c0_115 = arith.constant 0 : index
    %c0_116 = arith.constant 0 : index
    %c0_117 = arith.constant 0 : index
    %141 = vector.load %arg12[%c0_115, %c0_116, %c0_117] : memref<3x64x256xf32, #tpu.memory_space<vmem>>, vector<1x64x256xf32>
    %142 = vector.shape_cast %141 : vector<1x64x256xf32> to vector<64x256xf32>
    %cst_118 = arith.constant dense<0.000000e+00> : vector<27x256xf32>
    %143 = tpu.matmul %140, %142, %cst_118 {dimension_numbers = #tpu.dot_dimension_numbers<[1], [0], [0], [1], [0, 0, 1, 1], [], []>} : vector<27x64xf32>, vector<64x256xf32>, vector<27x256xf32> -> vector<27x256xf32>
    %144 = arith.addf %139, %143 : vector<27x256xf32>
    %c1_119 = arith.constant 1 : index
    %c0_120 = arith.constant 0 : index
    %145 = vector.load %arg23[%c1_119, %c0_120] : memref<64x256xf32, #tpu.memory_space<vmem>>, vector<27x64xf32>
    %c1_121 = arith.constant 1 : index
    %c0_122 = arith.constant 0 : index
    %c0_123 = arith.constant 0 : index
    %146 = vector.load %arg12[%c1_121, %c0_122, %c0_123] : memref<3x64x256xf32, #tpu.memory_space<vmem>>, vector<1x64x256xf32>
    %147 = vector.shape_cast %146 : vector<1x64x256xf32> to vector<64x256xf32>
    %cst_124 = arith.constant dense<0.000000e+00> : vector<27x256xf32>
    %148 = tpu.matmul %145, %147, %cst_124 {dimension_numbers = #tpu.dot_dimension_numbers<[1], [0], [0], [1], [0, 0, 1, 1], [], []>} : vector<27x64xf32>, vector<64x256xf32>, vector<27x256xf32> -> vector<27x256xf32>
    %149 = arith.addf %144, %148 : vector<27x256xf32>
    %c2_125 = arith.constant 2 : index
    %c0_126 = arith.constant 0 : index
    %150 = vector.load %arg23[%c2_125, %c0_126] : memref<64x256xf32, #tpu.memory_space<vmem>>, vector<27x64xf32>
    %c2_127 = arith.constant 2 : index
    %c0_128 = arith.constant 0 : index
    %c0_129 = arith.constant 0 : index
    %151 = vector.load %arg12[%c2_127, %c0_128, %c0_129] : memref<3x64x256xf32, #tpu.memory_space<vmem>>, vector<1x64x256xf32>
    %152 = vector.shape_cast %151 : vector<1x64x256xf32> to vector<64x256xf32>
    %cst_130 = arith.constant dense<0.000000e+00> : vector<27x256xf32>
    %153 = tpu.matmul %150, %152, %cst_130 {dimension_numbers = #tpu.dot_dimension_numbers<[1], [0], [0], [1], [0, 0, 1, 1], [], []>} : vector<27x64xf32>, vector<64x256xf32>, vector<27x256xf32> -> vector<27x256xf32>
    %154 = arith.addf %149, %153 : vector<27x256xf32>
    %c0_131 = arith.constant 0 : index
    %c0_132 = arith.constant 0 : index
    %155 = vector.load %arg13[%c0_131, %c0_132] : memref<1x256xf32, #tpu.memory_space<vmem>>, vector<1x256xf32>
    %156 = vector.broadcast %155 : vector<1x256xf32> to vector<27x256xf32>
    %157 = arith.addf %154, %156 : vector<27x256xf32>
    %cst_133 = arith.constant 0.000000e+00 : f32
    %158 = vector.broadcast %cst_133 : f32 to vector<27x256xf32>
    %159 = arith.maximumf %157, %158 : vector<27x256xf32>
    %cst_134 = arith.constant 0.000000e+00 : f32
    %160 = vector.broadcast %cst_134 : f32 to vector<1x256xf32>
    %c0_135 = arith.constant 0 : index
    %c0_136 = arith.constant 0 : index
    %161 = vector.load %arg23[%c0_135, %c0_136] : memref<64x256xf32, #tpu.memory_space<vmem>>, vector<1x256xf32>
    tpu.vector_store %arg23[%c0_135, %c0_136], %160 {strides = array<i32>} : memref<64x256xf32, #tpu.memory_space<vmem>>, vector<1x256xf32>,
    %c28_137 = arith.constant 28 : index
    %c0_138 = arith.constant 0 : index
    %162 = vector.load %arg23[%c28_137, %c0_138] : memref<64x256xf32, #tpu.memory_space<vmem>>, vector<1x256xf32>
    tpu.vector_store %arg23[%c28_137, %c0_138], %160 {strides = array<i32>} : memref<64x256xf32, #tpu.memory_space<vmem>>, vector<1x256xf32>,
    %c1_139 = arith.constant 1 : index
    %c0_140 = arith.constant 0 : index
    %163 = vector.load %arg23[%c1_139, %c0_140] : memref<64x256xf32, #tpu.memory_space<vmem>>, vector<27x256xf32>
    tpu.vector_store %arg23[%c1_139, %c0_140], %159 {strides = array<i32>} : memref<64x256xf32, #tpu.memory_space<vmem>>, vector<27x256xf32>,
    %cst_141 = arith.constant 0.000000e+00 : f32
    %164 = vector.broadcast %cst_141 : f32 to vector<27x256xf32>
    %c0_142 = arith.constant 0 : index
    %c0_143 = arith.constant 0 : index
    %165 = vector.load %arg23[%c0_142, %c0_143] : memref<64x256xf32, #tpu.memory_space<vmem>>, vector<27x256xf32>
    %c0_144 = arith.constant 0 : index
    %c0_145 = arith.constant 0 : index
    %c0_146 = arith.constant 0 : index
    %166 = vector.load %arg14[%c0_144, %c0_145, %c0_146] : memref<3x256x256xf32, #tpu.memory_space<vmem>>, vector<1x256x256xf32>
    %167 = vector.shape_cast %166 : vector<1x256x256xf32> to vector<256x256xf32>
    %cst_147 = arith.constant dense<0.000000e+00> : vector<27x256xf32>
    %168 = tpu.matmul %165, %167, %cst_147 {dimension_numbers = #tpu.dot_dimension_numbers<[1], [0], [0], [1], [0, 0, 1, 1], [], []>} : vector<27x256xf32>, vector<256x256xf32>, vector<27x256xf32> -> vector<27x256xf32>
    %169 = arith.addf %164, %168 : vector<27x256xf32>
    %c1_148 = arith.constant 1 : index
    %c0_149 = arith.constant 0 : index
    %170 = vector.load %arg23[%c1_148, %c0_149] : memref<64x256xf32, #tpu.memory_space<vmem>>, vector<27x256xf32>
    %c1_150 = arith.constant 1 : index
    %c0_151 = arith.constant 0 : index
    %c0_152 = arith.constant 0 : index
    %171 = vector.load %arg14[%c1_150, %c0_151, %c0_152] : memref<3x256x256xf32, #tpu.memory_space<vmem>>, vector<1x256x256xf32>
    %172 = vector.shape_cast %171 : vector<1x256x256xf32> to vector<256x256xf32>
    %cst_153 = arith.constant dense<0.000000e+00> : vector<27x256xf32>
    %173 = tpu.matmul %170, %172, %cst_153 {dimension_numbers = #tpu.dot_dimension_numbers<[1], [0], [0], [1], [0, 0, 1, 1], [], []>} : vector<27x256xf32>, vector<256x256xf32>, vector<27x256xf32> -> vector<27x256xf32>
    %174 = arith.addf %169, %173 : vector<27x256xf32>
    %c2_154 = arith.constant 2 : index
    %c0_155 = arith.constant 0 : index
    %175 = vector.load %arg23[%c2_154, %c0_155] : memref<64x256xf32, #tpu.memory_space<vmem>>, vector<27x256xf32>
    %c2_156 = arith.constant 2 : index
    %c0_157 = arith.constant 0 : index
    %c0_158 = arith.constant 0 : index
    %176 = vector.load %arg14[%c2_156, %c0_157, %c0_158] : memref<3x256x256xf32, #tpu.memory_space<vmem>>, vector<1x256x256xf32>
    %177 = vector.shape_cast %176 : vector<1x256x256xf32> to vector<256x256xf32>
    %cst_159 = arith.constant dense<0.000000e+00> : vector<27x256xf32>
    %178 = tpu.matmul %175, %177, %cst_159 {dimension_numbers = #tpu.dot_dimension_numbers<[1], [0], [0], [1], [0, 0, 1, 1], [], []>} : vector<27x256xf32>, vector<256x256xf32>, vector<27x256xf32> -> vector<27x256xf32>
    %179 = arith.addf %174, %178 : vector<27x256xf32>
    %c0_160 = arith.constant 0 : index
    %c0_161 = arith.constant 0 : index
    %180 = vector.load %arg15[%c0_160, %c0_161] : memref<1x256xf32, #tpu.memory_space<vmem>>, vector<1x256xf32>
    %181 = vector.broadcast %180 : vector<1x256xf32> to vector<27x256xf32>
    %182 = arith.addf %179, %181 : vector<27x256xf32>
    %cst_162 = arith.constant 0.000000e+00 : f32
    %183 = vector.broadcast %cst_162 : f32 to vector<27x256xf32>
    %184 = arith.maximumf %182, %183 : vector<27x256xf32>
    %c0_163 = arith.constant 0 : index
    %c0_164 = arith.constant 0 : index
    %185 = vector.load %arg16[%c0_163, %c0_164] : memref<13x27xf32, #tpu.memory_space<vmem>>, vector<13x27xf32>
    %cst_165 = arith.constant dense<0.000000e+00> : vector<13x256xf32>
    %186 = tpu.matmul %185, %184, %cst_165 {dimension_numbers = #tpu.dot_dimension_numbers<[1], [0], [0], [1], [0, 0, 1, 1], [], []>} : vector<13x27xf32>, vector<27x256xf32>, vector<13x256xf32> -> vector<13x256xf32>
    %cst_166 = arith.constant 0.000000e+00 : f32
    %187 = vector.broadcast %cst_166 : f32 to vector<1x128xf32>
    %188 = vector.extract_strided_slice %186 {offsets = [0, 0], sizes = [1, 256], strides = [1, 1]} : vector<13x256xf32> to vector<1x256xf32>
    %c0_167 = arith.constant 0 : index
    %c0_168 = arith.constant 0 : index
    %c0_169 = arith.constant 0 : index
    %189 = vector.load %arg17[%c0_167, %c0_168, %c0_169] : memref<13x256x128xf32, #tpu.memory_space<vmem>>, vector<1x256x128xf32>
    %190 = vector.shape_cast %189 : vector<1x256x128xf32> to vector<256x128xf32>
    %cst_170 = arith.constant dense<0.000000e+00> : vector<1x128xf32>
    %191 = tpu.matmul %188, %190, %cst_170 {dimension_numbers = #tpu.dot_dimension_numbers<[1], [0], [0], [1], [0, 0, 1, 1], [], []>} : vector<1x256xf32>, vector<256x128xf32>, vector<1x128xf32> -> vector<1x128xf32>
    %192 = arith.addf %187, %191 : vector<1x128xf32>
    %193 = vector.extract_strided_slice %186 {offsets = [1, 0], sizes = [1, 256], strides = [1, 1]} : vector<13x256xf32> to vector<1x256xf32>
    %c1_171 = arith.constant 1 : index
    %c0_172 = arith.constant 0 : index
    %c0_173 = arith.constant 0 : index
    %194 = vector.load %arg17[%c1_171, %c0_172, %c0_173] : memref<13x256x128xf32, #tpu.memory_space<vmem>>, vector<1x256x128xf32>
    %195 = vector.shape_cast %194 : vector<1x256x128xf32> to vector<256x128xf32>
    %cst_174 = arith.constant dense<0.000000e+00> : vector<1x128xf32>
    %196 = tpu.matmul %193, %195, %cst_174 {dimension_numbers = #tpu.dot_dimension_numbers<[1], [0], [0], [1], [0, 0, 1, 1], [], []>} : vector<1x256xf32>, vector<256x128xf32>, vector<1x128xf32> -> vector<1x128xf32>
    %197 = arith.addf %192, %196 : vector<1x128xf32>
    %198 = vector.extract_strided_slice %186 {offsets = [2, 0], sizes = [1, 256], strides = [1, 1]} : vector<13x256xf32> to vector<1x256xf32>
    %c2_175 = arith.constant 2 : index
    %c0_176 = arith.constant 0 : index
    %c0_177 = arith.constant 0 : index
    %199 = vector.load %arg17[%c2_175, %c0_176, %c0_177] : memref<13x256x128xf32, #tpu.memory_space<vmem>>, vector<1x256x128xf32>
    %200 = vector.shape_cast %199 : vector<1x256x128xf32> to vector<256x128xf32>
    %cst_178 = arith.constant dense<0.000000e+00> : vector<1x128xf32>
    %201 = tpu.matmul %198, %200, %cst_178 {dimension_numbers = #tpu.dot_dimension_numbers<[1], [0], [0], [1], [0, 0, 1, 1], [], []>} : vector<1x256xf32>, vector<256x128xf32>, vector<1x128xf32> -> vector<1x128xf32>
    %202 = arith.addf %197, %201 : vector<1x128xf32>
    %203 = vector.extract_strided_slice %186 {offsets = [3, 0], sizes = [1, 256], strides = [1, 1]} : vector<13x256xf32> to vector<1x256xf32>
    %c3_179 = arith.constant 3 : index
    %c0_180 = arith.constant 0 : index
    %c0_181 = arith.constant 0 : index
    %204 = vector.load %arg17[%c3_179, %c0_180, %c0_181] : memref<13x256x128xf32, #tpu.memory_space<vmem>>, vector<1x256x128xf32>
    %205 = vector.shape_cast %204 : vector<1x256x128xf32> to vector<256x128xf32>
    %cst_182 = arith.constant dense<0.000000e+00> : vector<1x128xf32>
    %206 = tpu.matmul %203, %205, %cst_182 {dimension_numbers = #tpu.dot_dimension_numbers<[1], [0], [0], [1], [0, 0, 1, 1], [], []>} : vector<1x256xf32>, vector<256x128xf32>, vector<1x128xf32> -> vector<1x128xf32>
    %207 = arith.addf %202, %206 : vector<1x128xf32>
    %208 = vector.extract_strided_slice %186 {offsets = [4, 0], sizes = [1, 256], strides = [1, 1]} : vector<13x256xf32> to vector<1x256xf32>
    %c4_183 = arith.constant 4 : index
    %c0_184 = arith.constant 0 : index
    %c0_185 = arith.constant 0 : index
    %209 = vector.load %arg17[%c4_183, %c0_184, %c0_185] : memref<13x256x128xf32, #tpu.memory_space<vmem>>, vector<1x256x128xf32>
    %210 = vector.shape_cast %209 : vector<1x256x128xf32> to vector<256x128xf32>
    %cst_186 = arith.constant dense<0.000000e+00> : vector<1x128xf32>
    %211 = tpu.matmul %208, %210, %cst_186 {dimension_numbers = #tpu.dot_dimension_numbers<[1], [0], [0], [1], [0, 0, 1, 1], [], []>} : vector<1x256xf32>, vector<256x128xf32>, vector<1x128xf32> -> vector<1x128xf32>
    %212 = arith.addf %207, %211 : vector<1x128xf32>
    %213 = vector.extract_strided_slice %186 {offsets = [5, 0], sizes = [1, 256], strides = [1, 1]} : vector<13x256xf32> to vector<1x256xf32>
    %c5_187 = arith.constant 5 : index
    %c0_188 = arith.constant 0 : index
    %c0_189 = arith.constant 0 : index
    %214 = vector.load %arg17[%c5_187, %c0_188, %c0_189] : memref<13x256x128xf32, #tpu.memory_space<vmem>>, vector<1x256x128xf32>
    %215 = vector.shape_cast %214 : vector<1x256x128xf32> to vector<256x128xf32>
    %cst_190 = arith.constant dense<0.000000e+00> : vector<1x128xf32>
    %216 = tpu.matmul %213, %215, %cst_190 {dimension_numbers = #tpu.dot_dimension_numbers<[1], [0], [0], [1], [0, 0, 1, 1], [], []>} : vector<1x256xf32>, vector<256x128xf32>, vector<1x128xf32> -> vector<1x128xf32>
    %217 = arith.addf %212, %216 : vector<1x128xf32>
    %218 = vector.extract_strided_slice %186 {offsets = [6, 0], sizes = [1, 256], strides = [1, 1]} : vector<13x256xf32> to vector<1x256xf32>
    %c6_191 = arith.constant 6 : index
    %c0_192 = arith.constant 0 : index
    %c0_193 = arith.constant 0 : index
    %219 = vector.load %arg17[%c6_191, %c0_192, %c0_193] : memref<13x256x128xf32, #tpu.memory_space<vmem>>, vector<1x256x128xf32>
    %220 = vector.shape_cast %219 : vector<1x256x128xf32> to vector<256x128xf32>
    %cst_194 = arith.constant dense<0.000000e+00> : vector<1x128xf32>
    %221 = tpu.matmul %218, %220, %cst_194 {dimension_numbers = #tpu.dot_dimension_numbers<[1], [0], [0], [1], [0, 0, 1, 1], [], []>} : vector<1x256xf32>, vector<256x128xf32>, vector<1x128xf32> -> vector<1x128xf32>
    %222 = arith.addf %217, %221 : vector<1x128xf32>
    %223 = vector.extract_strided_slice %186 {offsets = [7, 0], sizes = [1, 256], strides = [1, 1]} : vector<13x256xf32> to vector<1x256xf32>
    %c7_195 = arith.constant 7 : index
    %c0_196 = arith.constant 0 : index
    %c0_197 = arith.constant 0 : index
    %224 = vector.load %arg17[%c7_195, %c0_196, %c0_197] : memref<13x256x128xf32, #tpu.memory_space<vmem>>, vector<1x256x128xf32>
    %225 = vector.shape_cast %224 : vector<1x256x128xf32> to vector<256x128xf32>
    %cst_198 = arith.constant dense<0.000000e+00> : vector<1x128xf32>
    %226 = tpu.matmul %223, %225, %cst_198 {dimension_numbers = #tpu.dot_dimension_numbers<[1], [0], [0], [1], [0, 0, 1, 1], [], []>} : vector<1x256xf32>, vector<256x128xf32>, vector<1x128xf32> -> vector<1x128xf32>
    %227 = arith.addf %222, %226 : vector<1x128xf32>
    %228 = vector.extract_strided_slice %186 {offsets = [8, 0], sizes = [1, 256], strides = [1, 1]} : vector<13x256xf32> to vector<1x256xf32>
    %c8_199 = arith.constant 8 : index
    %c0_200 = arith.constant 0 : index
    %c0_201 = arith.constant 0 : index
    %229 = vector.load %arg17[%c8_199, %c0_200, %c0_201] : memref<13x256x128xf32, #tpu.memory_space<vmem>>, vector<1x256x128xf32>
    %230 = vector.shape_cast %229 : vector<1x256x128xf32> to vector<256x128xf32>
    %cst_202 = arith.constant dense<0.000000e+00> : vector<1x128xf32>
    %231 = tpu.matmul %228, %230, %cst_202 {dimension_numbers = #tpu.dot_dimension_numbers<[1], [0], [0], [1], [0, 0, 1, 1], [], []>} : vector<1x256xf32>, vector<256x128xf32>, vector<1x128xf32> -> vector<1x128xf32>
    %232 = arith.addf %227, %231 : vector<1x128xf32>
    %233 = vector.extract_strided_slice %186 {offsets = [9, 0], sizes = [1, 256], strides = [1, 1]} : vector<13x256xf32> to vector<1x256xf32>
    %c9_203 = arith.constant 9 : index
    %c0_204 = arith.constant 0 : index
    %c0_205 = arith.constant 0 : index
    %234 = vector.load %arg17[%c9_203, %c0_204, %c0_205] : memref<13x256x128xf32, #tpu.memory_space<vmem>>, vector<1x256x128xf32>
    %235 = vector.shape_cast %234 : vector<1x256x128xf32> to vector<256x128xf32>
    %cst_206 = arith.constant dense<0.000000e+00> : vector<1x128xf32>
    %236 = tpu.matmul %233, %235, %cst_206 {dimension_numbers = #tpu.dot_dimension_numbers<[1], [0], [0], [1], [0, 0, 1, 1], [], []>} : vector<1x256xf32>, vector<256x128xf32>, vector<1x128xf32> -> vector<1x128xf32>
    %237 = arith.addf %232, %236 : vector<1x128xf32>
    %238 = vector.extract_strided_slice %186 {offsets = [10, 0], sizes = [1, 256], strides = [1, 1]} : vector<13x256xf32> to vector<1x256xf32>
    %c10 = arith.constant 10 : index
    %c0_207 = arith.constant 0 : index
    %c0_208 = arith.constant 0 : index
    %239 = vector.load %arg17[%c10, %c0_207, %c0_208] : memref<13x256x128xf32, #tpu.memory_space<vmem>>, vector<1x256x128xf32>
    %240 = vector.shape_cast %239 : vector<1x256x128xf32> to vector<256x128xf32>
    %cst_209 = arith.constant dense<0.000000e+00> : vector<1x128xf32>
    %241 = tpu.matmul %238, %240, %cst_209 {dimension_numbers = #tpu.dot_dimension_numbers<[1], [0], [0], [1], [0, 0, 1, 1], [], []>} : vector<1x256xf32>, vector<256x128xf32>, vector<1x128xf32> -> vector<1x128xf32>
    %242 = arith.addf %237, %241 : vector<1x128xf32>
    %243 = vector.extract_strided_slice %186 {offsets = [11, 0], sizes = [1, 256], strides = [1, 1]} : vector<13x256xf32> to vector<1x256xf32>
    %c11 = arith.constant 11 : index
    %c0_210 = arith.constant 0 : index
    %c0_211 = arith.constant 0 : index
    %244 = vector.load %arg17[%c11, %c0_210, %c0_211] : memref<13x256x128xf32, #tpu.memory_space<vmem>>, vector<1x256x128xf32>
    %245 = vector.shape_cast %244 : vector<1x256x128xf32> to vector<256x128xf32>
    %cst_212 = arith.constant dense<0.000000e+00> : vector<1x128xf32>
    %246 = tpu.matmul %243, %245, %cst_212 {dimension_numbers = #tpu.dot_dimension_numbers<[1], [0], [0], [1], [0, 0, 1, 1], [], []>} : vector<1x256xf32>, vector<256x128xf32>, vector<1x128xf32> -> vector<1x128xf32>
    %247 = arith.addf %242, %246 : vector<1x128xf32>
    %248 = vector.extract_strided_slice %186 {offsets = [12, 0], sizes = [1, 256], strides = [1, 1]} : vector<13x256xf32> to vector<1x256xf32>
    %c12 = arith.constant 12 : index
    %c0_213 = arith.constant 0 : index
    %c0_214 = arith.constant 0 : index
    %249 = vector.load %arg17[%c12, %c0_213, %c0_214] : memref<13x256x128xf32, #tpu.memory_space<vmem>>, vector<1x256x128xf32>
    %250 = vector.shape_cast %249 : vector<1x256x128xf32> to vector<256x128xf32>
    %cst_215 = arith.constant dense<0.000000e+00> : vector<1x128xf32>
    %251 = tpu.matmul %248, %250, %cst_215 {dimension_numbers = #tpu.dot_dimension_numbers<[1], [0], [0], [1], [0, 0, 1, 1], [], []>} : vector<1x256xf32>, vector<256x128xf32>, vector<1x128xf32> -> vector<1x128xf32>
    %252 = arith.addf %247, %251 : vector<1x128xf32>
    %c0_216 = arith.constant 0 : index
    %c0_217 = arith.constant 0 : index
    %253 = vector.load %arg18[%c0_216, %c0_217] : memref<1x128xf32, #tpu.memory_space<vmem>>, vector<1x128xf32>
    %254 = arith.addf %252, %253 : vector<1x128xf32>
    %cst_218 = arith.constant 0.000000e+00 : f32
    %255 = vector.broadcast %cst_218 : f32 to vector<1x128xf32>
    %256 = arith.maximumf %254, %255 : vector<1x128xf32>
    %c0_219 = arith.constant 0 : index
    %c0_220 = arith.constant 0 : index
    %257 = vector.load %arg19[%c0_219, %c0_220] : memref<128x5xf32, #tpu.memory_space<vmem>>, vector<128x5xf32>
    %cst_221 = arith.constant dense<0.000000e+00> : vector<1x5xf32>
    %258 = tpu.matmul %256, %257, %cst_221 {dimension_numbers = #tpu.dot_dimension_numbers<[1], [0], [0], [1], [0, 0, 1, 1], [], []>} : vector<1x128xf32>, vector<128x5xf32>, vector<1x5xf32> -> vector<1x5xf32>
    %c0_222 = arith.constant 0 : index
    %c0_223 = arith.constant 0 : index
    %259 = vector.load %arg20[%c0_222, %c0_223] : memref<1x5xf32, #tpu.memory_space<vmem>>, vector<1x5xf32>
    %260 = arith.addf %258, %259 : vector<1x5xf32>
    %261 = vector.shape_cast %256 : vector<1x128xf32> to vector<1x1x128xf32>
    %c0_224 = arith.constant 0 : index
    %c0_225 = arith.constant 0 : index
    %c0_226 = arith.constant 0 : index
    %262 = vector.load %arg22[%c0_224, %c0_225, %c0_226] : memref<1x1x128xf32, #tpu.memory_space<vmem>>, vector<1x1x128xf32>
    tpu.vector_store %arg22[%c0_224, %c0_225, %c0_226], %261 {strides = array<i32>} : memref<1x1x128xf32, #tpu.memory_space<vmem>>, vector<1x1x128xf32>,
    %263 = vector.shape_cast %260 : vector<1x5xf32> to vector<1x1x5xf32>
    %c0_227 = arith.constant 0 : index
    %c0_228 = arith.constant 0 : index
    %c0_229 = arith.constant 0 : index
    %264 = vector.load %arg21[%c0_227, %c0_228, %c0_229] : memref<1x1x5xf32, #tpu.memory_space<vmem>>, vector<1x1x5xf32>
    tpu.vector_store %arg21[%c0_227, %c0_228, %c0_229], %263 {strides = array<i32>} : memref<1x1x5xf32, #tpu.memory_space<vmem>>, vector<1x1x5xf32>,
    return
  }
  func.func @transform_0(%arg0: i32) -> (i32, i32, i32) {
    %c0_i32 = arith.constant 0 : i32
    %c0_i32_0 = arith.constant 0 : i32
    %c0_i32_1 = arith.constant 0 : i32
    return %arg0, %c0_i32, %c0_i32_0 : i32, i32, i32
  }
  func.func @transform_1(%arg0: i32) -> (i32, i32) {
    %c0_i32 = arith.constant 0 : i32
    %c0_i32_0 = arith.constant 0 : i32
    %c0_i32_1 = arith.constant 0 : i32
    return %c0_i32, %c0_i32_0 : i32, i32
  }
  func.func @transform_2(%arg0: i32) -> (i32, i32) {
    %c0_i32 = arith.constant 0 : i32
    %c0_i32_0 = arith.constant 0 : i32
    %c0_i32_1 = arith.constant 0 : i32
    return %c0_i32, %c0_i32_0 : i32, i32
  }
  func.func @transform_3(%arg0: i32) -> (i32, i32, i32) {
    %c0_i32 = arith.constant 0 : i32
    %c0_i32_0 = arith.constant 0 : i32
    %c0_i32_1 = arith.constant 0 : i32
    %c0_i32_2 = arith.constant 0 : i32
    return %c0_i32, %c0_i32_0, %c0_i32_1 : i32, i32, i32
  }
  func.func @transform_4(%arg0: i32) -> (i32, i32) {
    %c0_i32 = arith.constant 0 : i32
    %c0_i32_0 = arith.constant 0 : i32
    %c0_i32_1 = arith.constant 0 : i32
    return %c0_i32, %c0_i32_0 : i32, i32
  }
  func.func @transform_5(%arg0: i32) -> (i32, i32) {
    %c0_i32 = arith.constant 0 : i32
    %c0_i32_0 = arith.constant 0 : i32
    %c0_i32_1 = arith.constant 0 : i32
    return %c0_i32, %c0_i32_0 : i32, i32
  }
  func.func @transform_6(%arg0: i32) -> (i32, i32, i32) {
    %c0_i32 = arith.constant 0 : i32
    %c0_i32_0 = arith.constant 0 : i32
    %c0_i32_1 = arith.constant 0 : i32
    %c0_i32_2 = arith.constant 0 : i32
    return %c0_i32, %c0_i32_0, %c0_i32_1 : i32, i32, i32
  }
  func.func @transform_7(%arg0: i32) -> (i32, i32) {
    %c0_i32 = arith.constant 0 : i32
    %c0_i32_0 = arith.constant 0 : i32
    %c0_i32_1 = arith.constant 0 : i32
    return %c0_i32, %c0_i32_0 : i32, i32
  }
  func.func @transform_8(%arg0: i32) -> (i32, i32, i32) {
    %c0_i32 = arith.constant 0 : i32
    %c0_i32_0 = arith.constant 0 : i32
    %c0_i32_1 = arith.constant 0 : i32
    %c0_i32_2 = arith.constant 0 : i32
    return %c0_i32, %c0_i32_0, %c0_i32_1 : i32, i32, i32
  }
  func.func @transform_9(%arg0: i32) -> (i32, i32) {
    %c0_i32 = arith.constant 0 : i32
    %c0_i32_0 = arith.constant 0 : i32
    %c0_i32_1 = arith.constant 0 : i32
    return %c0_i32, %c0_i32_0 : i32, i32
  }
  func.func @transform_10(%arg0: i32) -> (i32, i32) {
    %c0_i32 = arith.constant 0 : i32
    %c0_i32_0 = arith.constant 0 : i32
    %c0_i32_1 = arith.constant 0 : i32
    return %c0_i32, %c0_i32_0 : i32, i32
  }
  func.func @transform_11(%arg0: i32) -> (i32, i32, i32) {
    %c0_i32 = arith.constant 0 : i32
    %c0_i32_0 = arith.constant 0 : i32
    %c0_i32_1 = arith.constant 0 : i32
    %c0_i32_2 = arith.constant 0 : i32
    return %c0_i32, %c0_i32_0, %c0_i32_1 : i32, i32, i32
  }
  func.func @transform_12(%arg0: i32) -> (i32, i32) {
    %c0_i32 = arith.constant 0 : i32
    %c0_i32_0 = arith.constant 0 : i32
    %c0_i32_1 = arith.constant 0 : i32
    return %c0_i32, %c0_i32_0 : i32, i32
  }
  func.func @transform_13(%arg0: i32) -> (i32, i32, i32) {
    %c0_i32 = arith.constant 0 : i32
    %c0_i32_0 = arith.constant 0 : i32
    %c0_i32_1 = arith.constant 0 : i32
    %c0_i32_2 = arith.constant 0 : i32
    return %c0_i32, %c0_i32_0, %c0_i32_1 : i32, i32, i32
  }
  func.func @transform_14(%arg0: i32) -> (i32, i32) {
    %c0_i32 = arith.constant 0 : i32
    %c0_i32_0 = arith.constant 0 : i32
    %c0_i32_1 = arith.constant 0 : i32
    return %c0_i32, %c0_i32_0 : i32, i32
  }
  func.func @transform_15(%arg0: i32) -> (i32, i32) {
    %c0_i32 = arith.constant 0 : i32
    %c0_i32_0 = arith.constant 0 : i32
    %c0_i32_1 = arith.constant 0 : i32
    return %c0_i32, %c0_i32_0 : i32, i32
  }
  func.func @transform_16(%arg0: i32) -> (i32, i32, i32) {
    %c0_i32 = arith.constant 0 : i32
    %c0_i32_0 = arith.constant 0 : i32
    %c0_i32_1 = arith.constant 0 : i32
    %c0_i32_2 = arith.constant 0 : i32
    return %c0_i32, %c0_i32_0, %c0_i32_1 : i32, i32, i32
  }
  func.func @transform_17(%arg0: i32) -> (i32, i32) {
    %c0_i32 = arith.constant 0 : i32
    %c0_i32_0 = arith.constant 0 : i32
    %c0_i32_1 = arith.constant 0 : i32
    return %c0_i32, %c0_i32_0 : i32, i32
  }
  func.func @transform_18(%arg0: i32) -> (i32, i32) {
    %c0_i32 = arith.constant 0 : i32
    %c0_i32_0 = arith.constant 0 : i32
    %c0_i32_1 = arith.constant 0 : i32
    return %c0_i32, %c0_i32_0 : i32, i32
  }
  func.func @transform_19(%arg0: i32) -> (i32, i32) {
    %c0_i32 = arith.constant 0 : i32
    %c0_i32_0 = arith.constant 0 : i32
    %c0_i32_1 = arith.constant 0 : i32
    return %c0_i32, %c0_i32_0 : i32, i32
  }
  func.func @transform_20(%arg0: i32) -> (i32, i32, i32) {
    %c0_i32 = arith.constant 0 : i32
    %c0_i32_0 = arith.constant 0 : i32
    %c0_i32_1 = arith.constant 0 : i32
    return %arg0, %c0_i32, %c0_i32_0 : i32, i32, i32
  }
  func.func @transform_21(%arg0: i32) -> (i32, i32, i32) {
    %c0_i32 = arith.constant 0 : i32
    %c0_i32_0 = arith.constant 0 : i32
    %c0_i32_1 = arith.constant 0 : i32
    return %arg0, %c0_i32, %c0_i32_0 : i32, i32, i32
  }
}

</mosaic_0001>

<bundles_post_ra>
// kernel: conv_simple_forward.1
= control target key start
LH: loop header
LB: loop body
LE: loop exit
PB: predicated region body
PF: predicated region fallthrough
CT: control target
= control target key end

     0   :  { %s16788_s0 = inlined_call_operand.vmem [shape: f32[2,1002,10], index: 0, kind: input, shape index: {}]   ;;  %s16789_s1 = inlined_call_operand.vmem [shape: f32[10,32], index: 1, kind: input, shape index: {}]   ;;  %s16790_s2 = inlined_call_operand.vmem [shape: f32[1,32], index: 2, kind: input, shape index: {}]   ;;  %s16791_s3 = inlined_call_operand.vmem [shape: f32[10,32,32], index: 3, kind: input, shape index: {}]   ;;  %s16792_s4 = inlined_call_operand.vmem [shape: f32[1,32], index: 4, kind: input, shape index: {}]   ;;  %s16793_s5 = inlined_call_operand.vmem [shape: f32[55,331], index: 5, kind: input, shape index: {}]   ;;  %s16794_s6 = inlined_call_operand.vmem [shape: f32[3,32,64], index: 6, kind: input, shape index: {}]   ;;  %s16795_s7 = inlined_call_operand.vmem [shape: f32[1,64], index: 7, kind: input, shape index: {}]   ;;  %s16796_s8 = inlined_call_operand.vmem [shape: f32[3,64,64], index: 8, kind: input, shape index: {}]   ;;  %s16797_s9 = inlined_call_operand.vmem [shape: f32[1,64], index: 9, kind: input, shape index: {}]   ;;  %s16798_s10 = inlined_call_operand.vmem [shape: f32[27,55], index: 10, kind: input, shape index: {}]   ;;  %s16799_s11 = inlined_call_operand.vmem [shape: f32[3,64,256], index: 11, kind: input, shape index: {}]   ;;  %s16800_s12 = inlined_call_operand.vmem [shape: f32[1,256], index: 12, kind: input, shape index: {}]   ;;  %s16801_s13 = inlined_call_operand.vmem [shape: f32[3,256,256], index: 13, kind: input, shape index: {}]   ;;  %s16802_s14 = inlined_call_operand.vmem [shape: f32[1,256], index: 14, kind: input, shape index: {}]   ;;  %s16803_s15 = inlined_call_operand.vmem [shape: f32[13,27], index: 15, kind: input, shape index: {}]   ;;  %s16804_s16 = inlined_call_operand.vmem [shape: f32[13,256,128], index: 16, kind: input, shape index: {}]   ;;  %s16805_s17 = inlined_call_operand.vmem [shape: f32[1,128], index: 17, kind: input, shape index: {}]   ;;  %s16806_s18 = inlined_call_operand.vmem [shape: f32[128,5], index: 18, kind: input, shape index: {}]   ;;  %s16807_s19 = inlined_call_operand.vmem [shape: f32[1,5], index: 19, kind: input, shape index: {}]   ;;  %s16808_s20 = inlined_call_operand.hbm [shape: f32[2,1,5], index: 20, kind: output, shape index: {0}]   ;;  %s16809_s21 = inlined_call_operand.hbm [shape: f32[2,1,128], index: 21, kind: output, shape index: {1}]  }
   0x1   :  { %16932 = sst [smem:[#allocation183_spill]] %s16788_s0 }
   0x2   :  { %16933 = sst [smem:[#allocation184_spill]] %s16789_s1 }
   0x3   :  { %16934 = sst [smem:[#allocation185_spill]] %s16790_s2 }
   0x4   :  { %16935 = sst [smem:[#allocation186_spill]] %s16791_s3 }
   0x5   :  { %16936 = sst [smem:[#allocation187_spill]] %s16792_s4 }
   0x6   :  { %16937 = sst [smem:[#allocation188_spill]] %s16793_s5 }
   0x7   :  { %16938 = sst [smem:[#allocation189_spill]] %s16794_s6 }
   0x8   :  { %16939 = sst [smem:[#allocation190_spill]] %s16795_s7 }
   0x9   :  { %16940 = sst [smem:[#allocation191_spill]] %s16796_s8 }
   0xa   :  { %16941 = sst [smem:[#allocation192_spill]] %s16797_s9 }
   0xb   :  { %16942 = sst [smem:[#allocation193_spill]] %s16798_s10 }
   0xc   :  { %27 = vsyncpa [#allocation4], 0 }
   0xd   :  { %29 = vsyncpa [#allocation4 + $0x1], 0 }
   0xe   :  { %30 = vsyncpa [#allocation6], 0 }
   0xf   :  { %32 = vsyncpa [#allocation6 + $0x1], 0  ;;  %s11196_s2 = smov 0   ;;  %s11198_s25 = smov 0  }
  0x10   :  { %s11200_s26 = smov 0   ;;  %s11202_s27 = smov 0  }
  0x11 LB: > { %16943 = sst [smem:[#allocation9_spill]] %s11071_s2  ;;  %s11217_s3 = sadd.s32 4294967295, %s11083_s27   ;;  %s11083_s27 = sphi %s11202_s27, %s17501_s27   ;;  %s11079_s26 = sphi %s11200_s26, %s17503_s26   ;;  %s11075_s25 = sphi %s11198_s25, %s17505_s25   ;;  %s11071_s2 = sphi %s11196_s2, %s17504_s2  }
  0x12   : > { %16944 = sst [smem:[#allocation10_spill]] %s11079_s26  ;;  %s9689_s28 = sadd.s32 4294967294, %s11083_s27  }
  0x13   : > { %s11221_s29 = sadd.s32 1, %s11083_s27   ;;  %s470_s0 = sadd.s32 1, %s11079_s26 }
  0x14   : > { %16945 = sst [smem:[#allocation11_spill]] %s11221_s29  ;;  %s467_s4 = ssub.s32 %s11083_s27, %s11221_s29 }
  0x15   : > { %p480_p0 = scmp.ne.s32.totalorder %s11079_s26, %s11075_s25  ;;  %p468_p1 = scmp.eq.s32.totalorder %s467_s4, 0 }
  0x16   : > { %p481_p2 = scmp.eq.s32.totalorder %s11217_s3, 1  ;;  %p486_p3 = scmp.ne.s32.totalorder %s11075_s25, %s11071_s2 }
  0x17   : > { %p487_p4 = scmp.eq.s32.totalorder %s9689_s28, 1  ;;  %p9692_p7 = scmp.ge.s32.totalorder %s11083_s27, 1 }
  0x18   : > { %s11232_s30 = scalar_select %p468_p1, %s11079_s26, %s470_s0  }
  0x19   : > { %p11234_p5 = por %p481_p2, %p480_p0  ;;  %p11238_p6 = por %p487_p4, %p486_p3 }
  0x1a   : > { %16946 = sst [smem:[#allocation12_spill]] %s11232_s30  ;;  %p596_p8 = scmp.lt.s32.totalorder %s11083_s27, 3 }
  0x1b   : > { %s16948_s22 = scalar_select %p11238_p6, 1, 0 }
  0x1c   : > { %p597_p9 = pnand %p9692_p7, %p596_p8 }
  0x1d   : > { %16949 = sst [smem:[#allocation13_spill]] %s16948_s22 }
  0x1e   : > { %600 = sbr.rel (%p597_p9) target bundleno = 3696 (0xe70), region = 100 }
  0x23   : > { %s16950_s24 = sld [smem:[#allocation184_spill]]  ;;  %vm1175_vm0 = vcmask 1041408   ;;  %p659_p10 = scmp.lt.s32.totalorder %s11217_s3, 1  ;;  %vm796_vm1 = vcmask 80896   ;;  %vm3224_vm3 = vcmask 261120   ;;  %vm4124_vm5 = vcmask 1046528  }
  0x24   : > { %s16951_s22 = sld [smem:[#allocation183_spill]]  ;;  %vm3766_vm7 = vcmask 1043456   ;;  %vm4842_vm8 = vcmask 1042432   ;;  %vm6191_vm9 = vcmask 1044480   ;;  %vm5200_vm10 = vcmask 1045504  }
  0x25   : > { %s660_s4 = scalar_select %p659_p10, %s11217_s3, 1  ;;  %vm4482_vm11 = vcmask 1040384   ;;  %vm6653_vm13 = vcmask 613376   ;;  %vm6792_vm14 = vcmask 253952   ;;  %vm6822_vm15 = vcmask 261121  }
  0x26   : > { %s17413_s28 = sld [smem:[#allocation187_spill]] }
  0x27   : > { %s10936_s30 = smul.u32 1008, %s660_s4  ;;  %s17481_s29 = sld [smem:[#allocation188_spill]] }
  0x28   : > { %s17491_s6 = sld [smem:[#allocation189_spill]]  ;;  %s9602_s4 = scalar_lea.hbm %s16809_s21, %s11217_s3 }
  0x29   : > { %v791_v0 = vld [vmem:[%s16950_s24 + $0x8] sm:$0x3]  ;;  %v790_v1 = vld [vmem:[%s16950_s24] sm:$0xff]  ;;  %s17492_s8 = sld [smem:[#allocation191_spill]]  ;;  %s16734_s24 = sand.u32 1, %s11075_s25  }
  0x2a   : > { %9694 = vmatpush.msk.msra.mxu0 %vm1175_vm0, %v791_v0  ;;  %s11256_s2 = scalar_lea.vmem %s16951_s22, %s10936_s30  ;;  %s16958_s30 = sld [smem:[#allocation186_spill]] }
  0x2b   : > { %v664_v2 = vld [vmem:[%s11256_s2] sm:$0xff]  ;;  %v665_v3 = vld [vmem:[%s11256_s2 + $0x8] sm:$0xff]  ;;  %v666_v4 = vld [vmem:[%s11256_s2 + $0x10] sm:$0xff]  ;;  %s16961_s22 = sld [smem:[#allocation185_spill]]  ;;  %s9581_s23 = scalar_lea.sflag [#allocation6], %s16734_s24 }
  0x2c   : > { %1194 = vmatpush.msra.mxu0 %v790_v1  ;;  %v667_v5 = vld [vmem:[%s11256_s2 + $0x18] sm:$0xff]  ;;  %v668_v6 = vld [vmem:[%s11256_s2 + $0x20] sm:$0xff]  ;;  %v669_v7 = vld [vmem:[%s11256_s2 + $0x28] sm:$0xff]  ;;  %s17493_s7 = sld [smem:[#allocation190_spill]] }
  0x2d   : > { %9695 = vmatmul.msk.f32.vlgmr.msra.gmra.mxu0 %vm796_vm1, %v664_v2  ;;  %v670_v8 = vld [vmem:[%s11256_s2 + $0x30] sm:$0xff]  ;;  %v671_v9 = vld [vmem:[%s11256_s2 + $0x38] sm:$0xff]  ;;  %v672_v10 = vld [vmem:[%s11256_s2 + $0x40] sm:$0xff]  ;;  %s17494_s9 = sld [smem:[#allocation192_spill]] }
  0x2e   : > { %v673_v11 = vld [vmem:[%s11256_s2 + $0x48] sm:$0xff]  ;;  %v674_v12 = vld [vmem:[%s11256_s2 + $0x50] sm:$0xff]  ;;  %v675_v13 = vld [vmem:[%s11256_s2 + $0x58] sm:$0xff]  ;;  %s17495_s10 = sld [smem:[#allocation193_spill]] }
  0x2f   : > { %v676_v14 = vld [vmem:[%s11256_s2 + $0x60] sm:$0xff]  ;;  %v677_v15 = vld [vmem:[%s11256_s2 + $0x68] sm:$0xff]  ;;  %v678_v16 = vld [vmem:[%s11256_s2 + $0x70] sm:$0xff] }
  0x30   : > { %v679_v17 = vld [vmem:[%s11256_s2 + $0x78] sm:$0xff]  ;;  %v680_v19 = vld [vmem:[%s11256_s2 + $0x80] sm:$0xff]  ;;  %v681_v21 = vld [vmem:[%s11256_s2 + $0x88] sm:$0xff] }
  0x31   : > { %v682_v23 = vld [vmem:[%s11256_s2 + $0x90] sm:$0xff]  ;;  %v683_v25 = vld [vmem:[%s11256_s2 + $0x98] sm:$0xff]  ;;  %v684_v27 = vld [vmem:[%s11256_s2 + $0xa0] sm:$0xff] }
  0x32   : > { %v685_v29 = vld [vmem:[%s11256_s2 + $0xa8] sm:$0xff]  ;;  %v686_v31 = vld [vmem:[%s11256_s2 + $0xb0] sm:$0xff]  ;;  %v687_v33 = vld [vmem:[%s11256_s2 + $0xb8] sm:$0xff] }
  0x33   : > { %v688_v35 = vld [vmem:[%s11256_s2 + $0xc0] sm:$0xff]  ;;  %v689_v37 = vld [vmem:[%s11256_s2 + $0xc8] sm:$0xff]  ;;  %v690_v39 = vld [vmem:[%s11256_s2 + $0xd0] sm:$0xff] }
  0x34   : > { %v691_v41 = vld [vmem:[%s11256_s2 + $0xd8] sm:$0xff]  ;;  %v692_v43 = vld [vmem:[%s11256_s2 + $0xe0] sm:$0xff]  ;;  %v693_v45 = vld [vmem:[%s11256_s2 + $0xe8] sm:$0xff] }
  0x35   : > { %9696 = vmatmul.msk.f32.gmra.mxu0 %vm796_vm1, %v665_v3  ;;  %v694_v47 = vld [vmem:[%s11256_s2 + $0xf0] sm:$0xff]  ;;  %v695_v49 = vld [vmem:[%s11256_s2 + $0xf8] sm:$0xff]  ;;  %v696_v51 = vld [vmem:[%s11256_s2 + $0x100] sm:$0xff] }
  0x36   : > { %v697_v53 = vld [vmem:[%s11256_s2 + $0x108] sm:$0xff]  ;;  %v698_v55 = vld [vmem:[%s11256_s2 + $0x110] sm:$0xff]  ;;  %v699_v57 = vld [vmem:[%s11256_s2 + $0x118] sm:$0xff] }
  0x37   : > { %v700_v59 = vld [vmem:[%s11256_s2 + $0x120] sm:$0xff]  ;;  %v701_v61 = vld [vmem:[%s11256_s2 + $0x128] sm:$0xff]  ;;  %v702_v63 = vld [vmem:[%s11256_s2 + $0x130] sm:$0xff] }
  0x38   : > { %v703_v1 = vld [vmem:[%s11256_s2 + $0x138] sm:$0xff]  ;;  %v704_v3 = vld [vmem:[%s11256_s2 + $0x140] sm:$0xff] }
  0x3d   : > { %9697 = vmatmul.msk.f32.gmra.mxu0 %vm796_vm1, %v666_v4 }
  0x45   : > { %9698 = vmatmul.msk.f32.gmra.mxu0 %vm796_vm1, %v667_v5  ;;  %v705_v5 = vld [vmem:[%s11256_s2 + $0x148] sm:$0xff] }
  0x4d   : > { %9699 = vmatmul.msk.f32.gmra.mxu0 %vm796_vm1, %v668_v6 }
  0x55   : > { %9700 = vmatmul.msk.f32.gmra.mxu0 %vm796_vm1, %v669_v7  ;;  %v706_v7 = vld [vmem:[%s11256_s2 + $0x150] sm:$0xff] }
  0x5d   : > { %9701 = vmatmul.msk.f32.gmra.mxu0 %vm796_vm1, %v670_v8 }
  0x65   : > { %9702 = vmatmul.msk.f32.gmra.mxu0 %vm796_vm1, %v671_v9  ;;  %v707_v9 = vld [vmem:[%s11256_s2 + $0x158] sm:$0xff] }
  0x6d   : > { %9703 = vmatmul.msk.f32.gmra.mxu0 %vm796_vm1, %v672_v10 }
  0x75   : > { %9704 = vmatmul.msk.f32.gmra.mxu0 %vm796_vm1, %v673_v11  ;;  %v708_v11 = vld [vmem:[%s11256_s2 + $0x160] sm:$0xff] }
  0x7d   : > { %9705 = vmatmul.msk.f32.gmra.mxu0 %vm796_vm1, %v674_v12 }
  0x85   : > { %9706 = vmatmul.msk.f32.gmra.mxu0 %vm796_vm1, %v675_v13  ;;  %v709_v13 = vld [vmem:[%s11256_s2 + $0x168] sm:$0xff] }
  0x8d   : > { %9707 = vmatmul.msk.f32.gmra.mxu0 %vm796_vm1, %v676_v14 }
  0x95   : > { %9708 = vmatmul.msk.f32.gmra.mxu0 %vm796_vm1, %v677_v15  ;;  %v710_v15 = vld [vmem:[%s11256_s2 + $0x170] sm:$0xff] }
  0x9d   : > { %9709 = vmatmul.msk.f32.gmra.mxu0 %vm796_vm1, %v678_v16 }
  0xa5   : > { %9710 = vmatmul.msk.f32.gmra.mxu0 %vm796_vm1, %v679_v17  ;;  %v711_v17 = vld [vmem:[%s11256_s2 + $0x178] sm:$0xff] }
  0xaa   : > { %v11290_v18 = vpop.f32.mrf.mxu0 }
  0xad   : > { %9711 = vmatmul.msk.f32.gmra.mxu0 %vm796_vm1, %v680_v19 }
  0xb2   : > { %v11294_v20 = vpop.f32.mrf.mxu0 }
  0xb5   : > { %9712 = vmatmul.msk.f32.gmra.mxu0 %vm796_vm1, %v681_v21  ;;  %v712_v21 = vld [vmem:[%s11256_s2 + $0x180] sm:$0xff] }
  0xba   : > { %v11298_v22 = vpop.f32.mrf.mxu0 }
  0xbd   : > { %9713 = vmatmul.msk.f32.gmra.mxu0 %vm796_vm1, %v682_v23 }
  0xc2   : > { %v11302_v24 = vpop.f32.mrf.mxu0 }
  0xc5   : > { %9714 = vmatmul.msk.f32.gmra.mxu0 %vm796_vm1, %v683_v25  ;;  %v713_v25 = vld [vmem:[%s11256_s2 + $0x188] sm:$0xff] }
  0xca   : > { %v11306_v26 = vpop.f32.mrf.mxu0 }
  0xcd   : > { %9715 = vmatmul.msk.f32.gmra.mxu0 %vm796_vm1, %v684_v27 }
  0xd2   : > { %v11310_v28 = vpop.f32.mrf.mxu0 }
  0xd5   : > { %9716 = vmatmul.msk.f32.gmra.mxu0 %vm796_vm1, %v685_v29  ;;  %v714_v29 = vld [vmem:[%s11256_s2 + $0x190] sm:$0xff] }
  0xda   : > { %v11314_v30 = vpop.f32.mrf.mxu0 }
  0xdd   : > { %9717 = vmatmul.msk.f32.gmra.mxu0 %vm796_vm1, %v686_v31 }
  0xe2   : > { %v11318_v32 = vpop.f32.mrf.mxu0 }
  0xe5   : > { %9718 = vmatmul.msk.f32.gmra.mxu0 %vm796_vm1, %v687_v33  ;;  %v715_v33 = vld [vmem:[%s11256_s2 + $0x198] sm:$0xff] }
  0xea   : > { %v11322_v34 = vpop.f32.mrf.mxu0 }
  0xed   : > { %9719 = vmatmul.msk.f32.gmra.mxu0 %vm796_vm1, %v688_v35 }
  0xf2   : > { %v11326_v36 = vpop.f32.mrf.mxu0 }
  0xf5   : > { %9720 = vmatmul.msk.f32.gmra.mxu0 %vm796_vm1, %v689_v37  ;;  %v716_v37 = vld [vmem:[%s11256_s2 + $0x1a0] sm:$0xff] }
  0xfa   : > { %v11330_v38 = vpop.f32.mrf.mxu0 }
  0xfd   : > { %9721 = vmatmul.msk.f32.gmra.mxu0 %vm796_vm1, %v690_v39 }
 0x102   : > { %v11334_v40 = vpop.f32.mrf.mxu0 }
 0x105   : > { %9722 = vmatmul.msk.f32.gmra.mxu0 %vm796_vm1, %v691_v41  ;;  %v717_v41 = vld [vmem:[%s11256_s2 + $0x1a8] sm:$0xff] }
 0x10a   : > { %v11338_v42 = vpop.f32.mrf.mxu0 }
 0x10d   : > { %9723 = vmatmul.msk.f32.gmra.mxu0 %vm796_vm1, %v692_v43 }
 0x112   : > { %v11342_v44 = vpop.f32.mrf.mxu0 }
 0x115   : > { %9724 = vmatmul.msk.f32.gmra.mxu0 %vm796_vm1, %v693_v45  ;;  %v718_v45 = vld [vmem:[%s11256_s2 + $0x1b0] sm:$0xff] }
 0x11a   : > { %v11346_v46 = vpop.f32.mrf.mxu0 }
 0x11d   : > { %9725 = vmatmul.msk.f32.gmra.mxu0 %vm796_vm1, %v694_v47  ;;  %v9824_v47 = vld [vmem:[%s16958_s30 + $0x38] sm:$0xff] }
 0x11e   : > { %3321 = vmatpush.msra.mxu1 %v9824_v47  ;;  %10932 = vmatpush.msra.mxu2 %v9824_v47  ;;  %v723_v47 = vld [vmem:[%s11256_s2 + $0x1d8] sm:$0xff] }
 0x122   : > { %v11350_v48 = vpop.f32.mrf.mxu0 }
 0x125   : > { %9726 = vmatmul.msk.f32.gmra.mxu0 %vm796_vm1, %v695_v49  ;;  %v9823_v49 = vld [vmem:[%s16958_s30 + $0x30] sm:$0xff] }
 0x126   : > { %3322 = vmatpush.msra.mxu1 %v9823_v49  ;;  %10933 = vmatpush.msra.mxu2 %v9823_v49 }
 0x12a   : > { %v11354_v50 = vpop.f32.mrf.mxu0 }
 0x12d   : > { %9727 = vmatmul.msk.f32.gmra.mxu0 %vm796_vm1, %v696_v51  ;;  %v9822_v51 = vld [vmem:[%s16958_s30 + $0x28] sm:$0xff] }
 0x12e   : > { %3323 = vmatpush.msra.mxu1 %v9822_v51  ;;  %10934 = vmatpush.msra.mxu2 %v9822_v51 }
 0x132   : > { %v11358_v52 = vpop.f32.mrf.mxu0 }
 0x135   : > { %9728 = vmatmul.msk.f32.gmra.mxu0 %vm796_vm1, %v697_v53  ;;  %v9821_v53 = vld [vmem:[%s16958_s30 + $0x20] sm:$0xff] }
 0x136   : > { %3324 = vmatpush.msra.mxu1 %v9821_v53  ;;  %10935 = vmatpush.msra.mxu2 %v9821_v53 }
 0x13a   : > { %v11362_v54 = vpop.f32.mrf.mxu0 }
 0x13d   : > { %9729 = vmatmul.msk.f32.gmra.mxu0 %vm796_vm1, %v698_v55 }
 0x142   : > { %v11366_v56 = vpop.f32.mrf.mxu0 }
 0x145   : > { %9730 = vmatmul.msk.f32.gmra.mxu0 %vm796_vm1, %v699_v57  ;;  %v719_v57 = vld [vmem:[%s11256_s2 + $0x1b8] sm:$0xff] }
 0x14a   : > { %v11370_v58 = vpop.f32.mrf.mxu0 }
 0x14d   : > { %9731 = vmatmul.msk.f32.gmra.mxu0 %vm796_vm1, %v700_v59 }
 0x152   : > { %v11374_v60 = vpop.f32.mrf.mxu0 }
 0x155   : > { %9732 = vmatmul.msk.f32.gmra.mxu0 %vm796_vm1, %v701_v61  ;;  %v720_v61 = vld [vmem:[%s11256_s2 + $0x1c0] sm:$0xff] }
 0x15a   : > { %v11378_v62 = vpop.f32.mrf.mxu0 }
 0x15d   : > { %9733 = vmatmul.msk.f32.gmra.mxu0 %vm796_vm1, %v702_v63  ;;  %v16819_v63 = vlaneseq }
 0x162   : > { %v11382_v0 = vpop.f32.mrf.mxu0 }
 0x165   : > { %9734 = vmatmul.msk.f32.gmra.mxu0 %vm796_vm1, %v703_v1  ;;  %v11469_v1 = vld [vmem:[%s16961_s22] ss:$0 sm:$0xff] }
 0x16a   : > { %v11386_v2 = vpop.f32.mrf.mxu0 }
 0x16d   : > { %9735 = vmatmul.msk.f32.gmra.mxu0 %vm796_vm1, %v704_v3 }
 0x172   : > { %v11390_v4 = vpop.f32.mrf.mxu0 }
 0x175   : > { %9736 = vmatmul.msk.f32.gmra.mxu0 %vm796_vm1, %v705_v5  ;;  %v721_v5 = vld [vmem:[%s11256_s2 + $0x1c8] sm:$0xff] }
 0x17a   : > { %v11394_v6 = vpop.f32.mrf.mxu0 }
 0x17d   : > { %9737 = vmatmul.msk.f32.gmra.mxu0 %vm796_vm1, %v706_v7  ;;  %v11473_v7 = vshrl.u32 %v16819_v63, 7  ;;  %v732_v63 = vld [vmem:[%s11256_s2 + $0x220] sm:$0xff] }
 0x17f   : > { %16962 = vst [vmem:[#allocation22_spill] sm:$0xff] %v11473_v7  ;;  %vm1827_vm4 = vcmp.eq.s32.totalorder %v11473_v7, 0 }
 0x182   : > { %v11398_v8 = vpop.f32.mrf.mxu0 }
 0x185   : > { %9738 = vmatmul.msk.f32.gmra.mxu0 %vm796_vm1, %v707_v9 }
 0x18a   : > { %v11402_v10 = vpop.f32.mrf.mxu0 }
 0x18d   : > { %9739 = vmatmul.msk.f32.gmra.mxu0 %vm796_vm1, %v708_v11  ;;  %v1742_v11 = vadd.s32 328, %v11473_v7 }
 0x18f   : > { %vm1994_vm2 = vcmp.eq.s32.totalorder %v1742_v11, 333 }
 0x192   : > { %v11406_v12 = vpop.f32.mrf.mxu0 }
 0x195   : > { %9740 = vmatmul.msk.f32.gmra.mxu0 %vm796_vm1, %v709_v13 }
 0x19a   : > { %v11410_v14 = vpop.f32.mrf.mxu0 }
 0x19d   : > { %9741 = vmatmul.msk.f32.gmra.mxu0 %vm796_vm1, %v710_v15 }
 0x1a2   : > { %v11414_v16 = vpop.f32.mrf.mxu0 }
 0x1a5   : > { %9742 = vmatmul.msk.f32.gmra.mxu0 %vm796_vm1, %v711_v17  ;;  %v722_v17 = vld [vmem:[%s11256_s2 + $0x1d0] sm:$0xff] }
 0x1aa   : > { %v11418_v19 = vpop.f32.mrf.mxu0 }
 0x1ad   : > { %9743 = vmatmul.msk.f32.gmra.mxu0 %vm796_vm1, %v712_v21 }
 0x1b2   : > { %v11422_v23 = vpop.f32.mrf.mxu0 }
 0x1b3   : > { %16952 = vst [vmem:[#allocation14_spill] sm:$0xff] %v11422_v23 }
 0x1b5   : > { %9744 = vmatmul.msk.f32.gmra.mxu0 %vm796_vm1, %v713_v25 }
 0x1ba   : > { %v11426_v27 = vpop.f32.mrf.mxu0 }
 0x1bb   : > { %16953 = vst [vmem:[#allocation15_spill] sm:$0xff] %v11426_v27 }
 0x1bd   : > { %9745 = vmatmul.msk.f32.gmra.mxu0 %vm796_vm1, %v714_v29 }
 0x1c2   : > { %v11430_v31 = vpop.f32.mrf.mxu0 }
 0x1c3   : > { %16954 = vst [vmem:[#allocation16_spill] sm:$0xff] %v11430_v31 }
 0x1c5   : > { %9746 = vmatmul.msk.f32.gmra.mxu0 %vm796_vm1, %v715_v33 }
 0x1ca   : > { %v11434_v35 = vpop.f32.mrf.mxu0 }
 0x1cb   : > { %16955 = vst [vmem:[#allocation17_spill] sm:$0xff] %v11434_v35 }
 0x1cd   : > { %9747 = vmatmul.msk.f32.gmra.mxu0 %vm796_vm1, %v716_v37 }
 0x1d2   : > { %v11438_v39 = vpop.f32.mrf.mxu0 }
 0x1d3   : > { %16956 = vst [vmem:[#allocation18_spill] sm:$0xff] %v11438_v39 }
 0x1d5   : > { %9748 = vmatmul.msk.f32.gmra.mxu0 %vm796_vm1, %v717_v41 }
 0x1da   : > { %v11442_v43 = vpop.f32.mrf.mxu0 }
 0x1db   : > { %16957 = vst [vmem:[#allocation19_spill] sm:$0xff] %v11442_v43 }
 0x1dd   : > { %9749 = vmatmul.msk.f32.gmra.mxu0 %vm796_vm1, %v718_v45 }
 0x1e2   : > { %v11458_v55 = vpop.f32.mrf.mxu0 }
 0x1e3   : > { %16959 = vst [vmem:[#allocation20_spill] sm:$0xff] %v11458_v55 }
 0x1e5   : > { %9750 = vmatmul.msk.f32.gmra.mxu0 %vm796_vm1, %v719_v57 }
 0x1ea   : > { %v11462_v59 = vpop.f32.mrf.mxu0 }
 0x1eb   : > { %16960 = vst [vmem:[#allocation21_spill] sm:$0xff] %v11462_v59 }
 0x1ed   : > { %9751 = vmatmul.msk.f32.gmra.mxu0 %vm796_vm1, %v720_v61 }
 0x1f2   : > { %v1319_v3 = vpop.f32.mrf.mxu0 }
 0x1f3   : > { %v1320_v9 = vadd.f32 %v11469_v1, %v1319_v3  ;;  %v724_v3 = vld [vmem:[%s11256_s2 + $0x1e0] sm:$0xff] }
 0x1f5   : > { %9752 = vmatmul.msk.f32.gmra.mxu0 %vm796_vm1, %v721_v5  ;;  %v1615_v13 = vmax.f32 %v1320_v9, 0.0 }
 0x1f7   : > { %v11480_v25 = vsel %vm1994_vm2, 0.0, %v1615_v13  ;;  %vm7119_vm2 = vcmask 523264  }
 0x1f8   : > { %16963 = vst [vmem:[#allocation23_spill] sm:$0xff] %v11480_v25  ;;  %v3139_v33 = vrot.slane %v11480_v25, 6 }
 0x1fa   : > { %v1322_v15 = vpop.f32.mrf.mxu0 }
 0x1fb   : > { %v1323_v21 = vadd.f32 %v11469_v1, %v1322_v15 }
 0x1fd   : > { %v11482_v29 = vmax.f32 %v1323_v21, 0.0  ;;  %9753 = vmatmul.msk.f32.gmra.mxu0 %vm796_vm1, %v722_v17  ;;  %v725_v17 = vld [vmem:[%s11256_s2 + $0x1e8] sm:$0xff] }
 0x1ff   : > { %16964 = vst [vmem:[#allocation24_spill] sm:$0xff] %v11482_v29  ;;  %v3140_v37 = vrot.slane %v11482_v29, 6 }
 0x201   : > { %v3141_v41 = vsel %vm1175_vm0, %v3139_v33, %v3140_v37 }
 0x202   : > { %v1325_v45 = vpop.f32.mrf.mxu0  ;;  %9825 = vmatmul.msk.f32.vlgmr.msra.gmra.mxu1 %vm3224_vm3, %v3141_v41 }
 0x203   : > { %v1326_v49 = vadd.f32 %v11469_v1, %v1325_v45 }
 0x205   : > { %v11491_v51 = vmax.f32 %v1326_v49, 0.0  ;;  %9754 = vmatmul.msk.f32.gmra.mxu0 %vm796_vm1, %v723_v47  ;;  %v726_v47 = vld [vmem:[%s11256_s2 + $0x1f0] sm:$0xff] }
 0x207   : > { %16965 = vst [vmem:[#allocation25_spill] sm:$0xff] %v11491_v51  ;;  %v3142_v53 = vrot.slane %v11491_v51, 6 }
 0x209   : > { %v3143_v57 = vsel %vm1175_vm0, %v3140_v37, %v3142_v53 }
 0x20a   : > { %v1328_v61 = vpop.f32.mrf.mxu0  ;;  %9826 = vmatmul.msk.f32.gmra.mxu1 %vm3224_vm3, %v3143_v57 }
 0x20b   : > { %v1329_v5 = vadd.f32 %v11469_v1, %v1328_v61 }
 0x20d   : > { %v11499_v9 = vmax.f32 %v1329_v5, 0.0  ;;  %9755 = vmatmul.msk.f32.gmra.mxu0 %vm796_vm1, %v724_v3  ;;  %v727_v5 = vld [vmem:[%s11256_s2 + $0x1f8] sm:$0xff] }
 0x20f   : > { %16966 = vst [vmem:[#allocation26_spill] sm:$0xff] %v11499_v9  ;;  %v3144_v11 = vrot.slane %v11499_v9, 6 }
 0x211   : > { %v3145_v13 = vsel %vm1175_vm0, %v3142_v53, %v3144_v11 }
 0x212   : > { %v1331_v15 = vpop.f32.mrf.mxu0  ;;  %9827 = vmatmul.msk.f32.gmra.mxu1 %vm3224_vm3, %v3145_v13 }
 0x213   : > { %v1332_v21 = vadd.f32 %v11469_v1, %v1331_v15 }
 0x215   : > { %v11507_v33 = vmax.f32 %v1332_v21, 0.0  ;;  %9756 = vmatmul.msk.f32.gmra.mxu0 %vm796_vm1, %v725_v17 }
 0x217   : > { %16967 = vst [vmem:[#allocation27_spill] sm:$0xff] %v11507_v33  ;;  %v3146_v37 = vrot.slane %v11507_v33, 6 }
 0x219   : > { %v3147_v41 = vsel %vm1175_vm0, %v3144_v11, %v3146_v37 }
 0x21a   : > { %v1334_v45 = vpop.f32.mrf.mxu0  ;;  %9828 = vmatmul.msk.f32.gmra.mxu1 %vm3224_vm3, %v3147_v41  ;;  %v728_v41 = vld [vmem:[%s11256_s2 + $0x200] sm:$0xff] }
 0x21b   : > { %v1335_v49 = vadd.f32 %v11469_v1, %v1334_v45 }
 0x21d   : > { %v11515_v53 = vmax.f32 %v1335_v49, 0.0  ;;  %9757 = vmatmul.msk.f32.gmra.mxu0 %vm796_vm1, %v726_v47 }
 0x21f   : > { %16968 = vst [vmem:[#allocation28_spill] sm:$0xff] %v11515_v53  ;;  %v3148_v57 = vrot.slane %v11515_v53, 6 }
 0x221   : > { %v3149_v61 = vsel %vm1175_vm0, %v3146_v37, %v3148_v57 }
 0x222   : > { %v1337_v3 = vpop.f32.mrf.mxu0  ;;  %9829 = vmatmul.msk.f32.gmra.mxu1 %vm3224_vm3, %v3149_v61 }
 0x223   : > { %v1338_v11 = vadd.f32 %v11469_v1, %v1337_v3  ;;  %v729_v3 = vld [vmem:[%s11256_s2 + $0x208] sm:$0xff] }
 0x225   : > { %v11523_v13 = vmax.f32 %v1338_v11, 0.0  ;;  %9758 = vmatmul.msk.f32.gmra.mxu0 %vm796_vm1, %v727_v5 }
 0x227   : > { %16969 = vst [vmem:[#allocation29_spill] sm:$0xff] %v11523_v13  ;;  %v3150_v15 = vrot.slane %v11523_v13, 6 }
 0x229   : > { %v3151_v17 = vsel %vm1175_vm0, %v3148_v57, %v3150_v15 }
 0x22a   : > { %v1340_v21 = vpop.f32.mrf.mxu0  ;;  %9830 = vmatmul.msk.f32.gmra.mxu1 %vm3224_vm3, %v3151_v17 }
 0x22b   : > { %v1341_v37 = vadd.f32 %v11469_v1, %v1340_v21 }
 0x22d   : > { %v11531_v45 = vmax.f32 %v1341_v37, 0.0  ;;  %9759 = vmatmul.msk.f32.gmra.mxu0 %vm796_vm1, %v728_v41  ;;  %v730_v41 = vld [vmem:[%s11256_s2 + $0x210] sm:$0xff] }
 0x22f   : > { %16970 = vst [vmem:[#allocation30_spill] sm:$0xff] %v11531_v45  ;;  %v3152_v47 = vrot.slane %v11531_v45, 6 }
 0x231   : > { %v3153_v49 = vsel %vm1175_vm0, %v3150_v15, %v3152_v47 }
 0x232   : > { %v1343_v61 = vpop.f32.mrf.mxu0  ;;  %9831 = vmatmul.msk.f32.gmra.mxu1 %vm3224_vm3, %v3153_v49 }
 0x233   : > { %v1344_v57 = vadd.f32 %v11469_v1, %v1343_v61 }
 0x235   : > { %v11539_v5 = vmax.f32 %v1344_v57, 0.0  ;;  %9760 = vmatmul.msk.f32.gmra.mxu0 %vm796_vm1, %v729_v3  ;;  %v731_v57 = vld [vmem:[%s11256_s2 + $0x218] sm:$0xff] }
 0x237   : > { %16971 = vst [vmem:[#allocation31_spill] sm:$0xff] %v11539_v5  ;;  %v3154_v11 = vrot.slane %v11539_v5, 6 }
 0x239   : > { %v3155_v17 = vsel %vm1175_vm0, %v3152_v47, %v3154_v11 }
 0x23a   : > { %v1346_v21 = vpop.f32.mrf.mxu0  ;;  %9832 = vmatmul.msk.f32.gmra.mxu1 %vm3224_vm3, %v3155_v17 }
 0x23b   : > { %v1347_v15 = vadd.f32 %v11469_v1, %v1346_v21 }
 0x23d   : > { %v11547_v37 = vmax.f32 %v1347_v15, 0.0  ;;  %9761 = vmatmul.msk.f32.gmra.mxu0 %vm796_vm1, %v730_v41 }
 0x23f   : > { %16972 = vst [vmem:[#allocation32_spill] sm:$0xff] %v11547_v37  ;;  %v3156_v49 = vrot.slane %v11547_v37, 6 }
 0x241   : > { %v3157_v61 = vsel %vm1175_vm0, %v3154_v11, %v3156_v49 }
 0x242   : > { %v1349_v3 = vpop.f32.mrf.mxu0  ;;  %9833 = vmatmul.msk.f32.gmra.mxu1 %vm3224_vm3, %v3157_v61 }
 0x243   : > { %v1350_v47 = vadd.f32 %v11469_v1, %v1349_v3 }
 0x245   : > { %v11555_v17 = vmax.f32 %v1350_v47, 0.0  ;;  %9762 = vmatmul.msk.f32.gmra.mxu0 %vm796_vm1, %v731_v57 }
 0x247   : > { %16973 = vst [vmem:[#allocation33_spill] sm:$0xff] %v11555_v17  ;;  %v3158_v21 = vrot.slane %v11555_v17, 6  ;;  %v733_v17 = vld [vmem:[%s11256_s2 + $0x228] sm:$0xff] }
 0x249   : > { %v3159_v15 = vsel %vm1175_vm0, %v3156_v49, %v3158_v21 }
 0x24a   : > { %v1352_v41 = vpop.f32.mrf.mxu0  ;;  %9834 = vmatmul.msk.f32.gmra.mxu1 %vm3224_vm3, %v3159_v15 }
 0x24b   : > { %v1353_v11 = vadd.f32 %v11469_v1, %v1352_v41 }
 0x24d   : > { %v11563_v61 = vmax.f32 %v1353_v11, 0.0  ;;  %9763 = vmatmul.msk.f32.gmra.mxu0 %vm796_vm1, %v732_v63 }
 0x24f   : > { %16974 = vst [vmem:[#allocation34_spill] sm:$0xff] %v11563_v61  ;;  %v3160_v3 = vrot.slane %v11563_v61, 6  ;;  %v734_v61 = vld [vmem:[%s11256_s2 + $0x230] sm:$0xff] }
 0x251   : > { %v3161_v47 = vsel %vm1175_vm0, %v3158_v21, %v3160_v3 }
 0x252   : > { %v1355_v57 = vpop.f32.mrf.mxu0  ;;  %9835 = vmatmul.msk.f32.gmra.mxu1 %vm3224_vm3, %v3161_v47 }
 0x253   : > { %v1356_v49 = vadd.f32 %v11469_v1, %v1355_v57 }
 0x255   : > { %v11571_v15 = vmax.f32 %v1356_v49, 0.0  ;;  %9764 = vmatmul.msk.f32.gmra.mxu0 %vm796_vm1, %v733_v17 }
 0x257   : > { %16975 = vst [vmem:[#allocation35_spill] sm:$0xff] %v11571_v15  ;;  %v3162_v41 = vrot.slane %v11571_v15, 6  ;;  %v735_v15 = vld [vmem:[%s11256_s2 + $0x238] sm:$0xff] }
 0x259   : > { %v3163_v11 = vsel %vm1175_vm0, %v3160_v3, %v3162_v41 }
 0x25a   : > { %v1358_v63 = vpop.f32.mrf.mxu0  ;;  %9836 = vmatmul.msk.f32.gmra.mxu1 %vm3224_vm3, %v3163_v11 }
 0x25b   : > { %v1359_v21 = vadd.f32 %v11469_v1, %v1358_v63 }
 0x25d   : > { %v11579_v47 = vmax.f32 %v1359_v21, 0.0  ;;  %9765 = vmatmul.msk.f32.gmra.mxu0 %vm796_vm1, %v734_v61 }
 0x25f   : > { %16976 = vst [vmem:[#allocation36_spill] sm:$0xff] %v11579_v47  ;;  %v3164_v57 = vrot.slane %v11579_v47, 6  ;;  %v736_v47 = vld [vmem:[%s11256_s2 + $0x240] sm:$0xff] }
 0x261   : > { %v3165_v49 = vsel %vm1175_vm0, %v3162_v41, %v3164_v57 }
 0x262   : > { %v1361_v17 = vpop.f32.mrf.mxu0  ;;  %9837 = vmatmul.msk.f32.gmra.mxu1 %vm3224_vm3, %v3165_v49 }
 0x263   : > { %v1362_v3 = vadd.f32 %v11469_v1, %v1361_v17 }
 0x265   : > { %v11587_v11 = vmax.f32 %v1362_v3, 0.0  ;;  %9766 = vmatmul.msk.f32.gmra.mxu0 %vm796_vm1, %v735_v15 }
 0x267   : > { %16977 = vst [vmem:[#allocation37_spill] sm:$0xff] %v11587_v11  ;;  %v3166_v63 = vrot.slane %v11587_v11, 6  ;;  %v737_v11 = vld [vmem:[%s11256_s2 + $0x248] sm:$0xff] }
 0x269   : > { %v3167_v21 = vsel %vm1175_vm0, %v3164_v57, %v3166_v63 }
 0x26a   : > { %v1364_v61 = vpop.f32.mrf.mxu0  ;;  %9838 = vmatmul.msk.f32.gmra.mxu1 %vm3224_vm3, %v3167_v21 }
 0x26b   : > { %v1365_v41 = vadd.f32 %v11469_v1, %v1364_v61 }
 0x26d   : > { %v11595_v49 = vmax.f32 %v1365_v41, 0.0  ;;  %9767 = vmatmul.msk.f32.gmra.mxu0 %vm796_vm1, %v736_v47 }
 0x26f   : > { %16978 = vst [vmem:[#allocation38_spill] sm:$0xff] %v11595_v49  ;;  %v3168_v17 = vrot.slane %v11595_v49, 6  ;;  %v738_v49 = vld [vmem:[%s11256_s2 + $0x250] sm:$0xff] }
 0x271   : > { %v3169_v3 = vsel %vm1175_vm0, %v3166_v63, %v3168_v17 }
 0x272   : > { %v1367_v15 = vpop.f32.mrf.mxu0  ;;  %9839 = vmatmul.msk.f32.gmra.mxu1 %vm3224_vm3, %v3169_v3 }
 0x273   : > { %v1368_v57 = vadd.f32 %v11469_v1, %v1367_v15 }
 0x275   : > { %v11603_v21 = vmax.f32 %v1368_v57, 0.0  ;;  %9768 = vmatmul.msk.f32.gmra.mxu0 %vm796_vm1, %v737_v11 }
 0x277   : > { %16979 = vst [vmem:[#allocation39_spill] sm:$0xff] %v11603_v21  ;;  %v3170_v61 = vrot.slane %v11603_v21, 6 }
 0x279   : > { %v3171_v41 = vsel %vm1175_vm0, %v3168_v17, %v3170_v61  ;;  %v739_v17 = vld [vmem:[%s11256_s2 + $0x258] sm:$0xff] }
 0x27a   : > { %v1370_v47 = vpop.f32.mrf.mxu0  ;;  %9840 = vmatmul.msk.f32.gmra.mxu1 %vm3224_vm3, %v3171_v41 }
 0x27b   : > { %v1371_v63 = vadd.f32 %v11469_v1, %v1370_v47 }
 0x27d   : > { %v11611_v37 = vmax.f32 %v1371_v63, 0.0  ;;  %9769 = vmatmul.msk.f32.gmra.mxu0 %vm796_vm1, %v738_v49 }
 0x27f   : > { %16980 = vst [vmem:[#allocation40_spill] sm:$0xff] %v11611_v37  ;;  %v11614_v3 = vpop.f32.mrf.mxu1  ;;  %v3172_v15 = vrot.slane %v11611_v37, 6 }
 0x281   : > { %v3173_v11 = vsel %vm1175_vm0, %v3170_v61, %v3172_v15  ;;  %v740_v61 = vld [vmem:[%s11256_s2 + $0x260] sm:$0xff] }
 0x282   : > { %v1373_v57 = vpop.f32.mrf.mxu0  ;;  %9841 = vmatmul.msk.f32.gmra.mxu1 %vm3224_vm3, %v3173_v11 }
 0x283   : > { %v1374_v41 = vadd.f32 %v11469_v1, %v1373_v57 }
 0x285   : > { %v11621_v21 = vmax.f32 %v1374_v41, 0.0  ;;  %9770 = vmatmul.msk.f32.gmra.mxu0 %vm796_vm1, %v739_v17 }
 0x287   : > { %16981 = vst [vmem:[#allocation41_spill] sm:$0xff] %v11621_v21  ;;  %v11624_v47 = vpop.f32.mrf.mxu1  ;;  %v3174_v49 = vrot.slane %v11621_v21, 6 }
 0x289   : > { %v3175_v63 = vsel %vm1175_vm0, %v3172_v15, %v3174_v49  ;;  %v741_v15 = vld [vmem:[%s11256_s2 + $0x268] sm:$0xff] }
 0x28a   : > { %v1376_v37 = vpop.f32.mrf.mxu0  ;;  %9842 = vmatmul.msk.f32.gmra.mxu1 %vm3224_vm3, %v3175_v63 }
 0x28b   : > { %v1377_v11 = vadd.f32 %v11469_v1, %v1376_v37 }
 0x28d   : > { %v11631_v5 = vmax.f32 %v1377_v11, 0.0  ;;  %9771 = vmatmul.msk.f32.gmra.mxu0 %vm796_vm1, %v740_v61 }
 0x28f   : > { %16982 = vst [vmem:[#allocation42_spill] sm:$0xff] %v11631_v5  ;;  %v11634_v57 = vpop.f32.mrf.mxu1  ;;  %v3176_v17 = vrot.slane %v11631_v5, 6 }
 0x291   : > { %v3177_v41 = vsel %vm1175_vm0, %v3174_v49, %v3176_v17  ;;  %v742_v49 = vld [vmem:[%s11256_s2 + $0x270] sm:$0xff] }
 0x292   : > { %v1379_v21 = vpop.f32.mrf.mxu0  ;;  %9843 = vmatmul.msk.f32.gmra.mxu1 %vm3224_vm3, %v3177_v41 }
 0x293   : > { %v1380_v63 = vadd.f32 %v11469_v1, %v1379_v21 }
 0x295   : > { %v11641_v45 = vmax.f32 %v1380_v63, 0.0  ;;  %9772 = vmatmul.msk.f32.gmra.mxu0 %vm796_vm1, %v741_v15 }
 0x297   : > { %16983 = vst [vmem:[#allocation43_spill] sm:$0xff] %v11641_v45  ;;  %v11644_v37 = vpop.f32.mrf.mxu1  ;;  %v3178_v61 = vrot.slane %v11641_v45, 6 }
 0x299   : > { %v3179_v11 = vsel %vm1175_vm0, %v3176_v17, %v3178_v61  ;;  %v743_v17 = vld [vmem:[%s11256_s2 + $0x278] sm:$0xff] }
 0x29a   : > { %v1382_v5 = vpop.f32.mrf.mxu0  ;;  %9844 = vmatmul.msk.f32.gmra.mxu1 %vm3224_vm3, %v3179_v11 }
 0x29b   : > { %v1383_v41 = vadd.f32 %v11469_v1, %v1382_v5 }
 0x29d   : > { %v11651_v13 = vmax.f32 %v1383_v41, 0.0  ;;  %9773 = vmatmul.msk.f32.gmra.mxu0 %vm796_vm1, %v742_v49 }
 0x29f   : > { %16984 = vst [vmem:[#allocation44_spill] sm:$0xff] %v11651_v13  ;;  %v11654_v21 = vpop.f32.mrf.mxu1  ;;  %v3180_v15 = vrot.slane %v11651_v13, 6 }
 0x2a1   : > { %v3181_v63 = vsel %vm1175_vm0, %v3178_v61, %v3180_v15  ;;  %v744_v61 = vld [vmem:[%s11256_s2 + $0x280] sm:$0xff] }
 0x2a2   : > { %v1385_v45 = vpop.f32.mrf.mxu0  ;;  %9845 = vmatmul.msk.f32.gmra.mxu1 %vm3224_vm3, %v3181_v63 }
 0x2a3   : > { %v1386_v11 = vadd.f32 %v11469_v1, %v1385_v45 }
 0x2a5   : > { %v11661_v53 = vmax.f32 %v1386_v11, 0.0  ;;  %9774 = vmatmul.msk.f32.gmra.mxu0 %vm796_vm1, %v743_v17 }
 0x2a7   : > { %16985 = vst [vmem:[#allocation45_spill] sm:$0xff] %v11661_v53  ;;  %v11664_v5 = vpop.f32.mrf.mxu1  ;;  %v3182_v49 = vrot.slane %v11661_v53, 6 }
 0x2a9   : > { %v3183_v41 = vsel %vm1175_vm0, %v3180_v15, %v3182_v49  ;;  %v745_v15 = vld [vmem:[%s11256_s2 + $0x288] sm:$0xff] }
 0x2aa   : > { %v1388_v13 = vpop.f32.mrf.mxu0  ;;  %9846 = vmatmul.msk.f32.gmra.mxu1 %vm3224_vm3, %v3183_v41 }
 0x2ab   : > { %v1389_v63 = vadd.f32 %v11469_v1, %v1388_v13 }
 0x2ad   : > { %v11671_v33 = vmax.f32 %v1389_v63, 0.0  ;;  %9775 = vmatmul.msk.f32.gmra.mxu0 %vm796_vm1, %v744_v61 }
 0x2af   : > { %16986 = vst [vmem:[#allocation46_spill] sm:$0xff] %v11671_v33  ;;  %v11674_v45 = vpop.f32.mrf.mxu1  ;;  %v3184_v17 = vrot.slane %v11671_v33, 6 }
 0x2b1   : > { %v3185_v11 = vsel %vm1175_vm0, %v3182_v49, %v3184_v17  ;;  %v746_v49 = vld [vmem:[%s11256_s2 + $0x290] sm:$0xff] }
 0x2b2   : > { %v1391_v53 = vpop.f32.mrf.mxu0  ;;  %9847 = vmatmul.msk.f32.gmra.mxu1 %vm3224_vm3, %v3185_v11 }
 0x2b3   : > { %v1392_v41 = vadd.f32 %v11469_v1, %v1391_v53 }
 0x2b5   : > { %v11681_v9 = vmax.f32 %v1392_v41, 0.0  ;;  %9776 = vmatmul.msk.f32.gmra.mxu0 %vm796_vm1, %v745_v15 }
 0x2b7   : > { %16987 = vst [vmem:[#allocation47_spill] sm:$0xff] %v11681_v9  ;;  %v11684_v13 = vpop.f32.mrf.mxu1  ;;  %v3186_v61 = vrot.slane %v11681_v9, 6 }
 0x2b9   : > { %v3187_v63 = vsel %vm1175_vm0, %v3184_v17, %v3186_v61  ;;  %v747_v17 = vld [vmem:[%s11256_s2 + $0x298] sm:$0xff] }
 0x2ba   : > { %v1394_v33 = vpop.f32.mrf.mxu0  ;;  %9848 = vmatmul.msk.f32.gmra.mxu1 %vm3224_vm3, %v3187_v63 }
 0x2bb   : > { %v1395_v11 = vadd.f32 %v11469_v1, %v1394_v33 }
 0x2bd   : > { %v11691_v51 = vmax.f32 %v1395_v11, 0.0  ;;  %9777 = vmatmul.msk.f32.gmra.mxu0 %vm796_vm1, %v746_v49 }
 0x2bf   : > { %16988 = vst [vmem:[#allocation48_spill] sm:$0xff] %v11691_v51  ;;  %v3188_v53 = vrot.slane %v11691_v51, 6  ;;  %v11695_v15 = vpop.f32.mrf.mxu1 }
 0x2c1   : > { %v3189_v41 = vsel %vm1175_vm0, %v3186_v61, %v3188_v53  ;;  %v748_v61 = vld [vmem:[%s11256_s2 + $0x2a0] sm:$0xff] }
 0x2c2   : > { %v1397_v9 = vpop.f32.mrf.mxu0  ;;  %9849 = vmatmul.msk.f32.gmra.mxu1 %vm3224_vm3, %v3189_v41 }
 0x2c3   : > { %v1398_v63 = vadd.f32 %v11469_v1, %v1397_v9 }
 0x2c5   : > { %v11701_v29 = vmax.f32 %v1398_v63, 0.0  ;;  %9778 = vmatmul.msk.f32.gmra.mxu0 %vm796_vm1, %v747_v17 }
 0x2c7   : > { %16989 = vst [vmem:[#allocation49_spill] sm:$0xff] %v11701_v29  ;;  %v3190_v33 = vrot.slane %v11701_v29, 6  ;;  %v11705_v49 = vpop.f32.mrf.mxu1 }
 0x2c9   : > { %v3191_v11 = vsel %vm1175_vm0, %v3188_v53, %v3190_v33  ;;  %v749_v53 = vld [vmem:[%s11256_s2 + $0x2a8] sm:$0xff] }
 0x2ca   : > { %v1400_v51 = vpop.f32.mrf.mxu0  ;;  %9850 = vmatmul.msk.f32.gmra.mxu1 %vm3224_vm3, %v3191_v11 }
 0x2cb   : > { %v1401_v41 = vadd.f32 %v11469_v1, %v1400_v51 }
 0x2cd   : > { %v11711_v25 = vmax.f32 %v1401_v41, 0.0  ;;  %9779 = vmatmul.msk.f32.gmra.mxu0 %vm796_vm1, %v748_v61 }
 0x2cf   : > { %16990 = vst [vmem:[#allocation50_spill] sm:$0xff] %v11711_v25  ;;  %v3192_v9 = vrot.slane %v11711_v25, 6  ;;  %v11715_v17 = vpop.f32.mrf.mxu1 }
 0x2d1   : > { %v3193_v63 = vsel %vm1175_vm0, %v3190_v33, %v3192_v9  ;;  %v750_v33 = vld [vmem:[%s11256_s2 + $0x2b0] sm:$0xff] }
 0x2d2   : > { %v1403_v29 = vpop.f32.mrf.mxu0  ;;  %9851 = vmatmul.msk.f32.gmra.mxu1 %vm3224_vm3, %v3193_v63 }
 0x2d3   : > { %v1404_v11 = vadd.f32 %v11469_v1, %v1403_v29 }
 0x2d5   : > { %v11721_v59 = vmax.f32 %v1404_v11, 0.0  ;;  %9780 = vmatmul.msk.f32.gmra.mxu0 %vm796_vm1, %v749_v53 }
 0x2d7   : > { %16991 = vst [vmem:[#allocation51_spill] sm:$0xff] %v11721_v59  ;;  %v3194_v51 = vrot.slane %v11721_v59, 6  ;;  %v11725_v61 = vpop.f32.mrf.mxu1 }
 0x2d9   : > { %v3195_v41 = vsel %vm1175_vm0, %v3192_v9, %v3194_v51  ;;  %v751_v9 = vld [vmem:[%s11256_s2 + $0x2b8] sm:$0xff] }
 0x2da   : > { %v1406_v25 = vpop.f32.mrf.mxu0  ;;  %9852 = vmatmul.msk.f32.gmra.mxu1 %vm3224_vm3, %v3195_v41 }
 0x2db   : > { %v1407_v63 = vadd.f32 %v11469_v1, %v1406_v25 }
 0x2dd   : > { %v11731_v55 = vmax.f32 %v1407_v63, 0.0  ;;  %9781 = vmatmul.msk.f32.gmra.mxu0 %vm796_vm1, %v750_v33 }
 0x2df   : > { %16992 = vst [vmem:[#allocation52_spill] sm:$0xff] %v11731_v55  ;;  %v3196_v29 = vrot.slane %v11731_v55, 6  ;;  %v11735_v53 = vpop.f32.mrf.mxu1 }
 0x2e0   : > { %16993 = vst [vmem:[#allocation53_spill] sm:$0xff] %v11735_v53 }
 0x2e1   : > { %v3197_v11 = vsel %vm1175_vm0, %v3194_v51, %v3196_v29  ;;  %v752_v51 = vld [vmem:[%s11256_s2 + $0x2c0] sm:$0xff] }
 0x2e2   : > { %v1409_v59 = vpop.f32.mrf.mxu0  ;;  %9853 = vmatmul.msk.f32.gmra.mxu1 %vm3224_vm3, %v3197_v11 }
 0x2e3   : > { %v1410_v41 = vadd.f32 %v11469_v1, %v1409_v59 }
 0x2e5   : > { %v11741_v43 = vmax.f32 %v1410_v41, 0.0  ;;  %9782 = vmatmul.msk.f32.gmra.mxu0 %vm796_vm1, %v751_v9 }
 0x2e7   : > { %16994 = vst [vmem:[#allocation54_spill] sm:$0xff] %v11741_v43  ;;  %v3198_v25 = vrot.slane %v11741_v43, 6  ;;  %v11745_v33 = vpop.f32.mrf.mxu1 }
 0x2e8   : > { %16995 = vst [vmem:[#allocation55_spill] sm:$0xff] %v11745_v33  ;;  %v765_v33 = vld [vmem:[%s11256_s2 + $0x328] sm:$0xff] }
 0x2e9   : > { %v3199_v63 = vsel %vm1175_vm0, %v3196_v29, %v3198_v25  ;;  %v753_v29 = vld [vmem:[%s11256_s2 + $0x2c8] sm:$0xff] }
 0x2ea   : > { %v1412_v55 = vpop.f32.mrf.mxu0  ;;  %9854 = vmatmul.msk.f32.gmra.mxu1 %vm3224_vm3, %v3199_v63 }
 0x2eb   : > { %v1413_v11 = vadd.f32 %v11469_v1, %v1412_v55 }
 0x2ed   : > { %v11751_v39 = vmax.f32 %v1413_v11, 0.0  ;;  %9783 = vmatmul.msk.f32.gmra.mxu0 %vm796_vm1, %v752_v51 }
 0x2ef   : > { %16996 = vst [vmem:[#allocation56_spill] sm:$0xff] %v11751_v39  ;;  %v3200_v59 = vrot.slane %v11751_v39, 6  ;;  %v11755_v9 = vpop.f32.mrf.mxu1 }
 0x2f0   : > { %16997 = vst [vmem:[#allocation57_spill] sm:$0xff] %v11755_v9 }
 0x2f1   : > { %v3201_v41 = vsel %vm1175_vm0, %v3198_v25, %v3200_v59  ;;  %v754_v25 = vld [vmem:[%s11256_s2 + $0x2d0] sm:$0xff] }
 0x2f2   : > { %v1415_v43 = vpop.f32.mrf.mxu0  ;;  %9855 = vmatmul.msk.f32.gmra.mxu1 %vm3224_vm3, %v3201_v41 }
 0x2f3   : > { %v1416_v63 = vadd.f32 %v11469_v1, %v1415_v43 }
 0x2f5   : > { %v11761_v35 = vmax.f32 %v1416_v63, 0.0  ;;  %9784 = vmatmul.msk.f32.gmra.mxu0 %vm796_vm1, %v753_v29 }
 0x2f7   : > { %16998 = vst [vmem:[#allocation58_spill] sm:$0xff] %v11761_v35  ;;  %v3202_v55 = vrot.slane %v11761_v35, 6  ;;  %v11765_v51 = vpop.f32.mrf.mxu1 }
 0x2f8   : > { %16999 = vst [vmem:[#allocation59_spill] sm:$0xff] %v11765_v51 }
 0x2f9   : > { %v3203_v11 = vsel %vm1175_vm0, %v3200_v59, %v3202_v55  ;;  %v755_v59 = vld [vmem:[%s11256_s2 + $0x2d8] sm:$0xff] }
 0x2fa   : > { %v1418_v39 = vpop.f32.mrf.mxu0  ;;  %9856 = vmatmul.msk.f32.gmra.mxu1 %vm3224_vm3, %v3203_v11 }
 0x2fb   : > { %v1419_v41 = vadd.f32 %v11469_v1, %v1418_v39 }
 0x2fd   : > { %v11771_v9 = vmax.f32 %v1419_v41, 0.0  ;;  %9785 = vmatmul.msk.f32.gmra.mxu0 %vm796_vm1, %v754_v25 }
 0x2ff   : > { %17000 = vst [vmem:[#allocation60_spill] sm:$0xff] %v11771_v9  ;;  %v3204_v43 = vrot.slane %v11771_v9, 6  ;;  %v11775_v29 = vpop.f32.mrf.mxu1 }
 0x300   : > { %17001 = vst [vmem:[#allocation61_spill] sm:$0xff] %v11775_v29 }
 0x301   : > { %v3205_v63 = vsel %vm1175_vm0, %v3202_v55, %v3204_v43  ;;  %v756_v55 = vld [vmem:[%s11256_s2 + $0x2e0] sm:$0xff] }
 0x302   : > { %v1421_v35 = vpop.f32.mrf.mxu0  ;;  %9857 = vmatmul.msk.f32.gmra.mxu1 %vm3224_vm3, %v3205_v63 }
 0x303   : > { %v1422_v11 = vadd.f32 %v11469_v1, %v1421_v35 }
 0x305   : > { %v11781_v51 = vmax.f32 %v1422_v11, 0.0  ;;  %9786 = vmatmul.msk.f32.gmra.mxu0 %vm796_vm1, %v755_v59 }
 0x307   : > { %17002 = vst [vmem:[#allocation62_spill] sm:$0xff] %v11781_v51  ;;  %v3206_v39 = vrot.slane %v11781_v51, 6  ;;  %v11785_v25 = vpop.f32.mrf.mxu1 }
 0x308   : > { %17003 = vst [vmem:[#allocation63_spill] sm:$0xff] %v11785_v25 }
 0x309   : > { %v3207_v41 = vsel %vm1175_vm0, %v3204_v43, %v3206_v39  ;;  %v757_v43 = vld [vmem:[%s11256_s2 + $0x2e8] sm:$0xff] }
 0x30a   : > { %v1424_v9 = vpop.f32.mrf.mxu0  ;;  %9858 = vmatmul.msk.f32.gmra.mxu1 %vm3224_vm3, %v3207_v41 }
 0x30b   : > { %v1425_v63 = vadd.f32 %v11469_v1, %v1424_v9 }
 0x30d   : > { %v11791_v29 = vmax.f32 %v1425_v63, 0.0  ;;  %9787 = vmatmul.msk.f32.gmra.mxu0 %vm796_vm1, %v756_v55 }
 0x30f   : > { %17004 = vst [vmem:[#allocation64_spill] sm:$0xff] %v11791_v29  ;;  %v3208_v35 = vrot.slane %v11791_v29, 6  ;;  %v11795_v59 = vpop.f32.mrf.mxu1 }
 0x310   : > { %17005 = vst [vmem:[#allocation65_spill] sm:$0xff] %v11795_v59 }
 0x311   : > { %v3209_v11 = vsel %vm1175_vm0, %v3206_v39, %v3208_v35  ;;  %v758_v39 = vld [vmem:[%s11256_s2 + $0x2f0] sm:$0xff] }
 0x312   : > { %v1427_v51 = vpop.f32.mrf.mxu0  ;;  %9859 = vmatmul.msk.f32.gmra.mxu1 %vm3224_vm3, %v3209_v11  ;;  %v9958_v11 = vld [vmem:[%s16958_s30 + $0x78] sm:$0xff] }
 0x313   : > { %v1428_v41 = vadd.f32 %v11469_v1, %v1427_v51  ;;  %4304 = vmatpush.msrb.mxu1 %v9958_v11 }
 0x315   : > { %v11801_v25 = vmax.f32 %v1428_v41, 0.0  ;;  %9788 = vmatmul.msk.f32.gmra.mxu0 %vm796_vm1, %v757_v43  ;;  %v9957_v43 = vld [vmem:[%s16958_s30 + $0x70] sm:$0xff] }
 0x316   : > { %4305 = vmatpush.msrb.mxu1 %v9957_v43 }
 0x317   : > { %17006 = vst [vmem:[#allocation66_spill] sm:$0xff] %v11801_v25  ;;  %v3210_v9 = vrot.slane %v11801_v25, 6  ;;  %v11805_v63 = vpop.f32.mrf.mxu1 }
 0x318   : > { %17007 = vst [vmem:[#allocation67_spill] sm:$0xff] %v11805_v63 }
 0x319   : > { %v3211_v55 = vsel %vm1175_vm0, %v3208_v35, %v3210_v9  ;;  %v9956_v35 = vld [vmem:[%s16958_s30 + $0x68] sm:$0xff] }
 0x31a   : > { %v1430_v29 = vpop.f32.mrf.mxu0  ;;  %9860 = vmatmul.msk.f32.gmra.mxu1 %vm3224_vm3, %v3211_v55 }
 0x31b   : > { %v1431_v51 = vadd.f32 %v11469_v1, %v1430_v29  ;;  %4306 = vmatpush.msrb.mxu1 %v9956_v35  ;;  %v9955_v29 = vld [vmem:[%s16958_s30 + $0x60] sm:$0xff] }
 0x31d   : > { %v11817_v41 = vmax.f32 %v1431_v51, 0.0  ;;  %9789 = vmatmul.msk.f32.gmra.mxu0 %vm796_vm1, %v758_v39  ;;  %4307 = vmatpush.msrb.mxu1 %v9955_v29  ;;  %v759_v39 = vld [vmem:[%s11256_s2 + $0x2f8] sm:$0xff] }
 0x31e   : > { %v9912_v29 = vld [vmem:[%s16958_s30 + $0x58] sm:$0xff] }
 0x31f   : > { %17008 = vst [vmem:[#allocation68_spill] sm:$0xff] %v11817_v41  ;;  %v3212_v55 = vrot.slane %v11817_v41, 6  ;;  %v11824_v25 = vpop.f32.mrf.mxu1  ;;  %3946 = vmatpush.msra.mxu3 %v9912_v29 }
 0x320   : > { %17009 = vst [vmem:[#allocation69_spill] sm:$0xff] %v11824_v25 }
 0x321   : > { %v3213_v11 = vsel %vm1175_vm0, %v3210_v9, %v3212_v55  ;;  %v760_v9 = vld [vmem:[%s11256_s2 + $0x300] sm:$0xff] }
 0x322   : > { %v1433_v51 = vpop.f32.mrf.mxu0  ;;  %9861 = vmatmul.msk.f32.gmra.mxu1 %vm3224_vm3, %v3213_v11 }
 0x323   : > { %v1434_v43 = vadd.f32 %v11469_v1, %v1433_v51  ;;  %v3090_v51 = vld [vmem:[%s16958_s30 + $0x18] sm:$0xff] }
 0x324   : > { %3589 = vmatpush.msrb.mxu2 %v3090_v51  ;;  %v9909_v51 = vld [vmem:[%s16958_s30 + $0x40] sm:$0xff] }
 0x325   : > { %v11833_v63 = vmax.f32 %v1434_v43, 0.0  ;;  %9790 = vmatmul.msk.f32.gmra.mxu0 %vm796_vm1, %v759_v39 }
 0x327   : > { %17010 = vst [vmem:[#allocation70_spill] sm:$0xff] %v11833_v63  ;;  %v3214_v41 = vrot.slane %v11833_v63, 6  ;;  %v11837_v35 = vpop.f32.mrf.mxu1 }
 0x328   : > { %17011 = vst [vmem:[#allocation71_spill] sm:$0xff] %v11837_v35 }
 0x329   : > { %v3215_v25 = vsel %vm1175_vm0, %v3212_v55, %v3214_v41  ;;  %v9911_v55 = vld [vmem:[%s16958_s30 + $0x50] sm:$0xff] }
 0x32a   : > { %v1436_v59 = vpop.f32.mrf.mxu0  ;;  %9862 = vmatmul.msk.f32.gmra.mxu1 %vm3224_vm3, %v3215_v25  ;;  %3947 = vmatpush.msra.mxu3 %v9911_v55  ;;  %v3089_v25 = vld [vmem:[%s16958_s30 + $0x10] sm:$0xff] }
 0x32b   : > { %v1437_v11 = vadd.f32 %v11469_v1, %v1436_v59  ;;  %3590 = vmatpush.msrb.mxu2 %v3089_v25  ;;  %v9910_v59 = vld [vmem:[%s16958_s30 + $0x48] sm:$0xff]  ;;  %v3087_v25 = vld [vmem:[%s16958_s30] sm:$0xff] }
 0x32c   : > { %3948 = vmatpush.msra.mxu3 %v9910_v59  ;;  %v761_v59 = vld [vmem:[%s11256_s2 + $0x308] sm:$0xff] }
 0x32d   : > { %v11852_v39 = vmax.f32 %v1437_v11, 0.0  ;;  %9791 = vmatmul.msk.f32.gmra.mxu0 %vm796_vm1, %v760_v9  ;;  %v10234_v11 = vld [vmem:[%s16958_s30 + $0x138] sm:$0xff]  ;;  %v3088_v9 = vld [vmem:[%s16958_s30 + $0x8] sm:$0xff] }
 0x32e   : > { %6371 = vmatpush.msrb.mxu0 %v10234_v11  ;;  %3591 = vmatpush.msrb.mxu2 %v3088_v9  ;;  %v1200_v11 = vadd.f32 %v11469_v1, %v11294_v20 }
 0x32f   : > { %17012 = vst [vmem:[#allocation72_spill] sm:$0xff] %v11852_v39  ;;  %v3216_v43 = vrot.slane %v11852_v39, 6  ;;  %v11862_v29 = vpop.f32.mrf.mxu1  ;;  %3949 = vmatpush.msra.mxu3 %v9909_v51 }
 0x330   : > { %17013 = vst [vmem:[#allocation73_spill] sm:$0xff] %v11862_v29  ;;  %3592 = vmatpush.msrb.mxu2 %v3087_v25  ;;  %v1197_v29 = vadd.f32 %v11469_v1, %v11290_v18  ;;  %v11891_v25 = vmax.f32 %v1200_v11, 0.0  ;;  %v762_v18 = vld [vmem:[%s11256_s2 + $0x310] sm:$0xff] }
 0x331   : > { %v3217_v55 = vsel %vm1175_vm0, %v3214_v41, %v3216_v43 }
 0x332   : > { %v1439_v39 = vpop.f32.mrf.mxu0  ;;  %9863 = vmatmul.msk.f32.gmra.mxu1 %vm3224_vm3, %v3217_v55  ;;  %v1574_v55 = vmax.f32 %v1197_v29, 0.0  ;;  %v4126_v29 = vrot.slane %v11891_v25, 1 }
 0x333   : > { %v1440_v63 = vadd.f32 %v11469_v1, %v1439_v39 }
 0x335   : > { %v11884_v41 = vmax.f32 %v1440_v63, 0.0  ;;  %9792 = vmatmul.msk.f32.gmra.mxu0 %vm796_vm1, %v761_v59  ;;  %v11897_v63 = vsel %vm1827_vm4, 0.0, %v1574_v55  ;;  %v1203_v59 = vadd.f32 %v11469_v1, %v11298_v22 }
 0x337   : > { %17014 = vst [vmem:[#allocation74_spill] sm:$0xff] %v11884_v41  ;;  %v3218_v9 = vrot.slane %v11884_v41, 6  ;;  %v11888_v51 = vpop.f32.mrf.mxu1  ;;  %v11910_v55 = vmax.f32 %v1203_v59, 0.0 }
 0x338   : > { %17015 = vst [vmem:[#allocation75_spill] sm:$0xff] %v11888_v51 }
 0x339   : > { %v3219_v39 = vsel %vm1175_vm0, %v3216_v43, %v3218_v9  ;;  %v4125_v43 = vrot.slane %v11897_v63, 1 }
 0x33a   : > { %v1442_v35 = vpop.f32.mrf.mxu0  ;;  %9864 = vmatmul.msk.f32.gmra.mxu1 %vm3224_vm3, %v3219_v39 }
 0x33b   : > { %v1443_v20 = vadd.f32 %v11469_v1, %v1442_v35  ;;  %v1784_v35 = vadd.s32 664, %v11473_v7  ;;  %v4127_v22 = vsel %vm4124_vm5, %v4125_v43, %v4126_v29 }
 0x33d   : > { %v11901_v41 = vmax.f32 %v1443_v20, 0.0  ;;  %9793 = vmatmul.msk.f32.gmra.mxu0 %vm796_vm1, %v762_v18  ;;  %v763_v18 = vld [vmem:[%s11256_s2 + $0x318] sm:$0xff]  ;;  %vm2288_vm6 = vcmp.eq.s32.totalorder %v1784_v35, 667 }
 0x33f   : > { %17016 = vst [vmem:[#allocation76_spill] sm:$0xff] %v11901_v41  ;;  %v11906_v11 = vpop.f32.mrf.mxu1  ;;  %v3220_v39 = vrot.slane %v11901_v41, 6  ;;  %v1206_v41 = vadd.f32 %v11469_v1, %v11302_v24 }
 0x340   : > { %17017 = vst [vmem:[#allocation77_spill] sm:$0xff] %v11906_v11 }
 0x341   : > { %v3221_v51 = vsel %vm1175_vm0, %v3218_v9, %v3220_v39  ;;  %v4128_v9 = vrot.slane %v11910_v55, 1 }
 0x342   : > { %v1445_v20 = vpop.f32.mrf.mxu0  ;;  %9865 = vmatmul.msk.f32.vlgmr.msra.gmra.mxu2 %vm3224_vm3, %v3221_v51  ;;  %9959 = vmatmul.msk.f32.vlgmr.msrb.gmra.mxu1 %vm3224_vm3, %v4127_v22  ;;  %v11927_v22 = vmax.f32 %v1206_v41, 0.0 }
 0x343   : > { %v1446_v31 = vadd.f32 %v11469_v1, %v1445_v20  ;;  %v4129_v11 = vsel %vm4124_vm5, %v4126_v29, %v4128_v9 }
 0x344   : > { %v4130_v41 = vrot.slane %v11927_v22, 1 }
 0x345   : > { %v1657_v7 = vmax.f32 %v1446_v31, 0.0  ;;  %9794 = vmatmul.msk.f32.gmra.mxu0 %vm796_vm1, %v763_v18  ;;  %v764_v31 = vld [vmem:[%s11256_s2 + $0x320] sm:$0xff] }
 0x347   : > { %v11922_v59 = vsel %vm2288_vm6, 0.0, %v1657_v7  ;;  %v11924_v43 = vpop.f32.mrf.mxu1  ;;  %v1209_v7 = vadd.f32 %v11469_v1, %v11306_v26  ;;  %vm7464_vm6 = vcmask 519168  }
 0x348   : > { %17018 = vst [vmem:[#allocation78_spill] sm:$0xff] %v11922_v59  ;;  %v3222_v51 = vrot.slane %v11922_v59, 6 }
 0x349   : > { %17019 = vst [vmem:[#allocation79_spill] sm:$0xff] %v11924_v43 }
 0x34a   : > { %v1448_v20 = vpop.f32.mrf.mxu0  ;;  %9960 = vmatmul.msk.f32.gmra.mxu1 %vm3224_vm3, %v4129_v11  ;;  %v3223_v24 = vsel %vm1175_vm0, %v3220_v39, %v3222_v51  ;;  %v3767_v39 = vrot.slane %v11922_v59, 4 }
 0x34b   : > { %v1449_v35 = vadd.f32 %v11469_v1, %v1448_v20  ;;  %9866 = vmatmul.msk.f32.gmra.mxu2 %vm3224_vm3, %v3223_v24  ;;  %v11946_v24 = vmax.f32 %v1209_v7, 0.0 }
 0x34d   : > { %v11937_v18 = vmax.f32 %v1449_v35, 0.0  ;;  %9795 = vmatmul.msk.f32.gmra.mxu0 %vm796_vm1, %v764_v31  ;;  %v4131_v35 = vsel %vm4124_vm5, %v4128_v9, %v4130_v41  ;;  %v4132_v7 = vrot.slane %v11946_v24, 1 }
 0x34f   : > { %17020 = vst [vmem:[#allocation80_spill] sm:$0xff] %v11937_v18  ;;  %v5833_v29 = vrot.slane %v11937_v18, 6  ;;  %v11942_v11 = vpop.f32.mrf.mxu1  ;;  %v3768_v20 = vrot.slane %v11937_v18, 4 }
 0x350   : > { %17021 = vst [vmem:[#allocation81_spill] sm:$0xff] %v11942_v11 }
 0x351   : > { %v3769_v26 = vsel %vm3766_vm7, %v3767_v39, %v3768_v20  ;;  %v11951_v43 = vsel %vm1175_vm0, %v3222_v51, %v5833_v29  ;;  %v1212_v39 = vadd.f32 %v11469_v1, %v11310_v28  ;;  %v16908_v51 = vrot.slane %v11937_v18, 5 }
 0x352   : > { %17022 = vst [vmem:[#allocation82_spill] sm:$0xff] %v11951_v43  ;;  %v1451_v31 = vpop.f32.mrf.mxu0  ;;  %9913 = vmatmul.msk.f32.vlgmr.msra.gmra.mxu3 %vm3224_vm3, %v3769_v26  ;;  %9961 = vmatmul.msk.f32.gmra.mxu1 %vm3224_vm3, %v4131_v35 }
 0x353   : > { %v1452_v11 = vadd.f32 %v11469_v1, %v1451_v31  ;;  %9867 = vmatmul.msk.f32.vlgmr.msrb.gmra.mxu2 %vm3224_vm3, %v11897_v63  ;;  %v4133_v31 = vsel %vm4124_vm5, %v4130_v41, %v4132_v7  ;;  %v11967_v27 = vmax.f32 %v1212_v39, 0.0 }
 0x355   : > { %v1659_v9 = vmax.f32 %v1452_v11, 0.0  ;;  %9796 = vmatmul.msk.f32.gmra.mxu0 %vm796_vm1, %v765_v33 }
 0x357   : > { %v4846_v26 = vrot.slane %v1659_v9, 5  ;;  %v5835_v43 = vrot.slane %v1659_v9, 6  ;;  %v11964_v35 = vpop.f32.mrf.mxu1  ;;  %v3770_v59 = vrot.slane %v1659_v9, 4  ;;  %v766_v9 = vld [vmem:[%s11256_s2 + $0x330] sm:$0xff] }
 0x358   : > { %17023 = vst [vmem:[#allocation83_spill] sm:$0xff] %v11964_v35 }
 0x359   : > { %v3771_v53 = vsel %vm3766_vm7, %v3768_v20, %v3770_v59  ;;  %v11973_v28 = vsel %vm4842_vm8, %v16908_v51, %v4846_v26  ;;  %v11976_v33 = vsel %vm1175_vm0, %v5833_v29, %v5835_v43  ;;  %v1215_v20 = vadd.f32 %v11469_v1, %v11314_v30 }
 0x35a   : > { %17024 = vst [vmem:[#allocation84_spill] sm:$0xff] %v11973_v28  ;;  %v1454_v11 = vpop.f32.mrf.mxu0  ;;  %9914 = vmatmul.msk.f32.gmra.mxu3 %vm3224_vm3, %v3771_v53  ;;  %9962 = vmatmul.msk.f32.gmra.mxu1 %vm3224_vm3, %v4133_v31  ;;  %v4134_v29 = vrot.slane %v11967_v27, 1 }
 0x35b   : > { %17025 = vst [vmem:[#allocation85_spill] sm:$0xff] %v11976_v33  ;;  %v1455_v41 = vadd.f32 %v11469_v1, %v1454_v11  ;;  %9868 = vmatmul.msk.f32.gmra.mxu2 %vm3224_vm3, %v11891_v25  ;;  %v11990_v35 = vmax.f32 %v1215_v20, 0.0 }
 0x35c   : > { %v4135_v28 = vsel %vm4124_vm5, %v4132_v7, %v4134_v29  ;;  %v1218_v7 = vadd.f32 %v11469_v1, %v11318_v32 }
 0x35d   : > { %v1660_v39 = vmax.f32 %v1455_v41, 0.0  ;;  %9797 = vmatmul.msk.f32.gmra.mxu0 %vm796_vm1, %v766_v9  ;;  %v767_v41 = vld [vmem:[%s11256_s2 + $0x338] sm:$0xff] }
 0x35f   : > { %v4848_v51 = vrot.slane %v1660_v39, 5  ;;  %v5837_v33 = vrot.slane %v1660_v39, 6  ;;  %v11988_v53 = vpop.f32.mrf.mxu1  ;;  %v3772_v31 = vrot.slane %v1660_v39, 4 }
 0x360   : > { %17026 = vst [vmem:[#allocation86_spill] sm:$0xff] %v11988_v53 }
 0x361   : > { %v3773_v11 = vsel %vm3766_vm7, %v3770_v59, %v3772_v31  ;;  %v11995_v18 = vsel %vm4842_vm8, %v4846_v26, %v4848_v51  ;;  %v11998_v30 = vsel %vm1175_vm0, %v5835_v43, %v5837_v33  ;;  %v4136_v59 = vrot.slane %v11990_v35, 1 }
 0x362   : > { %17027 = vst [vmem:[#allocation87_spill] sm:$0xff] %v11995_v18  ;;  %v1457_v9 = vpop.f32.mrf.mxu0  ;;  %9915 = vmatmul.msk.f32.gmra.mxu3 %vm3224_vm3, %v3773_v11  ;;  %9963 = vmatmul.msk.f32.gmra.mxu1 %vm3224_vm3, %v4135_v28 }
 0x363   : > { %17028 = vst [vmem:[#allocation88_spill] sm:$0xff] %v11998_v30  ;;  %v1458_v39 = vadd.f32 %v11469_v1, %v1457_v9  ;;  %9869 = vmatmul.msk.f32.gmra.mxu2 %vm3224_vm3, %v11910_v55  ;;  %v4137_v30 = vsel %vm4124_vm5, %v4134_v29, %v4136_v59  ;;  %v12013_v9 = vmax.f32 %v1218_v7, 0.0  ;;  %v1221_v29 = vadd.f32 %v11469_v1, %v11322_v34 }
 0x365   : > { %v1661_v26 = vmax.f32 %v1458_v39, 0.0  ;;  %9798 = vmatmul.msk.f32.gmra.mxu0 %vm796_vm1, %v767_v41  ;;  %v768_v41 = vld [vmem:[%s11256_s2 + $0x340] sm:$0xff] }
 0x367   : > { %v4850_v43 = vrot.slane %v1661_v26, 5  ;;  %v5839_v20 = vrot.slane %v1661_v26, 6  ;;  %v12010_v11 = vpop.f32.mrf.mxu1  ;;  %v3774_v28 = vrot.slane %v1661_v26, 4  ;;  %v12034_v26 = vmax.f32 %v1221_v29, 0.0 }
 0x368   : > { %17029 = vst [vmem:[#allocation89_spill] sm:$0xff] %v12010_v11 }
 0x369   : > { %v3775_v53 = vsel %vm3766_vm7, %v3772_v31, %v3774_v28  ;;  %v12017_v18 = vsel %vm4842_vm8, %v4848_v51, %v4850_v43  ;;  %v12020_v23 = vsel %vm1175_vm0, %v5837_v33, %v5839_v20  ;;  %v4138_v33 = vrot.slane %v12013_v9, 1 }
 0x36a   : > { %17030 = vst [vmem:[#allocation90_spill] sm:$0xff] %v12017_v18  ;;  %v1460_v32 = vpop.f32.mrf.mxu0  ;;  %9916 = vmatmul.msk.f32.gmra.mxu3 %vm3224_vm3, %v3775_v53  ;;  %9964 = vmatmul.msk.f32.gmra.mxu1 %vm3224_vm3, %v4137_v30 }
 0x36b   : > { %17031 = vst [vmem:[#allocation91_spill] sm:$0xff] %v12020_v23  ;;  %v1461_v39 = vadd.f32 %v11469_v1, %v1460_v32  ;;  %9870 = vmatmul.msk.f32.gmra.mxu2 %vm3224_vm3, %v11927_v22  ;;  %v4139_v23 = vsel %vm4124_vm5, %v4136_v59, %v4138_v33  ;;  %v4140_v59 = vrot.slane %v12034_v26, 1 }
 0x36d   : > { %v1662_v51 = vmax.f32 %v1461_v39, 0.0  ;;  %9799 = vmatmul.msk.f32.gmra.mxu0 %vm796_vm1, %v768_v41  ;;  %v769_v41 = vld [vmem:[%s11256_s2 + $0x348] sm:$0xff]  ;;  %v12050_v39 = vld [vmem:[%s16961_s22] ss:$0 sm:$0xff] }
 0x36f   : > { %v4852_v31 = vrot.slane %v1662_v51, 5  ;;  %v5841_v7 = vrot.slane %v1662_v51, 6  ;;  %v12032_v53 = vpop.f32.mrf.mxu1  ;;  %v3776_v30 = vrot.slane %v1662_v51, 4 }
 0x370   : > { %17032 = vst [vmem:[#allocation92_spill] sm:$0xff] %v12032_v53 }
 0x371   : > { %v3777_v32 = vsel %vm3766_vm7, %v3774_v28, %v3776_v30  ;;  %v12039_v11 = vsel %vm4842_vm8, %v4850_v43, %v4852_v31  ;;  %v12042_v34 = vsel %vm1175_vm0, %v5839_v20, %v5841_v7  ;;  %v1224_v43 = vadd.f32 %v12050_v39, %v11326_v36 }
 0x372   : > { %17033 = vst [vmem:[#allocation93_spill] sm:$0xff] %v12039_v11  ;;  %v1463_v1 = vpop.f32.mrf.mxu0  ;;  %9917 = vmatmul.msk.f32.gmra.mxu3 %vm3224_vm3, %v3777_v32  ;;  %9965 = vmatmul.msk.f32.gmra.mxu1 %vm3224_vm3, %v4139_v23 }
 0x373   : > { %17034 = vst [vmem:[#allocation94_spill] sm:$0xff] %v12042_v34  ;;  %v1464_v28 = vadd.f32 %v12050_v39, %v1463_v1  ;;  %9871 = vmatmul.msk.f32.gmra.mxu2 %vm3224_vm3, %v11946_v24  ;;  %v4141_v34 = vsel %vm4124_vm5, %v4138_v33, %v4140_v59  ;;  %v12062_v1 = vmax.f32 %v1224_v43, 0.0  ;;  %v1227_v33 = vadd.f32 %v12050_v39, %v11330_v38 }
 0x375   : > { %v1663_v20 = vmax.f32 %v1464_v28, 0.0  ;;  %9800 = vmatmul.msk.f32.gmra.mxu0 %vm796_vm1, %v769_v41  ;;  %v770_v41 = vld [vmem:[%s11256_s2 + $0x350] sm:$0xff] }
 0x377   : > { %v4854_v23 = vrot.slane %v1663_v20, 5  ;;  %v5843_v29 = vrot.slane %v1663_v20, 6  ;;  %v12059_v51 = vpop.f32.mrf.mxu1  ;;  %v3778_v32 = vrot.slane %v1663_v20, 4  ;;  %v12083_v20 = vmax.f32 %v1227_v33, 0.0 }
 0x378   : > { %17035 = vst [vmem:[#allocation95_spill] sm:$0xff] %v12059_v51 }
 0x379   : > { %v3779_v53 = vsel %vm3766_vm7, %v3776_v30, %v3778_v32  ;;  %v12066_v11 = vsel %vm4842_vm8, %v4852_v31, %v4854_v23  ;;  %v12069_v18 = vsel %vm1175_vm0, %v5841_v7, %v5843_v29  ;;  %v4142_v7 = vrot.slane %v12062_v1, 1 }
 0x37a   : > { %17036 = vst [vmem:[#allocation96_spill] sm:$0xff] %v12066_v11  ;;  %v1466_v36 = vpop.f32.mrf.mxu0  ;;  %9918 = vmatmul.msk.f32.gmra.mxu3 %vm3224_vm3, %v3779_v53  ;;  %9966 = vmatmul.msk.f32.gmra.mxu1 %vm3224_vm3, %v4141_v34 }
 0x37b   : > { %17037 = vst [vmem:[#allocation97_spill] sm:$0xff] %v12069_v18  ;;  %v1467_v28 = vadd.f32 %v12050_v39, %v1466_v36  ;;  %9872 = vmatmul.msk.f32.gmra.mxu2 %vm3224_vm3, %v11967_v27  ;;  %v4143_v18 = vsel %vm4124_vm5, %v4140_v59, %v4142_v7  ;;  %v1230_v59 = vadd.f32 %v12050_v39, %v11334_v40 }
 0x37d   : > { %v1664_v31 = vmax.f32 %v1467_v28, 0.0  ;;  %9801 = vmatmul.msk.f32.gmra.mxu0 %vm796_vm1, %v770_v41  ;;  %v771_v28 = vld [vmem:[%s11256_s2 + $0x358] sm:$0xff] }
 0x37f   : > { %v4856_v30 = vrot.slane %v1664_v31, 5  ;;  %v5845_v43 = vrot.slane %v1664_v31, 6  ;;  %v12081_v53 = vpop.f32.mrf.mxu1  ;;  %v3780_v34 = vrot.slane %v1664_v31, 4 }
 0x380   : > { %17038 = vst [vmem:[#allocation98_spill] sm:$0xff] %v12081_v53 }
 0x381   : > { %v3781_v36 = vsel %vm3766_vm7, %v3778_v32, %v3780_v34  ;;  %v12088_v51 = vsel %vm4842_vm8, %v4854_v23, %v4856_v30  ;;  %v12091_v38 = vsel %vm1175_vm0, %v5843_v29, %v5845_v43  ;;  %v4144_v32 = vrot.slane %v12083_v20, 1 }
 0x382   : > { %17039 = vst [vmem:[#allocation99_spill] sm:$0xff] %v12088_v51  ;;  %v1469_v41 = vpop.f32.mrf.mxu0  ;;  %9919 = vmatmul.msk.f32.gmra.mxu3 %vm3224_vm3, %v3781_v36  ;;  %9967 = vmatmul.msk.f32.gmra.mxu1 %vm3224_vm3, %v4143_v18 }
 0x383   : > { %17040 = vst [vmem:[#allocation100_spill] sm:$0xff] %v12091_v38  ;;  %v1470_v31 = vadd.f32 %v12050_v39, %v1469_v41  ;;  %9873 = vmatmul.msk.f32.gmra.mxu2 %vm3224_vm3, %v11990_v35  ;;  %v4145_v38 = vsel %vm4124_vm5, %v4142_v7, %v4144_v32  ;;  %v12106_v41 = vmax.f32 %v1230_v59, 0.0  ;;  %v1233_v7 = vadd.f32 %v12050_v39, %v11338_v42 }
 0x385   : > { %v1665_v23 = vmax.f32 %v1470_v31, 0.0  ;;  %9802 = vmatmul.msk.f32.gmra.mxu0 %vm796_vm1, %v771_v28  ;;  %v772_v28 = vld [vmem:[%s11256_s2 + $0x360] sm:$0xff] }
 0x387   : > { %v4858_v29 = vrot.slane %v1665_v23, 5  ;;  %v5847_v33 = vrot.slane %v1665_v23, 6  ;;  %v12103_v36 = vpop.f32.mrf.mxu1  ;;  %v3782_v18 = vrot.slane %v1665_v23, 4  ;;  %v12127_v23 = vmax.f32 %v1233_v7, 0.0 }
 0x388   : > { %17041 = vst [vmem:[#allocation101_spill] sm:$0xff] %v12103_v36 }
 0x389   : > { %v3783_v53 = vsel %vm3766_vm7, %v3780_v34, %v3782_v18  ;;  %v12110_v51 = vsel %vm4842_vm8, %v4856_v30, %v4858_v29  ;;  %v12113_v11 = vsel %vm1175_vm0, %v5845_v43, %v5847_v33  ;;  %v4146_v43 = vrot.slane %v12106_v41, 1  ;;  %17045 = vst [vmem:[#allocation105_spill] sm:$0xff] %v12127_v23 }
 0x38a   : > { %17042 = vst [vmem:[#allocation102_spill] sm:$0xff] %v12110_v51  ;;  %v1472_v40 = vpop.f32.mrf.mxu0  ;;  %9920 = vmatmul.msk.f32.gmra.mxu3 %vm3224_vm3, %v3783_v53  ;;  %9968 = vmatmul.msk.f32.gmra.mxu1 %vm3224_vm3, %v4145_v38 }
 0x38b   : > { %17043 = vst [vmem:[#allocation103_spill] sm:$0xff] %v12113_v11  ;;  %v1473_v31 = vadd.f32 %v12050_v39, %v1472_v40  ;;  %9874 = vmatmul.msk.f32.gmra.mxu2 %vm3224_vm3, %v12013_v9  ;;  %v4147_v11 = vsel %vm4124_vm5, %v4144_v32, %v4146_v43  ;;  %v1236_v32 = vadd.f32 %v12050_v39, %v11342_v44 }
 0x38d   : > { %v1666_v30 = vmax.f32 %v1473_v31, 0.0  ;;  %9803 = vmatmul.msk.f32.gmra.mxu0 %vm796_vm1, %v772_v28  ;;  %v773_v31 = vld [vmem:[%s11256_s2 + $0x368] sm:$0xff] }
 0x38f   : > { %v4860_v34 = vrot.slane %v1666_v30, 5  ;;  %v5849_v59 = vrot.slane %v1666_v30, 6  ;;  %v12125_v53 = vpop.f32.mrf.mxu1  ;;  %v3784_v38 = vrot.slane %v1666_v30, 4 }
 0x390   : > { %17044 = vst [vmem:[#allocation104_spill] sm:$0xff] %v12125_v53 }
 0x391   : > { %v3785_v40 = vsel %vm3766_vm7, %v3782_v18, %v3784_v38  ;;  %v12132_v36 = vsel %vm4842_vm8, %v4858_v29, %v4860_v34  ;;  %v12135_v42 = vsel %vm1175_vm0, %v5847_v33, %v5849_v59  ;;  %v4148_v18 = vrot.slane %v12127_v23, 1 }
 0x392   : > { %17046 = vst [vmem:[#allocation106_spill] sm:$0xff] %v12132_v36  ;;  %v1475_v28 = vpop.f32.mrf.mxu0  ;;  %9921 = vmatmul.msk.f32.gmra.mxu3 %vm3224_vm3, %v3785_v40  ;;  %9969 = vmatmul.msk.f32.gmra.mxu1 %vm3224_vm3, %v4147_v11 }
 0x393   : > { %17047 = vst [vmem:[#allocation107_spill] sm:$0xff] %v12135_v42  ;;  %v1476_v30 = vadd.f32 %v12050_v39, %v1475_v28  ;;  %9875 = vmatmul.msk.f32.gmra.mxu2 %vm3224_vm3, %v12034_v26  ;;  %v4149_v42 = vsel %vm4124_vm5, %v4146_v43, %v4148_v18  ;;  %v12150_v28 = vmax.f32 %v1236_v32, 0.0  ;;  %v1239_v43 = vadd.f32 %v12050_v39, %v11346_v46 }
 0x395   : > { %v1667_v29 = vmax.f32 %v1476_v30, 0.0  ;;  %9804 = vmatmul.msk.f32.gmra.mxu0 %vm796_vm1, %v773_v31  ;;  %17049 = vst [vmem:[#allocation109_spill] sm:$0xff] %v12150_v28  ;;  %v774_v31 = vld [vmem:[%s11256_s2 + $0x370] sm:$0xff] }
 0x397   : > { %v4862_v33 = vrot.slane %v1667_v29, 5  ;;  %v5851_v7 = vrot.slane %v1667_v29, 6  ;;  %v12147_v40 = vpop.f32.mrf.mxu1  ;;  %v3786_v11 = vrot.slane %v1667_v29, 4  ;;  %v12171_v29 = vmax.f32 %v1239_v43, 0.0 }
 0x398   : > { %17048 = vst [vmem:[#allocation108_spill] sm:$0xff] %v12147_v40 }
 0x399   : > { %v3787_v53 = vsel %vm3766_vm7, %v3784_v38, %v3786_v11  ;;  %v12154_v36 = vsel %vm4842_vm8, %v4860_v34, %v4862_v33  ;;  %v12157_v51 = vsel %vm1175_vm0, %v5849_v59, %v5851_v7  ;;  %v4150_v59 = vrot.slane %v12150_v28, 1  ;;  %17053 = vst [vmem:[#allocation113_spill] sm:$0xff] %v12171_v29 }
 0x39a   : > { %17050 = vst [vmem:[#allocation110_spill] sm:$0xff] %v12154_v36  ;;  %v1478_v44 = vpop.f32.mrf.mxu0  ;;  %9922 = vmatmul.msk.f32.gmra.mxu3 %vm3224_vm3, %v3787_v53  ;;  %9970 = vmatmul.msk.f32.gmra.mxu1 %vm3224_vm3, %v4149_v42 }
 0x39b   : > { %17051 = vst [vmem:[#allocation111_spill] sm:$0xff] %v12157_v51  ;;  %v1479_v30 = vadd.f32 %v12050_v39, %v1478_v44  ;;  %9876 = vmatmul.msk.f32.gmra.mxu2 %vm3224_vm3, %v12062_v1  ;;  %v4151_v51 = vsel %vm4124_vm5, %v4148_v18, %v4150_v59  ;;  %v1242_v18 = vadd.f32 %v12050_v39, %v11350_v48 }
 0x39d   : > { %v1668_v34 = vmax.f32 %v1479_v30, 0.0  ;;  %9805 = vmatmul.msk.f32.gmra.mxu0 %vm796_vm1, %v774_v31  ;;  %v775_v30 = vld [vmem:[%s11256_s2 + $0x378] sm:$0xff] }
 0x39f   : > { %v4864_v38 = vrot.slane %v1668_v34, 5  ;;  %v5853_v32 = vrot.slane %v1668_v34, 6  ;;  %v12169_v53 = vpop.f32.mrf.mxu1  ;;  %v3788_v42 = vrot.slane %v1668_v34, 4 }
 0x3a0   : > { %17052 = vst [vmem:[#allocation112_spill] sm:$0xff] %v12169_v53 }
 0x3a1   : > { %v3789_v44 = vsel %vm3766_vm7, %v3786_v11, %v3788_v42  ;;  %v12176_v40 = vsel %vm4842_vm8, %v4862_v33, %v4864_v38  ;;  %v12179_v46 = vsel %vm1175_vm0, %v5851_v7, %v5853_v32  ;;  %v4152_v11 = vrot.slane %v12171_v29, 1 }
 0x3a2   : > { %17054 = vst [vmem:[#allocation114_spill] sm:$0xff] %v12176_v40  ;;  %v1481_v31 = vpop.f32.mrf.mxu0  ;;  %9923 = vmatmul.msk.f32.gmra.mxu3 %vm3224_vm3, %v3789_v44  ;;  %9971 = vmatmul.msk.f32.gmra.mxu1 %vm3224_vm3, %v4151_v51 }
 0x3a3   : > { %17055 = vst [vmem:[#allocation115_spill] sm:$0xff] %v12179_v46  ;;  %v1482_v34 = vadd.f32 %v12050_v39, %v1481_v31  ;;  %9877 = vmatmul.msk.f32.gmra.mxu2 %vm3224_vm3, %v12083_v20  ;;  %v4153_v46 = vsel %vm4124_vm5, %v4150_v59, %v4152_v11  ;;  %v12194_v31 = vmax.f32 %v1242_v18, 0.0  ;;  %v1245_v59 = vadd.f32 %v12050_v39, %v11354_v50 }
 0x3a5   : > { %v1669_v33 = vmax.f32 %v1482_v34, 0.0  ;;  %9806 = vmatmul.msk.f32.gmra.mxu0 %vm796_vm1, %v775_v30  ;;  %17057 = vst [vmem:[#allocation117_spill] sm:$0xff] %v12194_v31  ;;  %v776_v30 = vld [vmem:[%s11256_s2 + $0x380] sm:$0xff] }
 0x3a7   : > { %v4866_v7 = vrot.slane %v1669_v33, 5  ;;  %v5855_v43 = vrot.slane %v1669_v33, 6  ;;  %v12191_v44 = vpop.f32.mrf.mxu1  ;;  %v3790_v51 = vrot.slane %v1669_v33, 4  ;;  %v12215_v33 = vmax.f32 %v1245_v59, 0.0 }
 0x3a8   : > { %17056 = vst [vmem:[#allocation116_spill] sm:$0xff] %v12191_v44 }
 0x3a9   : > { %v3791_v53 = vsel %vm3766_vm7, %v3788_v42, %v3790_v51  ;;  %v12198_v40 = vsel %vm4842_vm8, %v4864_v38, %v4866_v7  ;;  %v12201_v36 = vsel %vm1175_vm0, %v5853_v32, %v5855_v43  ;;  %v4154_v32 = vrot.slane %v12194_v31, 1  ;;  %17061 = vst [vmem:[#allocation121_spill] sm:$0xff] %v12215_v33 }
 0x3aa   : > { %17058 = vst [vmem:[#allocation118_spill] sm:$0xff] %v12198_v40  ;;  %v1484_v48 = vpop.f32.mrf.mxu0  ;;  %9924 = vmatmul.msk.f32.gmra.mxu3 %vm3224_vm3, %v3791_v53  ;;  %9972 = vmatmul.msk.f32.gmra.mxu1 %vm3224_vm3, %v4153_v46 }
 0x3ab   : > { %17059 = vst [vmem:[#allocation119_spill] sm:$0xff] %v12201_v36  ;;  %v1485_v34 = vadd.f32 %v12050_v39, %v1484_v48  ;;  %9878 = vmatmul.msk.f32.gmra.mxu2 %vm3224_vm3, %v12106_v41  ;;  %v4155_v36 = vsel %vm4124_vm5, %v4152_v11, %v4154_v32  ;;  %v1248_v11 = vadd.f32 %v12050_v39, %v11358_v52 }
 0x3ad   : > { %v1670_v38 = vmax.f32 %v1485_v34, 0.0  ;;  %9807 = vmatmul.msk.f32.gmra.mxu0 %vm796_vm1, %v776_v30  ;;  %v777_v34 = vld [vmem:[%s11256_s2 + $0x388] sm:$0xff] }
 0x3af   : > { %v4868_v42 = vrot.slane %v1670_v38, 5  ;;  %v5857_v18 = vrot.slane %v1670_v38, 6  ;;  %v12213_v53 = vpop.f32.mrf.mxu1  ;;  %v3792_v46 = vrot.slane %v1670_v38, 4 }
 0x3b0   : > { %17060 = vst [vmem:[#allocation120_spill] sm:$0xff] %v12213_v53 }
 0x3b1   : > { %v3793_v48 = vsel %vm3766_vm7, %v3790_v51, %v3792_v46  ;;  %v12220_v44 = vsel %vm4842_vm8, %v4866_v7, %v4868_v42  ;;  %v12223_v50 = vsel %vm1175_vm0, %v5855_v43, %v5857_v18  ;;  %v4156_v51 = vrot.slane %v12215_v33, 1 }
 0x3b2   : > { %17062 = vst [vmem:[#allocation122_spill] sm:$0xff] %v12220_v44  ;;  %v1487_v30 = vpop.f32.mrf.mxu0  ;;  %9925 = vmatmul.msk.f32.gmra.mxu3 %vm3224_vm3, %v3793_v48  ;;  %9973 = vmatmul.msk.f32.gmra.mxu1 %vm3224_vm3, %v4155_v36 }
 0x3b3   : > { %17063 = vst [vmem:[#allocation123_spill] sm:$0xff] %v12223_v50  ;;  %v1488_v38 = vadd.f32 %v12050_v39, %v1487_v30  ;;  %9879 = vmatmul.msk.f32.gmra.mxu2 %vm3224_vm3, %v12127_v23  ;;  %v4157_v50 = vsel %vm4124_vm5, %v4154_v32, %v4156_v51  ;;  %v12238_v30 = vmax.f32 %v1248_v11, 0.0  ;;  %v1251_v32 = vadd.f32 %v12050_v39, %v11362_v54 }
 0x3b5   : > { %v1671_v7 = vmax.f32 %v1488_v38, 0.0  ;;  %9808 = vmatmul.msk.f32.gmra.mxu0 %vm796_vm1, %v777_v34  ;;  %v778_v34 = vld [vmem:[%s11256_s2 + $0x390] sm:$0xff] }
 0x3b7   : > { %v4870_v43 = vrot.slane %v1671_v7, 5  ;;  %v5859_v59 = vrot.slane %v1671_v7, 6  ;;  %v12235_v48 = vpop.f32.mrf.mxu1  ;;  %v3794_v36 = vrot.slane %v1671_v7, 4  ;;  %v12259_v7 = vmax.f32 %v1251_v32, 0.0 }
 0x3b8   : > { %17064 = vst [vmem:[#allocation124_spill] sm:$0xff] %v12235_v48 }
 0x3b9   : > { %v3795_v53 = vsel %vm3766_vm7, %v3792_v46, %v3794_v36  ;;  %v12242_v44 = vsel %vm4842_vm8, %v4868_v42, %v4870_v43  ;;  %v12245_v40 = vsel %vm1175_vm0, %v5857_v18, %v5859_v59  ;;  %v4158_v18 = vrot.slane %v12238_v30, 1 }
 0x3ba   : > { %17065 = vst [vmem:[#allocation125_spill] sm:$0xff] %v12242_v44  ;;  %v1490_v52 = vpop.f32.mrf.mxu0  ;;  %9926 = vmatmul.msk.f32.gmra.mxu3 %vm3224_vm3, %v3795_v53  ;;  %9974 = vmatmul.msk.f32.gmra.mxu1 %vm3224_vm3, %v4157_v50 }
 0x3bb   : > { %17066 = vst [vmem:[#allocation126_spill] sm:$0xff] %v12245_v40  ;;  %v1491_v38 = vadd.f32 %v12050_v39, %v1490_v52  ;;  %9880 = vmatmul.msk.f32.gmra.mxu2 %vm3224_vm3, %v12150_v28  ;;  %v4159_v40 = vsel %vm4124_vm5, %v4156_v51, %v4158_v18  ;;  %v1254_v51 = vadd.f32 %v12050_v39, %v11366_v56 }
 0x3bd   : > { %v1672_v42 = vmax.f32 %v1491_v38, 0.0  ;;  %9809 = vmatmul.msk.f32.gmra.mxu0 %vm796_vm1, %v778_v34  ;;  %v779_v38 = vld [vmem:[%s11256_s2 + $0x398] sm:$0xff] }
 0x3bf   : > { %v4872_v46 = vrot.slane %v1672_v42, 5  ;;  %v5861_v11 = vrot.slane %v1672_v42, 6  ;;  %v12257_v53 = vpop.f32.mrf.mxu1  ;;  %v3796_v50 = vrot.slane %v1672_v42, 4 }
 0x3c1   : > { %v3797_v52 = vsel %vm3766_vm7, %v3794_v36, %v3796_v50  ;;  %v12264_v48 = vsel %vm4842_vm8, %v4870_v43, %v4872_v46  ;;  %v12267_v54 = vsel %vm1175_vm0, %v5859_v59, %v5861_v11  ;;  %v4160_v36 = vrot.slane %v12259_v7, 1 }
 0x3c2   : > { %17067 = vst [vmem:[#allocation127_spill] sm:$0xff] %v12264_v48  ;;  %v1493_v34 = vpop.f32.mrf.mxu0  ;;  %9927 = vmatmul.msk.f32.gmra.mxu3 %vm3224_vm3, %v3797_v52  ;;  %9975 = vmatmul.msk.f32.gmra.mxu1 %vm3224_vm3, %v4159_v40  ;;  %v12284_v48 = vmax.f32 %v1254_v51, 0.0 }
 0x3c3   : > { %17068 = vst [vmem:[#allocation128_spill] sm:$0xff] %v12267_v54  ;;  %v1494_v42 = vadd.f32 %v12050_v39, %v1493_v34  ;;  %9881 = vmatmul.msk.f32.gmra.mxu2 %vm3224_vm3, %v12171_v29  ;;  %v4161_v34 = vsel %vm4124_vm5, %v4158_v18, %v4160_v36  ;;  %v1257_v18 = vadd.f32 %v12050_v39, %v11370_v58 }
 0x3c5   : > { %v1673_v43 = vmax.f32 %v1494_v42, 0.0  ;;  %9810 = vmatmul.msk.f32.gmra.mxu0 %vm796_vm1, %v779_v38  ;;  %v12279_v59 = vpop.f32.mrf.mxu2  ;;  %v780_v42 = vld [vmem:[%s11256_s2 + $0x3a0] sm:$0xff] }
 0x3c6   : > { %17069 = vst [vmem:[#allocation129_spill] sm:$0xff] %v12279_v59 }
 0x3c7   : > { %v4874_v32 = vrot.slane %v1673_v43, 5  ;;  %v5863_v52 = vrot.slane %v1673_v43, 6  ;;  %v12281_v40 = vpop.f32.mrf.mxu1  ;;  %v3798_v54 = vrot.slane %v1673_v43, 4 }
 0x3c9   : > { %v3799_v44 = vsel %vm3766_vm7, %v3796_v50, %v3798_v54  ;;  %v12288_v29 = vsel %vm4842_vm8, %v4872_v46, %v4874_v32  ;;  %v12291_v56 = vsel %vm1175_vm0, %v5861_v11, %v5863_v52  ;;  %v4162_v46 = vrot.slane %v12284_v48, 1 }
 0x3ca   : > { %17070 = vst [vmem:[#allocation130_spill] sm:$0xff] %v12288_v29  ;;  %v1496_v38 = vpop.f32.mrf.mxu0  ;;  %9928 = vmatmul.msk.f32.gmra.mxu3 %vm3224_vm3, %v3799_v44  ;;  %9976 = vmatmul.msk.f32.gmra.mxu1 %vm3224_vm3, %v4161_v34 }
 0x3cb   : > { %17071 = vst [vmem:[#allocation131_spill] sm:$0xff] %v12291_v56  ;;  %v1497_v43 = vadd.f32 %v12050_v39, %v1496_v38  ;;  %9882 = vmatmul.msk.f32.gmra.mxu2 %vm3224_vm3, %v12194_v31  ;;  %v12307_v38 = vmax.f32 %v1257_v18, 0.0  ;;  %v4163_v59 = vsel %vm4124_vm5, %v4160_v36, %v4162_v46 }
 0x3cd   : > { %v1674_v50 = vmax.f32 %v1497_v43, 0.0  ;;  %9811 = vmatmul.msk.f32.gmra.mxu0 %vm796_vm1, %v780_v42  ;;  %v4164_v36 = vrot.slane %v12307_v38, 1 }
 0x3ce   : > { %v12303_v11 = vpop.f32.mrf.mxu2 }
 0x3cf   : > { %17072 = vst [vmem:[#allocation132_spill] sm:$0xff] %v12303_v11  ;;  %v4876_v44 = vrot.slane %v1674_v50, 5  ;;  %v5865_v51 = vrot.slane %v1674_v50, 6  ;;  %v12305_v34 = vpop.f32.mrf.mxu1  ;;  %v3800_v56 = vrot.slane %v1674_v50, 4  ;;  %v781_v11 = vld [vmem:[%s11256_s2 + $0x3a8] sm:$0xff] }
 0x3d1   : > { %v3801_v29 = vsel %vm3766_vm7, %v3798_v54, %v3800_v56  ;;  %v12312_v58 = vsel %vm4842_vm8, %v4874_v32, %v4876_v44  ;;  %v12315_v42 = vsel %vm1175_vm0, %v5863_v52, %v5865_v51  ;;  %v1260_v54 = vadd.f32 %v12050_v39, %v11374_v60 }
 0x3d2   : > { %17073 = vst [vmem:[#allocation133_spill] sm:$0xff] %v12312_v58  ;;  %v1499_v43 = vpop.f32.mrf.mxu0  ;;  %9929 = vmatmul.msk.f32.gmra.mxu3 %vm3224_vm3, %v3801_v29  ;;  %9977 = vmatmul.msk.f32.gmra.mxu1 %vm3224_vm3, %v4163_v59 }
 0x3d3   : > { %17074 = vst [vmem:[#allocation134_spill] sm:$0xff] %v12315_v42  ;;  %v1500_v50 = vadd.f32 %v12050_v39, %v1499_v43  ;;  %9883 = vmatmul.msk.f32.gmra.mxu2 %vm3224_vm3, %v12215_v33  ;;  %v12330_v31 = vmax.f32 %v1260_v54, 0.0  ;;  %v4165_v33 = vsel %vm4124_vm5, %v4162_v46, %v4164_v36 }
 0x3d5   : > { %v1675_v32 = vmax.f32 %v1500_v50, 0.0  ;;  %9812 = vmatmul.msk.f32.gmra.mxu0 %vm796_vm1, %v781_v11  ;;  %v3951_v52 = vpop.f32.mrf.mxu3 }
 0x3d6   : > { %v3594_v18 = vpop.f32.mrf.mxu2 }
 0x3d7   : > { %v4878_v29 = vrot.slane %v1675_v32, 5  ;;  %v5867_v42 = vrot.slane %v1675_v32, 6  ;;  %v3595_v59 = vadd.f32 %v3594_v18, %v11614_v3  ;;  %v12328_v58 = vpop.f32.mrf.mxu1  ;;  %v3802_v43 = vrot.slane %v1675_v32, 4  ;;  %v782_v3 = vld [vmem:[%s11256_s2 + $0x3b0] sm:$0xff] }
 0x3d9   : > { %v4077_v60 = vadd.f32 %v3951_v52, %v3595_v59  ;;  %v3803_v28 = vsel %vm3766_vm7, %v3800_v56, %v3802_v43  ;;  %v12335_v50 = vsel %vm4842_vm8, %v4876_v44, %v4878_v29  ;;  %v12338_v11 = vsel %vm1175_vm0, %v5865_v51, %v5867_v42 }
 0x3da   : > { %17075 = vst [vmem:[#allocation135_spill] sm:$0xff] %v12335_v50  ;;  %v1502_v23 = vpop.f32.mrf.mxu0  ;;  %9930 = vmatmul.msk.f32.gmra.mxu3 %vm3224_vm3, %v3803_v28  ;;  %9978 = vmatmul.msk.f32.gmra.mxu1 %vm3224_vm3, %v4165_v33  ;;  %v1263_v56 = vadd.f32 %v12050_v39, %v11378_v62  ;;  %v4166_v44 = vrot.slane %v12330_v31, 1 }
 0x3db   : > { %17076 = vst [vmem:[#allocation136_spill] sm:$0xff] %v12338_v11  ;;  %v1503_v54 = vadd.f32 %v12050_v39, %v1502_v23  ;;  %9884 = vmatmul.msk.f32.gmra.mxu2 %vm3224_vm3, %v12238_v30  ;;  %v12347_v46 = vadd.f32 %v12257_v53, %v4077_v60 }
 0x3dc   : > { %v12356_v53 = vmax.f32 %v1263_v56, 0.0  ;;  %v4167_v60 = vsel %vm4124_vm5, %v4164_v36, %v4166_v44 }
 0x3dd   : > { %17077 = vst [vmem:[#allocation137_spill] sm:$0xff] %v12347_v46  ;;  %v1676_v51 = vmax.f32 %v1503_v54, 0.0  ;;  %9813 = vmatmul.msk.f32.gmra.mxu0 %vm796_vm1, %v782_v3  ;;  %v3954_v28 = vpop.f32.mrf.mxu3 }
 0x3de   : > { %v3597_v33 = vpop.f32.mrf.mxu2 }
 0x3df   : > { %v4880_v32 = vrot.slane %v1676_v51, 5  ;;  %v5869_v52 = vrot.slane %v1676_v51, 6  ;;  %v3598_v23 = vadd.f32 %v3597_v33, %v11624_v47  ;;  %v12354_v18 = vpop.f32.mrf.mxu1  ;;  %v3804_v59 = vrot.slane %v1676_v51, 4  ;;  %v783_v47 = vld [vmem:[%s11256_s2 + $0x3b8] sm:$0xff] }
 0x3e1   : > { %v4078_v62 = vadd.f32 %v3954_v28, %v3598_v23  ;;  %v3805_v11 = vsel %vm3766_vm7, %v3802_v43, %v3804_v59  ;;  %v12361_v54 = vsel %vm4842_vm8, %v4878_v29, %v4880_v32  ;;  %v12364_v3 = vsel %vm1175_vm0, %v5867_v42, %v5869_v52 }
 0x3e2   : > { %17078 = vst [vmem:[#allocation138_spill] sm:$0xff] %v12361_v54  ;;  %v1505_v50 = vpop.f32.mrf.mxu0  ;;  %9931 = vmatmul.msk.f32.gmra.mxu3 %vm3224_vm3, %v3805_v11  ;;  %9979 = vmatmul.msk.f32.gmra.mxu1 %vm3224_vm3, %v4167_v60  ;;  %v1266_v29 = vadd.f32 %v12050_v39, %v11382_v0  ;;  %v4168_v42 = vrot.slane %v12356_v53, 1 }
 0x3e3   : > { %17079 = vst [vmem:[#allocation139_spill] sm:$0xff] %v12364_v3  ;;  %v1506_v56 = vadd.f32 %v12050_v39, %v1505_v50  ;;  %9885 = vmatmul.msk.f32.gmra.mxu2 %vm3224_vm3, %v12259_v7  ;;  %v12373_v36 = vadd.f32 %v12281_v40, %v4078_v62 }
 0x3e4   : > { %v12382_v40 = vmax.f32 %v1266_v29, 0.0  ;;  %v4169_v62 = vsel %vm4124_vm5, %v4166_v44, %v4168_v42 }
 0x3e5   : > { %17080 = vst [vmem:[#allocation140_spill] sm:$0xff] %v12373_v36  ;;  %v1677_v43 = vmax.f32 %v1506_v56, 0.0  ;;  %9814 = vmatmul.msk.f32.gmra.mxu0 %vm796_vm1, %v783_v47  ;;  %v3957_v11 = vpop.f32.mrf.mxu3 }
 0x3e6   : > { %v3600_v51 = vpop.f32.mrf.mxu2 }
 0x3e7   : > { %v4882_v28 = vrot.slane %v1677_v43, 5  ;;  %v5871_v33 = vrot.slane %v1677_v43, 6  ;;  %v3601_v50 = vadd.f32 %v3600_v51, %v11634_v57  ;;  %v12380_v23 = vpop.f32.mrf.mxu1  ;;  %v3806_v60 = vrot.slane %v1677_v43, 4  ;;  %v784_v57 = vld [vmem:[%s11256_s2 + $0x3c0] sm:$0xff] }
 0x3e9   : > { %v4079_v0 = vadd.f32 %v3957_v11, %v3601_v50  ;;  %v3807_v3 = vsel %vm3766_vm7, %v3804_v59, %v3806_v60  ;;  %v12387_v56 = vsel %vm4842_vm8, %v4880_v32, %v4882_v28  ;;  %v12390_v47 = vsel %vm1175_vm0, %v5869_v52, %v5871_v33 }
 0x3ea   : > { %17081 = vst [vmem:[#allocation141_spill] sm:$0xff] %v12387_v56  ;;  %v1508_v54 = vpop.f32.mrf.mxu0  ;;  %9932 = vmatmul.msk.f32.gmra.mxu3 %vm3224_vm3, %v3807_v3  ;;  %9980 = vmatmul.msk.f32.gmra.mxu1 %vm3224_vm3, %v4169_v62  ;;  %v1269_v32 = vadd.f32 %v12050_v39, %v11386_v2  ;;  %v4170_v52 = vrot.slane %v12382_v40, 1 }
 0x3eb   : > { %17082 = vst [vmem:[#allocation142_spill] sm:$0xff] %v12390_v47  ;;  %v1509_v29 = vadd.f32 %v12050_v39, %v1508_v54  ;;  %9886 = vmatmul.msk.f32.gmra.mxu2 %vm3224_vm3, %v12284_v48  ;;  %v12399_v44 = vadd.f32 %v12305_v34, %v4079_v0 }
 0x3ec   : > { %v12408_v34 = vmax.f32 %v1269_v32, 0.0  ;;  %v4171_v0 = vsel %vm4124_vm5, %v4168_v42, %v4170_v52 }
 0x3ed   : > { %17083 = vst [vmem:[#allocation143_spill] sm:$0xff] %v12399_v44  ;;  %v1678_v59 = vmax.f32 %v1509_v29, 0.0  ;;  %9815 = vmatmul.msk.f32.gmra.mxu0 %vm796_vm1, %v784_v57  ;;  %v3960_v3 = vpop.f32.mrf.mxu3 }
 0x3ee   : > { %v3603_v43 = vpop.f32.mrf.mxu2 }
 0x3ef   : > { %v4884_v11 = vrot.slane %v1678_v59, 5  ;;  %v5873_v51 = vrot.slane %v1678_v59, 6  ;;  %v3604_v54 = vadd.f32 %v3603_v43, %v11644_v37  ;;  %v12406_v50 = vpop.f32.mrf.mxu1  ;;  %v3808_v62 = vrot.slane %v1678_v59, 4  ;;  %v785_v37 = vld [vmem:[%s11256_s2 + $0x3c8] sm:$0xff] }
 0x3f1   : > { %v4080_v2 = vadd.f32 %v3960_v3, %v3604_v54  ;;  %v3809_v47 = vsel %vm3766_vm7, %v3806_v60, %v3808_v62  ;;  %v12413_v29 = vsel %vm4842_vm8, %v4882_v28, %v4884_v11  ;;  %v12416_v57 = vsel %vm1175_vm0, %v5871_v33, %v5873_v51 }
 0x3f2   : > { %17084 = vst [vmem:[#allocation144_spill] sm:$0xff] %v12413_v29  ;;  %v1511_v56 = vpop.f32.mrf.mxu0  ;;  %9933 = vmatmul.msk.f32.gmra.mxu3 %vm3224_vm3, %v3809_v47  ;;  %9981 = vmatmul.msk.f32.gmra.mxu1 %vm3224_vm3, %v4171_v0  ;;  %v1272_v28 = vadd.f32 %v12050_v39, %v11390_v4  ;;  %v4172_v33 = vrot.slane %v12408_v34, 1 }
 0x3f3   : > { %17085 = vst [vmem:[#allocation145_spill] sm:$0xff] %v12416_v57  ;;  %v1512_v32 = vadd.f32 %v12050_v39, %v1511_v56  ;;  %9887 = vmatmul.msk.f32.gmra.mxu2 %vm3224_vm3, %v12307_v38  ;;  %v12425_v42 = vadd.f32 %v12328_v58, %v4080_v2  ;;  %v10233_v58 = vld [vmem:[%s16958_s30 + $0x130] sm:$0xff]  ;;  %v10232_v57 = vld [vmem:[%s16958_s30 + $0x128] sm:$0xff] }
 0x3f4   : > { %v12437_v4 = vmax.f32 %v1272_v28, 0.0  ;;  %v4173_v2 = vsel %vm4124_vm5, %v4170_v52, %v4172_v33  ;;  %6372 = vmatpush.msrb.mxu0 %v10233_v58  ;;  %v786_v52 = vld [vmem:[%s11256_s2 + $0x3d0] sm:$0xff] }
 0x3f5   : > { %17086 = vst [vmem:[#allocation146_spill] sm:$0xff] %v12425_v42  ;;  %v1679_v60 = vmax.f32 %v1512_v32, 0.0  ;;  %9816 = vmatmul.msk.f32.gmra.mxu0 %vm796_vm1, %v785_v37  ;;  %v3963_v47 = vpop.f32.mrf.mxu3 }
 0x3f6   : > { %v3606_v59 = vpop.f32.mrf.mxu2  ;;  %6373 = vmatpush.msrb.mxu0 %v10232_v57 }
 0x3f7   : > { %v4886_v3 = vrot.slane %v1679_v60, 5  ;;  %v5875_v43 = vrot.slane %v1679_v60, 6  ;;  %v3607_v56 = vadd.f32 %v3606_v59, %v11654_v21  ;;  %v12432_v54 = vpop.f32.mrf.mxu1  ;;  %v3810_v0 = vrot.slane %v1679_v60, 4 }
 0x3f9   : > { %v4081_v37 = vadd.f32 %v3963_v47, %v3607_v56  ;;  %v3811_v32 = vsel %vm3766_vm7, %v3808_v62, %v3810_v0  ;;  %v12445_v21 = vsel %vm4842_vm8, %v4884_v11, %v4886_v3  ;;  %v12448_v60 = vsel %vm1175_vm0, %v5873_v51, %v5875_v43  ;;  %v10231_v11 = vld [vmem:[%s16958_s30 + $0x120] sm:$0xff] }
 0x3fa   : > { %17087 = vst [vmem:[#allocation147_spill] sm:$0xff] %v12445_v21  ;;  %v1514_v59 = vpop.f32.mrf.mxu0  ;;  %9934 = vmatmul.msk.f32.gmra.mxu3 %vm3224_vm3, %v3811_v32  ;;  %9982 = vmatmul.msk.f32.gmra.mxu1 %vm3224_vm3, %v4173_v2  ;;  %v1275_v51 = vadd.f32 %v12050_v39, %v11394_v6  ;;  %v4174_v47 = vrot.slane %v12437_v4, 1 }
 0x3fb   : > { %17088 = vst [vmem:[#allocation148_spill] sm:$0xff] %v12448_v60  ;;  %v1515_v28 = vadd.f32 %v12050_v39, %v1514_v59  ;;  %9888 = vmatmul.msk.f32.gmra.mxu2 %vm3224_vm3, %v12330_v31  ;;  %v12460_v62 = vadd.f32 %v12354_v18, %v4081_v37  ;;  %6374 = vmatpush.msrb.mxu0 %v10231_v11 }
 0x3fc   : > { %v12469_v37 = vmax.f32 %v1275_v51, 0.0  ;;  %v4175_v6 = vsel %vm4124_vm5, %v4172_v33, %v4174_v47 }
 0x3fd   : > { %17089 = vst [vmem:[#allocation149_spill] sm:$0xff] %v12460_v62  ;;  %v1680_v56 = vmax.f32 %v1515_v28, 0.0  ;;  %9817 = vmatmul.msk.f32.gmra.mxu0 %vm796_vm1, %v786_v52  ;;  %v3966_v58 = vpop.f32.mrf.mxu3 }
 0x3fe   : > { %v3609_v2 = vpop.f32.mrf.mxu2 }
 0x3ff   : > { %v4888_v57 = vrot.slane %v1680_v56, 5  ;;  %v5877_v32 = vrot.slane %v1680_v56, 6  ;;  %v3610_v59 = vadd.f32 %v3609_v2, %v11664_v5  ;;  %v12467_v60 = vpop.f32.mrf.mxu1  ;;  %v3812_v18 = vrot.slane %v1680_v56, 4  ;;  %v787_v5 = vld [vmem:[%s11256_s2 + $0x3d8] sm:$0xff] }
 0x401   : > { %v4082_v21 = vadd.f32 %v3966_v58, %v3610_v59  ;;  %v3813_v28 = vsel %vm3766_vm7, %v3810_v0, %v3812_v18  ;;  %v12474_v52 = vsel %vm4842_vm8, %v4886_v3, %v4888_v57  ;;  %v12477_v62 = vsel %vm1175_vm0, %v5875_v43, %v5877_v32 }
 0x402   : > { %17090 = vst [vmem:[#allocation150_spill] sm:$0xff] %v12474_v52  ;;  %v1517_v11 = vpop.f32.mrf.mxu0  ;;  %9935 = vmatmul.msk.f32.gmra.mxu3 %vm3224_vm3, %v3813_v28  ;;  %9983 = vmatmul.msk.f32.gmra.mxu1 %vm3224_vm3, %v4175_v6  ;;  %v1278_v3 = vadd.f32 %v12050_v39, %v11398_v8  ;;  %v4176_v43 = vrot.slane %v12469_v37, 1 }
 0x403   : > { %17091 = vst [vmem:[#allocation151_spill] sm:$0xff] %v12477_v62  ;;  %v1518_v51 = vadd.f32 %v12050_v39, %v1517_v11  ;;  %9889 = vmatmul.msk.f32.gmra.mxu2 %vm3224_vm3, %v12356_v53  ;;  %v12486_v33 = vadd.f32 %v12380_v23, %v4082_v21 }
 0x404   : > { %v12495_v23 = vmax.f32 %v1278_v3, 0.0  ;;  %v4177_v21 = vsel %vm4124_vm5, %v4174_v47, %v4176_v43 }
 0x405   : > { %17092 = vst [vmem:[#allocation152_spill] sm:$0xff] %v12486_v33  ;;  %v1681_v0 = vmax.f32 %v1518_v51, 0.0  ;;  %9818 = vmatmul.msk.f32.gmra.mxu0 %vm796_vm1, %v787_v5  ;;  %v3969_v56 = vpop.f32.mrf.mxu3 }
 0x406   : > { %v3612_v58 = vpop.f32.mrf.mxu2 }
 0x407   : > { %v4890_v2 = vrot.slane %v1681_v0, 5  ;;  %v5879_v59 = vrot.slane %v1681_v0, 6  ;;  %v3613_v6 = vadd.f32 %v3612_v58, %v11674_v45  ;;  %v12493_v28 = vpop.f32.mrf.mxu1  ;;  %v3814_v11 = vrot.slane %v1681_v0, 4  ;;  %v788_v45 = vld [vmem:[%s11256_s2 + $0x3e0] sm:$0xff] }
 0x409   : > { %v4083_v8 = vadd.f32 %v3969_v56, %v3613_v6  ;;  %v3815_v62 = vsel %vm3766_vm7, %v3812_v18, %v3814_v11  ;;  %v12500_v51 = vsel %vm4842_vm8, %v4888_v57, %v4890_v2  ;;  %v12503_v5 = vsel %vm1175_vm0, %v5877_v32, %v5879_v59 }
 0x40a   : > { %17093 = vst [vmem:[#allocation153_spill] sm:$0xff] %v12500_v51  ;;  %v1520_v52 = vpop.f32.mrf.mxu0  ;;  %9936 = vmatmul.msk.f32.gmra.mxu3 %vm3224_vm3, %v3815_v62  ;;  %9984 = vmatmul.msk.f32.gmra.mxu1 %vm3224_vm3, %v4177_v21  ;;  %v1281_v57 = vadd.f32 %v12050_v39, %v11402_v10  ;;  %v4178_v32 = vrot.slane %v12495_v23, 1 }
 0x40b   : > { %17094 = vst [vmem:[#allocation154_spill] sm:$0xff] %v12503_v5  ;;  %v1521_v3 = vadd.f32 %v12050_v39, %v1520_v52  ;;  %9890 = vmatmul.msk.f32.gmra.mxu2 %vm3224_vm3, %v12382_v40  ;;  %v12512_v47 = vadd.f32 %v12406_v50, %v4083_v8 }
 0x40c   : > { %v12521_v50 = vmax.f32 %v1281_v57, 0.0  ;;  %v4179_v8 = vsel %vm4124_vm5, %v4176_v43, %v4178_v32 }
 0x40d   : > { %17095 = vst [vmem:[#allocation155_spill] sm:$0xff] %v12512_v47  ;;  %v1682_v18 = vmax.f32 %v1521_v3, 0.0  ;;  %9819 = vmatmul.msk.f32.gmra.mxu0 %vm796_vm1, %v788_v45  ;;  %v3972_v62 = vpop.f32.mrf.mxu3 }
 0x40e   : > { %v3615_v0 = vpop.f32.mrf.mxu2 }
 0x40f   : > { %v3816_v56 = vrot.slane %v1682_v18, 4  ;;  %v4892_v58 = vrot.slane %v1682_v18, 5  ;;  %v5881_v52 = vrot.slane %v1682_v18, 6  ;;  %v3616_v6 = vadd.f32 %v3615_v0, %v11684_v13  ;;  %v12519_v21 = vpop.f32.mrf.mxu1  ;;  %v789_v13 = vld [vmem:[%s11256_s2 + $0x3e8] sm:$0x3] }
 0x411   : > { %v4084_v10 = vadd.f32 %v3972_v62, %v3616_v6  ;;  %v3817_v5 = vsel %vm3766_vm7, %v3814_v11, %v3816_v56  ;;  %v12526_v3 = vsel %vm4842_vm8, %v4890_v2, %v4892_v58  ;;  %v12529_v45 = vsel %vm1175_vm0, %v5879_v59, %v5881_v52 }
 0x412   : > { %17096 = vst [vmem:[#allocation156_spill] sm:$0xff] %v12526_v3  ;;  %v1523_v51 = vpop.f32.mrf.mxu0  ;;  %9937 = vmatmul.msk.f32.gmra.mxu3 %vm3224_vm3, %v3817_v5  ;;  %9985 = vmatmul.msk.f32.gmra.mxu1 %vm3224_vm3, %v4179_v8  ;;  %v1284_v2 = vadd.f32 %v12050_v39, %v11406_v12  ;;  %v4180_v59 = vrot.slane %v12521_v50, 1  ;;  %v6193_v12 = vrot.slane %v11891_v25, 3 }
 0x413   : > { %17097 = vst [vmem:[#allocation157_spill] sm:$0xff] %v12529_v45  ;;  %v1524_v57 = vadd.f32 %v12050_v39, %v1523_v51  ;;  %9891 = vmatmul.msk.f32.gmra.mxu2 %vm3224_vm3, %v12408_v34  ;;  %v12538_v43 = vadd.f32 %v12432_v54, %v4084_v10 }
 0x414   : > { %v12547_v45 = vmax.f32 %v1284_v2, 0.0  ;;  %v4181_v54 = vsel %vm4124_vm5, %v4178_v32, %v4180_v59 }
 0x415   : > { %17098 = vst [vmem:[#allocation158_spill] sm:$0xff] %v12538_v43  ;;  %v1683_v11 = vmax.f32 %v1524_v57, 0.0  ;;  %9820 = vmatmul.msk.f32.gmra.mxu0 %vm796_vm1, %v789_v13  ;;  %v3975_v5 = vpop.f32.mrf.mxu3  ;;  %vm7117_vm1 = vcmask 523265  }
 0x416   : > { %v3618_v18 = vpop.f32.mrf.mxu2  ;;  %v4182_v2 = vrot.slane %v12547_v45, 1 }
 0x417   : > { %v3818_v62 = vrot.slane %v1683_v11, 4  ;;  %v4894_v0 = vrot.slane %v1683_v11, 5  ;;  %v5883_v6 = vrot.slane %v1683_v11, 6  ;;  %v3619_v51 = vadd.f32 %v3618_v18, %v11695_v15  ;;  %v12545_v8 = vpop.f32.mrf.mxu1 }
 0x418   : > { %v6192_v15 = vrot.slane %v11897_v63, 3 }
 0x419   : > { %v4085_v10 = vadd.f32 %v3975_v5, %v3619_v51  ;;  %v3819_v57 = vsel %vm3766_vm7, %v3816_v56, %v3818_v62  ;;  %v12553_v13 = vsel %vm4842_vm8, %v4892_v58, %v4894_v0  ;;  %v12556_v3 = vsel %vm1175_vm0, %v5881_v52, %v5883_v6 }
 0x41a   : > { %17099 = vst [vmem:[#allocation159_spill] sm:$0xff] %v12553_v13  ;;  %v1526_v11 = vpop.f32.mrf.mxu0  ;;  %9938 = vmatmul.msk.f32.gmra.mxu3 %vm3224_vm3, %v3819_v57  ;;  %9986 = vmatmul.msk.f32.gmra.mxu1 %vm3224_vm3, %v4181_v54  ;;  %v1287_v58 = vadd.f32 %v12050_v39, %v11410_v14  ;;  %v6194_v52 = vsel %vm6191_vm9, %v6192_v15, %v6193_v12 }
 0x41b   : > { %17100 = vst [vmem:[#allocation160_spill] sm:$0xff] %v12556_v3  ;;  %v1527_v32 = vadd.f32 %v12050_v39, %v1526_v11  ;;  %9892 = vmatmul.msk.f32.gmra.mxu2 %vm3224_vm3, %v12437_v4  ;;  %v12565_v56 = vadd.f32 %v12467_v60, %v4085_v10  ;;  %v4183_v14 = vsel %vm4124_vm5, %v4180_v59, %v4182_v2  ;;  %v6195_v10 = vrot.slane %v11910_v55, 3 }
 0x41c   : > { %v12575_v60 = vmax.f32 %v1287_v58, 0.0  ;;  %v1290_v59 = vadd.f32 %v12050_v39, %v11414_v16 }
 0x41d   : > { %17101 = vst [vmem:[#allocation161_spill] sm:$0xff] %v12565_v56  ;;  %v1684_v5 = vmax.f32 %v1527_v32, 0.0  ;;  %v3978_v18 = vpop.f32.mrf.mxu3  ;;  %10235 = vmatmul.msk.f32.vlgmr.msrb.gmra.mxu0 %vm3224_vm3, %v6194_v52 }
 0x41e   : > { %v3621_v51 = vpop.f32.mrf.mxu2 }
 0x41f   : > { %v3820_v54 = vrot.slane %v1684_v5, 4  ;;  %v4896_v57 = vrot.slane %v1684_v5, 5  ;;  %v5885_v11 = vrot.slane %v1684_v5, 6  ;;  %v3622_v3 = vadd.f32 %v3621_v51, %v11705_v49  ;;  %v12573_v13 = vpop.f32.mrf.mxu1 }
 0x421   : > { %v4086_v15 = vadd.f32 %v3978_v18, %v3622_v3  ;;  %v3821_v32 = vsel %vm3766_vm7, %v3818_v62, %v3820_v54  ;;  %v12581_v56 = vsel %vm4842_vm8, %v4894_v0, %v4896_v57  ;;  %v12584_v52 = vsel %vm1175_vm0, %v5883_v6, %v5885_v11 }
 0x422   : > { %17102 = vst [vmem:[#allocation162_spill] sm:$0xff] %v12581_v56  ;;  %v1529_v5 = vpop.f32.mrf.mxu0  ;;  %9939 = vmatmul.msk.f32.gmra.mxu3 %vm3224_vm3, %v3821_v32  ;;  %9987 = vmatmul.msk.f32.gmra.mxu1 %vm3224_vm3, %v4183_v14  ;;  %v6196_v62 = vsel %vm6191_vm9, %v6193_v12, %v6195_v10  ;;  %v4184_v0 = vrot.slane %v12575_v60, 1  ;;  %v6197_v12 = vrot.slane %v11927_v22, 3 }
 0x423   : > { %17103 = vst [vmem:[#allocation163_spill] sm:$0xff] %v12584_v52  ;;  %v1530_v49 = vadd.f32 %v12050_v39, %v1529_v5  ;;  %9893 = vmatmul.msk.f32.gmra.mxu2 %vm3224_vm3, %v12469_v37  ;;  %v12592_v3 = vadd.f32 %v12493_v28, %v4086_v15  ;;  %v12602_v28 = vmax.f32 %v1290_v59, 0.0 }
 0x424   : > { %v4185_v16 = vsel %vm4124_vm5, %v4182_v2, %v4184_v0 }
 0x425   : > { %17104 = vst [vmem:[#allocation164_spill] sm:$0xff] %v12592_v3  ;;  %v1685_v6 = vmax.f32 %v1530_v49, 0.0  ;;  %v3981_v58 = vpop.f32.mrf.mxu3  ;;  %10236 = vmatmul.msk.f32.gmra.mxu0 %vm3224_vm3, %v6196_v62 }
 0x426   : > { %v3624_v18 = vpop.f32.mrf.mxu2 }
 0x427   : > { %v3822_v51 = vrot.slane %v1685_v6, 4  ;;  %v4898_v14 = vrot.slane %v1685_v6, 5  ;;  %v5887_v32 = vrot.slane %v1685_v6, 6  ;;  %v3625_v5 = vadd.f32 %v3624_v18, %v11715_v17  ;;  %v12600_v52 = vpop.f32.mrf.mxu1 }
 0x429   : > { %v4087_v15 = vadd.f32 %v3981_v58, %v3625_v5  ;;  %v3823_v49 = vsel %vm3766_vm7, %v3820_v54, %v3822_v51  ;;  %v12608_v56 = vsel %vm4842_vm8, %v4896_v57, %v4898_v14  ;;  %v12611_v62 = vsel %vm1175_vm0, %v5885_v11, %v5887_v32 }
 0x42a   : > { %17105 = vst [vmem:[#allocation165_spill] sm:$0xff] %v12608_v56  ;;  %v1532_v6 = vpop.f32.mrf.mxu0  ;;  %9940 = vmatmul.msk.f32.gmra.mxu3 %vm3224_vm3, %v3823_v49  ;;  %9988 = vmatmul.msk.f32.gmra.mxu1 %vm3224_vm3, %v4185_v16  ;;  %v1293_v54 = vadd.f32 %v12050_v39, %v11418_v19  ;;  %v6198_v57 = vsel %vm6191_vm9, %v6195_v10, %v6197_v12  ;;  %v4186_v11 = vrot.slane %v12602_v28, 1 }
 0x42b   : > { %17106 = vst [vmem:[#allocation166_spill] sm:$0xff] %v12611_v62  ;;  %v1533_v17 = vadd.f32 %v12050_v39, %v1532_v6  ;;  %9894 = vmatmul.msk.f32.gmra.mxu2 %vm3224_vm3, %v12495_v23  ;;  %v12619_v2 = vadd.f32 %v12519_v21, %v4087_v15  ;;  %v6199_v39 = vrot.slane %v11946_v24, 3 }
 0x42c   : > { %v12629_v21 = vmax.f32 %v1293_v54, 0.0  ;;  %v4187_v19 = vsel %vm4124_vm5, %v4184_v0, %v4186_v11 }
 0x42d   : > { %17107 = vst [vmem:[#allocation167_spill] sm:$0xff] %v12619_v2  ;;  %v1686_v59 = vmax.f32 %v1533_v17, 0.0  ;;  %v3984_v58 = vpop.f32.mrf.mxu3  ;;  %10237 = vmatmul.msk.f32.gmra.mxu0 %vm3224_vm3, %v6198_v57  ;;  %v6200_v54 = vsel %vm6191_vm9, %v6197_v12, %v6199_v39  ;;  %v6201_v12 = vrot.slane %v11967_v27, 3 }
 0x42e   : > { %v3627_v18 = vpop.f32.mrf.mxu2 }
 0x42f   : > { %v3824_v5 = vrot.slane %v1686_v59, 4  ;;  %v4900_v16 = vrot.slane %v1686_v59, 5  ;;  %v5889_v49 = vrot.slane %v1686_v59, 6  ;;  %v3628_v6 = vadd.f32 %v3627_v18, %v11725_v61  ;;  %v12627_v62 = vpop.f32.mrf.mxu1  ;;  %v12645_v61 = vld [vmem:[%s16961_s22] ss:$0 sm:$0xff] }
 0x431   : > { %v4088_v10 = vadd.f32 %v3984_v58, %v3628_v6  ;;  %v3825_v15 = vsel %vm3766_vm7, %v3822_v51, %v3824_v5  ;;  %v12635_v17 = vsel %vm4842_vm8, %v4898_v14, %v4900_v16  ;;  %v12638_v57 = vsel %vm1175_vm0, %v5887_v32, %v5889_v49  ;;  %v17111_v14 = vld [vmem:[#allocation14_spill] sm:$0xff] }
 0x432   : > { %17108 = vst [vmem:[#allocation168_spill] sm:$0xff] %v12635_v17  ;;  %v1535_v59 = vpop.f32.mrf.mxu0  ;;  %9941 = vmatmul.msk.f32.gmra.mxu3 %vm3224_vm3, %v3825_v15  ;;  %9989 = vmatmul.msk.f32.gmra.mxu1 %vm3224_vm3, %v4187_v19  ;;  %v1296_v32 = vadd.f32 %v12645_v61, %v17111_v14  ;;  %v4188_v58 = vrot.slane %v12629_v21, 1  ;;  %v17112_v17 = vld [vmem:[#allocation53_spill] sm:$0xff] }
 0x433   : > { %17109 = vst [vmem:[#allocation169_spill] sm:$0xff] %v12638_v57  ;;  %v1536_v0 = vadd.f32 %v12645_v61, %v1535_v59  ;;  %9895 = vmatmul.msk.f32.gmra.mxu2 %vm3224_vm3, %v12521_v50  ;;  %v12651_v51 = vadd.f32 %v12545_v8, %v4088_v10 }
 0x434   : > { %v12661_v8 = vmax.f32 %v1296_v32, 0.0  ;;  %v4189_v10 = vsel %vm4124_vm5, %v4186_v11, %v4188_v58  ;;  %v17116_v11 = vld [vmem:[#allocation15_spill] sm:$0xff] }
 0x435   : > { %17110 = vst [vmem:[#allocation170_spill] sm:$0xff] %v12651_v51  ;;  %v1687_v18 = vmax.f32 %v1536_v0, 0.0  ;;  %v3987_v6 = vpop.f32.mrf.mxu3  ;;  %10238 = vmatmul.msk.f32.gmra.mxu0 %vm3224_vm3, %v6200_v54 }
 0x436   : > { %v3630_v19 = vpop.f32.mrf.mxu2 }
 0x437   : > { %v3826_v15 = vrot.slane %v1687_v18, 4  ;;  %v4902_v59 = vrot.slane %v1687_v18, 5  ;;  %v5891_v57 = vrot.slane %v1687_v18, 6  ;;  %v3631_v56 = vadd.f32 %v3630_v19, %v17112_v17  ;;  %v12659_v2 = vpop.f32.mrf.mxu1 }
 0x439   : > { %v4089_v14 = vadd.f32 %v3987_v6, %v3631_v56  ;;  %v3827_v0 = vsel %vm3766_vm7, %v3824_v5, %v3826_v15  ;;  %v12667_v51 = vsel %vm4842_vm8, %v4900_v16, %v4902_v59  ;;  %v12670_v54 = vsel %vm1175_vm0, %v5889_v49, %v5891_v57 }
 0x43a   : > { %17113 = vst [vmem:[#allocation14_spill] sm:$0xff] %v12667_v51  ;;  %v1538_v18 = vpop.f32.mrf.mxu0  ;;  %9942 = vmatmul.msk.f32.gmra.mxu3 %vm3224_vm3, %v3827_v0  ;;  %9990 = vmatmul.msk.f32.gmra.mxu1 %vm3224_vm3, %v4189_v10  ;;  %v1299_v5 = vadd.f32 %v12645_v61, %v17116_v11  ;;  %v6202_v16 = vsel %vm6191_vm9, %v6199_v39, %v6201_v12  ;;  %v4190_v49 = vrot.slane %v12661_v8, 1  ;;  %v6203_v39 = vrot.slane %v11990_v35, 3 }
 0x43b   : > { %17114 = vst [vmem:[#allocation53_spill] sm:$0xff] %v12670_v54  ;;  %v1539_v17 = vadd.f32 %v12645_v61, %v1538_v18  ;;  %9896 = vmatmul.msk.f32.gmra.mxu2 %vm3224_vm3, %v12547_v45  ;;  %v12678_v56 = vadd.f32 %v12573_v13, %v4089_v14  ;;  %v17117_v54 = vld [vmem:[#allocation55_spill] sm:$0xff] }
 0x43c   : > { %v12688_v13 = vmax.f32 %v1299_v5, 0.0  ;;  %v4191_v14 = vsel %vm4124_vm5, %v4188_v58, %v4190_v49  ;;  %v17121_v58 = vld [vmem:[#allocation16_spill] sm:$0xff] }
 0x43d   : > { %17115 = vst [vmem:[#allocation171_spill] sm:$0xff] %v12678_v56  ;;  %v1688_v32 = vmax.f32 %v1539_v17, 0.0  ;;  %v3990_v6 = vpop.f32.mrf.mxu3  ;;  %10239 = vmatmul.msk.f32.gmra.mxu0 %vm3224_vm3, %v6202_v16 }
 0x43e   : > { %v3633_v19 = vpop.f32.mrf.mxu2 }
 0x43f   : > { %v3828_v10 = vrot.slane %v1688_v32, 4  ;;  %v4904_v0 = vrot.slane %v1688_v32, 5  ;;  %v5893_v18 = vrot.slane %v1688_v32, 6  ;;  %v3634_v51 = vadd.f32 %v3633_v19, %v17117_v54  ;;  %v12686_v3 = vpop.f32.mrf.mxu1 }
 0x441   : > { %v4090_v11 = vadd.f32 %v3990_v6, %v3634_v51  ;;  %v3829_v17 = vsel %vm3766_vm7, %v3826_v15, %v3828_v10  ;;  %v12694_v56 = vsel %vm4842_vm8, %v4902_v59, %v4904_v0  ;;  %v12697_v16 = vsel %vm1175_vm0, %v5891_v57, %v5893_v18 }
 0x442   : > { %17118 = vst [vmem:[#allocation15_spill] sm:$0xff] %v12694_v56  ;;  %v1541_v32 = vpop.f32.mrf.mxu0  ;;  %9943 = vmatmul.msk.f32.gmra.mxu3 %vm3224_vm3, %v3829_v17  ;;  %9991 = vmatmul.msk.f32.gmra.mxu1 %vm3224_vm3, %v4191_v14  ;;  %v1302_v15 = vadd.f32 %v12645_v61, %v17121_v58  ;;  %v6204_v59 = vsel %vm6191_vm9, %v6201_v12, %v6203_v39  ;;  %v4192_v57 = vrot.slane %v12688_v13, 1  ;;  %v6205_v12 = vrot.slane %v12013_v9, 3 }
 0x443   : > { %17119 = vst [vmem:[#allocation55_spill] sm:$0xff] %v12697_v16  ;;  %v1542_v54 = vadd.f32 %v12645_v61, %v1541_v32  ;;  %9897 = vmatmul.msk.f32.gmra.mxu2 %vm3224_vm3, %v12575_v60  ;;  %v12705_v51 = vadd.f32 %v12600_v52, %v4090_v11  ;;  %v17122_v16 = vld [vmem:[#allocation57_spill] sm:$0xff] }
 0x444   : > { %v12715_v52 = vmax.f32 %v1302_v15, 0.0  ;;  %v4193_v11 = vsel %vm4124_vm5, %v4190_v49, %v4192_v57  ;;  %v17127_v49 = vld [vmem:[#allocation17_spill] sm:$0xff] }
 0x445   : > { %17120 = vst [vmem:[#allocation172_spill] sm:$0xff] %v12705_v51  ;;  %v1689_v5 = vmax.f32 %v1542_v54, 0.0  ;;  %v3993_v6 = vpop.f32.mrf.mxu3  ;;  %10240 = vmatmul.msk.f32.gmra.mxu0 %vm3224_vm3, %v6204_v59 }
 0x446   : > { %v3636_v19 = vpop.f32.mrf.mxu2  ;;  %17123 = vst [vmem:[#allocation16_spill] sm:$0xff] %v12715_v52 }
 0x447   : > { %v3830_v14 = vrot.slane %v1689_v5, 4  ;;  %v4906_v17 = vrot.slane %v1689_v5, 5  ;;  %v5895_v32 = vrot.slane %v1689_v5, 6  ;;  %v3637_v56 = vadd.f32 %v3636_v19, %v17122_v16  ;;  %v12713_v43 = vpop.f32.mrf.mxu1 }
 0x449   : > { %v4091_v58 = vadd.f32 %v3993_v6, %v3637_v56  ;;  %v3831_v54 = vsel %vm3766_vm7, %v3828_v10, %v3830_v14  ;;  %v12721_v51 = vsel %vm4842_vm8, %v4904_v0, %v4906_v17  ;;  %v12724_v59 = vsel %vm1175_vm0, %v5893_v18, %v5895_v32 }
 0x44a   : > { %17124 = vst [vmem:[#allocation57_spill] sm:$0xff] %v12721_v51  ;;  %v1544_v5 = vpop.f32.mrf.mxu0  ;;  %9944 = vmatmul.msk.f32.gmra.mxu3 %vm3224_vm3, %v3831_v54  ;;  %9992 = vmatmul.msk.f32.gmra.mxu1 %vm3224_vm3, %v4193_v11  ;;  %v1305_v10 = vadd.f32 %v12645_v61, %v17127_v49  ;;  %v6206_v0 = vsel %vm6191_vm9, %v6203_v39, %v6205_v12  ;;  %v4194_v18 = vrot.slane %v12715_v52, 1  ;;  %v6207_v39 = vrot.slane %v12034_v26, 3 }
 0x44b   : > { %17125 = vst [vmem:[#allocation173_spill] sm:$0xff] %v12724_v59  ;;  %v1545_v16 = vadd.f32 %v12645_v61, %v1544_v5  ;;  %9898 = vmatmul.msk.f32.gmra.mxu2 %vm3224_vm3, %v12602_v28  ;;  %v12732_v56 = vadd.f32 %v12627_v62, %v4091_v58  ;;  %v17128_v59 = vld [vmem:[#allocation59_spill] sm:$0xff] }
 0x44c   : > { %v12742_v62 = vmax.f32 %v1305_v10, 0.0  ;;  %v4195_v58 = vsel %vm4124_vm5, %v4192_v57, %v4194_v18  ;;  %v17133_v57 = vld [vmem:[#allocation18_spill] sm:$0xff] }
 0x44d   : > { %17126 = vst [vmem:[#allocation174_spill] sm:$0xff] %v12732_v56  ;;  %v1690_v15 = vmax.f32 %v1545_v16, 0.0  ;;  %v3996_v6 = vpop.f32.mrf.mxu3  ;;  %10241 = vmatmul.msk.f32.gmra.mxu0 %vm3224_vm3, %v6206_v0 }
 0x44e   : > { %v3639_v19 = vpop.f32.mrf.mxu2  ;;  %17129 = vst [vmem:[#allocation17_spill] sm:$0xff] %v12742_v62 }
 0x44f   : > { %v3832_v11 = vrot.slane %v1690_v15, 4  ;;  %v4908_v54 = vrot.slane %v1690_v15, 5  ;;  %v5897_v5 = vrot.slane %v1690_v15, 6  ;;  %v3640_v51 = vadd.f32 %v3639_v19, %v17128_v59  ;;  %v12740_v47 = vpop.f32.mrf.mxu1 }
 0x451   : > { %v4092_v49 = vadd.f32 %v3996_v6, %v3640_v51  ;;  %v3833_v16 = vsel %vm3766_vm7, %v3830_v14, %v3832_v11  ;;  %v12748_v56 = vsel %vm4842_vm8, %v4906_v17, %v4908_v54  ;;  %v12751_v0 = vsel %vm1175_vm0, %v5895_v32, %v5897_v5 }
 0x452   : > { %17130 = vst [vmem:[#allocation59_spill] sm:$0xff] %v12748_v56  ;;  %v1547_v15 = vpop.f32.mrf.mxu0  ;;  %9945 = vmatmul.msk.f32.gmra.mxu3 %vm3224_vm3, %v3833_v16  ;;  %9993 = vmatmul.msk.f32.gmra.mxu1 %vm3224_vm3, %v4195_v58  ;;  %v1308_v14 = vadd.f32 %v12645_v61, %v17133_v57  ;;  %v6208_v17 = vsel %vm6191_vm9, %v6205_v12, %v6207_v39  ;;  %v4196_v32 = vrot.slane %v12742_v62, 1  ;;  %v6209_v12 = vrot.slane %v12062_v1, 3 }
 0x453   : > { %17131 = vst [vmem:[#allocation175_spill] sm:$0xff] %v12751_v0  ;;  %v1548_v59 = vadd.f32 %v12645_v61, %v1547_v15  ;;  %9899 = vmatmul.msk.f32.gmra.mxu2 %vm3224_vm3, %v12629_v21  ;;  %v12759_v51 = vadd.f32 %v12659_v2, %v4092_v49  ;;  %v17134_v0 = vld [vmem:[#allocation61_spill] sm:$0xff] }
 0x454   : > { %v12769_v2 = vmax.f32 %v1308_v14, 0.0  ;;  %v4197_v49 = vsel %vm4124_vm5, %v4194_v18, %v4196_v32  ;;  %v17139_v18 = vld [vmem:[#allocation19_spill] sm:$0xff] }
 0x455   : > { %17132 = vst [vmem:[#allocation176_spill] sm:$0xff] %v12759_v51  ;;  %v1691_v10 = vmax.f32 %v1548_v59, 0.0  ;;  %v3999_v6 = vpop.f32.mrf.mxu3  ;;  %10242 = vmatmul.msk.f32.gmra.mxu0 %vm3224_vm3, %v6208_v17 }
 0x456   : > { %v3642_v19 = vpop.f32.mrf.mxu2  ;;  %17135 = vst [vmem:[#allocation18_spill] sm:$0xff] %v12769_v2 }
 0x457   : > { %v3834_v58 = vrot.slane %v1691_v10, 4  ;;  %v4910_v16 = vrot.slane %v1691_v10, 5  ;;  %v5899_v15 = vrot.slane %v1691_v10, 6  ;;  %v3643_v56 = vadd.f32 %v3642_v19, %v17134_v0  ;;  %v12767_v33 = vpop.f32.mrf.mxu1 }
 0x459   : > { %v4093_v57 = vadd.f32 %v3999_v6, %v3643_v56  ;;  %v3835_v59 = vsel %vm3766_vm7, %v3832_v11, %v3834_v58  ;;  %v12775_v51 = vsel %vm4842_vm8, %v4908_v54, %v4910_v16  ;;  %v12778_v17 = vsel %vm1175_vm0, %v5897_v5, %v5899_v15 }
 0x45a   : > { %17136 = vst [vmem:[#allocation61_spill] sm:$0xff] %v12775_v51  ;;  %v1550_v10 = vpop.f32.mrf.mxu0  ;;  %9946 = vmatmul.msk.f32.gmra.mxu3 %vm3224_vm3, %v3835_v59  ;;  %9994 = vmatmul.msk.f32.gmra.mxu1 %vm3224_vm3, %v4197_v49  ;;  %v1311_v11 = vadd.f32 %v12645_v61, %v17139_v18  ;;  %v6210_v54 = vsel %vm6191_vm9, %v6207_v39, %v6209_v12  ;;  %v4198_v5 = vrot.slane %v12769_v2, 1  ;;  %v6211_v39 = vrot.slane %v12083_v20, 3 }
 0x45b   : > { %17137 = vst [vmem:[#allocation177_spill] sm:$0xff] %v12778_v17  ;;  %v1551_v0 = vadd.f32 %v12645_v61, %v1550_v10  ;;  %9900 = vmatmul.msk.f32.gmra.mxu2 %vm3224_vm3, %v12661_v8  ;;  %v12786_v56 = vadd.f32 %v12686_v3, %v4093_v57  ;;  %v17140_v17 = vld [vmem:[#allocation63_spill] sm:$0xff] }
 0x45c   : > { %v12796_v3 = vmax.f32 %v1311_v11, 0.0  ;;  %v4199_v57 = vsel %vm4124_vm5, %v4196_v32, %v4198_v5  ;;  %v17145_v32 = vld [vmem:[#allocation20_spill] sm:$0xff] }
 0x45d   : > { %17138 = vst [vmem:[#allocation178_spill] sm:$0xff] %v12786_v56  ;;  %v1692_v14 = vmax.f32 %v1551_v0, 0.0  ;;  %v4002_v6 = vpop.f32.mrf.mxu3  ;;  %10243 = vmatmul.msk.f32.gmra.mxu0 %vm3224_vm3, %v6210_v54 }
 0x45e   : > { %v3645_v19 = vpop.f32.mrf.mxu2  ;;  %17141 = vst [vmem:[#allocation19_spill] sm:$0xff] %v12796_v3 }
 0x45f   : > { %v3836_v49 = vrot.slane %v1692_v14, 4  ;;  %v4912_v59 = vrot.slane %v1692_v14, 5  ;;  %v5901_v10 = vrot.slane %v1692_v14, 6  ;;  %v3646_v51 = vadd.f32 %v3645_v19, %v17140_v17  ;;  %v12794_v29 = vpop.f32.mrf.mxu1 }
 0x461   : > { %v4094_v18 = vadd.f32 %v4002_v6, %v3646_v51  ;;  %v3837_v0 = vsel %vm3766_vm7, %v3834_v58, %v3836_v49  ;;  %v12802_v56 = vsel %vm4842_vm8, %v4910_v16, %v4912_v59  ;;  %v12805_v54 = vsel %vm1175_vm0, %v5899_v15, %v5901_v10 }
 0x462   : > { %17142 = vst [vmem:[#allocation63_spill] sm:$0xff] %v12802_v56  ;;  %v1553_v14 = vpop.f32.mrf.mxu0  ;;  %9947 = vmatmul.msk.f32.gmra.mxu3 %vm3224_vm3, %v3837_v0  ;;  %9995 = vmatmul.msk.f32.gmra.mxu1 %vm3224_vm3, %v4199_v57  ;;  %v1314_v58 = vadd.f32 %v12645_v61, %v17145_v32  ;;  %v6212_v16 = vsel %vm6191_vm9, %v6209_v12, %v6211_v39  ;;  %v4200_v15 = vrot.slane %v12796_v3, 1  ;;  %v6213_v12 = vrot.slane %v12106_v41, 3 }
 0x463   : > { %17143 = vst [vmem:[#allocation179_spill] sm:$0xff] %v12805_v54  ;;  %v1554_v17 = vadd.f32 %v12645_v61, %v1553_v14  ;;  %9901 = vmatmul.msk.f32.gmra.mxu2 %vm3224_vm3, %v12688_v13  ;;  %v12813_v51 = vadd.f32 %v12713_v43, %v4094_v18  ;;  %v17146_v54 = vld [vmem:[#allocation65_spill] sm:$0xff] }
 0x464   : > { %v12823_v43 = vmax.f32 %v1314_v58, 0.0  ;;  %v4201_v18 = vsel %vm4124_vm5, %v4198_v5, %v4200_v15  ;;  %v10096_v5 = vld [vmem:[%s16958_s30 + $0xd8] sm:$0xff] }
 0x465   : > { %17144 = vst [vmem:[#allocation180_spill] sm:$0xff] %v12813_v51  ;;  %v1693_v11 = vmax.f32 %v1554_v17, 0.0  ;;  %v4005_v6 = vpop.f32.mrf.mxu3  ;;  %10244 = vmatmul.msk.f32.gmra.mxu0 %vm3224_vm3, %v6212_v16  ;;  %5380 = vmatpush.msra.mxu1 %v10096_v5 }
 0x466   : > { %v3648_v19 = vpop.f32.mrf.mxu2  ;;  %v4202_v58 = vrot.slane %v12823_v43, 1 }
 0x467   : > { %v3838_v57 = vrot.slane %v1693_v11, 4  ;;  %v4914_v0 = vrot.slane %v1693_v11, 5  ;;  %v5903_v14 = vrot.slane %v1693_v11, 6  ;;  %v3649_v56 = vadd.f32 %v3648_v19, %v17146_v54  ;;  %v12821_v42 = vpop.f32.mrf.mxu1 }
 0x469   : > { %v4095_v32 = vadd.f32 %v4005_v6, %v3649_v56  ;;  %v3839_v17 = vsel %vm3766_vm7, %v3836_v49, %v3838_v57  ;;  %v12829_v51 = vsel %vm4842_vm8, %v4912_v59, %v4914_v0  ;;  %v12832_v16 = vsel %vm1175_vm0, %v5901_v10, %v5903_v14  ;;  %v17150_v49 = vld [vmem:[#allocation21_spill] sm:$0xff]  ;;  %v10095_v6 = vld [vmem:[%s16958_s30 + $0xd0] sm:$0xff] }
 0x46a   : > { %17147 = vst [vmem:[#allocation20_spill] sm:$0xff] %v12829_v51  ;;  %v1556_v11 = vpop.f32.mrf.mxu0  ;;  %9948 = vmatmul.msk.f32.gmra.mxu3 %vm3224_vm3, %v3839_v17  ;;  %9996 = vmatmul.msk.f32.gmra.mxu1 %vm3224_vm3, %v4201_v18  ;;  %v1317_v59 = vadd.f32 %v12645_v61, %v17150_v49  ;;  %v6214_v10 = vsel %vm6191_vm9, %v6211_v39, %v6213_v12  ;;  %v17151_v39 = vld [vmem:[#allocation67_spill] sm:$0xff] }
 0x46b   : > { %17148 = vst [vmem:[#allocation65_spill] sm:$0xff] %v12832_v16  ;;  %v1557_v54 = vadd.f32 %v12645_v61, %v1556_v11  ;;  %9902 = vmatmul.msk.f32.gmra.mxu2 %vm3224_vm3, %v12715_v52  ;;  %v12843_v56 = vadd.f32 %v12740_v47, %v4095_v32  ;;  %5381 = vmatpush.msra.mxu1 %v10095_v6  ;;  %v10094_v47 = vld [vmem:[%s16958_s30 + $0xc8] sm:$0xff]  ;;  %v10093_v6 = vld [vmem:[%s16958_s30 + $0xc0] sm:$0xff] }
 0x46c   : > { %v12859_v51 = vmax.f32 %v1317_v59, 0.0  ;;  %v17167_v52 = vld [vmem:[#allocation117_spill] sm:$0xff] }
 0x46d   : > { %17149 = vst [vmem:[#allocation181_spill] sm:$0xff] %v12843_v56  ;;  %v1694_v19 = vmax.f32 %v1557_v54, 0.0  ;;  %v4008_v18 = vpop.f32.mrf.mxu3  ;;  %10245 = vmatmul.msk.f32.gmra.mxu0 %vm3224_vm3, %v6214_v10  ;;  %5382 = vmatpush.msra.mxu1 %v10094_v47  ;;  %v4203_v54 = vsel %vm4124_vm5, %v4200_v15, %v4202_v58  ;;  %v17152_v56 = vld [vmem:[#allocation105_spill] sm:$0xff] }
 0x46e   : > { %v3651_v17 = vpop.f32.mrf.mxu2  ;;  %v6215_v10 = vrot.slane %v17152_v56, 3 }
 0x46f   : > { %v3840_v32 = vrot.slane %v1694_v19, 4  ;;  %v4916_v11 = vrot.slane %v1694_v19, 5  ;;  %v5905_v5 = vrot.slane %v1694_v19, 6  ;;  %v3652_v49 = vadd.f32 %v3651_v17, %v17151_v39  ;;  %v12857_v16 = vpop.f32.mrf.mxu1  ;;  %v10004_v19 = vld [vmem:[%s16958_s30 + $0x98] sm:$0xff]  ;;  %5383 = vmatpush.msra.mxu1 %v10093_v6 }
 0x470   : > { %v6216_v47 = vsel %vm6191_vm9, %v6213_v12, %v6215_v10  ;;  %4664 = vmatpush.msra.mxu2 %v10004_v19  ;;  %v10050_v12 = vld [vmem:[%s16958_s30 + $0xb8] sm:$0xff] }
 0x471   : > { %v4096_v44 = vadd.f32 %v4008_v18, %v3652_v49  ;;  %v3841_v36 = vsel %vm3766_vm7, %v3838_v57, %v3840_v32  ;;  %v12871_v17 = vsel %vm4842_vm8, %v4914_v0, %v4916_v11  ;;  %v12874_v59 = vsel %vm1175_vm0, %v5903_v14, %v5905_v5  ;;  %5022 = vmatpush.msrb.mxu3 %v10050_v12 }
 0x472   : > { %17153 = vst [vmem:[#allocation21_spill] sm:$0xff] %v12871_v17  ;;  %v1559_v15 = vpop.f32.mrf.mxu0  ;;  %9949 = vmatmul.msk.f32.gmra.mxu3 %vm3224_vm3, %v3841_v36  ;;  %9997 = vmatmul.msk.f32.gmra.mxu1 %vm3224_vm3, %v4203_v54  ;;  %v4204_v0 = vrot.slane %v12859_v51, 1 }
 0x473   : > { %17154 = vst [vmem:[#allocation67_spill] sm:$0xff] %v12874_v59  ;;  %v1560_v18 = vadd.f32 %v12645_v61, %v1559_v15  ;;  %9903 = vmatmul.msk.f32.gmra.mxu2 %vm3224_vm3, %v12742_v62  ;;  %v12882_v57 = vadd.f32 %v12767_v33, %v4096_v44  ;;  %v17156_v15 = vld [vmem:[#allocation69_spill] sm:$0xff] }
 0x474   : > { %v4205_v44 = vsel %vm4124_vm5, %v4202_v58, %v4204_v0  ;;  %v17157_v33 = vld [vmem:[#allocation109_spill] sm:$0xff] }
 0x475   : > { %17155 = vst [vmem:[#allocation105_spill] sm:$0xff] %v12882_v57  ;;  %v1695_v14 = vmax.f32 %v1560_v18, 0.0  ;;  %v4011_v39 = vpop.f32.mrf.mxu3  ;;  %10246 = vmatmul.msk.f32.gmra.mxu0 %vm3224_vm3, %v6216_v47  ;;  %v6217_v57 = vrot.slane %v17157_v33, 3 }
 0x476   : > { %v3654_v36 = vpop.f32.mrf.mxu2 }
 0x477   : > { %v3842_v49 = vrot.slane %v1695_v14, 4  ;;  %v4918_v54 = vrot.slane %v1695_v14, 5  ;;  %v5907_v6 = vrot.slane %v1695_v14, 6  ;;  %v3655_v59 = vadd.f32 %v3654_v36, %v17156_v15  ;;  %v12888_v17 = vpop.f32.mrf.mxu1 }
 0x479   : > { %v4097_v19 = vadd.f32 %v4011_v39, %v3655_v59  ;;  %v3843_v18 = vsel %vm3766_vm7, %v3840_v32, %v3842_v49  ;;  %v12897_v47 = vsel %vm4842_vm8, %v4916_v11, %v4918_v54  ;;  %v12900_v14 = vsel %vm1175_vm0, %v5905_v5, %v5907_v6  ;;  %v17161_v11 = vld [vmem:[#allocation23_spill] sm:$0xff] }
 0x47a   : > { %17158 = vst [vmem:[#allocation69_spill] sm:$0xff] %v12897_v47  ;;  %v1562_v36 = vpop.f32.mrf.mxu0  ;;  %9950 = vmatmul.msk.f32.gmra.mxu3 %vm3224_vm3, %v3843_v18  ;;  %9998 = vmatmul.msk.f32.gmra.mxu1 %vm3224_vm3, %v4205_v44  ;;  %v6218_v32 = vsel %vm6191_vm9, %v6215_v10, %v6217_v57  ;;  %v4206_v39 = vrot.slane %v17161_v11, 1  ;;  %v10049_v5 = vld [vmem:[%s16958_s30 + $0xb0] sm:$0xff] }
 0x47b   : > { %17159 = vst [vmem:[#allocation109_spill] sm:$0xff] %v12900_v14  ;;  %v1563_v58 = vadd.f32 %v12645_v61, %v1562_v36  ;;  %9904 = vmatmul.msk.f32.gmra.mxu2 %vm3224_vm3, %v12769_v2  ;;  %v12908_v59 = vadd.f32 %v12794_v29, %v4097_v19  ;;  %5023 = vmatpush.msrb.mxu3 %v10049_v5  ;;  %v10003_v44 = vld [vmem:[%s16958_s30 + $0x90] sm:$0xff]  ;;  %v10048_v29 = vld [vmem:[%s16958_s30 + $0xa8] sm:$0xff]  ;;  %v10047_v2 = vld [vmem:[%s16958_s30 + $0xa0] sm:$0xff] }
 0x47c   : > { %4665 = vmatpush.msra.mxu2 %v10003_v44  ;;  %v17162_v14 = vld [vmem:[#allocation71_spill] sm:$0xff]  ;;  %v4207_v5 = vsel %vm4124_vm5, %v4204_v0, %v4206_v39 }
 0x47d   : > { %17160 = vst [vmem:[#allocation182_spill] sm:$0xff] %v12908_v59  ;;  %v1696_v15 = vmax.f32 %v1563_v58, 0.0  ;;  %v4014_v12 = vpop.f32.mrf.mxu3  ;;  %10247 = vmatmul.msk.f32.gmra.mxu0 %vm3224_vm3, %v6218_v32  ;;  %5024 = vmatpush.msrb.mxu3 %v10048_v29  ;;  %v10002_v32 = vld [vmem:[%s16958_s30 + $0x88] sm:$0xff]  ;;  %v17163_v59 = vld [vmem:[#allocation113_spill] sm:$0xff] }
 0x47e   : > { %v3657_v18 = vpop.f32.mrf.mxu2  ;;  %v6219_v44 = vrot.slane %v17163_v59, 3  ;;  %4666 = vmatpush.msra.mxu2 %v10002_v32 }
 0x47f   : > { %v3844_v10 = vrot.slane %v1696_v15, 4  ;;  %v4920_v19 = vrot.slane %v1696_v15, 5  ;;  %v5909_v36 = vrot.slane %v1696_v15, 6  ;;  %v3658_v47 = vadd.f32 %v3657_v18, %v17162_v14  ;;  %v12923_v58 = vpop.f32.mrf.mxu1  ;;  %5025 = vmatpush.msrb.mxu3 %v10047_v2  ;;  %v10001_v14 = vld [vmem:[%s16958_s30 + $0x80] sm:$0xff] }
 0x480   : > { %4667 = vmatpush.msra.mxu2 %v10001_v14 }
 0x481   : > { %v4098_v62 = vadd.f32 %v4014_v12, %v3658_v47  ;;  %v3845_v15 = vsel %vm3766_vm7, %v3842_v49, %v3844_v10  ;;  %v12938_v18 = vsel %vm4842_vm8, %v4918_v54, %v4920_v19  ;;  %v12941_v0 = vsel %vm1175_vm0, %v5907_v6, %v5909_v36 }
 0x482   : > { %17164 = vst [vmem:[#allocation23_spill] sm:$0xff] %v12938_v18  ;;  %v1565_v29 = vpop.f32.mrf.mxu0  ;;  %9951 = vmatmul.msk.f32.gmra.mxu3 %vm3224_vm3, %v3845_v15  ;;  %9999 = vmatmul.msk.f32.gmra.mxu1 %vm3224_vm3, %v4207_v5  ;;  %v6220_v49 = vsel %vm6191_vm9, %v6217_v57, %v6219_v44  ;;  %v17166_v5 = vld [vmem:[#allocation73_spill] sm:$0xff] }
 0x483   : > { %17165 = vst [vmem:[#allocation71_spill] sm:$0xff] %v12941_v0  ;;  %v1566_v47 = vadd.f32 %v12645_v61, %v1565_v29  ;;  %9905 = vmatmul.msk.f32.gmra.mxu2 %vm3224_vm3, %v12796_v3  ;;  %v12949_v2 = vadd.f32 %v12821_v42, %v4098_v62  ;;  %v6221_v3 = vrot.slane %v17167_v52, 3 }
 0x485   : > { %v1697_v54 = vmax.f32 %v1566_v47, 0.0  ;;  %v4017_v12 = vpop.f32.mrf.mxu3  ;;  %10248 = vmatmul.msk.f32.gmra.mxu0 %vm3224_vm3, %v6220_v49 }
 0x486   : > { %v3660_v6 = vpop.f32.mrf.mxu2 }
 0x487   : > { %v3846_v32 = vrot.slane %v1697_v54, 4  ;;  %v4922_v15 = vrot.slane %v1697_v54, 5  ;;  %v5911_v0 = vrot.slane %v1697_v54, 6  ;;  %v3661_v18 = vadd.f32 %v3660_v6, %v17166_v5  ;;  %v12954_v29 = vpop.f32.mrf.mxu1  ;;  %v17170_v5 = vld [vmem:[#allocation121_spill] sm:$0xff] }
 0x489   : > { %v4099_v46 = vadd.f32 %v4017_v12, %v3661_v18  ;;  %v3847_v42 = vsel %vm3766_vm7, %v3844_v10, %v3846_v32  ;;  %v12959_v62 = vsel %vm4842_vm8, %v4920_v19, %v4922_v15  ;;  %v12962_v57 = vsel %vm1175_vm0, %v5909_v36, %v5911_v0 }
 0x48a   : > { %17168 = vst [vmem:[#allocation113_spill] sm:$0xff] %v12962_v57  ;;  %v1568_v14 = vpop.f32.mrf.mxu0  ;;  %9952 = vmatmul.msk.f32.gmra.mxu3 %vm3224_vm3, %v3847_v42  ;;  %10000 = vmatmul.msk.f32.gmra.mxu1 %vm3224_vm3, %v4206_v39  ;;  %v5202_v10 = vrot.slane %v11891_v25, 2  ;;  %v6222_v19 = vsel %vm6191_vm9, %v6219_v44, %v6221_v3  ;;  %v5201_v39 = vrot.slane %v11897_v63, 2  ;;  %v6223_v42 = vrot.slane %v17170_v5, 3 }
 0x48b   : > { %v1569_v47 = vadd.f32 %v12645_v61, %v1568_v14  ;;  %9906 = vmatmul.msk.f32.gmra.mxu2 %vm3224_vm3, %v12823_v43  ;;  %v12970_v18 = vadd.f32 %v12857_v16, %v4099_v46  ;;  %v17169_v16 = vld [vmem:[#allocation75_spill] sm:$0xff] }
 0x48c   : > { %v5203_v44 = vsel %vm5200_vm10, %v5201_v39, %v5202_v10 }
 0x48d   : > { %v12974_v49 = vmax.f32 %v1569_v47, 0.0  ;;  %v4020_v36 = vpop.f32.mrf.mxu3  ;;  %10249 = vmatmul.msk.f32.gmra.mxu0 %vm3224_vm3, %v6222_v19 }
 0x48e   : > { %v3663_v54 = vpop.f32.mrf.mxu2 }
 0x48f   : > { %v3848_v61 = vrot.slane %v12974_v49, 4  ;;  %v16929_v12 = vrot.slane %v12974_v49, 5  ;;  %v16928_v46 = vrot.slane %v12974_v49, 6  ;;  %v3664_v6 = vadd.f32 %v3663_v54, %v17169_v16  ;;  %v4387_v25 = vpop.f32.mrf.mxu1 }
 0x491   : > { %v4100_v14 = vadd.f32 %v4020_v36, %v3664_v6  ;;  %v3849_v47 = vsel %vm3766_vm7, %v3846_v32, %v3848_v61  ;;  %v12988_v63 = vsel %vm4842_vm8, %v4922_v15, %v16929_v12  ;;  %v12993_v19 = vsel %vm1175_vm0, %v5911_v0, %v16928_v46  ;;  %v17172_v0 = vld [vmem:[#allocation77_spill] sm:$0xff] }
 0x492   : > { %17171 = vst [vmem:[#allocation73_spill] sm:$0xff] %v12993_v19  ;;  %9953 = vmatmul.msk.f32.gmra.mxu3 %vm3224_vm3, %v3849_v47  ;;  %10097 = vmatmul.msk.f32.vlgmr.msra.gmra.mxu1 %vm3224_vm3, %v5203_v44  ;;  %v6224_v32 = vsel %vm6191_vm9, %v6221_v3, %v6223_v42  ;;  %v5204_v15 = vrot.slane %v11910_v55, 2  ;;  %v6225_v47 = vrot.slane %v12238_v30, 3  ;;  %v4483_v12 = vrot.slane %v17161_v11, 7 }
 0x493   : > { %9907 = vmatmul.msk.f32.gmra.mxu2 %vm3224_vm3, %v12859_v51  ;;  %v13000_v36 = vadd.f32 %v12888_v17, %v4100_v14  ;;  %v5206_v14 = vrot.slane %v11927_v22, 2 }
 0x494   : > { %v5205_v46 = vsel %vm5200_vm10, %v5202_v10, %v5204_v15  ;;  %v6226_v55 = vsel %vm6191_vm9, %v6223_v42, %v6225_v47  ;;  %v17176_v42 = vld [vmem:[#allocation80_spill] sm:$0xff] }
 0x495   : > { %v4023_v39 = vpop.f32.mrf.mxu3  ;;  %10250 = vmatmul.msk.f32.gmra.mxu0 %vm3224_vm3, %v6224_v32  ;;  %v17173_v32 = vld [vmem:[#allocation24_spill] sm:$0xff]  ;;  %v17177_v19 = vrot.slane %v17176_v42, 5  ;;  %v5207_v22 = vsel %vm5200_vm10, %v5204_v15, %v5206_v14  ;;  %v17179_v42 = vld [vmem:[#allocation81_spill] sm:$0xff] }
 0x496   : > { %v3666_v54 = vpop.f32.mrf.mxu2 }
 0x497   : > { %v3667_v16 = vadd.f32 %v3666_v54, %v17172_v0  ;;  %v4390_v6 = vpop.f32.mrf.mxu1  ;;  %v17174_v54 = vld [vmem:[#allocation79_spill] sm:$0xff] }
 0x499   : > { %v4101_v44 = vadd.f32 %v4023_v39, %v3667_v16  ;;  %v4484_v39 = vrot.slane %v17173_v32, 7 }
 0x49a   : > { %9954 = vmatmul.msk.f32.gmra.mxu3 %vm3224_vm3, %v3848_v61  ;;  %10098 = vmatmul.msk.f32.gmra.mxu1 %vm3224_vm3, %v5205_v46  ;;  %v17175_v46 = vld [vmem:[#allocation78_spill] sm:$0xff] }
 0x49b   : > { %9908 = vmatmul.msk.f32.gmra.mxu2 %vm3224_vm3, %v17161_v11  ;;  %v13013_v3 = vadd.f32 %v12923_v58, %v4101_v44  ;;  %v4843_v16 = vrot.slane %v17175_v46, 5  ;;  %v6227_v58 = vrot.slane %v12259_v7, 3 }
 0x49d   : > { %v4026_v17 = vpop.f32.mrf.mxu3  ;;  %10251 = vmatmul.msk.f32.gmra.mxu0 %vm3224_vm3, %v6226_v55  ;;  %v4845_v55 = vsel %vm4842_vm8, %v4843_v16, %v17177_v19  ;;  %v6228_v57 = vsel %vm6191_vm9, %v6225_v47, %v6227_v58  ;;  %v5208_v19 = vrot.slane %v11946_v24, 2 }
 0x49e   : > { %v3669_v10 = vpop.f32.mrf.mxu2 }
 0x49f   : > { %v3670_v61 = vadd.f32 %v3669_v10, %v17174_v54  ;;  %v4393_v0 = vpop.f32.mrf.mxu1  ;;  %v4485_v10 = vsel %vm4482_vm11, %v4483_v12, %v4484_v39  ;;  %v6229_v12 = vrot.slane %v12284_v48, 3 }
 0x4a1   : > { %v4102_v44 = vadd.f32 %v4026_v17, %v3670_v61  ;;  %v17178_v61 = vld [vmem:[#allocation25_spill] sm:$0xff]  ;;  %v6230_v47 = vsel %vm6191_vm9, %v6227_v58, %v6229_v12 }
 0x4a2   : > { %10051 = vmatmul.msk.f32.vlgmr.msrb.gmra.mxu3 %vm3224_vm3, %v4845_v55  ;;  %10099 = vmatmul.msk.f32.gmra.mxu1 %vm3224_vm3, %v5207_v22  ;;  %v4486_v15 = vrot.slane %v17178_v61, 7 }
 0x4a3   : > { %10005 = vmatmul.msk.f32.vlgmr.msra.gmra.mxu2 %vm3224_vm3, %v4485_v10  ;;  %v13032_v54 = vadd.f32 %v12954_v29, %v4102_v44  ;;  %v5209_v10 = vsel %vm5200_vm10, %v5206_v14, %v5208_v19  ;;  %v17180_v29 = vld [vmem:[#allocation84_spill] sm:$0xff] }
 0x4a5   : > { %v4029_v17 = vpop.f32.mrf.mxu3  ;;  %10252 = vmatmul.msk.f32.gmra.mxu0 %vm3224_vm3, %v6228_v57  ;;  %v4487_v57 = vsel %vm4482_vm11, %v4484_v39, %v4486_v15  ;;  %v13054_v39 = vpop.f32.mrf.mxu0 }
 0x4a6   : > { %v3672_v16 = vpop.f32.mrf.mxu2  ;;  %17183 = vst [vmem:[#allocation117_spill] sm:$0xff] %v13054_v39  ;;  %v17186_v39 = vld [vmem:[#allocation86_spill] sm:$0xff] }
 0x4a7   : > { %v3673_v55 = vadd.f32 %v3672_v16, %v17179_v42  ;;  %v4396_v22 = vpop.f32.mrf.mxu1  ;;  %v17181_v16 = vld [vmem:[#allocation26_spill] sm:$0xff] }
 0x4a8   : > { %v4488_v14 = vrot.slane %v17181_v16, 7 }
 0x4a9   : > { %v4103_v32 = vadd.f32 %v4029_v17, %v3673_v55  ;;  %v5210_v17 = vrot.slane %v11967_v27, 2  ;;  %v17182_v55 = vld [vmem:[#allocation83_spill] sm:$0xff] }
 0x4aa   : > { %10052 = vmatmul.msk.f32.gmra.mxu3 %vm3224_vm3, %v17180_v29  ;;  %10100 = vmatmul.msk.f32.gmra.mxu1 %vm3224_vm3, %v5209_v10  ;;  %v6231_v10 = vrot.slane %v12307_v38, 3  ;;  %v4489_v27 = vsel %vm4482_vm11, %v4486_v15, %v4488_v14 }
 0x4ab   : > { %10006 = vmatmul.msk.f32.gmra.mxu2 %vm3224_vm3, %v4487_v57  ;;  %v13046_v24 = vadd.f32 %v4387_v25, %v4103_v32  ;;  %v5211_v25 = vsel %vm5200_vm10, %v5208_v19, %v5210_v17  ;;  %v17184_v32 = vld [vmem:[#allocation87_spill] sm:$0xff] }
 0x4ad   : > { %v4032_v44 = vpop.f32.mrf.mxu3  ;;  %10253 = vmatmul.msk.f32.gmra.mxu0 %vm3224_vm3, %v6230_v47  ;;  %v6232_v47 = vsel %vm6191_vm9, %v6229_v12, %v6231_v10 }
 0x4ae   : > { %v3675_v42 = vpop.f32.mrf.mxu2 }
 0x4af   : > { %v3676_v29 = vadd.f32 %v3675_v42, %v17182_v55  ;;  %v4399_v61 = vpop.f32.mrf.mxu1  ;;  %v17185_v55 = vld [vmem:[#allocation27_spill] sm:$0xff] }
 0x4b0   : > { %v4490_v19 = vrot.slane %v17185_v55, 7 }
 0x4b1   : > { %v4104_v57 = vadd.f32 %v4032_v44, %v3676_v29  ;;  %v5212_v44 = vrot.slane %v11990_v35, 2 }
 0x4b2   : > { %10053 = vmatmul.msk.f32.gmra.mxu3 %vm3224_vm3, %v17184_v32  ;;  %10101 = vmatmul.msk.f32.gmra.mxu1 %vm3224_vm3, %v5211_v25  ;;  %v6233_v25 = vrot.slane %v12330_v31, 3  ;;  %v4491_v12 = vsel %vm4482_vm11, %v4488_v14, %v4490_v19  ;;  %v6235_v14 = vrot.slane %v12356_v53, 3 }
 0x4b3   : > { %10007 = vmatmul.msk.f32.gmra.mxu2 %vm3224_vm3, %v4489_v27  ;;  %v13062_v58 = vadd.f32 %v4390_v6, %v4104_v57  ;;  %v5213_v27 = vsel %vm5200_vm10, %v5210_v17, %v5212_v44  ;;  %v17187_v6 = vld [vmem:[#allocation90_spill] sm:$0xff]  ;;  %v13075_v57 = vpop.f32.mrf.mxu0  ;;  %v5214_v17 = vrot.slane %v12013_v9, 2 }
 0x4b4   : > { %17188 = vst [vmem:[#allocation75_spill] sm:$0xff] %v13075_v57 }
 0x4b5   : > { %v4035_v42 = vpop.f32.mrf.mxu3  ;;  %10254 = vmatmul.msk.f32.gmra.mxu0 %vm3224_vm3, %v6232_v47 }
 0x4b6   : > { %v3678_v29 = vpop.f32.mrf.mxu2 }
 0x4b7   : > { %v3679_v32 = vadd.f32 %v3678_v29, %v17186_v39  ;;  %v4402_v16 = vpop.f32.mrf.mxu1  ;;  %v6234_v39 = vsel %vm6191_vm9, %v6231_v10, %v6233_v25 }
 0x4b9   : > { %v4105_v15 = vadd.f32 %v4035_v42, %v3679_v32  ;;  %v17189_v42 = vld [vmem:[#allocation28_spill] sm:$0xff] }
 0x4ba   : > { %10054 = vmatmul.msk.f32.gmra.mxu3 %vm3224_vm3, %v17187_v6  ;;  %10102 = vmatmul.msk.f32.gmra.mxu1 %vm3224_vm3, %v5213_v27  ;;  %v4492_v29 = vrot.slane %v17189_v42, 7  ;;  %v17190_v6 = vld [vmem:[#allocation89_spill] sm:$0xff] }
 0x4bb   : > { %10008 = vmatmul.msk.f32.gmra.mxu2 %vm3224_vm3, %v4491_v12  ;;  %v13078_v35 = vadd.f32 %v4393_v0, %v4105_v15  ;;  %v5215_v12 = vsel %vm5200_vm10, %v5212_v44, %v5214_v17  ;;  %v17191_v0 = vld [vmem:[#allocation93_spill] sm:$0xff]  ;;  %v6236_v15 = vsel %vm6191_vm9, %v6233_v25, %v6235_v14  ;;  %v5216_v44 = vrot.slane %v12034_v26, 2 }
 0x4bc   : > { %v4493_v10 = vsel %vm4482_vm11, %v4490_v19, %v4492_v29  ;;  %v6237_v19 = vrot.slane %v12382_v40, 3 }
 0x4bd   : > { %v4038_v47 = vpop.f32.mrf.mxu3  ;;  %10255 = vmatmul.msk.f32.gmra.mxu0 %vm3224_vm3, %v6234_v39  ;;  %v13095_v39 = vpop.f32.mrf.mxu0 }
 0x4be   : > { %v3681_v32 = vpop.f32.mrf.mxu2  ;;  %17192 = vst [vmem:[#allocation121_spill] sm:$0xff] %v13095_v39 }
 0x4bf   : > { %v3682_v27 = vadd.f32 %v3681_v32, %v17190_v6  ;;  %v4405_v55 = vpop.f32.mrf.mxu1 }
 0x4c1   : > { %v4106_v57 = vadd.f32 %v4038_v47, %v3682_v27  ;;  %v17193_v47 = vld [vmem:[#allocation29_spill] sm:$0xff] }
 0x4c2   : > { %10055 = vmatmul.msk.f32.gmra.mxu3 %vm3224_vm3, %v17191_v0  ;;  %10103 = vmatmul.msk.f32.gmra.mxu1 %vm3224_vm3, %v5215_v12  ;;  %v4494_v6 = vrot.slane %v17193_v47, 7  ;;  %v17194_v0 = vld [vmem:[#allocation92_spill] sm:$0xff] }
 0x4c3   : > { %10009 = vmatmul.msk.f32.gmra.mxu2 %vm3224_vm3, %v4493_v10  ;;  %v13092_v9 = vadd.f32 %v4396_v22, %v4106_v57  ;;  %v5217_v22 = vsel %vm5200_vm10, %v5214_v17, %v5216_v44  ;;  %v17195_v57 = vld [vmem:[#allocation96_spill] sm:$0xff] }
 0x4c4   : > { %v4495_v25 = vsel %vm4482_vm11, %v4492_v29, %v4494_v6  ;;  %v6239_v29 = vrot.slane %v12408_v34, 3 }
 0x4c5   : > { %v4041_v32 = vpop.f32.mrf.mxu3  ;;  %10256 = vmatmul.msk.f32.gmra.mxu0 %vm3224_vm3, %v6236_v15  ;;  %v6238_v15 = vsel %vm6191_vm9, %v6235_v14, %v6237_v19  ;;  %v13114_v39 = vpop.f32.mrf.mxu0 }
 0x4c6   : > { %v3684_v27 = vpop.f32.mrf.mxu2  ;;  %17197 = vst [vmem:[#allocation77_spill] sm:$0xff] %v13114_v39  ;;  %v17201_v39 = vld [vmem:[#allocation98_spill] sm:$0xff] }
 0x4c7   : > { %v3685_v12 = vadd.f32 %v3684_v27, %v17194_v0  ;;  %v4408_v42 = vpop.f32.mrf.mxu1  ;;  %v17196_v0 = vld [vmem:[#allocation30_spill] sm:$0xff] }
 0x4c8   : > { %v4496_v17 = vrot.slane %v17196_v0, 7 }
 0x4c9   : > { %v4107_v10 = vadd.f32 %v4041_v32, %v3685_v12  ;;  %v5218_v32 = vrot.slane %v12062_v1, 2 }
 0x4ca   : > { %10056 = vmatmul.msk.f32.gmra.mxu3 %vm3224_vm3, %v17195_v57  ;;  %10104 = vmatmul.msk.f32.gmra.mxu1 %vm3224_vm3, %v5217_v22  ;;  %v17198_v57 = vld [vmem:[#allocation95_spill] sm:$0xff]  ;;  %v4497_v1 = vsel %vm4482_vm11, %v4494_v6, %v4496_v17 }
 0x4cb   : > { %10010 = vmatmul.msk.f32.gmra.mxu2 %vm3224_vm3, %v4495_v25  ;;  %v13108_v26 = vadd.f32 %v4399_v61, %v4107_v10  ;;  %v5219_v61 = vsel %vm5200_vm10, %v5216_v44, %v5218_v32  ;;  %v17199_v10 = vld [vmem:[#allocation99_spill] sm:$0xff] }
 0x4cd   : > { %v4044_v27 = vpop.f32.mrf.mxu3  ;;  %10257 = vmatmul.msk.f32.gmra.mxu0 %vm3224_vm3, %v6238_v15  ;;  %v6240_v15 = vsel %vm6191_vm9, %v6237_v19, %v6239_v29  ;;  %v13132_v6 = vpop.f32.mrf.mxu0 }
 0x4ce   : > { %v3687_v12 = vpop.f32.mrf.mxu2  ;;  %17202 = vst [vmem:[#allocation79_spill] sm:$0xff] %v13132_v6  ;;  %v17205_v6 = vld [vmem:[#allocation101_spill] sm:$0xff] }
 0x4cf   : > { %v3688_v22 = vadd.f32 %v3687_v12, %v17198_v57  ;;  %v4411_v47 = vpop.f32.mrf.mxu1  ;;  %v17200_v57 = vld [vmem:[#allocation31_spill] sm:$0xff] }
 0x4d0   : > { %v4498_v44 = vrot.slane %v17200_v57, 7 }
 0x4d1   : > { %v4108_v25 = vadd.f32 %v4044_v27, %v3688_v22  ;;  %v5220_v27 = vrot.slane %v12083_v20, 2 }
 0x4d2   : > { %10057 = vmatmul.msk.f32.gmra.mxu3 %vm3224_vm3, %v17199_v10  ;;  %10105 = vmatmul.msk.f32.gmra.mxu1 %vm3224_vm3, %v5219_v61  ;;  %v6241_v61 = vrot.slane %v12437_v4, 3  ;;  %v4499_v20 = vsel %vm4482_vm11, %v4496_v17, %v4498_v44 }
 0x4d3   : > { %10011 = vmatmul.msk.f32.gmra.mxu2 %vm3224_vm3, %v4497_v1  ;;  %v13124_v14 = vadd.f32 %v4402_v16, %v4108_v25  ;;  %v5221_v16 = vsel %vm5200_vm10, %v5218_v32, %v5220_v27  ;;  %v17203_v25 = vld [vmem:[#allocation102_spill] sm:$0xff] }
 0x4d5   : > { %v4047_v12 = vpop.f32.mrf.mxu3  ;;  %10258 = vmatmul.msk.f32.gmra.mxu0 %vm3224_vm3, %v6240_v15 }
 0x4d6   : > { %v3690_v22 = vpop.f32.mrf.mxu2 }
 0x4d7   : > { %v3691_v10 = vadd.f32 %v3690_v22, %v17201_v39  ;;  %v4414_v0 = vpop.f32.mrf.mxu1  ;;  %v6242_v39 = vsel %vm6191_vm9, %v6239_v29, %v6241_v61  ;;  %v17204_v22 = vld [vmem:[#allocation32_spill] sm:$0xff] }
 0x4d8   : > { %v4500_v32 = vrot.slane %v17204_v22, 7 }
 0x4d9   : > { %v4109_v1 = vadd.f32 %v4047_v12, %v3691_v10  ;;  %v5222_v12 = vrot.slane %v12106_v41, 2 }
 0x4da   : > { %10058 = vmatmul.msk.f32.gmra.mxu3 %vm3224_vm3, %v17203_v25  ;;  %10106 = vmatmul.msk.f32.gmra.mxu1 %vm3224_vm3, %v5221_v16  ;;  %v6243_v16 = vrot.slane %v12469_v37, 3  ;;  %v4501_v29 = vsel %vm4482_vm11, %v4498_v44, %v4500_v32  ;;  %v6245_v44 = vrot.slane %v12495_v23, 3 }
 0x4db   : > { %10012 = vmatmul.msk.f32.gmra.mxu2 %vm3224_vm3, %v4499_v20  ;;  %v13140_v19 = vadd.f32 %v4405_v55, %v4109_v1  ;;  %v5223_v20 = vsel %vm5200_vm10, %v5220_v27, %v5222_v12  ;;  %v17206_v55 = vld [vmem:[#allocation106_spill] sm:$0xff]  ;;  %v13153_v1 = vpop.f32.mrf.mxu0  ;;  %v5224_v27 = vrot.slane %v17152_v56, 2 }
 0x4dc   : > { %17207 = vst [vmem:[#allocation78_spill] sm:$0xff] %v13153_v1 }
 0x4dd   : > { %v4050_v15 = vpop.f32.mrf.mxu3  ;;  %10259 = vmatmul.msk.f32.gmra.mxu0 %vm3224_vm3, %v6242_v39 }
 0x4de   : > { %v3693_v10 = vpop.f32.mrf.mxu2 }
 0x4df   : > { %v3694_v25 = vadd.f32 %v3693_v10, %v17205_v6  ;;  %v4417_v57 = vpop.f32.mrf.mxu1  ;;  %v6244_v6 = vsel %vm6191_vm9, %v6241_v61, %v6243_v16 }
 0x4e1   : > { %v4110_v17 = vadd.f32 %v4050_v15, %v3694_v25  ;;  %v17208_v15 = vld [vmem:[#allocation33_spill] sm:$0xff] }
 0x4e2   : > { %10059 = vmatmul.msk.f32.gmra.mxu3 %vm3224_vm3, %v17206_v55  ;;  %10107 = vmatmul.msk.f32.gmra.mxu1 %vm3224_vm3, %v5223_v20  ;;  %v4502_v10 = vrot.slane %v17208_v15, 7  ;;  %v17209_v55 = vld [vmem:[#allocation104_spill] sm:$0xff] }
 0x4e3   : > { %10013 = vmatmul.msk.f32.gmra.mxu2 %vm3224_vm3, %v4501_v29  ;;  %v13156_v41 = vadd.f32 %v4408_v42, %v4110_v17  ;;  %v5225_v29 = vsel %vm5200_vm10, %v5222_v12, %v5224_v27  ;;  %v17210_v42 = vld [vmem:[#allocation110_spill] sm:$0xff]  ;;  %v6246_v17 = vsel %vm6191_vm9, %v6243_v16, %v6245_v44  ;;  %v5226_v12 = vrot.slane %v17157_v33, 2 }
 0x4e4   : > { %v4503_v61 = vsel %vm4482_vm11, %v4500_v32, %v4502_v10  ;;  %v6247_v32 = vrot.slane %v12521_v50, 3 }
 0x4e5   : > { %v4053_v39 = vpop.f32.mrf.mxu3  ;;  %10260 = vmatmul.msk.f32.gmra.mxu0 %vm3224_vm3, %v6244_v6  ;;  %v13173_v6 = vpop.f32.mrf.mxu0 }
 0x4e6   : > { %v3696_v25 = vpop.f32.mrf.mxu2  ;;  %17211 = vst [vmem:[#allocation80_spill] sm:$0xff] %v13173_v6 }
 0x4e7   : > { %v3697_v20 = vadd.f32 %v3696_v25, %v17209_v55  ;;  %v4420_v22 = vpop.f32.mrf.mxu1 }
 0x4e9   : > { %v4111_v1 = vadd.f32 %v4053_v39, %v3697_v20  ;;  %v17212_v39 = vld [vmem:[#allocation34_spill] sm:$0xff] }
 0x4ea   : > { %10060 = vmatmul.msk.f32.gmra.mxu3 %vm3224_vm3, %v17210_v42  ;;  %10108 = vmatmul.msk.f32.gmra.mxu1 %vm3224_vm3, %v5225_v29  ;;  %v4504_v55 = vrot.slane %v17212_v39, 7  ;;  %v17213_v42 = vld [vmem:[#allocation108_spill] sm:$0xff] }
 0x4eb   : > { %10014 = vmatmul.msk.f32.gmra.mxu2 %vm3224_vm3, %v4503_v61  ;;  %v13170_v56 = vadd.f32 %v4411_v47, %v4111_v1  ;;  %v5227_v47 = vsel %vm5200_vm10, %v5224_v27, %v5226_v12  ;;  %v17214_v1 = vld [vmem:[#allocation114_spill] sm:$0xff] }
 0x4ec   : > { %v4505_v16 = vsel %vm4482_vm11, %v4502_v10, %v4504_v55  ;;  %v6249_v10 = vrot.slane %v12547_v45, 3 }
 0x4ed   : > { %v4056_v25 = vpop.f32.mrf.mxu3  ;;  %10261 = vmatmul.msk.f32.gmra.mxu0 %vm3224_vm3, %v6246_v17  ;;  %v6248_v17 = vsel %vm6191_vm9, %v6245_v44, %v6247_v32  ;;  %v13192_v6 = vpop.f32.mrf.mxu0 }
 0x4ee   : > { %v3699_v20 = vpop.f32.mrf.mxu2  ;;  %17216 = vst [vmem:[#allocation81_spill] sm:$0xff] %v13192_v6  ;;  %v17220_v6 = vld [vmem:[#allocation116_spill] sm:$0xff] }
 0x4ef   : > { %v3700_v29 = vadd.f32 %v3699_v20, %v17213_v42  ;;  %v4423_v15 = vpop.f32.mrf.mxu1  ;;  %v17215_v42 = vld [vmem:[#allocation35_spill] sm:$0xff] }
 0x4f0   : > { %v4506_v27 = vrot.slane %v17215_v42, 7 }
 0x4f1   : > { %v4112_v61 = vadd.f32 %v4056_v25, %v3700_v29  ;;  %v5228_v25 = vrot.slane %v17163_v59, 2 }
 0x4f2   : > { %10061 = vmatmul.msk.f32.gmra.mxu3 %vm3224_vm3, %v17214_v1  ;;  %10109 = vmatmul.msk.f32.gmra.mxu1 %vm3224_vm3, %v5227_v47  ;;  %v17217_v1 = vld [vmem:[#allocation112_spill] sm:$0xff]  ;;  %v4507_v59 = vsel %vm4482_vm11, %v4504_v55, %v4506_v27 }
 0x4f3   : > { %10015 = vmatmul.msk.f32.gmra.mxu2 %vm3224_vm3, %v4505_v16  ;;  %v13186_v33 = vadd.f32 %v4414_v0, %v4112_v61  ;;  %v5229_v0 = vsel %vm5200_vm10, %v5226_v12, %v5228_v25  ;;  %v17218_v61 = vld [vmem:[#allocation118_spill] sm:$0xff] }
 0x4f5   : > { %v4059_v20 = vpop.f32.mrf.mxu3  ;;  %10262 = vmatmul.msk.f32.gmra.mxu0 %vm3224_vm3, %v6248_v17  ;;  %v6250_v17 = vsel %vm6191_vm9, %v6247_v32, %v6249_v10  ;;  %v13210_v55 = vpop.f32.mrf.mxu0 }
 0x4f6   : > { %v3702_v29 = vpop.f32.mrf.mxu2  ;;  %17221 = vst [vmem:[#allocation84_spill] sm:$0xff] %v13210_v55  ;;  %v17224_v55 = vld [vmem:[#allocation120_spill] sm:$0xff] }
 0x4f7   : > { %v3703_v47 = vadd.f32 %v3702_v29, %v17217_v1  ;;  %v4426_v39 = vpop.f32.mrf.mxu1  ;;  %v17219_v1 = vld [vmem:[#allocation36_spill] sm:$0xff] }
 0x4f8   : > { %v4508_v12 = vrot.slane %v17219_v1, 7 }
 0x4f9   : > { %v4113_v16 = vadd.f32 %v4059_v20, %v3703_v47  ;;  %v5230_v20 = vrot.slane %v17167_v52, 2 }
 0x4fa   : > { %10062 = vmatmul.msk.f32.gmra.mxu3 %vm3224_vm3, %v17218_v61  ;;  %10110 = vmatmul.msk.f32.gmra.mxu1 %vm3224_vm3, %v5229_v0  ;;  %v6251_v0 = vrot.slane %v12575_v60, 3  ;;  %v4509_v52 = vsel %vm4482_vm11, %v4506_v27, %v4508_v12 }
 0x4fb   : > { %10016 = vmatmul.msk.f32.gmra.mxu2 %vm3224_vm3, %v4507_v59  ;;  %v13202_v44 = vadd.f32 %v4417_v57, %v4113_v16  ;;  %v5231_v57 = vsel %vm5200_vm10, %v5228_v25, %v5230_v20  ;;  %v17222_v16 = vld [vmem:[#allocation122_spill] sm:$0xff] }
 0x4fd   : > { %v4062_v29 = vpop.f32.mrf.mxu3  ;;  %10263 = vmatmul.msk.f32.gmra.mxu0 %vm3224_vm3, %v6250_v17 }
 0x4fe   : > { %v3705_v47 = vpop.f32.mrf.mxu2 }
 0x4ff   : > { %v3706_v61 = vadd.f32 %v3705_v47, %v17220_v6  ;;  %v4429_v42 = vpop.f32.mrf.mxu1  ;;  %v6252_v6 = vsel %vm6191_vm9, %v6249_v10, %v6251_v0  ;;  %v17223_v47 = vld [vmem:[#allocation37_spill] sm:$0xff] }
 0x500   : > { %v4510_v25 = vrot.slane %v17223_v47, 7 }
 0x501   : > { %v4114_v59 = vadd.f32 %v4062_v29, %v3706_v61  ;;  %v5232_v29 = vrot.slane %v17170_v5, 2 }
 0x502   : > { %10063 = vmatmul.msk.f32.gmra.mxu3 %vm3224_vm3, %v17222_v16  ;;  %10111 = vmatmul.msk.f32.gmra.mxu1 %vm3224_vm3, %v5231_v57  ;;  %v6253_v57 = vrot.slane %v12602_v28, 3  ;;  %v4511_v10 = vsel %vm4482_vm11, %v4508_v12, %v4510_v25  ;;  %v6255_v12 = vrot.slane %v12629_v21, 3 }
 0x503   : > { %10017 = vmatmul.msk.f32.gmra.mxu2 %vm3224_vm3, %v4509_v52  ;;  %v13218_v32 = vadd.f32 %v4420_v22, %v4114_v59  ;;  %v5233_v52 = vsel %vm5200_vm10, %v5230_v20, %v5232_v29  ;;  %v17225_v22 = vld [vmem:[#allocation125_spill] sm:$0xff]  ;;  %v13231_v59 = vpop.f32.mrf.mxu0  ;;  %v5234_v20 = vrot.slane %v12238_v30, 2 }
 0x504   : > { %17226 = vst [vmem:[#allocation83_spill] sm:$0xff] %v13231_v59 }
 0x505   : > { %v4065_v17 = vpop.f32.mrf.mxu3  ;;  %10264 = vmatmul.msk.f32.gmra.mxu0 %vm3224_vm3, %v6252_v6 }
 0x506   : > { %v3708_v61 = vpop.f32.mrf.mxu2 }
 0x507   : > { %v3709_v16 = vadd.f32 %v3708_v61, %v17224_v55  ;;  %v4432_v1 = vpop.f32.mrf.mxu1  ;;  %v6254_v55 = vsel %vm6191_vm9, %v6251_v0, %v6253_v57 }
 0x509   : > { %v4115_v27 = vadd.f32 %v4065_v17, %v3709_v16  ;;  %v17227_v17 = vld [vmem:[#allocation38_spill] sm:$0xff] }
 0x50a   : > { %10064 = vmatmul.msk.f32.gmra.mxu3 %vm3224_vm3, %v17225_v22  ;;  %10112 = vmatmul.msk.f32.gmra.mxu1 %vm3224_vm3, %v5233_v52  ;;  %v4512_v61 = vrot.slane %v17227_v17, 7  ;;  %v17228_v22 = vld [vmem:[#allocation124_spill] sm:$0xff] }
 0x50b   : > { %10018 = vmatmul.msk.f32.gmra.mxu2 %vm3224_vm3, %v4511_v10  ;;  %v13234_v5 = vadd.f32 %v4423_v15, %v4115_v27  ;;  %v5235_v10 = vsel %vm5200_vm10, %v5232_v29, %v5234_v20  ;;  %v17229_v15 = vld [vmem:[#allocation127_spill] sm:$0xff]  ;;  %v6256_v27 = vsel %vm6191_vm9, %v6253_v57, %v6255_v12  ;;  %v5236_v29 = vrot.slane %v12259_v7, 2 }
 0x50c   : > { %v4513_v0 = vsel %vm4482_vm11, %v4510_v25, %v4512_v61  ;;  %v6257_v25 = vrot.slane %v12661_v8, 3 }
 0x50d   : > { %v4068_v6 = vpop.f32.mrf.mxu3  ;;  %10265 = vmatmul.msk.f32.gmra.mxu0 %vm3224_vm3, %v6254_v55  ;;  %v13251_v55 = vpop.f32.mrf.mxu0 }
 0x50e   : > { %v3711_v16 = vpop.f32.mrf.mxu2  ;;  %17230 = vst [vmem:[#allocation87_spill] sm:$0xff] %v13251_v55 }
 0x50f   : > { %v3712_v52 = vadd.f32 %v3711_v16, %v17228_v22  ;;  %v5385_v47 = vpop.f32.mrf.mxu1 }
 0x511   : > { %v4116_v59 = vadd.f32 %v4068_v6, %v3712_v52  ;;  %v17231_v6 = vld [vmem:[#allocation39_spill] sm:$0xff] }
 0x512   : > { %10065 = vmatmul.msk.f32.gmra.mxu3 %vm3224_vm3, %v17229_v15  ;;  %10113 = vmatmul.msk.f32.gmra.mxu1 %vm3224_vm3, %v5235_v10  ;;  %v4514_v22 = vrot.slane %v17231_v6, 7  ;;  %v17232_v15 = vld [vmem:[#allocation129_spill] sm:$0xff] }
 0x513   : > { %10019 = vmatmul.msk.f32.gmra.mxu2 %vm3224_vm3, %v4513_v0  ;;  %v13248_v30 = vadd.f32 %v4426_v39, %v4116_v59  ;;  %v5237_v39 = vsel %vm5200_vm10, %v5234_v20, %v5236_v29  ;;  %v17233_v59 = vld [vmem:[#allocation130_spill] sm:$0xff] }
 0x514   : > { %v4515_v57 = vsel %vm4482_vm11, %v4512_v61, %v4514_v22  ;;  %v6259_v61 = vrot.slane %v12688_v13, 3 }
 0x515   : > { %v4071_v16 = vpop.f32.mrf.mxu3  ;;  %10266 = vmatmul.msk.f32.gmra.mxu0 %vm3224_vm3, %v6256_v27  ;;  %v6258_v27 = vsel %vm6191_vm9, %v6255_v12, %v6257_v25  ;;  %v13270_v55 = vpop.f32.mrf.mxu0 }
 0x516   : > { %v3714_v52 = vpop.f32.mrf.mxu2  ;;  %17236 = vst [vmem:[#allocation90_spill] sm:$0xff] %v13270_v55  ;;  %v17241_v55 = vld [vmem:[#allocation137_spill] sm:$0xff] }
 0x517   : > { %v3715_v10 = vadd.f32 %v3714_v52, %v17232_v15  ;;  %v5388_v17 = vpop.f32.mrf.mxu1  ;;  %v17235_v15 = vld [vmem:[#allocation40_spill] sm:$0xff] }
 0x518   : > { %v4516_v20 = vrot.slane %v17235_v15, 7 }
 0x519   : > { %v4117_v0 = vadd.f32 %v4071_v16, %v3715_v10  ;;  %v5238_v16 = vrot.slane %v12284_v48, 2 }
 0x51a   : > { %10066 = vmatmul.msk.f32.gmra.mxu3 %vm3224_vm3, %v17233_v59  ;;  %10114 = vmatmul.msk.f32.gmra.mxu1 %vm3224_vm3, %v5237_v39  ;;  %v17237_v59 = vld [vmem:[#allocation132_spill] sm:$0xff]  ;;  %v4517_v48 = vsel %vm4482_vm11, %v4514_v22, %v4516_v20 }
 0x51b   : > { %10020 = vmatmul.msk.f32.gmra.mxu2 %vm3224_vm3, %v4515_v57  ;;  %v13264_v7 = vadd.f32 %v4429_v42, %v4117_v0  ;;  %v5239_v42 = vsel %vm5200_vm10, %v5236_v29, %v5238_v16  ;;  %v17238_v0 = vld [vmem:[#allocation133_spill] sm:$0xff] }
 0x51d   : > { %17234 = vst [vmem:[#allocation86_spill] sm:$0xff] %v13264_v7  ;;  %v4074_v52 = vpop.f32.mrf.mxu3  ;;  %10267 = vmatmul.msk.f32.gmra.mxu0 %vm3224_vm3, %v6258_v27  ;;  %v6260_v27 = vsel %vm6191_vm9, %v6257_v25, %v6259_v61  ;;  %v13288_v22 = vpop.f32.mrf.mxu0 }
 0x51e   : > { %v3717_v10 = vpop.f32.mrf.mxu2  ;;  %17243 = vst [vmem:[#allocation93_spill] sm:$0xff] %v13288_v22  ;;  %v17247_v22 = vld [vmem:[#allocation140_spill] sm:$0xff] }
 0x51f   : > { %v3718_v39 = vadd.f32 %v3717_v10, %v17237_v59  ;;  %v5391_v6 = vpop.f32.mrf.mxu1  ;;  %v17240_v59 = vld [vmem:[#allocation41_spill] sm:$0xff] }
 0x520   : > { %v4518_v29 = vrot.slane %v17240_v59, 7 }
 0x521   : > { %v4118_v57 = vadd.f32 %v4074_v52, %v3718_v39  ;;  %v5240_v52 = vrot.slane %v12307_v38, 2 }
 0x522   : > { %10067 = vmatmul.msk.f32.gmra.mxu3 %vm3224_vm3, %v17238_v0  ;;  %10115 = vmatmul.msk.f32.gmra.mxu1 %vm3224_vm3, %v5239_v42  ;;  %v17242_v42 = vld [vmem:[#allocation16_spill] sm:$0xff]  ;;  %v4519_v38 = vsel %vm4482_vm11, %v4516_v20, %v4518_v29 }
 0x523   : > { %10021 = vmatmul.msk.f32.gmra.mxu2 %vm3224_vm3, %v4517_v48  ;;  %v13280_v12 = vadd.f32 %v4432_v1, %v4118_v57  ;;  %v6261_v7 = vrot.slane %v17242_v42, 3  ;;  %v5241_v1 = vsel %vm5200_vm10, %v5238_v16, %v5240_v52  ;;  %v17244_v57 = vld [vmem:[#allocation135_spill] sm:$0xff] }
 0x525   : > { %17239 = vst [vmem:[#allocation89_spill] sm:$0xff] %v13280_v12  ;;  %v5027_v10 = vpop.f32.mrf.mxu3  ;;  %10268 = vmatmul.msk.f32.gmra.mxu0 %vm3224_vm3, %v6260_v27 }
 0x526   : > { %v4669_v39 = vpop.f32.mrf.mxu2 }
 0x527   : > { %v4795_v0 = vadd.f32 %v4669_v39, %v17241_v55  ;;  %v5394_v15 = vpop.f32.mrf.mxu1  ;;  %v6262_v55 = vsel %vm6191_vm9, %v6259_v61, %v6261_v7  ;;  %v17246_v39 = vld [vmem:[#allocation42_spill] sm:$0xff] }
 0x528   : > { %v4520_v16 = vrot.slane %v17246_v39, 7  ;;  %v17254_v39 = vld [vmem:[#allocation18_spill] sm:$0xff] }
 0x529   : > { %v5153_v48 = vadd.f32 %v5027_v10, %v4795_v0  ;;  %v5242_v10 = vrot.slane %v12330_v31, 2 }
 0x52a   : > { %10068 = vmatmul.msk.f32.gmra.mxu3 %vm3224_vm3, %v17244_v57  ;;  %10116 = vmatmul.msk.f32.gmra.mxu1 %vm3224_vm3, %v5241_v1  ;;  %v17248_v1 = vld [vmem:[#allocation17_spill] sm:$0xff]  ;;  %v4521_v61 = vsel %vm4482_vm11, %v4518_v29, %v4520_v16  ;;  %v6265_v29 = vrot.slane %v17254_v39, 3 }
 0x52b   : > { %10022 = vmatmul.msk.f32.gmra.mxu2 %vm3224_vm3, %v4519_v38  ;;  %v13296_v25 = vadd.f32 %v5385_v47, %v5153_v48  ;;  %v6263_v12 = vrot.slane %v17248_v1, 3  ;;  %v5243_v38 = vsel %vm5200_vm10, %v5240_v52, %v5242_v10  ;;  %v17249_v47 = vld [vmem:[#allocation138_spill] sm:$0xff]  ;;  %v13309_v48 = vpop.f32.mrf.mxu0  ;;  %v5244_v52 = vrot.slane %v12356_v53, 2 }
 0x52c   : > { %17250 = vst [vmem:[#allocation96_spill] sm:$0xff] %v13309_v48 }
 0x52d   : > { %17245 = vst [vmem:[#allocation92_spill] sm:$0xff] %v13296_v25  ;;  %v5030_v27 = vpop.f32.mrf.mxu3  ;;  %10269 = vmatmul.msk.f32.gmra.mxu0 %vm3224_vm3, %v6262_v55  ;;  %v5245_v48 = vsel %vm5200_vm10, %v5242_v10, %v5244_v52  ;;  %v5246_v10 = vrot.slane %v12382_v40, 2 }
 0x52e   : > { %v4672_v0 = vpop.f32.mrf.mxu2 }
 0x52f   : > { %v4796_v57 = vadd.f32 %v4672_v0, %v17247_v22  ;;  %v5397_v59 = vpop.f32.mrf.mxu1  ;;  %v6264_v22 = vsel %vm6191_vm9, %v6261_v7, %v6263_v12 }
 0x531   : > { %v5154_v20 = vadd.f32 %v5030_v27, %v4796_v57  ;;  %v17252_v27 = vld [vmem:[#allocation43_spill] sm:$0xff] }
 0x532   : > { %10069 = vmatmul.msk.f32.gmra.mxu3 %vm3224_vm3, %v17249_v47  ;;  %10117 = vmatmul.msk.f32.gmra.mxu1 %vm3224_vm3, %v5243_v38  ;;  %v4522_v0 = vrot.slane %v17252_v27, 7  ;;  %v17253_v47 = vld [vmem:[#allocation143_spill] sm:$0xff] }
 0x533   : > { %10023 = vmatmul.msk.f32.gmra.mxu2 %vm3224_vm3, %v4521_v61  ;;  %v13312_v31 = vadd.f32 %v5388_v17, %v5154_v20  ;;  %v17255_v17 = vld [vmem:[#allocation141_spill] sm:$0xff]  ;;  %v6266_v20 = vsel %vm6191_vm9, %v6263_v12, %v6265_v29  ;;  %v17259_v27 = vld [vmem:[#allocation19_spill] sm:$0xff] }
 0x534   : > { %v4523_v7 = vsel %vm4482_vm11, %v4520_v16, %v4522_v0  ;;  %v6267_v16 = vrot.slane %v17259_v27, 3 }
 0x535   : > { %17251 = vst [vmem:[#allocation95_spill] sm:$0xff] %v13312_v31  ;;  %v5033_v55 = vpop.f32.mrf.mxu3  ;;  %10270 = vmatmul.msk.f32.gmra.mxu0 %vm3224_vm3, %v6264_v22  ;;  %v13329_v22 = vpop.f32.mrf.mxu0 }
 0x536   : > { %v4675_v57 = vpop.f32.mrf.mxu2  ;;  %17256 = vst [vmem:[#allocation99_spill] sm:$0xff] %v13329_v22 }
 0x537   : > { %v4797_v38 = vadd.f32 %v4675_v57, %v17253_v47  ;;  %v5400_v61 = vpop.f32.mrf.mxu1 }
 0x539   : > { %v5155_v25 = vadd.f32 %v5033_v55, %v4797_v38  ;;  %v17257_v55 = vld [vmem:[#allocation44_spill] sm:$0xff] }
 0x53a   : > { %10070 = vmatmul.msk.f32.gmra.mxu3 %vm3224_vm3, %v17255_v17  ;;  %10118 = vmatmul.msk.f32.gmra.mxu1 %vm3224_vm3, %v5245_v48  ;;  %v4524_v47 = vrot.slane %v17257_v55, 7  ;;  %v17258_v17 = vld [vmem:[#allocation146_spill] sm:$0xff] }
 0x53b   : > { %10024 = vmatmul.msk.f32.gmra.mxu2 %vm3224_vm3, %v4523_v7  ;;  %v13326_v53 = vadd.f32 %v5391_v6, %v5155_v25  ;;  %v5247_v6 = vsel %vm5200_vm10, %v5244_v52, %v5246_v10  ;;  %v17260_v25 = vld [vmem:[#allocation144_spill] sm:$0xff]  ;;  %v17261_v52 = vld [vmem:[#allocation45_spill] sm:$0xff] }
 0x53c   : > { %v4525_v12 = vsel %vm4482_vm11, %v4522_v0, %v4524_v47  ;;  %v6269_v0 = vrot.slane %v12823_v43, 3 }
 0x53d   : > { %v5036_v57 = vpop.f32.mrf.mxu3  ;;  %10271 = vmatmul.msk.f32.gmra.mxu0 %vm3224_vm3, %v6266_v20  ;;  %v6268_v20 = vsel %vm6191_vm9, %v6265_v29, %v6267_v16 }
 0x53e   : > { %v4678_v38 = vpop.f32.mrf.mxu2 }
 0x53f   : > { %v4798_v48 = vadd.f32 %v4678_v38, %v17258_v17  ;;  %v5403_v7 = vpop.f32.mrf.mxu1  ;;  %v4526_v17 = vrot.slane %v17261_v52, 7 }
 0x541   : > { %v5156_v31 = vadd.f32 %v5036_v57, %v4798_v48  ;;  %v5248_v57 = vrot.slane %v12408_v34, 2  ;;  %v4527_v29 = vsel %vm4482_vm11, %v4524_v47, %v4526_v17 }
 0x542   : > { %10071 = vmatmul.msk.f32.gmra.mxu3 %vm3224_vm3, %v17260_v25  ;;  %10119 = vmatmul.msk.f32.gmra.mxu1 %vm3224_vm3, %v5247_v6  ;;  %v13348_v25 = vpop.f32.mrf.mxu0  ;;  %v17263_v6 = vld [vmem:[#allocation149_spill] sm:$0xff] }
 0x543   : > { %10025 = vmatmul.msk.f32.gmra.mxu2 %vm3224_vm3, %v4525_v12  ;;  %v13342_v40 = vadd.f32 %v5394_v15, %v5156_v31  ;;  %17262 = vst [vmem:[#allocation98_spill] sm:$0xff] %v13348_v25  ;;  %v5249_v15 = vsel %vm5200_vm10, %v5246_v10, %v5248_v57  ;;  %v17264_v31 = vld [vmem:[#allocation147_spill] sm:$0xff] }
 0x545   : > { %v5039_v38 = vpop.f32.mrf.mxu3  ;;  %10272 = vmatmul.msk.f32.gmra.mxu0 %vm3224_vm3, %v6268_v20  ;;  %v6270_v20 = vsel %vm6191_vm9, %v6267_v16, %v6269_v0 }
 0x546   : > { %v4681_v48 = vpop.f32.mrf.mxu2 }
 0x547   : > { %v4799_v22 = vadd.f32 %v4681_v48, %v17263_v6  ;;  %v5406_v48 = vpop.f32.mrf.mxu1 }
 0x549   : > { %v5157_v12 = vadd.f32 %v5039_v38, %v4799_v22  ;;  %v5250_v22 = vrot.slane %v12437_v4, 2  ;;  %v17265_v38 = vld [vmem:[#allocation46_spill] sm:$0xff] }
 0x54a   : > { %10072 = vmatmul.msk.f32.gmra.mxu3 %vm3224_vm3, %v17264_v31  ;;  %10120 = vmatmul.msk.f32.gmra.mxu1 %vm3224_vm3, %v5249_v15  ;;  %v4528_v10 = vrot.slane %v17265_v38, 7  ;;  %v17266_v31 = vld [vmem:[#allocation152_spill] sm:$0xff]  ;;  %v6271_v15 = vrot.slane %v12859_v51, 3  ;;  %v13366_v47 = vpop.f32.mrf.mxu0 }
 0x54b   : > { %10026 = vmatmul.msk.f32.gmra.mxu2 %vm3224_vm3, %v4527_v29  ;;  %v13358_v34 = vadd.f32 %v5397_v59, %v5157_v12  ;;  %17267 = vst [vmem:[#allocation102_spill] sm:$0xff] %v13366_v47  ;;  %v5251_v59 = vsel %vm5200_vm10, %v5248_v57, %v5250_v22  ;;  %v17268_v12 = vld [vmem:[#allocation150_spill] sm:$0xff]  ;;  %v17271_v47 = vld [vmem:[#allocation155_spill] sm:$0xff] }
 0x54c   : > { %v4529_v4 = vsel %vm4482_vm11, %v4526_v17, %v4528_v10 }
 0x54d   : > { %v5042_v25 = vpop.f32.mrf.mxu3  ;;  %10273 = vmatmul.msk.f32.gmra.mxu0 %vm3224_vm3, %v6270_v20  ;;  %v6272_v20 = vsel %vm6191_vm9, %v6269_v0, %v6271_v15 }
 0x54e   : > { %v4684_v6 = vpop.f32.mrf.mxu2 }
 0x54f   : > { %v4800_v52 = vadd.f32 %v4684_v6, %v17266_v31  ;;  %v5409_v38 = vpop.f32.mrf.mxu1 }
 0x551   : > { %v5158_v29 = vadd.f32 %v5042_v25, %v4800_v52  ;;  %v5252_v52 = vrot.slane %v12469_v37, 2  ;;  %v17270_v25 = vld [vmem:[#allocation47_spill] sm:$0xff] }
 0x552   : > { %10073 = vmatmul.msk.f32.gmra.mxu3 %vm3224_vm3, %v17268_v12  ;;  %10121 = vmatmul.msk.f32.gmra.mxu1 %vm3224_vm3, %v5251_v59  ;;  %v4530_v57 = vrot.slane %v17270_v25, 7  ;;  %v6273_v59 = vrot.slane %v17161_v11, 3 }
 0x553   : > { %10027 = vmatmul.msk.f32.gmra.mxu2 %vm3224_vm3, %v4529_v4  ;;  %v13374_v16 = vadd.f32 %v5400_v61, %v5158_v29  ;;  %v5253_v4 = vsel %vm5200_vm10, %v5250_v22, %v5252_v52  ;;  %v17272_v61 = vld [vmem:[#allocation153_spill] sm:$0xff]  ;;  %v13387_v29 = vpop.f32.mrf.mxu0  ;;  %v5254_v22 = vrot.slane %v12495_v23, 2 }
 0x554   : > { %v4531_v0 = vsel %vm4482_vm11, %v4528_v10, %v4530_v57  ;;  %17273 = vst [vmem:[#allocation106_spill] sm:$0xff] %v13387_v29 }
 0x555   : > { %17269 = vst [vmem:[#allocation101_spill] sm:$0xff] %v13374_v16  ;;  %v5045_v6 = vpop.f32.mrf.mxu3  ;;  %10274 = vmatmul.msk.f32.gmra.mxu0 %vm3224_vm3, %v6272_v20  ;;  %v5255_v10 = vsel %vm5200_vm10, %v5252_v52, %v5254_v22  ;;  %v17276_v16 = vld [vmem:[#allocation156_spill] sm:$0xff]  ;;  %v17278_v52 = vld [vmem:[#allocation49_spill] sm:$0xff] }
 0x556   : > { %v4687_v31 = vpop.f32.mrf.mxu2 }
 0x557   : > { %v4801_v12 = vadd.f32 %v4687_v31, %v17271_v47  ;;  %v6274_v47 = vsel %vm6191_vm9, %v6271_v15, %v6273_v59  ;;  %v5412_v29 = vpop.f32.mrf.mxu1 }
 0x559   : > { %v5159_v17 = vadd.f32 %v5045_v6, %v4801_v12  ;;  %v17274_v6 = vld [vmem:[#allocation48_spill] sm:$0xff] }
 0x55a   : > { %10074 = vmatmul.msk.f32.gmra.mxu3 %vm3224_vm3, %v17272_v61  ;;  %10122 = vmatmul.msk.f32.gmra.mxu1 %vm3224_vm3, %v5253_v4  ;;  %v4532_v31 = vrot.slane %v17274_v6, 7  ;;  %v17275_v61 = vld [vmem:[#allocation158_spill] sm:$0xff] }
 0x55b   : > { %10028 = vmatmul.msk.f32.gmra.mxu2 %vm3224_vm3, %v4531_v0  ;;  %v13390_v37 = vadd.f32 %v5403_v7, %v5159_v17  ;;  %v13405_v23 = vpop.f32.mrf.mxu0  ;;  %v5256_v0 = vrot.slane %v12521_v50, 2 }
 0x55c   : > { %v4533_v7 = vsel %vm4482_vm11, %v4530_v57, %v4532_v31  ;;  %17277 = vst [vmem:[#allocation104_spill] sm:$0xff] %v13405_v23  ;;  %v17280_v57 = vld [vmem:[#allocation159_spill] sm:$0xff]  ;;  %v17283_v23 = vld [vmem:[#allocation162_spill] sm:$0xff] }
 0x55d   : > { %v5048_v20 = vpop.f32.mrf.mxu3  ;;  %10275 = vmatmul.msk.f32.gmra.mxu0 %vm3224_vm3, %v6274_v47  ;;  %v4534_v47 = vrot.slane %v17278_v52, 7 }
 0x55e   : > { %v4690_v12 = vpop.f32.mrf.mxu2 }
 0x55f   : > { %v4802_v4 = vadd.f32 %v4690_v12, %v17275_v61  ;;  %v17279_v12 = vld [vmem:[#allocation161_spill] sm:$0xff]  ;;  %v5415_v50 = vpop.f32.mrf.mxu1 }
 0x561   : > { %v5160_v25 = vadd.f32 %v5048_v20, %v4802_v4  ;;  %v5257_v4 = vsel %vm5200_vm10, %v5254_v22, %v5256_v0 }
 0x562   : > { %10075 = vmatmul.msk.f32.gmra.mxu3 %vm3224_vm3, %v17276_v16  ;;  %10123 = vmatmul.msk.f32.gmra.mxu1 %vm3224_vm3, %v5255_v10  ;;  %v5258_v10 = vrot.slane %v12547_v45, 2 }
 0x563   : > { %10029 = vmatmul.msk.f32.gmra.mxu2 %vm3224_vm3, %v4533_v7  ;;  %v13403_v15 = vadd.f32 %v5406_v48, %v5160_v25  ;;  %v4535_v48 = vsel %vm4482_vm11, %v4532_v31, %v4534_v47  ;;  %v17281_v7 = vld [vmem:[#allocation50_spill] sm:$0xff] }
 0x565   : > { %v5051_v17 = vpop.f32.mrf.mxu3  ;;  %10276 = vmatmul.msk.f32.gmra.mxu0 %vm3224_vm3, %v6273_v59 }
 0x566   : > { %v4693_v20 = vpop.f32.mrf.mxu2 }
 0x567   : > { %v4803_v16 = vadd.f32 %v4693_v20, %v17279_v12  ;;  %v4536_v20 = vrot.slane %v17281_v7, 7  ;;  %v17282_v12 = vld [vmem:[#allocation164_spill] sm:$0xff]  ;;  %v17287_v7 = vld [vmem:[#allocation165_spill] sm:$0xff] }
 0x569   : > { %v5161_v61 = vadd.f32 %v5051_v17, %v4803_v16 }
 0x56a   : > { %10076 = vmatmul.msk.f32.gmra.mxu3 %vm3224_vm3, %v17280_v57  ;;  %10124 = vmatmul.msk.f32.gmra.mxu1 %vm3224_vm3, %v5257_v4  ;;  %v5259_v57 = vsel %vm5200_vm10, %v5256_v0, %v5258_v10  ;;  %v17285_v4 = vld [vmem:[#allocation51_spill] sm:$0xff] }
 0x56b   : > { %10030 = vmatmul.msk.f32.gmra.mxu2 %vm3224_vm3, %v4535_v48  ;;  %v13417_v25 = vadd.f32 %v5409_v38, %v5161_v61  ;;  %v4537_v38 = vsel %vm4482_vm11, %v4534_v47, %v4536_v20  ;;  %v5260_v61 = vrot.slane %v12575_v60, 2  ;;  %v4538_v48 = vrot.slane %v17285_v4, 7 }
 0x56d   : > { %v5054_v59 = vpop.f32.mrf.mxu3 }
 0x56e   : > { %v4696_v17 = vpop.f32.mrf.mxu2 }
 0x56f   : > { %v4804_v22 = vadd.f32 %v4696_v17, %v17282_v12  ;;  %v5418_v17 = vpop.f32.mrf.mxu1  ;;  %v17286_v12 = vld [vmem:[#allocation167_spill] sm:$0xff] }
 0x571   : > { %v5162_v16 = vadd.f32 %v5054_v59, %v4804_v22 }
 0x572   : > { %10077 = vmatmul.msk.f32.gmra.mxu3 %vm3224_vm3, %v17283_v23  ;;  %10125 = vmatmul.msk.f32.gmra.mxu1 %vm3224_vm3, %v5259_v57  ;;  %v5261_v23 = vsel %vm5200_vm10, %v5258_v10, %v5260_v61  ;;  %v17289_v57 = vld [vmem:[#allocation52_spill] sm:$0xff] }
 0x573   : > { %10031 = vmatmul.msk.f32.gmra.mxu2 %vm3224_vm3, %v4537_v38  ;;  %v13428_v31 = vadd.f32 %v5412_v29, %v5162_v16  ;;  %v4539_v29 = vsel %vm4482_vm11, %v4536_v20, %v4538_v48  ;;  %v5262_v16 = vrot.slane %v12602_v28, 2  ;;  %v4540_v38 = vrot.slane %v17289_v57, 7 }
 0x575   : > { %17284 = vst [vmem:[#allocation110_spill] sm:$0xff] %v13428_v31  ;;  %v5057_v45 = vpop.f32.mrf.mxu3  ;;  %v17291_v31 = vld [vmem:[#allocation168_spill] sm:$0xff] }
 0x576   : > { %v4699_v59 = vpop.f32.mrf.mxu2 }
 0x577   : > { %v4805_v0 = vadd.f32 %v4699_v59, %v17286_v12  ;;  %v5421_v10 = vpop.f32.mrf.mxu1 }
 0x579   : > { %v5163_v22 = vadd.f32 %v5057_v45, %v4805_v0  ;;  %v17290_v45 = vld [vmem:[#allocation170_spill] sm:$0xff] }
 0x57a   : > { %10078 = vmatmul.msk.f32.gmra.mxu3 %vm3224_vm3, %v17287_v7  ;;  %10126 = vmatmul.msk.f32.gmra.mxu1 %vm3224_vm3, %v5261_v23  ;;  %v5263_v7 = vsel %vm5200_vm10, %v5260_v61, %v5262_v16  ;;  %v17293_v23 = vld [vmem:[#allocation54_spill] sm:$0xff] }
 0x57b   : > { %10032 = vmatmul.msk.f32.gmra.mxu2 %vm3224_vm3, %v4539_v29  ;;  %v13439_v47 = vadd.f32 %v5415_v50, %v5163_v22  ;;  %v4541_v50 = vsel %vm4482_vm11, %v4538_v48, %v4540_v38  ;;  %v5264_v22 = vrot.slane %v12629_v21, 2  ;;  %v4542_v29 = vrot.slane %v17293_v23, 7 }
 0x57d   : > { %17288 = vst [vmem:[#allocation108_spill] sm:$0xff] %v13439_v47  ;;  %v5060_v60 = vpop.f32.mrf.mxu3  ;;  %v17295_v47 = vld [vmem:[#allocation14_spill] sm:$0xff]  ;;  %v4543_v48 = vsel %vm4482_vm11, %v4540_v38, %v4542_v29 }
 0x57e   : > { %v4702_v59 = vpop.f32.mrf.mxu2 }
 0x57f   : > { %v4806_v12 = vadd.f32 %v4702_v59, %v17290_v45 }
 0x581   : > { %v5164_v0 = vadd.f32 %v5060_v60, %v4806_v12  ;;  %v17294_v60 = vld [vmem:[#allocation171_spill] sm:$0xff]  ;;  %v5265_v12 = vsel %vm5200_vm10, %v5262_v16, %v5264_v22 }
 0x582   : > { %10079 = vmatmul.msk.f32.gmra.mxu3 %vm3224_vm3, %v17291_v31  ;;  %10127 = vmatmul.msk.f32.gmra.mxu1 %vm3224_vm3, %v5263_v7  ;;  %v5424_v31 = vpop.f32.mrf.mxu1  ;;  %v17297_v7 = vld [vmem:[#allocation56_spill] sm:$0xff] }
 0x583   : > { %10033 = vmatmul.msk.f32.gmra.mxu2 %vm3224_vm3, %v4541_v50  ;;  %v13450_v20 = vadd.f32 %v5418_v17, %v5164_v0  ;;  %v5266_v0 = vrot.slane %v12661_v8, 2  ;;  %v4544_v50 = vrot.slane %v17297_v7, 7 }
 0x585   : > { %17292 = vst [vmem:[#allocation114_spill] sm:$0xff] %v13450_v20  ;;  %v5063_v28 = vpop.f32.mrf.mxu3  ;;  %v4545_v38 = vsel %vm4482_vm11, %v4542_v29, %v4544_v50  ;;  %v17302_v20 = vld [vmem:[#allocation57_spill] sm:$0xff] }
 0x586   : > { %v4705_v59 = vpop.f32.mrf.mxu2 }
 0x587   : > { %v4807_v45 = vadd.f32 %v4705_v59, %v17294_v60  ;;  %v17298_v59 = vld [vmem:[#allocation172_spill] sm:$0xff] }
 0x589   : > { %v5165_v61 = vadd.f32 %v5063_v28, %v4807_v45  ;;  %v5267_v45 = vsel %vm5200_vm10, %v5264_v22, %v5266_v0 }
 0x58a   : > { %10080 = vmatmul.msk.f32.gmra.mxu3 %vm3224_vm3, %v17295_v47  ;;  %10128 = vmatmul.msk.f32.gmra.mxu1 %vm3224_vm3, %v5265_v12  ;;  %v17299_v47 = vld [vmem:[#allocation15_spill] sm:$0xff]  ;;  %v5427_v8 = vpop.f32.mrf.mxu1  ;;  %v5268_v12 = vrot.slane %v12688_v13, 2 }
 0x58b   : > { %10034 = vmatmul.msk.f32.gmra.mxu2 %vm3224_vm3, %v4543_v48  ;;  %v13461_v17 = vadd.f32 %v5421_v10, %v5165_v61  ;;  %v17300_v48 = vld [vmem:[#allocation58_spill] sm:$0xff] }
 0x58d   : > { %17296 = vst [vmem:[#allocation112_spill] sm:$0xff] %v13461_v17  ;;  %v5066_v21 = vpop.f32.mrf.mxu3  ;;  %v17305_v17 = vld [vmem:[#allocation59_spill] sm:$0xff] }
 0x58e   : > { %v4708_v28 = vpop.f32.mrf.mxu2 }
 0x58f   : > { %v4808_v16 = vadd.f32 %v4708_v28, %v17298_v59  ;;  %v4546_v28 = vrot.slane %v17300_v48, 7  ;;  %v17301_v59 = vld [vmem:[#allocation174_spill] sm:$0xff] }
 0x591   : > { %v5166_v60 = vadd.f32 %v5066_v21, %v4808_v16  ;;  %v4547_v29 = vsel %vm4482_vm11, %v4544_v50, %v4546_v28 }
 0x592   : > { %10081 = vmatmul.msk.f32.gmra.mxu3 %vm3224_vm3, %v17299_v47  ;;  %10129 = vmatmul.msk.f32.gmra.mxu1 %vm3224_vm3, %v5267_v45  ;;  %v5269_v47 = vsel %vm5200_vm10, %v5266_v0, %v5268_v12  ;;  %v17303_v45 = vld [vmem:[#allocation60_spill] sm:$0xff] }
 0x593   : > { %10035 = vmatmul.msk.f32.gmra.mxu2 %vm3224_vm3, %v4545_v38  ;;  %v13472_v10 = vadd.f32 %v5424_v31, %v5166_v60  ;;  %v5270_v60 = vrot.slane %v17242_v42, 2  ;;  %v4548_v38 = vrot.slane %v17303_v45, 7  ;;  %v17308_v45 = vld [vmem:[#allocation61_spill] sm:$0xff] }
 0x595   : > { %v5069_v61 = vpop.f32.mrf.mxu3  ;;  %v4549_v50 = vsel %vm4482_vm11, %v4546_v28, %v4548_v38 }
 0x596   : > { %v4711_v21 = vpop.f32.mrf.mxu2 }
 0x597   : > { %v4809_v22 = vadd.f32 %v4711_v21, %v17301_v59  ;;  %v5430_v21 = vpop.f32.mrf.mxu1  ;;  %v17304_v59 = vld [vmem:[#allocation176_spill] sm:$0xff] }
 0x599   : > { %v5167_v16 = vadd.f32 %v5069_v61, %v4809_v22 }
 0x59a   : > { %10082 = vmatmul.msk.f32.gmra.mxu3 %vm3224_vm3, %v17302_v20  ;;  %10130 = vmatmul.msk.f32.gmra.mxu1 %vm3224_vm3, %v5269_v47  ;;  %v5271_v20 = vsel %vm5200_vm10, %v5268_v12, %v5270_v60  ;;  %v17306_v47 = vld [vmem:[#allocation62_spill] sm:$0xff] }
 0x59b   : > { %10036 = vmatmul.msk.f32.gmra.mxu2 %vm3224_vm3, %v4547_v29  ;;  %v13483_v31 = vadd.f32 %v5427_v8, %v5167_v16  ;;  %v5272_v16 = vrot.slane %v17248_v1, 2  ;;  %v4550_v29 = vrot.slane %v17306_v47, 7  ;;  %v17311_v47 = vld [vmem:[#allocation63_spill] sm:$0xff] }
 0x59d   : > { %v5072_v13 = vpop.f32.mrf.mxu3  ;;  %v4551_v28 = vsel %vm4482_vm11, %v4548_v38, %v4550_v29 }
 0x59e   : > { %v4714_v61 = vpop.f32.mrf.mxu2 }
 0x59f   : > { %v4810_v0 = vadd.f32 %v4714_v61, %v17304_v59  ;;  %v5433_v12 = vpop.f32.mrf.mxu1 }
 0x5a1   : > { %v5168_v22 = vadd.f32 %v5072_v13, %v4810_v0  ;;  %v17307_v13 = vld [vmem:[#allocation178_spill] sm:$0xff] }
 0x5a2   : > { %10083 = vmatmul.msk.f32.gmra.mxu3 %vm3224_vm3, %v17305_v17  ;;  %10131 = vmatmul.msk.f32.gmra.mxu1 %vm3224_vm3, %v5271_v20  ;;  %v5273_v17 = vsel %vm5200_vm10, %v5270_v60, %v5272_v16  ;;  %v17309_v20 = vld [vmem:[#allocation64_spill] sm:$0xff] }
 0x5a3   : > { %10037 = vmatmul.msk.f32.gmra.mxu2 %vm3224_vm3, %v4549_v50  ;;  %v13494_v8 = vadd.f32 %v5430_v21, %v5168_v22  ;;  %v5274_v22 = vrot.slane %v17254_v39, 2  ;;  %v4552_v50 = vrot.slane %v17309_v20, 7 }
 0x5a5   : > { %v5075_v42 = vpop.f32.mrf.mxu3  ;;  %v4553_v38 = vsel %vm4482_vm11, %v4550_v29, %v4552_v50 }
 0x5a6   : > { %v4717_v61 = vpop.f32.mrf.mxu2 }
 0x5a7   : > { %v4811_v59 = vadd.f32 %v4717_v61, %v17307_v13 }
 0x5a9   : > { %v5169_v0 = vadd.f32 %v5075_v42, %v4811_v59  ;;  %v17310_v42 = vld [vmem:[#allocation180_spill] sm:$0xff]  ;;  %v5275_v59 = vsel %vm5200_vm10, %v5272_v16, %v5274_v22 }
 0x5aa   : > { %10084 = vmatmul.msk.f32.gmra.mxu3 %vm3224_vm3, %v17308_v45  ;;  %10132 = vmatmul.msk.f32.gmra.mxu1 %vm3224_vm3, %v5273_v17  ;;  %v5436_v45 = vpop.f32.mrf.mxu1  ;;  %v17312_v17 = vld [vmem:[#allocation66_spill] sm:$0xff] }
 0x5ab   : > { %10038 = vmatmul.msk.f32.gmra.mxu2 %vm3224_vm3, %v4551_v28  ;;  %v13505_v21 = vadd.f32 %v5433_v12, %v5169_v0  ;;  %v5276_v0 = vrot.slane %v17259_v27, 2  ;;  %v4554_v28 = vrot.slane %v17312_v17, 7  ;;  %v5278_v27 = vrot.slane %v12823_v43, 2 }
 0x5ad   : > { %v5078_v1 = vpop.f32.mrf.mxu3  ;;  %v4555_v29 = vsel %vm4482_vm11, %v4552_v50, %v4554_v28  ;;  %v10188_v50 = vld [vmem:[%s16958_s30 + $0x118] sm:$0xff] }
 0x5ae   : > { %v4720_v61 = vpop.f32.mrf.mxu2  ;;  %6013 = vmatpush.msra.mxu3 %v10188_v50  ;;  %v10187_v50 = vld [vmem:[%s16958_s30 + $0x110] sm:$0xff] }
 0x5af   : > { %v4812_v13 = vadd.f32 %v4720_v61, %v17310_v42  ;;  %v17313_v61 = vld [vmem:[#allocation181_spill] sm:$0xff] }
 0x5b0   : > { %6014 = vmatpush.msra.mxu3 %v10187_v50  ;;  %v17324_v50 = vld [vmem:[#allocation23_spill] sm:$0xff] }
 0x5b1   : > { %v5170_v60 = vadd.f32 %v5078_v1, %v4812_v13  ;;  %v17315_v13 = vld [vmem:[#allocation20_spill] sm:$0xff] }
 0x5b2   : > { %10085 = vmatmul.msk.f32.gmra.mxu3 %vm3224_vm3, %v17311_v47  ;;  %10133 = vmatmul.msk.f32.gmra.mxu1 %vm3224_vm3, %v5275_v59  ;;  %v5277_v47 = vsel %vm5200_vm10, %v5274_v22, %v5276_v0  ;;  %v17316_v59 = vld [vmem:[#allocation68_spill] sm:$0xff]  ;;  %v5279_v22 = vsel %vm5200_vm10, %v5276_v0, %v5278_v27 }
 0x5b3   : > { %10039 = vmatmul.msk.f32.gmra.mxu2 %vm3224_vm3, %v4553_v38  ;;  %v13516_v12 = vadd.f32 %v5436_v45, %v5170_v60  ;;  %v4556_v45 = vrot.slane %v17316_v59, 7 }
 0x5b5   : > { %v5081_v39 = vpop.f32.mrf.mxu3  ;;  %v4557_v43 = vsel %vm4482_vm11, %v4554_v28, %v4556_v45 }
 0x5b6   : > { %v4723_v1 = vpop.f32.mrf.mxu2 }
 0x5b7   : > { %v4813_v16 = vadd.f32 %v4723_v1, %v17313_v61  ;;  %v17317_v1 = vld [vmem:[#allocation105_spill] sm:$0xff] }
 0x5b9   : > { %v13521_v42 = vadd.f32 %v5081_v39, %v4813_v16  ;;  %v10142_v16 = vld [vmem:[%s16958_s30 + $0xf8] sm:$0xff] }
 0x5ba   : > { %10086 = vmatmul.msk.f32.gmra.mxu3 %vm3224_vm3, %v17315_v13  ;;  %10134 = vmatmul.msk.f32.gmra.mxu1 %vm3224_vm3, %v5277_v47  ;;  %v17319_v47 = vld [vmem:[#allocation21_spill] sm:$0xff]  ;;  %v5280_v13 = vrot.slane %v12859_v51, 2  ;;  %v5282_v51 = vrot.slane %v17161_v11, 2  ;;  %v10140_v11 = vld [vmem:[%s16958_s30 + $0xe8] sm:$0xff] }
 0x5bb   : > { %17314 = vst [vmem:[#allocation118_spill] sm:$0xff] %v13521_v42  ;;  %10040 = vmatmul.msk.f32.gmra.mxu2 %vm3224_vm3, %v4555_v29  ;;  %v17320_v29 = vld [vmem:[#allocation70_spill] sm:$0xff] }
 0x5bc   : > { %5654 = vmatpush.msrb.mxu2 %v10142_v16  ;;  %v5281_v28 = vsel %vm5200_vm10, %v5278_v27, %v5280_v13  ;;  %v10141_v27 = vld [vmem:[%s16958_s30 + $0xf0] sm:$0xff] }
 0x5bd   : > { %v5084_v60 = vpop.f32.mrf.mxu3 }
 0x5be   : > { %v4726_v38 = vpop.f32.mrf.mxu2  ;;  %5655 = vmatpush.msrb.mxu2 %v10141_v27 }
 0x5bf   : > { %v4814_v39 = vadd.f32 %v4726_v38, %v17317_v1  ;;  %v17321_v1 = vld [vmem:[#allocation182_spill] sm:$0xff] }
 0x5c0   : > { %5656 = vmatpush.msrb.mxu2 %v10140_v11 }
 0x5c1   : > { %v13532_v61 = vadd.f32 %v5084_v60, %v4814_v39  ;;  %v4558_v60 = vrot.slane %v17320_v29, 7 }
 0x5c2   : > { %10087 = vmatmul.msk.f32.gmra.mxu3 %vm3224_vm3, %v17319_v47  ;;  %10135 = vmatmul.msk.f32.gmra.mxu1 %vm3224_vm3, %v5279_v22  ;;  %v17322_v22 = vld [vmem:[#allocation69_spill] sm:$0xff] }
 0x5c3   : > { %17318 = vst [vmem:[#allocation116_spill] sm:$0xff] %v13532_v61  ;;  %10041 = vmatmul.msk.f32.gmra.mxu2 %vm3224_vm3, %v4557_v43  ;;  %v4559_v43 = vsel %vm4482_vm11, %v4556_v45, %v4558_v60  ;;  %v10186_v45 = vld [vmem:[%s16958_s30 + $0x108] sm:$0xff] }
 0x5c4   : > { %6015 = vmatpush.msra.mxu3 %v10186_v45  ;;  %v17409_v61 = vld [vmem:[#allocation110_spill] sm:$0xff] }
 0x5c5   : > { %v5087_v0 = vpop.f32.mrf.mxu3 }
 0x5c6   : > { %v4729_v38 = vpop.f32.mrf.mxu2 }
 0x5c7   : > { %v4815_v39 = vadd.f32 %v4729_v38, %v17321_v1 }
 0x5c9   : > { %v13549_v47 = vadd.f32 %v5087_v0, %v4815_v39  ;;  %v17323_v0 = vld [vmem:[#allocation72_spill] sm:$0xff] }
 0x5ca   : > { %10088 = vmatmul.msk.f32.gmra.mxu3 %vm3224_vm3, %v17322_v22  ;;  %10136 = vmatmul.msk.f32.gmra.mxu1 %vm3224_vm3, %v5281_v28  ;;  %v4560_v38 = vrot.slane %v17323_v0, 7  ;;  %v5283_v22 = vsel %vm5200_vm10, %v5280_v13, %v5282_v51 }
 0x5cb   : > { %10042 = vmatmul.msk.f32.gmra.mxu2 %vm3224_vm3, %v4559_v43  ;;  %v10185_v43 = vld [vmem:[%s16958_s30 + $0x100] sm:$0xff] }
 0x5cc   : > { %6016 = vmatpush.msra.mxu3 %v10185_v43  ;;  %v17326_v43 = vld [vmem:[#allocation76_spill] sm:$0xff] }
 0x5cd   : > { %v5090_v16 = vpop.f32.mrf.mxu3 }
 0x5ce   : > { %v4732_v1 = vpop.f32.mrf.mxu2 }
 0x5cf   : > { %v4816_v39 = vadd.f32 %v4732_v1, %v12949_v2  ;;  %v10139_v2 = vld [vmem:[%s16958_s30 + $0xe0] sm:$0xff]  ;;  %v4561_v1 = vsel %vm4482_vm11, %v4558_v60, %v4560_v38 }
 0x5d0   : > { %5657 = vmatpush.msrb.mxu2 %v10139_v2  ;;  %v4564_v2 = vrot.slane %v17326_v43, 7 }
 0x5d1   : > { %v13572_v28 = vadd.f32 %v5090_v16, %v4816_v39  ;;  %v17325_v16 = vld [vmem:[#allocation74_spill] sm:$0xff] }
 0x5d2   : > { %10089 = vmatmul.msk.f32.gmra.mxu3 %vm3224_vm3, %v17324_v50  ;;  %10137 = vmatmul.msk.f32.gmra.mxu1 %vm3224_vm3, %v5283_v22  ;;  %v4562_v27 = vrot.slane %v17325_v16, 7 }
 0x5d3   : > { %10043 = vmatmul.msk.f32.gmra.mxu2 %vm3224_vm3, %v4561_v1 }
 0x5d4   : > { %v4563_v22 = vsel %vm4482_vm11, %v4560_v38, %v4562_v27  ;;  %v4566_v38 = vrot.slane %v17175_v46, 7 }
 0x5d5   : > { %v5093_v13 = vpop.f32.mrf.mxu3 }
 0x5d6   : > { %v4735_v39 = vpop.f32.mrf.mxu2 }
 0x5d7   : > { %v4817_v45 = vadd.f32 %v4735_v39, %v12970_v18  ;;  %v4565_v18 = vsel %vm4482_vm11, %v4562_v27, %v4564_v2 }
 0x5d9   : > { %v13588_v11 = vadd.f32 %v5093_v13, %v4817_v45  ;;  %v17327_v45 = vrot.slane %v12974_v49, 5 }
 0x5da   : > { %10090 = vmatmul.msk.f32.gmra.mxu3 %vm3224_vm3, %v12959_v62  ;;  %10138 = vmatmul.msk.f32.gmra.mxu1 %vm3224_vm3, %v5282_v51 }
 0x5db   : > { %10044 = vmatmul.msk.f32.gmra.mxu2 %vm3224_vm3, %v4563_v22 }
 0x5dd   : > { %v5096_v60 = vpop.f32.mrf.mxu3 }
 0x5de   : > { %v4738_v50 = vpop.f32.mrf.mxu2 }
 0x5df   : > { %v4818_v1 = vadd.f32 %v4738_v50, %v13000_v36  ;;  %v4567_v36 = vsel %vm4482_vm11, %v4564_v2, %v4566_v38  ;;  %v17328_v50 = vld [vmem:[#allocation82_spill] sm:$0xff]  ;;  %v17330_v2 = vld [vmem:[#allocation85_spill] sm:$0xff] }
 0x5e0   : > { %v17331_v38 = vld [vmem:[#allocation25_spill] sm:$0xff] }
 0x5e1   : > { %v13597_v42 = vadd.f32 %v5096_v60, %v4818_v1 }
 0x5e2   : > { %10091 = vmatmul.msk.f32.gmra.mxu3 %vm3224_vm3, %v12988_v63 }
 0x5e3   : > { %10045 = vmatmul.msk.f32.gmra.mxu2 %vm3224_vm3, %v4565_v18 }
 0x5e5   : > { %v5099_v62 = vpop.f32.mrf.mxu3 }
 0x5e6   : > { %v4741_v51 = vpop.f32.mrf.mxu2 }
 0x5e7   : > { %v4819_v13 = vadd.f32 %v4741_v51, %v13013_v3  ;;  %v17329_v3 = vld [vmem:[#allocation24_spill] sm:$0xff] }
 0x5e9   : > { %v13605_v39 = vadd.f32 %v5099_v62, %v4819_v13 }
 0x5ea   : > { %10092 = vmatmul.msk.f32.gmra.mxu3 %vm3224_vm3, %v17327_v45 }
 0x5eb   : > { %10046 = vmatmul.msk.f32.gmra.mxu2 %vm3224_vm3, %v4567_v36 }
 0x5ed   : > { %v5102_v63 = vpop.f32.mrf.mxu3 }
 0x5ee   : > { %v4744_v27 = vpop.f32.mrf.mxu2 }
 0x5ef   : > { %v4820_v22 = vadd.f32 %v4744_v27, %v13032_v54  ;;  %v17333_v27 = vld [vmem:[#allocation26_spill] sm:$0xff] }
 0x5f1   : > { %v13613_v60 = vadd.f32 %v5102_v63, %v4820_v22  ;;  %v17332_v63 = vld [vmem:[#allocation88_spill] sm:$0xff] }
 0x5f2   : > { %10189 = vmatmul.msk.f32.vlgmr.msra.gmra.mxu3 %vm3224_vm3, %v17328_v50 }
 0x5f3   : > { %10143 = vmatmul.msk.f32.vlgmr.msrb.gmra.mxu2 %vm3224_vm3, %v17329_v3 }
 0x5f5   : > { %v5105_v1 = vpop.f32.mrf.mxu3 }
 0x5f6   : > { %v4747_v18 = vpop.f32.mrf.mxu2 }
 0x5f7   : > { %v4821_v62 = vadd.f32 %v4747_v18, %v13046_v24  ;;  %v17335_v18 = vld [vmem:[#allocation27_spill] sm:$0xff] }
 0x5f9   : > { %v13620_v51 = vadd.f32 %v5105_v1, %v4821_v62  ;;  %v17334_v1 = vld [vmem:[#allocation91_spill] sm:$0xff] }
 0x5fa   : > { %10190 = vmatmul.msk.f32.gmra.mxu3 %vm3224_vm3, %v17330_v2 }
 0x5fb   : > { %10144 = vmatmul.msk.f32.gmra.mxu2 %vm3224_vm3, %v17331_v38 }
 0x5fd   : > { %v5108_v54 = vpop.f32.mrf.mxu3 }
 0x5fe   : > { %v4750_v13 = vpop.f32.mrf.mxu2 }
 0x5ff   : > { %v4822_v45 = vadd.f32 %v4750_v13, %v13062_v58  ;;  %v17337_v13 = vld [vmem:[#allocation28_spill] sm:$0xff] }
 0x601   : > { %v13627_v36 = vadd.f32 %v5108_v54, %v4822_v45  ;;  %v17336_v54 = vld [vmem:[#allocation94_spill] sm:$0xff] }
 0x602   : > { %10191 = vmatmul.msk.f32.gmra.mxu3 %vm3224_vm3, %v17332_v63 }
 0x603   : > { %10145 = vmatmul.msk.f32.gmra.mxu2 %vm3224_vm3, %v17333_v27 }
 0x605   : > { %v5111_v24 = vpop.f32.mrf.mxu3 }
 0x606   : > { %v4753_v22 = vpop.f32.mrf.mxu2 }
 0x607   : > { %v4823_v50 = vadd.f32 %v4753_v22, %v13078_v35  ;;  %v17339_v22 = vld [vmem:[#allocation29_spill] sm:$0xff] }
 0x609   : > { %v13634_v3 = vadd.f32 %v5111_v24, %v4823_v50  ;;  %v17338_v24 = vld [vmem:[#allocation97_spill] sm:$0xff] }
 0x60a   : > { %10192 = vmatmul.msk.f32.gmra.mxu3 %vm3224_vm3, %v17334_v1 }
 0x60b   : > { %10146 = vmatmul.msk.f32.gmra.mxu2 %vm3224_vm3, %v17335_v18 }
 0x60d   : > { %v5114_v58 = vpop.f32.mrf.mxu3 }
 0x60e   : > { %v4756_v62 = vpop.f32.mrf.mxu2 }
 0x60f   : > { %v4824_v2 = vadd.f32 %v4756_v62, %v13092_v9  ;;  %v17341_v62 = vld [vmem:[#allocation30_spill] sm:$0xff] }
 0x611   : > { %v13641_v38 = vadd.f32 %v5114_v58, %v4824_v2  ;;  %v17340_v58 = vld [vmem:[#allocation100_spill] sm:$0xff] }
 0x612   : > { %10193 = vmatmul.msk.f32.gmra.mxu3 %vm3224_vm3, %v17336_v54 }
 0x613   : > { %10147 = vmatmul.msk.f32.gmra.mxu2 %vm3224_vm3, %v17337_v13 }
 0x615   : > { %v5117_v35 = vpop.f32.mrf.mxu3 }
 0x616   : > { %v4759_v45 = vpop.f32.mrf.mxu2 }
 0x617   : > { %v4825_v63 = vadd.f32 %v4759_v45, %v13108_v26  ;;  %v17344_v45 = vld [vmem:[#allocation31_spill] sm:$0xff] }
 0x619   : > { %v13648_v27 = vadd.f32 %v5117_v35, %v4825_v63  ;;  %v17343_v35 = vld [vmem:[#allocation103_spill] sm:$0xff] }
 0x61a   : > { %10194 = vmatmul.msk.f32.gmra.mxu3 %vm3224_vm3, %v17338_v24 }
 0x61b   : > { %10148 = vmatmul.msk.f32.gmra.mxu2 %vm3224_vm3, %v17339_v22 }
 0x61d   : > { %v5120_v9 = vpop.f32.mrf.mxu3 }
 0x61e   : > { %v4762_v50 = vpop.f32.mrf.mxu2 }
 0x61f   : > { %v4826_v1 = vadd.f32 %v4762_v50, %v13124_v14  ;;  %v17347_v50 = vld [vmem:[#allocation32_spill] sm:$0xff] }
 0x621   : > { %v13655_v18 = vadd.f32 %v5120_v9, %v4826_v1  ;;  %v17346_v9 = vld [vmem:[#allocation107_spill] sm:$0xff] }
 0x622   : > { %10195 = vmatmul.msk.f32.gmra.mxu3 %vm3224_vm3, %v17340_v58 }
 0x623   : > { %10149 = vmatmul.msk.f32.gmra.mxu2 %vm3224_vm3, %v17341_v62 }
 0x625   : > { %v5123_v26 = vpop.f32.mrf.mxu3 }
 0x626   : > { %v4765_v2 = vpop.f32.mrf.mxu2 }
 0x627   : > { %v4827_v54 = vadd.f32 %v4765_v2, %v13140_v19  ;;  %v17350_v2 = vld [vmem:[#allocation33_spill] sm:$0xff] }
 0x629   : > { %v13662_v13 = vadd.f32 %v5123_v26, %v4827_v54  ;;  %v17349_v26 = vld [vmem:[#allocation111_spill] sm:$0xff] }
 0x62a   : > { %10196 = vmatmul.msk.f32.gmra.mxu3 %vm3224_vm3, %v17343_v35 }
 0x62b   : > { %17342 = vst [vmem:[#allocation122_spill] sm:$0xff] %v13662_v13  ;;  %10150 = vmatmul.msk.f32.gmra.mxu2 %vm3224_vm3, %v17344_v45  ;;  %v17378_v13 = vld [vmem:[#allocation139_spill] sm:$0xff] }
 0x62d   : > { %v5126_v14 = vpop.f32.mrf.mxu3 }
 0x62e   : > { %v4768_v63 = vpop.f32.mrf.mxu2 }
 0x62f   : > { %v4828_v24 = vadd.f32 %v4768_v63, %v13156_v41  ;;  %v17353_v63 = vld [vmem:[#allocation34_spill] sm:$0xff] }
 0x631   : > { %v13669_v22 = vadd.f32 %v5126_v14, %v4828_v24  ;;  %v17352_v14 = vld [vmem:[#allocation115_spill] sm:$0xff] }
 0x632   : > { %10197 = vmatmul.msk.f32.gmra.mxu3 %vm3224_vm3, %v17346_v9 }
 0x633   : > { %17345 = vst [vmem:[#allocation120_spill] sm:$0xff] %v13669_v22  ;;  %10151 = vmatmul.msk.f32.gmra.mxu2 %vm3224_vm3, %v17347_v50 }
 0x635   : > { %v5129_v19 = vpop.f32.mrf.mxu3 }
 0x636   : > { %v4771_v1 = vpop.f32.mrf.mxu2 }
 0x637   : > { %v4829_v58 = vadd.f32 %v4771_v1, %v13170_v56  ;;  %v17356_v1 = vld [vmem:[#allocation35_spill] sm:$0xff] }
 0x639   : > { %v13676_v62 = vadd.f32 %v5129_v19, %v4829_v58  ;;  %v17355_v19 = vld [vmem:[#allocation119_spill] sm:$0xff] }
 0x63a   : > { %10198 = vmatmul.msk.f32.gmra.mxu3 %vm3224_vm3, %v17349_v26 }
 0x63b   : > { %17348 = vst [vmem:[#allocation125_spill] sm:$0xff] %v13676_v62  ;;  %10152 = vmatmul.msk.f32.gmra.mxu2 %vm3224_vm3, %v17350_v2  ;;  %v17407_v62 = vld [vmem:[#allocation108_spill] sm:$0xff] }
 0x63d   : > { %v5132_v41 = vpop.f32.mrf.mxu3 }
 0x63e   : > { %v4774_v54 = vpop.f32.mrf.mxu2 }
 0x63f   : > { %v4830_v35 = vadd.f32 %v4774_v54, %v13186_v33  ;;  %v17359_v54 = vld [vmem:[#allocation36_spill] sm:$0xff] }
 0x641   : > { %v13683_v45 = vadd.f32 %v5132_v41, %v4830_v35  ;;  %v17358_v41 = vld [vmem:[#allocation123_spill] sm:$0xff] }
 0x642   : > { %10199 = vmatmul.msk.f32.gmra.mxu3 %vm3224_vm3, %v17352_v14 }
 0x643   : > { %17351 = vst [vmem:[#allocation124_spill] sm:$0xff] %v13683_v45  ;;  %10153 = vmatmul.msk.f32.gmra.mxu2 %vm3224_vm3, %v17353_v63 }
 0x645   : > { %v5135_v56 = vpop.f32.mrf.mxu3 }
 0x646   : > { %v4777_v24 = vpop.f32.mrf.mxu2 }
 0x647   : > { %v4831_v9 = vadd.f32 %v4777_v24, %v13202_v44  ;;  %v17362_v24 = vld [vmem:[#allocation37_spill] sm:$0xff] }
 0x649   : > { %v13690_v50 = vadd.f32 %v5135_v56, %v4831_v9  ;;  %v17361_v56 = vld [vmem:[#allocation126_spill] sm:$0xff] }
 0x64a   : > { %10200 = vmatmul.msk.f32.gmra.mxu3 %vm3224_vm3, %v17355_v19 }
 0x64b   : > { %17354 = vst [vmem:[#allocation127_spill] sm:$0xff] %v13690_v50  ;;  %10154 = vmatmul.msk.f32.gmra.mxu2 %vm3224_vm3, %v17356_v1 }
 0x64d   : > { %v5138_v33 = vpop.f32.mrf.mxu3 }
 0x64e   : > { %v4780_v58 = vpop.f32.mrf.mxu2 }
 0x64f   : > { %v4832_v26 = vadd.f32 %v4780_v58, %v13218_v32  ;;  %v17365_v58 = vld [vmem:[#allocation38_spill] sm:$0xff] }
 0x651   : > { %v13697_v2 = vadd.f32 %v5138_v33, %v4832_v26  ;;  %v17364_v33 = vld [vmem:[#allocation128_spill] sm:$0xff] }
 0x652   : > { %10201 = vmatmul.msk.f32.gmra.mxu3 %vm3224_vm3, %v17358_v41  ;;  %v17366_v41 = vld [vmem:[#allocation86_spill] sm:$0xff] }
 0x653   : > { %17357 = vst [vmem:[#allocation129_spill] sm:$0xff] %v13697_v2  ;;  %10155 = vmatmul.msk.f32.gmra.mxu2 %vm3224_vm3, %v17359_v54 }
 0x655   : > { %v5141_v44 = vpop.f32.mrf.mxu3 }
 0x656   : > { %v4783_v35 = vpop.f32.mrf.mxu2 }
 0x657   : > { %v4833_v14 = vadd.f32 %v4783_v35, %v13234_v5  ;;  %v17368_v35 = vld [vmem:[#allocation131_spill] sm:$0xff] }
 0x659   : > { %v13704_v63 = vadd.f32 %v5141_v44, %v4833_v14  ;;  %v17369_v14 = vld [vmem:[#allocation39_spill] sm:$0xff] }
 0x65a   : > { %10202 = vmatmul.msk.f32.gmra.mxu3 %vm3224_vm3, %v17361_v56 }
 0x65b   : > { %17360 = vst [vmem:[#allocation130_spill] sm:$0xff] %v13704_v63  ;;  %10156 = vmatmul.msk.f32.gmra.mxu2 %vm3224_vm3, %v17362_v24  ;;  %v17370_v24 = vld [vmem:[#allocation89_spill] sm:$0xff] }
 0x65d   : > { %v5144_v32 = vpop.f32.mrf.mxu3 }
 0x65e   : > { %v4786_v9 = vpop.f32.mrf.mxu2 }
 0x65f   : > { %v4834_v19 = vadd.f32 %v4786_v9, %v13248_v30 }
 0x661   : > { %v13711_v1 = vadd.f32 %v5144_v32, %v4834_v19  ;;  %v17372_v19 = vld [vmem:[#allocation134_spill] sm:$0xff] }
 0x662   : > { %10203 = vmatmul.msk.f32.gmra.mxu3 %vm3224_vm3, %v17364_v33  ;;  %v17373_v33 = vld [vmem:[#allocation40_spill] sm:$0xff] }
 0x663   : > { %17363 = vst [vmem:[#allocation132_spill] sm:$0xff] %v13711_v1  ;;  %10157 = vmatmul.msk.f32.gmra.mxu2 %vm3224_vm3, %v17365_v58 }
 0x665   : > { %v5147_v5 = vpop.f32.mrf.mxu3 }
 0x666   : > { %v4789_v26 = vpop.f32.mrf.mxu2 }
 0x667   : > { %v4835_v54 = vadd.f32 %v4789_v26, %v17366_v41  ;;  %v17374_v26 = vld [vmem:[#allocation92_spill] sm:$0xff] }
 0x669   : > { %v13718_v44 = vadd.f32 %v5147_v5, %v4835_v54 }
 0x66a   : > { %10204 = vmatmul.msk.f32.gmra.mxu3 %vm3224_vm3, %v17368_v35  ;;  %v17375_v35 = vld [vmem:[#allocation136_spill] sm:$0xff] }
 0x66b   : > { %17367 = vst [vmem:[#allocation133_spill] sm:$0xff] %v13718_v44  ;;  %10158 = vmatmul.msk.f32.gmra.mxu2 %vm3224_vm3, %v17369_v14  ;;  %v17376_v14 = vld [vmem:[#allocation41_spill] sm:$0xff]  ;;  %v17405_v44 = vld [vmem:[#allocation114_spill] sm:$0xff] }
 0x66d   : > { %v5150_v30 = vpop.f32.mrf.mxu3 }
 0x66e   : > { %v4792_v56 = vpop.f32.mrf.mxu2 }
 0x66f   : > { %v4836_v32 = vadd.f32 %v4792_v56, %v17370_v24  ;;  %v17377_v24 = vld [vmem:[#allocation95_spill] sm:$0xff] }
 0x671   : > { %v13725_v9 = vadd.f32 %v5150_v30, %v4836_v32 }
 0x672   : > { %10205 = vmatmul.msk.f32.gmra.mxu3 %vm3224_vm3, %v17372_v19 }
 0x673   : > { %17371 = vst [vmem:[#allocation137_spill] sm:$0xff] %v13725_v9  ;;  %10159 = vmatmul.msk.f32.gmra.mxu2 %vm3224_vm3, %v17373_v33  ;;  %v17379_v33 = vld [vmem:[#allocation42_spill] sm:$0xff] }
 0x675   : > { %v6018_v58 = vpop.f32.mrf.mxu3 }
 0x676   : > { %v5659_v5 = vpop.f32.mrf.mxu2 }
 0x677   : > { %v5785_v41 = vadd.f32 %v5659_v5, %v17374_v26 }
 0x679   : > { %v13732_v54 = vadd.f32 %v6018_v58, %v5785_v41 }
 0x67a   : > { %10206 = vmatmul.msk.f32.gmra.mxu3 %vm3224_vm3, %v17375_v35  ;;  %v17380_v35 = vld [vmem:[#allocation142_spill] sm:$0xff] }
 0x67b   : > { %10160 = vmatmul.msk.f32.gmra.mxu2 %vm3224_vm3, %v17376_v14  ;;  %v17381_v14 = vld [vmem:[#allocation43_spill] sm:$0xff] }
 0x67d   : > { %v6021_v30 = vpop.f32.mrf.mxu3 }
 0x67e   : > { %v5662_v56 = vpop.f32.mrf.mxu2 }
 0x67f   : > { %v5786_v32 = vadd.f32 %v5662_v56, %v17377_v24 }
 0x681   : > { %v13739_v19 = vadd.f32 %v6021_v30, %v5786_v32  ;;  %v17382_v32 = vld [vmem:[#allocation145_spill] sm:$0xff] }
 0x682   : > { %10207 = vmatmul.msk.f32.gmra.mxu3 %vm3224_vm3, %v17378_v13 }
 0x683   : > { %10161 = vmatmul.msk.f32.gmra.mxu2 %vm3224_vm3, %v17379_v33 }
 0x685   : > { %v6024_v58 = vpop.f32.mrf.mxu3 }
 0x686   : > { %v5665_v5 = vpop.f32.mrf.mxu2 }
 0x687   : > { %v5787_v26 = vadd.f32 %v5665_v5, %v13326_v53 }
 0x689   : > { %v13746_v41 = vadd.f32 %v6024_v58, %v5787_v26  ;;  %v17383_v26 = vld [vmem:[#allocation148_spill] sm:$0xff] }
 0x68a   : > { %10208 = vmatmul.msk.f32.gmra.mxu3 %vm3224_vm3, %v17380_v35  ;;  %v17384_v35 = vld [vmem:[#allocation45_spill] sm:$0xff] }
 0x68b   : > { %10162 = vmatmul.msk.f32.gmra.mxu2 %vm3224_vm3, %v17381_v14 }
 0x68d   : > { %v6027_v30 = vpop.f32.mrf.mxu3 }
 0x68e   : > { %v5668_v56 = vpop.f32.mrf.mxu2 }
 0x68f   : > { %v5788_v24 = vadd.f32 %v5668_v56, %v13342_v40 }
 0x691   : > { %v13753_v13 = vadd.f32 %v6027_v30, %v5788_v24  ;;  %v17385_v30 = vld [vmem:[#allocation101_spill] sm:$0xff] }
 0x692   : > { %10209 = vmatmul.msk.f32.gmra.mxu3 %vm3224_vm3, %v17382_v32  ;;  %v17386_v32 = vld [vmem:[#allocation151_spill] sm:$0xff] }
 0x693   : > { %10163 = vmatmul.msk.f32.gmra.mxu2 %vm3224_vm3, %v17257_v55  ;;  %v17387_v55 = vld [vmem:[#allocation46_spill] sm:$0xff] }
 0x695   : > { %v6030_v53 = vpop.f32.mrf.mxu3 }
 0x696   : > { %v5671_v33 = vpop.f32.mrf.mxu2 }
 0x697   : > { %v5789_v58 = vadd.f32 %v5671_v33, %v13358_v34 }
 0x699   : > { %v13760_v5 = vadd.f32 %v6030_v53, %v5789_v58 }
 0x69a   : > { %10210 = vmatmul.msk.f32.gmra.mxu3 %vm3224_vm3, %v17383_v26  ;;  %v17388_v26 = vld [vmem:[#allocation154_spill] sm:$0xff] }
 0x69b   : > { %10164 = vmatmul.msk.f32.gmra.mxu2 %vm3224_vm3, %v17384_v35  ;;  %v17389_v35 = vld [vmem:[#allocation47_spill] sm:$0xff] }
 0x69d   : > { %v6033_v40 = vpop.f32.mrf.mxu3 }
 0x69e   : > { %v5674_v14 = vpop.f32.mrf.mxu2 }
 0x69f   : > { %v5790_v56 = vadd.f32 %v5674_v14, %v17385_v30 }
 0x6a1   : > { %v13767_v24 = vadd.f32 %v6033_v40, %v5790_v56 }
 0x6a2   : > { %10211 = vmatmul.msk.f32.gmra.mxu3 %vm3224_vm3, %v17386_v32  ;;  %v17390_v32 = vld [vmem:[#allocation157_spill] sm:$0xff] }
 0x6a3   : > { %10165 = vmatmul.msk.f32.gmra.mxu2 %vm3224_vm3, %v17387_v55 }
 0x6a5   : > { %v6036_v34 = vpop.f32.mrf.mxu3 }
 0x6a6   : > { %v5677_v53 = vpop.f32.mrf.mxu2 }
 0x6a7   : > { %v5791_v33 = vadd.f32 %v5677_v53, %v13390_v37 }
 0x6a9   : > { %v13774_v58 = vadd.f32 %v6036_v34, %v5791_v33  ;;  %v17391_v33 = vld [vmem:[#allocation160_spill] sm:$0xff] }
 0x6aa   : > { %10212 = vmatmul.msk.f32.gmra.mxu3 %vm3224_vm3, %v17388_v26 }
 0x6ab   : > { %10166 = vmatmul.msk.f32.gmra.mxu2 %vm3224_vm3, %v17389_v35  ;;  %v17392_v35 = vld [vmem:[#allocation163_spill] sm:$0xff] }
 0x6ad   : > { %v6039_v40 = vpop.f32.mrf.mxu3 }
 0x6ae   : > { %v5680_v14 = vpop.f32.mrf.mxu2 }
 0x6af   : > { %v5792_v30 = vadd.f32 %v5680_v14, %v13403_v15 }
 0x6b1   : > { %v13781_v56 = vadd.f32 %v6039_v40, %v5792_v30  ;;  %v17393_v40 = vld [vmem:[#allocation50_spill] sm:$0xff] }
 0x6b2   : > { %10213 = vmatmul.msk.f32.gmra.mxu3 %vm3224_vm3, %v17390_v32  ;;  %v17394_v30 = vld [vmem:[#allocation166_spill] sm:$0xff] }
 0x6b3   : > { %10167 = vmatmul.msk.f32.gmra.mxu2 %vm3224_vm3, %v17274_v6 }
 0x6b5   : > { %v6042_v37 = vpop.f32.mrf.mxu3 }
 0x6b6   : > { %v5683_v55 = vpop.f32.mrf.mxu2 }
 0x6b7   : > { %v5793_v34 = vadd.f32 %v5683_v55, %v13417_v25  ;;  %v13806_v55 = vpop.f32.mrf.mxu1 }
 0x6b8   : > { %17396 = vst [vmem:[#allocation16_spill] sm:$0xff] %v13806_v55 }
 0x6b9   : > { %v13788_v53 = vadd.f32 %v6042_v37, %v5793_v34  ;;  %v17395_v37 = vld [vmem:[#allocation169_spill] sm:$0xff] }
 0x6ba   : > { %10214 = vmatmul.msk.f32.gmra.mxu3 %vm3224_vm3, %v17391_v33  ;;  %v17397_v33 = vld [vmem:[#allocation53_spill] sm:$0xff] }
 0x6bb   : > { %10168 = vmatmul.msk.f32.gmra.mxu2 %vm3224_vm3, %v17278_v52 }
 0x6bd   : > { %v6045_v15 = vpop.f32.mrf.mxu3 }
 0x6be   : > { %v5686_v26 = vpop.f32.mrf.mxu2 }
 0x6c2   : > { %10215 = vmatmul.msk.f32.gmra.mxu3 %vm3224_vm3, %v17392_v35  ;;  %v13812_v35 = vpop.f32.mrf.mxu0 }
 0x6c3   : > { %10169 = vmatmul.msk.f32.gmra.mxu2 %vm3224_vm3, %v17393_v40  ;;  %17398 = vst [vmem:[#allocation135_spill] sm:$0xff] %v13812_v35 }
 0x6c5   : > { %v6048_v6 = vpop.f32.mrf.mxu3 }
 0x6c6   : > { %v5689_v14 = vpop.f32.mrf.mxu2 }
 0x6c7   : > { %v5795_v55 = vadd.f32 %v5689_v14, %v17407_v62  ;;  %v17414_v62 = vld [vmem:[#allocation60_spill] sm:$0xff] }
 0x6ca   : > { %10216 = vmatmul.msk.f32.gmra.mxu3 %vm3224_vm3, %v17394_v30  ;;  %v13814_v30 = vpop.f32.mrf.mxu1  ;;  %v13820_v22 = vpop.f32.mrf.mxu0 }
 0x6cb   : > { %10170 = vmatmul.msk.f32.gmra.mxu2 %vm3224_vm3, %v17285_v4  ;;  %17399 = vst [vmem:[#allocation140_spill] sm:$0xff] %v13814_v30  ;;  %v17408_v30 = vld [vmem:[#allocation98_spill] sm:$0xff] }
 0x6cc   : > { %17401 = vst [vmem:[#allocation17_spill] sm:$0xff] %v13820_v22 }
 0x6cd   : > { %v6051_v25 = vpop.f32.mrf.mxu3 }
 0x6ce   : > { %v5692_v32 = vpop.f32.mrf.mxu2 }
 0x6cf   : > { %v5796_v35 = vadd.f32 %v5692_v32, %v17405_v44  ;;  %v17412_v44 = vld [vmem:[#allocation102_spill] sm:$0xff]  ;;  %v17416_v32 = vld [vmem:[#allocation93_spill] sm:$0xff] }
 0x6d2   : > { %10217 = vmatmul.msk.f32.gmra.mxu3 %vm3224_vm3, %v17395_v37  ;;  %v17400_v37 = vld [vmem:[#allocation55_spill] sm:$0xff]  ;;  %v13823_v50 = vpop.f32.mrf.mxu1 }
 0x6d3   : > { %10171 = vmatmul.msk.f32.gmra.mxu2 %vm3224_vm3, %v17289_v57  ;;  %17402 = vst [vmem:[#allocation138_spill] sm:$0xff] %v13823_v50  ;;  %v17410_v50 = vld [vmem:[#allocation175_spill] sm:$0xff] }
 0x6d5   : > { %v6054_v52 = vpop.f32.mrf.mxu3 }
 0x6d6   : > { %v5695_v34 = vpop.f32.mrf.mxu2 }
 0x6da   : > { %10218 = vmatmul.msk.f32.gmra.mxu3 %vm3224_vm3, %v17397_v33 }
 0x6db   : > { %10172 = vmatmul.msk.f32.gmra.mxu2 %vm3224_vm3, %v17293_v23  ;;  %v17403_v23 = vld [vmem:[#allocation173_spill] sm:$0xff] }
 0x6dd   : > { %v6057_v4 = vpop.f32.mrf.mxu3 }
 0x6de   : > { %v5698_v40 = vpop.f32.mrf.mxu2 }
 0x6df   : > { %v5798_v9 = vadd.f32 %v5698_v40, %v13472_v10 }
 0x6e1   : > { %v6157_v22 = vadd.f32 %v6057_v4, %v5798_v9 }
 0x6e2   : > { %10219 = vmatmul.msk.f32.gmra.mxu3 %vm3224_vm3, %v17400_v37  ;;  %v17404_v37 = vld [vmem:[#allocation112_spill] sm:$0xff] }
 0x6e3   : > { %10173 = vmatmul.msk.f32.gmra.mxu2 %vm3224_vm3, %v17297_v7  ;;  %v5797_v2 = vadd.f32 %v5695_v34, %v17404_v37  ;;  %v6155_v34 = vadd.f32 %v6051_v25, %v5796_v35  ;;  %v17417_v37 = vld [vmem:[#allocation90_spill] sm:$0xff] }
 0x6e5   : > { %v6060_v57 = vpop.f32.mrf.mxu3 }
 0x6e6   : > { %v5701_v45 = vpop.f32.mrf.mxu2 }
 0x6e7   : > { %v5799_v33 = vadd.f32 %v5701_v45, %v13483_v31  ;;  %v13833_v45 = vpop.f32.mrf.mxu0 }
 0x6e8   : > { %17406 = vst [vmem:[#allocation143_spill] sm:$0xff] %v13833_v45 }
 0x6e9   : > { %v6158_v63 = vadd.f32 %v6060_v57, %v5799_v33  ;;  %v17411_v57 = vld [vmem:[#allocation99_spill] sm:$0xff] }
 0x6ea   : > { %10220 = vmatmul.msk.f32.gmra.mxu3 %vm3224_vm3, %v17403_v23  ;;  %v6156_v23 = vadd.f32 %v6054_v52, %v5797_v2  ;;  %v6515_v33 = vadd.f32 %v17411_v57, %v6157_v22  ;;  %v13849_v2 = vpop.f32.mrf.mxu1  ;;  %v6513_v52 = vadd.f32 %v17416_v32, %v6155_v34  ;;  %v17423_v57 = vld [vmem:[#allocation83_spill] sm:$0xff] }
 0x6eb   : > { %10174 = vmatmul.msk.f32.gmra.mxu2 %vm3224_vm3, %v17300_v48  ;;  %v6516_v10 = vadd.f32 %v17408_v30, %v6158_v63  ;;  %v5794_v48 = vadd.f32 %v5686_v26, %v17409_v61  ;;  %v6154_v63 = vadd.f32 %v6048_v6, %v5795_v55  ;;  %v17415_v61 = vld [vmem:[#allocation96_spill] sm:$0xff] }
 0x6ed   : > { %v6063_v7 = vpop.f32.mrf.mxu3  ;;  %v6153_v14 = vadd.f32 %v6045_v15, %v5794_v48  ;;  %v17421_v15 = vld [vmem:[#allocation87_spill] sm:$0xff]  ;;  %v17422_v48 = vld [vmem:[#allocation62_spill] sm:$0xff] }
 0x6ee   : > { %v5704_v1 = vpop.f32.mrf.mxu2 }
 0x6ef   : > { %v5800_v31 = vadd.f32 %v5704_v1, %v13494_v8  ;;  %v13845_v8 = vld [vmem:[%s17413_s28] ss:$0 sm:$0xff]  ;;  %v6514_v1 = vadd.f32 %v17415_v61, %v6156_v23  ;;  %v13861_v23 = vpop.f32.mrf.mxu0  ;;  %s658_s28 = scalar_lea.vmem [#allocation5], %s16734_s24 }
 0x6f0   : > { %v6562_v22 = vadd.f32 %v13845_v8, %v6516_v10  ;;  %v6561_v30 = vadd.f32 %v13845_v8, %v6515_v33  ;;  %17419 = vst [vmem:[#allocation141_spill] sm:$0xff] %v13861_v23  ;;  %v17420_v10 = vld [vmem:[#allocation177_spill] sm:$0xff]  ;;  %v6559_v34 = vadd.f32 %v13845_v8, %v6513_v52  ;;  %v6510_v33 = vadd.f32 %v17423_v57, %v13788_v53  ;;  %s9604_s26 = sshll.u32 %s658_s28, 4  ;;  %s9605_s26 = int_to_ptr.vmem [resolvable:$true] %s9604_s26 }
 0x6f1   : > { %v6159_v40 = vadd.f32 %v6063_v7, %v5800_v31  ;;  %v6512_v7 = vadd.f32 %v17417_v37, %v6154_v63  ;;  %v6560_v55 = vadd.f32 %v13845_v8, %v6514_v1  ;;  %v17424_v1 = vld [vmem:[#allocation84_spill] sm:$0xff]  ;;  %v17434_v57 = vld [vmem:[#allocation77_spill] sm:$0xff] }
 0x6f2   : > { %10221 = vmatmul.msk.f32.gmra.mxu3 %vm3224_vm3, %v17410_v50  ;;  %v6604_v6 = vmax.f32 %v6562_v22, 0.0  ;;  %v13872_v63 = vpop.f32.mrf.mxu1  ;;  %v6601_v22 = vmax.f32 %v6559_v34, 0.0 }
 0x6f3   : > { %v6517_v9 = vadd.f32 %v17412_v44, %v6159_v40  ;;  %10175 = vmatmul.msk.f32.gmra.mxu2 %vm3224_vm3, %v17414_v62  ;;  %v6511_v40 = vadd.f32 %v17421_v15, %v6153_v14  ;;  %v6558_v62 = vadd.f32 %v13845_v8, %v6512_v7  ;;  %v17430_v7 = vld [vmem:[#allocation78_spill] sm:$0xff] }
 0x6f5   : > { %v6563_v50 = vadd.f32 %v13845_v8, %v6517_v9  ;;  %v6066_v26 = vpop.f32.mrf.mxu3  ;;  %v6602_v9 = vmax.f32 %v6560_v55, 0.0  ;;  %v6557_v14 = vadd.f32 %v13845_v8, %v6511_v40  ;;  %v6600_v52 = vmax.f32 %v6558_v62, 0.0  ;;  %v17436_v62 = vld [vmem:[#allocation121_spill] sm:$0xff] }
 0x6f6   : > { %v5707_v25 = vpop.f32.mrf.mxu2 }
 0x6f7   : > { %v5801_v35 = vadd.f32 %v5707_v25, %v13505_v21  ;;  %v6605_v4 = vmax.f32 %v6563_v50, 0.0  ;;  %v6603_v21 = vmax.f32 %v6561_v30, 0.0  ;;  %v6509_v50 = vadd.f32 %v17424_v1, %v13781_v56  ;;  %v17425_v25 = vld [vmem:[#allocation81_spill] sm:$0xff]  ;;  %v17428_v56 = vld [vmem:[#allocation80_spill] sm:$0xff] }
 0x6f8   : > { %v6508_v53 = vadd.f32 %v17425_v25, %v13774_v58  ;;  %v6507_v30 = vadd.f32 %v17428_v56, %v13767_v24  ;;  %v13890_v58 = vpop.f32.mrf.mxu0  ;;  %v17433_v24 = vld [vmem:[#allocation79_spill] sm:$0xff] }
 0x6f9   : > { %v13858_v31 = vadd.f32 %v6066_v26, %v5801_v35  ;;  %6678 = vmatpush.msrb.mxu1 %v6605_v4  ;;  %v6556_v35 = vadd.f32 %v13845_v8, %v6510_v33  ;;  %v17427_v4 = vld [vmem:[#allocation179_spill] sm:$0xff]  ;;  %v6555_v37 = vadd.f32 %v13845_v8, %v6509_v50  ;;  %17429 = vst [vmem:[#allocation146_spill] sm:$0xff] %v13890_v58 }
 0x6fa   : > { %10222 = vmatmul.msk.f32.gmra.mxu3 %vm3224_vm3, %v17420_v10  ;;  %v6554_v15 = vadd.f32 %v13845_v8, %v6508_v53  ;;  %v13902_v34 = vpop.f32.mrf.mxu1  ;;  %v17437_v50 = vld [vmem:[#allocation75_spill] sm:$0xff] }
 0x6fb   : > { %17418 = vst [vmem:[#allocation18_spill] sm:$0xff] %v13858_v31  ;;  %10176 = vmatmul.msk.f32.gmra.mxu2 %vm3224_vm3, %v17422_v48  ;;  %6679 = vmatpush.msrb.mxu1 %v6604_v6  ;;  %v6506_v6 = vadd.f32 %v17430_v7, %v13760_v5  ;;  %v6598_v10 = vmax.f32 %v6556_v35, 0.0  ;;  %v6597_v48 = vmax.f32 %v6555_v37, 0.0  ;;  %v6504_v5 = vadd.f32 %v17434_v57, %v13746_v41 }
 0x6fc   : > { %v6596_v33 = vmax.f32 %v6554_v15, 0.0  ;;  %v6502_v41 = vadd.f32 %v17437_v50, %v13732_v54  ;;  %v17441_v54 = vld [vmem:[#allocation67_spill] sm:$0xff] }
 0x6fd   : > { %v6069_v44 = vpop.f32.mrf.mxu3  ;;  %6680 = vmatpush.msrb.mxu1 %v6603_v21  ;;  %v6553_v21 = vadd.f32 %v13845_v8, %v6507_v30 }
 0x6fe   : > { %v5710_v61 = vpop.f32.mrf.mxu2  ;;  %v6548_v35 = vadd.f32 %v13845_v8, %v6502_v41 }
 0x6ff   : > { %v5802_v26 = vadd.f32 %v5710_v61, %v13516_v12  ;;  %6681 = vmatpush.msrb.mxu1 %v6602_v9  ;;  %v6599_v12 = vmax.f32 %v6557_v14, 0.0  ;;  %v17435_v9 = vld [vmem:[#allocation65_spill] sm:$0xff]  ;;  %v6503_v61 = vadd.f32 %v17436_v62, %v13739_v19  ;;  %v6550_v14 = vadd.f32 %v13845_v8, %v6504_v5 }
 0x700   : > { %v13919_v25 = vpop.f32.mrf.mxu0  ;;  %v17448_v5 = vld [vmem:[#allocation117_spill] sm:$0xff] }
 0x701   : > { %v13880_v32 = vadd.f32 %v6069_v44, %v5802_v26  ;;  %6682 = vmatpush.msrb.mxu1 %v6601_v22  ;;  %v6552_v44 = vadd.f32 %v13845_v8, %v6506_v6  ;;  %17439 = vst [vmem:[#allocation147_spill] sm:$0xff] %v13919_v25  ;;  %v17444_v6 = vld [vmem:[#allocation109_spill] sm:$0xff] }
 0x702   : > { %10223 = vmatmul.msk.f32.gmra.mxu3 %vm3224_vm3, %v17427_v4  ;;  %v13925_v4 = vpop.f32.mrf.mxu1 }
 0x703   : > { %17426 = vst [vmem:[#allocation44_spill] sm:$0xff] %v13880_v32  ;;  %10177 = vmatmul.msk.f32.gmra.mxu2 %vm3224_vm3, %v17309_v20  ;;  %6683 = vmatpush.msrb.mxu1 %v6600_v52  ;;  %v6505_v20 = vadd.f32 %v17433_v24, %v13753_v13  ;;  %v6595_v13 = vmax.f32 %v6553_v21, 0.0  ;;  %v6594_v22 = vmax.f32 %v6552_v44, 0.0  ;;  %v6592_v52 = vmax.f32 %v6550_v14, 0.0  ;;  %v17449_v44 = vld [vmem:[#allocation113_spill] sm:$0xff] }
 0x705   : > { %v13894_v55 = vpop.f32.mrf.mxu3  ;;  %6684 = vmatpush.msrb.mxu1 %v6599_v12  ;;  %v6551_v1 = vadd.f32 %v13845_v8, %v6505_v20  ;;  %v6590_v12 = vmax.f32 %v6548_v35, 0.0  ;;  %v17446_v20 = vld [vmem:[#allocation71_spill] sm:$0xff] }
 0x706   : > { %17431 = vst [vmem:[#allocation19_spill] sm:$0xff] %v13894_v55  ;;  %v13897_v40 = vpop.f32.mrf.mxu2 }
 0x707   : > { %17432 = vst [vmem:[#allocation144_spill] sm:$0xff] %v13897_v40  ;;  %6685 = vmatpush.msrb.mxu1 %v6598_v10  ;;  %v6593_v19 = vmax.f32 %v6551_v1, 0.0 }
 0x708   : > { %v13935_v7 = vpop.f32.mrf.mxu0 }
 0x709   : > { %6686 = vmatpush.msrb.mxu1 %v6597_v48  ;;  %17443 = vst [vmem:[#allocation155_spill] sm:$0xff] %v13935_v7 }
 0x70a   : > { %10224 = vmatmul.msk.f32.gmra.mxu3 %vm3224_vm3, %v17435_v9  ;;  %v13941_v10 = vpop.f32.mrf.mxu1  ;;  %v17450_v9 = vld [vmem:[#allocation22_spill] sm:$0xff] }
 0x70b   : > { %10178 = vmatmul.msk.f32.gmra.mxu2 %vm3224_vm3, %v17312_v17  ;;  %6687 = vmatpush.msrb.mxu1 %v6596_v33  ;;  %v6549_v17 = vadd.f32 %v13845_v8, %v6503_v61  ;;  %v1826_v62 = vadd.s32 1000, %v17450_v9 }
 0x70d   : > { %v13916_v26 = vpop.f32.mrf.mxu3  ;;  %6688 = vmatpush.msrb.mxu1 %v6595_v13  ;;  %v6591_v56 = vmax.f32 %v6549_v17, 0.0  ;;  %vm2582_vm12 = vcmp.eq.s32.totalorder %v1826_v62, 1001 }
 0x70e   : > { %17438 = vst [vmem:[#allocation149_spill] sm:$0xff] %v13916_v26  ;;  %v13921_v53 = vpop.f32.mrf.mxu2 }
 0x70f   : > { %17440 = vst [vmem:[#allocation152_spill] sm:$0xff] %v13921_v53  ;;  %6689 = vmatpush.msrb.mxu1 %v6594_v22  ;;  %v17451_v22 = vld [vmem:[#allocation73_spill] sm:$0xff] }
 0x710   : > { %v13947_v24 = vpop.f32.mrf.mxu0 }
 0x711   : > { %6690 = vmatpush.msrb.mxu1 %v6593_v19 }
 0x712   : > { %10225 = vmatmul.msk.f32.gmra.mxu3 %vm3224_vm3, %v17441_v54  ;;  %v5463_v21 = vpop.f32.mrf.mxu1 }
 0x713   : > { %10179 = vmatmul.msk.f32.gmra.mxu2 %vm3224_vm3, %v17316_v59  ;;  %6691 = vmatpush.msrb.mxu1 %v6592_v52  ;;  %v17452_v52 = vrot.slane %v12974_v49, 6 }
 0x715   : > { %v13931_v30 = vpop.f32.mrf.mxu3  ;;  %6692 = vmatpush.msrb.mxu1 %v6591_v56 }
 0x716   : > { %17442 = vst [vmem:[#allocation150_spill] sm:$0xff] %v13931_v30  ;;  %v13933_v37 = vpop.f32.mrf.mxu2 }
 0x717   : > { %6693 = vmatpush.msrb.mxu1 %v6590_v12 }
 0x71a   : > { %10226 = vmatmul.msk.f32.gmra.mxu3 %vm3224_vm3, %v17444_v6  ;;  %v5466_v50 = vpop.f32.mrf.mxu1 }
 0x71b   : > { %10180 = vmatmul.msk.f32.gmra.mxu2 %vm3224_vm3, %v17320_v29  ;;  %v10988_v29 = vld [vmem:[%s16961_s22] ss:$0 sm:$0xff]  ;;  %v5538_v40 = vadd.f32 %v5466_v50, %v13627_v36  ;;  %v5535_v36 = vadd.f32 %v13925_v4, %v13605_v39  ;;  %v5533_v39 = vadd.f32 %v13872_v63, %v13588_v11  ;;  %s9606_s22 = sshll.u32 %s9602_s4, 4  ;;  %s9607_s22 = int_to_ptr.hbm [resolvable:$true] %s9606_s22 }
 0x71c   : > { %v1572_v33 = vadd.f32 %v10988_v29, %v17448_v5  ;;  %s11003_s30 = sshra.s32 %s9607_s22, 4  ;;  %s11004_s30 = int_to_ptr.hbm [resolvable:$true] %s11003_s30 }
 0x71d   : > { %v13943_v59 = vpop.f32.mrf.mxu3  ;;  %s11005_s1 = scalar_lea.hbm %s11004_s30, 1  ;;  %p11010_p0 = scmp.lt.s32.totalorder %s11004_s30, %s16809_s21 }
 0x71e   : > { %17445 = vst [vmem:[#allocation153_spill] sm:$0xff] %v13943_v59  ;;  %v13945_v15 = vpop.f32.mrf.mxu2  ;;  %v1699_v13 = vmax.f32 %v1572_v33, 0.0  ;;  %p11006_p11 = scmp.ne.s32.totalorder %s11004_s30, %s11005_s1 }
 0x720   : > { %v3086_v41 = vsel %vm2582_vm12, 0.0, %v1699_v13  ;;  %p11007_p12 = pnand %p11006_p11, %p11234_p5 }
 0x721   : > { %v5915_v14 = vrot.slane %v3086_v41, 6 }
 0x722   : > { %10227 = vmatmul.msk.f32.gmra.mxu3 %vm3224_vm3, %v17446_v20  ;;  %v5469_v54 = vpop.f32.mrf.mxu1  ;;  %p11008_p13 = pneg %p11007_p12 }
 0x723   : > { %10181 = vmatmul.msk.f32.gmra.mxu2 %vm3224_vm3, %v17323_v0  ;;  %v13966_v0 = vpop.f32.mrf.mxu0  ;;  %v5916_v35 = vsel %vm1175_vm0, %v17452_v52, %v5915_v14  ;;  %v5539_v26 = vadd.f32 %v5469_v54, %v13634_v3  ;;  %vm7087_vm0 = vcmask 516096  }
 0x725   : > { %v13953_v48 = vpop.f32.mrf.mxu3 }
 0x726   : > { %17447 = vst [vmem:[#allocation48_spill] sm:$0xff] %v13953_v48  ;;  %v13955_v57 = vpop.f32.mrf.mxu2 }
 0x72a   : > { %10228 = vmatmul.msk.f32.gmra.mxu3 %vm3224_vm3, %v17449_v44 }
 0x72b   : > { %10182 = vmatmul.msk.f32.gmra.mxu2 %vm3224_vm3, %v17325_v16  ;;  %v13978_v16 = vpop.f32.mrf.mxu0 }
 0x72d   : > { %v13968_v61 = vpop.f32.mrf.mxu3 }
 0x72e   : > { %v13970_v1 = vpop.f32.mrf.mxu2 }
 0x732   : > { %10229 = vmatmul.msk.f32.gmra.mxu3 %vm3224_vm3, %v17451_v22 }
 0x733   : > { %10183 = vmatmul.msk.f32.gmra.mxu2 %vm3224_vm3, %v17326_v43  ;;  %v6460_v6 = vpop.f32.mrf.mxu0  ;;  %v5472_v43 = vpop.f32.mrf.mxu1 }
 0x734   : > { %v5540_v55 = vadd.f32 %v5472_v43, %v13641_v38  ;;  %v5536_v38 = vadd.f32 %v13941_v10, %v13613_v60 }
 0x735   : > { %v13976_v19 = vpop.f32.mrf.mxu3 }
 0x736   : > { %v5731_v17 = vpop.f32.mrf.mxu2 }
 0x73a   : > { %10230 = vmatmul.msk.f32.gmra.mxu3 %vm3224_vm3, %v5916_v35 }
 0x73b   : > { %10184 = vmatmul.msk.f32.gmra.mxu2 %vm3224_vm3, %v17175_v46  ;;  %v6463_v5 = vpop.f32.mrf.mxu0  ;;  %v5475_v44 = vpop.f32.mrf.mxu1 }
 0x73c   : > { %v5541_v32 = vadd.f32 %v5475_v44, %v13648_v27  ;;  %v5537_v27 = vadd.f32 %v5463_v21, %v13620_v51  ;;  %v5534_v51 = vadd.f32 %v13902_v34, %v13597_v42  ;;  %v5532_v21 = vadd.f32 %v13849_v2, %v13572_v28 }
 0x73d   : > { %v6093_v56 = vpop.f32.mrf.mxu3 }
 0x73e   : > { %v5734_v12 = vpop.f32.mrf.mxu2  ;;  %v5808_v4 = vadd.f32 %v13970_v1, %v5534_v51  ;;  %v17455_v1 = vld [vmem:[#allocation138_spill] sm:$0xff]  ;;  %v17468_v51 = vld [vmem:[#allocation149_spill] sm:$0xff] }
 0x740   : > { %v6167_v43 = vadd.f32 %v13968_v61, %v5808_v4  ;;  %v17460_v61 = vld [vmem:[#allocation118_spill] sm:$0xff] }
 0x743   : > { %v6466_v62 = vpop.f32.mrf.mxu0  ;;  %v5478_v41 = vpop.f32.mrf.mxu1 }
 0x745   : > { %v6096_v20 = vpop.f32.mrf.mxu3 }
 0x746   : > { %v5737_v29 = vpop.f32.mrf.mxu2 }
 0x747   : > { %v5811_v3 = vadd.f32 %v5737_v29, %v5537_v27 }
 0x74b   : > { %v6469_v14 = vpop.f32.mrf.mxu0  ;;  %v13986_v35 = vpop.f32.mrf.mxu1 }
 0x74c   : > { %17453 = vst [vmem:[#allocation158_spill] sm:$0xff] %v13986_v35  ;;  %v5542_v35 = vadd.f32 %v5478_v41, %v13655_v18 }
 0x74d   : > { %v6099_v33 = vpop.f32.mrf.mxu3 }
 0x74e   : > { %v5740_v9 = vpop.f32.mrf.mxu2 }
 0x74f   : > { %v5812_v44 = vadd.f32 %v5740_v9, %v5538_v40  ;;  %v6170_v40 = vadd.f32 %v6096_v20, %v5811_v3 }
 0x751   : > { %v6171_v18 = vadd.f32 %v6099_v33, %v5812_v44  ;;  %v17458_v33 = vld [vmem:[#allocation48_spill] sm:$0xff] }
 0x753   : > { %v13989_v45 = vpop.f32.mrf.mxu0  ;;  %v13993_v30 = vpop.f32.mrf.mxu1  ;;  %v6529_v42 = vadd.f32 %v13978_v16, %v6171_v18  ;;  %v5806_v16 = vadd.f32 %v13945_v15, %v5532_v21 }
 0x754   : > { %17454 = vst [vmem:[#allocation156_spill] sm:$0xff] %v13989_v45 }
 0x755   : > { %v6102_v49 = vpop.f32.mrf.mxu3  ;;  %v6575_v2 = vadd.f32 %v13845_v8, %v6529_v42 }
 0x756   : > { %v5743_v13 = vpop.f32.mrf.mxu2 }
 0x757   : > { %v5813_v25 = vadd.f32 %v5743_v13, %v5539_v26  ;;  %v17461_v13 = vld [vmem:[#allocation16_spill] sm:$0xff]  ;;  %v6617_v44 = vmax.f32 %v6575_v2, 0.0 }
 0x758   : > { %v5529_v41 = vadd.f32 %v17461_v13, %v17460_v61 }
 0x75b   : > { %v14000_v54 = vpop.f32.mrf.mxu0  ;;  %v5487_v10 = vpop.f32.mrf.mxu1 }
 0x75d   : > { %v6105_v22 = vpop.f32.mrf.mxu3 }
 0x75e   : > { %v5746_v52 = vpop.f32.mrf.mxu2 }
 0x75f   : > { %v5814_v58 = vadd.f32 %v5746_v52, %v5540_v55 }
 0x761   : > { %v6173_v45 = vadd.f32 %v6105_v22, %v5814_v58  ;;  %v5809_v58 = vadd.f32 %v5731_v17, %v5535_v36  ;;  %v5807_v17 = vadd.f32 %v13955_v57, %v5533_v39  ;;  %v17462_v22 = vld [vmem:[#allocation152_spill] sm:$0xff]  ;;  %v17470_v39 = vld [vmem:[#allocation125_spill] sm:$0xff] }
 0x762   : > { %v5545_v4 = vadd.f32 %v5487_v10, %v17470_v39  ;;  %v17474_v10 = vld [vmem:[#allocation135_spill] sm:$0xff] }
 0x763   : > { %v6531_v26 = vadd.f32 %v6463_v5, %v6173_v45  ;;  %v6478_v57 = vpop.f32.mrf.mxu0  ;;  %v6166_v9 = vadd.f32 %v17458_v33, %v5807_v17  ;;  %v14045_v3 = vpop.f32.mrf.mxu1 }
 0x765   : > { %v6108_v46 = vpop.f32.mrf.mxu3 }
 0x766   : > { %v5749_v31 = vpop.f32.mrf.mxu2 }
 0x767   : > { %v5815_v23 = vadd.f32 %v5749_v31, %v5541_v32  ;;  %v6172_v31 = vadd.f32 %v6102_v49, %v5813_v25 }
 0x769   : > { %v6174_v59 = vadd.f32 %v6108_v46, %v5815_v23  ;;  %v5810_v23 = vadd.f32 %v5734_v12, %v5536_v38  ;;  %v6168_v12 = vadd.f32 %v13976_v19, %v5809_v58  ;;  %v17456_v19 = vld [vmem:[#allocation116_spill] sm:$0xff] }
 0x76b   : > { %v6532_v32 = vadd.f32 %v6466_v62, %v6174_v59  ;;  %v6169_v59 = vadd.f32 %v6093_v56, %v5810_v23  ;;  %v5531_v56 = vadd.f32 %v17455_v1, %v13549_v47  ;;  %v17459_v62 = vld [vmem:[#allocation155_spill] sm:$0xff]  ;;  %v17467_v23 = vld [vmem:[#allocation146_spill] sm:$0xff] }
 0x76c   : > { %v6526_v47 = vadd.f32 %v17459_v62, %v6168_v12  ;;  %v6524_v18 = vadd.f32 %v17467_v23, %v6166_v9 }
 0x76d   : > { %v6111_v53 = vpop.f32.mrf.mxu3  ;;  %v6527_v20 = vadd.f32 %v13947_v24, %v6169_v59  ;;  %v5805_v5 = vadd.f32 %v13933_v37, %v5531_v56  ;;  %v17464_v37 = vld [vmem:[#allocation147_spill] sm:$0xff] }
 0x76e   : > { %v5752_v7 = vpop.f32.mrf.mxu2  ;;  %v6525_v27 = vadd.f32 %v17464_v37, %v6167_v43  ;;  %v17471_v59 = vld [vmem:[#allocation19_spill] sm:$0xff]  ;;  %v6570_v12 = vadd.f32 %v13845_v8, %v6524_v18 }
 0x76f   : > { %v5816_v48 = vadd.f32 %v5752_v7, %v5542_v35  ;;  %v6530_v7 = vadd.f32 %v6460_v6, %v6172_v31  ;;  %v6528_v6 = vadd.f32 %v13966_v0, %v6170_v40  ;;  %v17457_v0 = vld [vmem:[#allocation140_spill] sm:$0xff]  ;;  %v17463_v35 = vld [vmem:[#allocation153_spill] sm:$0xff]  ;;  %v6573_v38 = vadd.f32 %v13845_v8, %v6527_v20 }
 0x770   : > { %v5530_v29 = vadd.f32 %v17457_v0, %v17456_v19  ;;  %v6165_v46 = vadd.f32 %v17463_v35, %v5806_v16  ;;  %v17465_v31 = vld [vmem:[#allocation144_spill] sm:$0xff]  ;;  %v17469_v40 = vld [vmem:[#allocation141_spill] sm:$0xff]  ;;  %v6612_v2 = vmax.f32 %v6570_v12, 0.0  ;;  %v5493_v0 = vpop.f32.mrf.mxu1 }
 0x771   : > { %v6175_v55 = vadd.f32 %v6111_v53, %v5816_v48  ;;  %v6578_v53 = vadd.f32 %v13845_v8, %v6532_v32  ;;  %v6577_v48 = vadd.f32 %v13845_v8, %v6531_v26  ;;  %v6576_v63 = vadd.f32 %v13845_v8, %v6530_v7 }
 0x772   : > { %v6574_v24 = vadd.f32 %v13845_v8, %v6528_v6  ;;  %v5803_v32 = vadd.f32 %v17465_v31, %v5529_v41  ;;  %v6523_v7 = vadd.f32 %v17469_v40, %v6165_v46  ;;  %v14058_v6 = vpop.f32.mrf.mxu0 }
 0x773   : > { %v6533_v50 = vadd.f32 %v6469_v14, %v6175_v55  ;;  %v6620_v11 = vmax.f32 %v6578_v53, 0.0  ;;  %v6619_v28 = vmax.f32 %v6577_v48, 0.0  ;;  %v6618_v15 = vmax.f32 %v6576_v63, 0.0  ;;  %v17466_v55 = vld [vmem:[#allocation150_spill] sm:$0xff]  ;;  %v17473_v63 = vld [vmem:[#allocation17_spill] sm:$0xff] }
 0x774   : > { %v5804_v14 = vadd.f32 %v17462_v22, %v5530_v29  ;;  %v6164_v36 = vadd.f32 %v17466_v55, %v5805_v5  ;;  %v6616_v26 = vmax.f32 %v6574_v24, 0.0  ;;  %v6571_v53 = vadd.f32 %v13845_v8, %v6525_v27  ;;  %v17475_v29 = vld [vmem:[#allocation44_spill] sm:$0xff]  ;;  %v17478_v24 = vld [vmem:[#allocation106_spill] sm:$0xff] }
 0x775   : > { %v6579_v60 = vadd.f32 %v13845_v8, %v6533_v50  ;;  %v14007_v25 = vpop.f32.mrf.mxu3  ;;  %v6572_v50 = vadd.f32 %v13845_v8, %v6526_v47  ;;  %v6162_v42 = vadd.f32 %v17471_v59, %v5803_v32  ;;  %v6569_v43 = vadd.f32 %v13845_v8, %v6523_v7  ;;  %v17476_v5 = vld [vmem:[#allocation104_spill] sm:$0xff] }
 0x776   : > { %v14013_v45 = vpop.f32.mrf.mxu2  ;;  %v6163_v58 = vadd.f32 %v17468_v51, %v5804_v14  ;;  %v6613_v16 = vmax.f32 %v6571_v53, 0.0  ;;  %v6519_v33 = vadd.f32 %v17476_v5, %v17475_v29 }
 0x777   : > { %v6621_v34 = vmax.f32 %v6579_v60, 0.0  ;;  %v6615_v60 = vmax.f32 %v6573_v38, 0.0  ;;  %v6614_v17 = vmax.f32 %v6572_v50, 0.0  ;;  %v6520_v20 = vadd.f32 %v17474_v10, %v6162_v42  ;;  %v17479_v42 = vld [vmem:[#allocation133_spill] sm:$0xff] }
 0x778   : > { %v6521_v1 = vadd.f32 %v17473_v63, %v6163_v58  ;;  %v6611_v62 = vmax.f32 %v6569_v43, 0.0  ;;  %v6565_v46 = vadd.f32 %v13845_v8, %v6519_v33  ;;  %v5496_v38 = vpop.f32.mrf.mxu1  ;;  %v17482_v63 = vld [vmem:[#allocation130_spill] sm:$0xff]  ;;  %v17483_v10 = vld [vmem:[#allocation129_spill] sm:$0xff]  ;;  %v17485_v33 = vld [vmem:[#allocation127_spill] sm:$0xff] }
 0x779   : > { %6716 = vmatpush.msra.mxu2 %v6621_v34  ;;  %v17472_v34 = vld [vmem:[#allocation143_spill] sm:$0xff]  ;;  %v6566_v22 = vadd.f32 %v13845_v8, %v6520_v20  ;;  %v6632_v43 = vld [vmem:[%s17481_s29] sm:$0xff]  ;;  %v5548_v20 = vadd.f32 %v5496_v38, %v17483_v10 }
 0x77a   : > { %v6522_v48 = vadd.f32 %v17472_v34, %v6164_v36  ;;  %v6567_v47 = vadd.f32 %v13845_v8, %v6521_v1  ;;  %6694 = vmatmul.f32.vlgmr.msrb.gmra.mxu1 %v6632_v43 }
 0x77b   : > { %6717 = vmatpush.msra.mxu2 %v6620_v11  ;;  %v6608_v37 = vmax.f32 %v6566_v22, 0.0 }
 0x77c   : > { %v6568_v19 = vadd.f32 %v13845_v8, %v6522_v48  ;;  %v6609_v35 = vmax.f32 %v6567_v47, 0.0 }
 0x77d   : > { %v14034_v49 = vpop.f32.mrf.mxu3  ;;  %6718 = vmatpush.msra.mxu2 %v6619_v28 }
 0x77e   : > { %v14040_v52 = vpop.f32.mrf.mxu2  ;;  %v6610_v41 = vmax.f32 %v6568_v19, 0.0  ;;  %v17484_v19 = vld [vmem:[#allocation137_spill] sm:$0xff] }
 0x77f   : > { %6719 = vmatpush.msra.mxu2 %v6618_v15  ;;  %v17477_v15 = vld [vmem:[#allocation18_spill] sm:$0xff] }
 0x780   : > { %v6518_v61 = vadd.f32 %v17478_v24, %v17477_v15  ;;  %v5499_v18 = vpop.f32.mrf.mxu1 }
 0x781   : > { %6720 = vmatpush.msra.mxu2 %v6617_v44  ;;  %v6607_v44 = vmax.f32 %v6565_v46, 0.0  ;;  %v5549_v1 = vadd.f32 %v5499_v18, %v17482_v63 }
 0x782   : > { %v6564_v27 = vadd.f32 %v13845_v8, %v6518_v61  ;;  %v17486_v61 = vld [vmem:[#allocation124_spill] sm:$0xff] }
 0x783   : > { %6721 = vmatpush.msra.mxu2 %v6616_v26 }
 0x784   : > { %v6606_v32 = vmax.f32 %v6564_v27, 0.0 }
 0x785   : > { %v6120_v21 = vpop.f32.mrf.mxu3  ;;  %6722 = vmatpush.msra.mxu2 %v6615_v60 }
 0x786   : > { %v5761_v11 = vpop.f32.mrf.mxu2 }
 0x787   : > { %v5819_v56 = vadd.f32 %v5761_v11, %v5545_v4  ;;  %6723 = vmatpush.msra.mxu2 %v6614_v17  ;;  %v6633_v11 = vld [vmem:[%s17481_s29 + $0x8] sm:$0xff] }
 0x788   : > { %v5502_v40 = vpop.f32.mrf.mxu1 }
 0x789   : > { %v6178_v28 = vadd.f32 %v6120_v21, %v5819_v56  ;;  %6724 = vmatpush.msra.mxu2 %v6613_v16  ;;  %v17480_v21 = vld [vmem:[#allocation132_spill] sm:$0xff] }
 0x78a   : > { %v5550_v17 = vadd.f32 %v5502_v40, %v17480_v21 }
 0x78b   : > { %v14066_v9 = vadd.f32 %v6478_v57, %v6178_v28  ;;  %6725 = vmatpush.msra.mxu2 %v6612_v2  ;;  %v14075_v57 = vpop.f32.mrf.mxu0 }
 0x78d   : > { %v14071_v13 = vpop.f32.mrf.mxu3  ;;  %6726 = vmatpush.msra.mxu2 %v6611_v62  ;;  %v5547_v62 = vadd.f32 %v5493_v0, %v17485_v33  ;;  %v6648_v33 = vld [vmem:[%s17481_s29 + $0x80] sm:$0xff] }
 0x78e   : > { %v5764_v14 = vpop.f32.mrf.mxu2 }
 0x78f   : > { %6727 = vmatpush.msra.mxu2 %v6610_v41  ;;  %v5546_v41 = vadd.f32 %v14045_v3, %v17486_v61  ;;  %v6635_v3 = vld [vmem:[%s17481_s29 + $0x18] sm:$0xff]  ;;  %v6650_v61 = vld [vmem:[%s17481_s29 + $0x90] sm:$0x7f] }
 0x790   : > { %v5505_v39 = vpop.f32.mrf.mxu1  ;;  %6697 = vmatmul.f32.gmra.mxu1 %v6635_v3  ;;  %v10287_v3 = vld [vmem:[%s17491_s6 + $0x30] sm:$0xff] }
 0x791   : > { %6728 = vmatpush.msra.mxu2 %v6609_v35  ;;  %v5551_v34 = vadd.f32 %v5505_v39, %v17479_v42  ;;  %v6636_v35 = vld [vmem:[%s17481_s29 + $0x20] sm:$0xff] }
 0x792   : > { %v17488_v39 = vld [vmem:[#allocation122_spill] sm:$0xff] }
 0x793   : > { %6729 = vmatpush.msra.mxu2 %v6608_v37  ;;  %v6487_v36 = vpop.f32.mrf.mxu0 }
 0x795   : > { %v6126_v31 = vpop.f32.mrf.mxu3  ;;  %6730 = vmatpush.msra.mxu2 %v6607_v44 }
 0x796   : > { %v5767_v55 = vpop.f32.mrf.mxu2 }
 0x797   : > { %6731 = vmatpush.msra.mxu2 %v6606_v32  ;;  %v5821_v46 = vadd.f32 %v5767_v55, %v5547_v62  ;;  %v5820_v32 = vadd.f32 %v5764_v14, %v5546_v41  ;;  %v17489_v14 = vld [vmem:[#allocation158_spill] sm:$0xff]  ;;  %v6643_v41 = vld [vmem:[%s17481_s29 + $0x58] sm:$0xff] }
 0x798   : > { %6732 = vmatmul.f32.vlgmr.msra.gmra.mxu2 %v6633_v11  ;;  %v5508_v16 = vpop.f32.mrf.mxu1  ;;  %v6637_v62 = vld [vmem:[%s17481_s29 + $0x28] sm:$0xff] }
 0x799   : > { %v5552_v29 = vadd.f32 %v5508_v16, %v17484_v19 }
 0x79b   : > { %v6490_v50 = vpop.f32.mrf.mxu0 }
 0x79d   : > { %v6129_v23 = vpop.f32.mrf.mxu3 }
 0x79e   : > { %v5770_v26 = vpop.f32.mrf.mxu2 }
 0x79f   : > { %v5822_v47 = vadd.f32 %v5770_v26, %v5548_v20  ;;  %v17487_v26 = vld [vmem:[#allocation120_spill] sm:$0xff] }
 0x7a0   : > { %6735 = vmatmul.f32.gmra.mxu2 %v6636_v35  ;;  %v5544_v40 = vadd.f32 %v13993_v30, %v17487_v26  ;;  %v6649_v35 = vld [vmem:[%s17481_s29 + $0x88] sm:$0xff]  ;;  %v10288_v26 = vld [vmem:[%s17491_s6 + $0x38] sm:$0xff] }
 0x7a1   : > { %v6181_v18 = vadd.f32 %v6129_v23, %v5822_v47  ;;  %v5543_v23 = vadd.f32 %v17489_v14, %v17488_v39  ;;  %v6647_v47 = vld [vmem:[%s17481_s29 + $0x78] sm:$0xff]  ;;  %6894 = vmatpush.msra.mxu1 %v10288_v26  ;;  %v10303_v39 = vld [vmem:[%s17491_s6 + $0x40] sm:$0xff] }
 0x7a2   : > { %v10285_v14 = vld [vmem:[%s17491_s6 + $0x20] sm:$0xff] }
 0x7a3   : > { %v6493_v60 = vpop.f32.mrf.mxu0  ;;  %6895 = vmatpush.msra.mxu1 %v10287_v3 }
 0x7a5   : > { %v6132_v51 = vpop.f32.mrf.mxu3 }
 0x7a6   : > { %v5773_v58 = vpop.f32.mrf.mxu2 }
 0x7a7   : > { %v5823_v28 = vadd.f32 %v5773_v58, %v5549_v1  ;;  %v6642_v1 = vld [vmem:[%s17481_s29 + $0x50] sm:$0xff] }
 0x7a9   : > { %v6182_v37 = vadd.f32 %v6132_v51, %v5823_v28 }
 0x7ab   : > { %v6496_v48 = vpop.f32.mrf.mxu0 }
 0x7ad   : > { %v6135_v7 = vpop.f32.mrf.mxu3 }
 0x7ae   : > { %v5776_v53 = vpop.f32.mrf.mxu2 }
 0x7af   : > { %v5824_v56 = vadd.f32 %v5776_v53, %v5550_v17  ;;  %v6540_v53 = vadd.f32 %v6490_v50, %v6182_v37  ;;  %v5817_v50 = vadd.f32 %v14013_v45, %v5543_v23  ;;  %v6638_v45 = vld [vmem:[%s17481_s29 + $0x30] sm:$0xff]  ;;  %v6840_v37 = vld [vmem:[%s17491_s6 + $0x18] sm:$0xff] }
 0x7b0   : > { %6700 = vmatmul.f32.gmra.mxu1 %v6638_v45  ;;  %6948 = vmatpush.msrb.mxu2 %v6840_v37 }
 0x7b1   : > { %v6183_v15 = vadd.f32 %v6135_v7, %v5824_v56  ;;  %v6180_v7 = vadd.f32 %v6126_v31, %v5821_v46  ;;  %v6639_v31 = vld [vmem:[%s17481_s29 + $0x38] sm:$0xff]  ;;  %v6586_v21 = vadd.f32 %v13845_v8, %v6540_v53  ;;  %v6652_v46 = vld [vmem:[%s17481_s29 + $0xa0] sm:$0x7f]  ;;  %v10286_v53 = vld [vmem:[%s17491_s6 + $0x28] sm:$0xff] }
 0x7b2   : > { %6738 = vmatmul.f32.gmra.mxu2 %v6639_v31  ;;  %v17490_v56 = vld [vmem:[#allocation156_spill] sm:$0xff]  ;;  %6896 = vmatpush.msra.mxu1 %v10286_v53 }
 0x7b3   : > { %v6499_v38 = vpop.f32.mrf.mxu0  ;;  %v6541_v58 = vadd.f32 %v6493_v60, %v6183_v15  ;;  %v5818_v60 = vadd.f32 %v14040_v52, %v5544_v40  ;;  %v6651_v15 = vld [vmem:[%s17481_s29 + $0x98] sm:$0x7f]  ;;  %v10305_v40 = vld [vmem:[%s17491_s6 + $0x50] sm:$0xff] }
 0x7b4   : > { %6897 = vmatpush.msra.mxu1 %v10285_v14 }
 0x7b5   : > { %v6138_v4 = vpop.f32.mrf.mxu3  ;;  %v6587_v42 = vadd.f32 %v13845_v8, %v6541_v58  ;;  %v6177_v52 = vadd.f32 %v14034_v49, %v5818_v60 }
 0x7b6   : > { %v5779_v59 = vpop.f32.mrf.mxu2 }
 0x7b7   : > { %v5825_v12 = vadd.f32 %v5779_v59, %v5551_v34  ;;  %v6539_v59 = vadd.f32 %v6487_v36, %v6181_v18  ;;  %v6538_v34 = vadd.f32 %v14075_v57, %v6180_v7  ;;  %v6629_v36 = vmax.f32 %v6587_v42, 0.0  ;;  %v10304_v7 = vld [vmem:[%s17491_s6 + $0x48] sm:$0xff] }
 0x7b8   : > { %v6176_v57 = vadd.f32 %v14007_v25, %v5817_v50  ;;  %v6535_v49 = vadd.f32 %v14000_v54, %v6177_v52  ;;  %v6582_v25 = vadd.f32 %v13845_v8, %v14066_v9  ;;  %v6641_v54 = vld [vmem:[%s17481_s29 + $0x48] sm:$0xff] }
 0x7b9   : > { %v6184_v2 = vadd.f32 %v6138_v4, %v5825_v12  ;;  %v6179_v4 = vadd.f32 %v14071_v13, %v5820_v32  ;;  %v6585_v17 = vadd.f32 %v13845_v8, %v6539_v59  ;;  %v6628_v12 = vmax.f32 %v6586_v21, 0.0  ;;  %6703 = vmatmul.f32.gmra.mxu1 %v6641_v54  ;;  %v6645_v9 = vld [vmem:[%s17481_s29 + $0x68] sm:$0xff]  ;;  %v6837_v32 = vld [vmem:[%s17491_s6] sm:$0xff] }
 0x7ba   : > { %v6584_v11 = vadd.f32 %v13845_v8, %v6538_v34  ;;  %v6534_v16 = vadd.f32 %v17490_v56, %v6176_v57  ;;  %v6581_v20 = vadd.f32 %v13845_v8, %v6535_v49  ;;  %6741 = vmatmul.f32.gmra.mxu2 %v6642_v1  ;;  %v6624_v28 = vmax.f32 %v6582_v25, 0.0 }
 0x7bb   : > { %v6542_v27 = vadd.f32 %v6496_v48, %v6184_v2  ;;  %v6537_v13 = vadd.f32 %v14058_v6, %v6179_v4  ;;  %v6627_v6 = vmax.f32 %v6585_v17, 0.0 }
 0x7bc   : > { %v6626_v43 = vmax.f32 %v6584_v11, 0.0  ;;  %v6580_v2 = vadd.f32 %v13845_v8, %v6534_v16  ;;  %v6623_v19 = vmax.f32 %v6581_v20, 0.0 }
 0x7bd   : > { %v6141_v22 = vpop.f32.mrf.mxu3  ;;  %v6588_v51 = vadd.f32 %v13845_v8, %v6542_v27  ;;  %v6583_v63 = vadd.f32 %v13845_v8, %v6537_v13  ;;  %v11085_v27 = vmov 0.0  }
 0x7be   : > { %v5782_v5 = vpop.f32.mrf.mxu2  ;;  %6793 = vst.msk [vmem:[#allocation2] sm:$0x1] %vm6792_vm14, %v11085_v27 }
 0x7bf   : > { %v5826_v24 = vadd.f32 %v5782_v5, %v5552_v29  ;;  %v6630_v48 = vmax.f32 %v6588_v51, 0.0  ;;  %v6625_v10 = vmax.f32 %v6583_v63, 0.0  ;;  %v6622_v29 = vmax.f32 %v6580_v2, 0.0  ;;  %v6634_v5 = vld [vmem:[%s17481_s29 + $0x10] sm:$0xff]  ;;  %6794 = vst.msk [vmem:[#allocation2 + $0x70] sm:$0x1] %vm6792_vm14, %v11085_v27 }
 0x7c1   : > { %v6185_v44 = vadd.f32 %v6141_v22, %v5826_v24  ;;  %v6640_v24 = vld [vmem:[%s17481_s29 + $0x40] sm:$0xff]  ;;  %v6646_v22 = vld [vmem:[%s17481_s29 + $0x70] sm:$0xff] }
 0x7c2   : > { %6744 = vmatmul.f32.gmra.mxu2 %v6645_v9 }
 0x7c3   : > { %v6543_v0 = vadd.f32 %v6499_v38, %v6185_v44  ;;  %v6839_v44 = vld [vmem:[%s17491_s6 + $0x10] sm:$0xff]  ;;  %v6838_v38 = vld [vmem:[%s17491_s6 + $0x8] sm:$0xff] }
 0x7c4   : > { %6949 = vmatpush.msrb.mxu2 %v6839_v44 }
 0x7c5   : > { %v6589_v55 = vadd.f32 %v13845_v8, %v6543_v0  ;;  %v6644_v8 = vld [vmem:[%s17481_s29 + $0x60] sm:$0xff]  ;;  %v10306_v0 = vld [vmem:[%s17491_s6 + $0x58] sm:$0xff] }
 0x7c6   : > { %6706 = vmatmul.f32.gmra.mxu1 %v6644_v8  ;;  %6950 = vmatpush.msrb.mxu2 %v6838_v38 }
 0x7c7   : > { %v6631_v30 = vmax.f32 %v6589_v55, 0.0 }
 0x7c8   : > { %6951 = vmatpush.msrb.mxu2 %v6837_v32 }
 0x7c9   : > { %10277 = vmatpush.msk.msrb.mxu3 %vm4842_vm8, %v6631_v30 }
 0x7ca   : > { %6747 = vmatmul.f32.gmra.mxu2 %v6648_v33 }
 0x7cb   : > { %6761 = vmatpush.msrb.mxu3 %v6630_v48 }
 0x7cd   : > { %6762 = vmatpush.msrb.mxu3 %v6629_v36 }
 0x7ce   : > { %6709 = vmatmul.f32.gmra.mxu1 %v6647_v47 }
 0x7cf   : > { %6763 = vmatpush.msrb.mxu3 %v6628_v12 }
 0x7d1   : > { %6764 = vmatpush.msrb.mxu3 %v6627_v6 }
 0x7d2   : > { %6750 = vmatmul.f32.gmra.mxu2 %v6651_v15 }
 0x7d3   : > { %6765 = vmatpush.msrb.mxu3 %v6626_v43 }
 0x7d5   : > { %6766 = vmatpush.msrb.mxu3 %v6625_v10 }
 0x7d6   : > { %6712 = vmatmul.f32.gmra.mxu1 %v6650_v61 }
 0x7d7   : > { %6767 = vmatpush.msrb.mxu3 %v6624_v28 }
 0x7d9   : > { %6768 = vmatpush.msrb.mxu3 %v6623_v19 }
 0x7db   : > { %6769 = vmatpush.msrb.mxu3 %v6622_v29 }
 0x7dc   : > { %10278 = vmatmul.msk.f32.vlgmr.msrb.gmra.mxu3 %vm6653_vm13, %v6634_v5 }
 0x7dd   : > { %7036 = vmatpush.msra.mxu3 %v10306_v0 }
 0x7df   : > { %7037 = vmatpush.msra.mxu3 %v10305_v40  ;;  %v6981_v40 = vld [vmem:[#allocation2 + $0x70] sm:$0x1] }
 0x7e0   : > { %7089 = vst.msk [vmem:[#allocation2 + $0x70] sm:$0x1] %vm7087_vm0, %v11085_v27 }
 0x7e1   : > { %7038 = vmatpush.msra.mxu3 %v10304_v7 }
 0x7e3   : > { %7039 = vmatpush.msra.mxu3 %v10303_v39 }
 0x7e4   : > { %10279 = vmatmul.msk.f32.gmra.mxu3 %vm6653_vm13, %v6637_v62 }
 0x7ec   : > { %10280 = vmatmul.msk.f32.gmra.mxu3 %vm6653_vm13, %v6640_v24 }
 0x7f4   : > { %10281 = vmatmul.msk.f32.gmra.mxu3 %vm6653_vm13, %v6643_v41 }
 0x7f7   : > { %v6695_v18 = vpop.f32.mrf.mxu1 }
 0x7fc   : > { %10282 = vmatmul.msk.f32.gmra.mxu3 %vm6653_vm13, %v6646_v22 }
 0x804   : > { %10283 = vmatmul.msk.f32.gmra.mxu3 %vm6653_vm13, %v6649_v35 }
 0x80c   : > { %10284 = vmatmul.msk.f32.gmra.mxu3 %vm6653_vm13, %v6652_v46 }
 0x80d   : > { %v6698_v55 = vpop.f32.mrf.mxu1 }
 0x81b   : > { %v6733_v58 = vpop.f32.mrf.mxu2 }
 0x81c   : > { %v6734_v23 = vadd.f32 %v6733_v58, %v6695_v18 }
 0x823   : > { %v6736_v51 = vpop.f32.mrf.mxu2 }
 0x824   : > { %v6737_v31 = vadd.f32 %v6736_v51, %v6698_v55 }
 0x82d   : > { %v6701_v59 = vpop.f32.mrf.mxu1 }
 0x835   : > { %v6739_v30 = vpop.f32.mrf.mxu2 }
 0x836   : > { %v6704_v21 = vpop.f32.mrf.mxu1  ;;  %v6740_v17 = vadd.f32 %v6739_v30, %v6701_v59 }
 0x83d   : > { %v6742_v52 = vpop.f32.mrf.mxu2 }
 0x83e   : > { %v6743_v63 = vadd.f32 %v6742_v52, %v6704_v21 }
 0x843   : > { %v6707_v56 = vpop.f32.mrf.mxu1 }
 0x845   : > { %v6745_v20 = vpop.f32.mrf.mxu2 }
 0x846   : > { %v6746_v5 = vadd.f32 %v6745_v20, %v6707_v56  ;;  %v7137_v56 = vld [vmem:[%s17492_s8 + $0x20] sm:$0xff]  ;;  %v7134_v20 = vld [vmem:[%s17492_s8 + $0x8] sm:$0xff] }
 0x84b   : > { %v6710_v47 = vpop.f32.mrf.mxu1 }
 0x84d   : > { %v6748_v41 = vpop.f32.mrf.mxu2 }
 0x84e   : > { %v6749_v37 = vadd.f32 %v6748_v41, %v6710_v47  ;;  %v10338_v47 = vld [vmem:[%s17492_s8 + $0x90] sm:$0xff]  ;;  %v10315_v41 = vld [vmem:[%s17492_s8 + $0x48] sm:$0xff] }
 0x853   : > { %v6713_v3 = vpop.f32.mrf.mxu1 }
 0x855   : > { %v6751_v7 = vpop.f32.mrf.mxu2 }
 0x856   : > { %v6752_v51 = vadd.f32 %v6751_v7, %v6713_v3 }
 0x85f   : > { %v6771_v60 = vpop.f32.mrf.mxu3 }
 0x860   : > { %v6772_v4 = vadd.f32 %v6771_v60, %v6734_v23 }
 0x862   : > { %v6802_v42 = vrot.slane %v6772_v4, 7 }
 0x864   : > { %6823 = vst.msk [vmem:[#allocation2] sm:$0xfe] %vm6822_vm15, %v6802_v42 }
 0x867   : > { %v6774_v50 = vpop.f32.mrf.mxu3 }
 0x868   : > { %v6775_v34 = vadd.f32 %v6774_v50, %v6737_v31 }
 0x86a   : > { %v6803_v48 = vrot.slane %v6775_v34, 7 }
 0x86b   : > { %v6830_v13 = vld [vmem:[#allocation2] sm:$0xff] }
 0x86c   : > { %v6804_v36 = vsel %vm4482_vm11, %v6802_v42, %v6803_v48  ;;  %10296 = vmatmul.msk.f32.vlgmr.msrb.gmra.mxu2 %vm3224_vm3, %v6830_v13  ;;  %v6974_v11 = vld [vmem:[#allocation2] sm:$0xfc]  ;;  %7088 = vst.msk [vmem:[#allocation2] sm:$0x1] %vm7087_vm0, %v11085_v27 }
 0x86d   : > { %6824 = vst.msk [vmem:[#allocation2 + $0x10] sm:$0xff] %vm3224_vm3, %v6804_v36  ;;  %v6841_v49 = vld [vmem:[#allocation2] sm:$0xfe]  ;;  %v6995_v16 = vrot.slane %v6974_v11, 2  ;;  %v7008_v11 = vrot.slane %v6981_v40, 2 }
 0x86e   : > { %v6855_v25 = vrot.slane %v6841_v49, 1 }
 0x86f   : > { %v6777_v45 = vpop.f32.mrf.mxu3 }
 0x870   : > { %v6778_v57 = vadd.f32 %v6777_v45, %v6740_v17 }
 0x872   : > { %v6805_v12 = vrot.slane %v6778_v57, 7 }
 0x874   : > { %v6806_v6 = vsel %vm4482_vm11, %v6803_v48, %v6805_v12  ;;  %v6975_v1 = vld [vmem:[#allocation2 + $0x10] sm:$0xff] }
 0x875   : > { %6825 = vst.msk [vmem:[#allocation2 + $0x20] sm:$0xff] %vm3224_vm3, %v6806_v6  ;;  %v6996_v43 = vrot.slane %v6975_v1, 2  ;;  %v6856_v10 = vrot.slane %v6975_v1, 1  ;;  %10297 = vmatmul.msk.f32.gmra.mxu2 %vm3224_vm3, %v6975_v1  ;;  %v7140_v6 = vld [vmem:[%s17492_s8 + $0x38] sm:$0xff]  ;;  %v7138_v1 = vld [vmem:[%s17492_s8 + $0x28] sm:$0xff] }
 0x876   : > { %7248 = vmatpush.msra.mxu2 %v7140_v6 }
 0x877   : > { %v6780_v54 = vpop.f32.mrf.mxu3  ;;  %v6997_v28 = vsel %vm5200_vm10, %v6995_v16, %v6996_v43  ;;  %v6857_v2 = vsel %vm4124_vm5, %v6855_v25, %v6856_v10  ;;  %v7136_v16 = vld [vmem:[%s17492_s8 + $0x18] sm:$0xff] }
 0x878   : > { %v6781_v19 = vadd.f32 %v6780_v54, %v6743_v63  ;;  %10307 = vmatmul.msk.f32.vlgmr.msra.gmra.mxu3 %vm3224_vm3, %v6997_v28  ;;  %10289 = vmatmul.msk.f32.vlgmr.msra.gmra.mxu1 %vm3224_vm3, %v6857_v2  ;;  %v7139_v63 = vld [vmem:[%s17492_s8 + $0x30] sm:$0xff]  ;;  %v10343_v25 = vld [vmem:[%s17492_s8 + $0xb8] sm:$0xff]  ;;  %v7133_v2 = vld [vmem:[%s17492_s8] sm:$0xff] }
 0x879   : > { %7249 = vmatpush.msra.mxu2 %v7139_v63  ;;  %7340 = vmatpush.msrb.mxu3 %v10343_v25  ;;  %v10342_v54 = vld [vmem:[%s17492_s8 + $0xb0] sm:$0xff] }
 0x87a   : > { %v6807_v9 = vrot.slane %v6781_v19, 7  ;;  %v10320_v28 = vld [vmem:[%s17492_s8 + $0x70] sm:$0xff]  ;;  %v10341_v19 = vld [vmem:[%s17492_s8 + $0xa8] sm:$0xff] }
 0x87b   : > { %7250 = vmatpush.msra.mxu2 %v7138_v1  ;;  %7341 = vmatpush.msrb.mxu3 %v10342_v54 }
 0x87c   : > { %v6808_v29 = vsel %vm4482_vm11, %v6805_v12, %v6807_v9  ;;  %v6976_v8 = vld [vmem:[#allocation2 + $0x20] sm:$0xff] }
 0x87d   : > { %6826 = vst.msk [vmem:[#allocation2 + $0x30] sm:$0xff] %vm3224_vm3, %v6808_v29  ;;  %v6998_v33 = vrot.slane %v6976_v8, 2  ;;  %v6858_v62 = vrot.slane %v6976_v8, 1  ;;  %10298 = vmatmul.msk.f32.gmra.mxu2 %vm3224_vm3, %v6976_v8  ;;  %7342 = vmatpush.msrb.mxu3 %v10341_v19  ;;  %v10318_v8 = vld [vmem:[%s17492_s8 + $0x60] sm:$0xff] }
 0x87e   : > { %7251 = vmatpush.msra.mxu2 %v7137_v56 }
 0x87f   : > { %v6783_v15 = vpop.f32.mrf.mxu3  ;;  %v6999_v24 = vsel %vm5200_vm10, %v6996_v43, %v6998_v33  ;;  %v6859_v61 = vsel %vm4124_vm5, %v6856_v10, %v6858_v62  ;;  %v7135_v43 = vld [vmem:[%s17492_s8 + $0x10] sm:$0xff]  ;;  %v10321_v10 = vld [vmem:[%s17492_s8 + $0x78] sm:$0xff] }
 0x880   : > { %v6784_v22 = vadd.f32 %v6783_v15, %v6746_v5  ;;  %10308 = vmatmul.msk.f32.gmra.mxu3 %vm3224_vm3, %v6999_v24  ;;  %10290 = vmatmul.msk.f32.gmra.mxu1 %vm3224_vm3, %v6859_v61  ;;  %v10340_v5 = vld [vmem:[%s17492_s8 + $0xa0] sm:$0xff]  ;;  %v10316_v15 = vld [vmem:[%s17492_s8 + $0x50] sm:$0xff]  ;;  %v10337_v61 = vld [vmem:[%s17492_s8 + $0x88] sm:$0xff] }
 0x881   : > { %7252 = vmatpush.msra.mxu2 %v7136_v16  ;;  %7194 = vmatpush.msrb.mxu1 %v10321_v10 }
 0x882   : > { %v6809_v35 = vrot.slane %v6784_v22, 7  ;;  %7343 = vmatpush.msrb.mxu3 %v10340_v5  ;;  %v10336_v22 = vld [vmem:[%s17492_s8 + $0x80] sm:$0xff] }
 0x883   : > { %7253 = vmatpush.msra.mxu2 %v7135_v43  ;;  %7195 = vmatpush.msrb.mxu1 %v10320_v28 }
 0x884   : > { %v6810_v46 = vsel %vm4482_vm11, %v6807_v9, %v6809_v35  ;;  %v6977_v44 = vld [vmem:[#allocation2 + $0x30] sm:$0xff]  ;;  %v10319_v9 = vld [vmem:[%s17492_s8 + $0x68] sm:$0xff] }
 0x885   : > { %6827 = vst.msk [vmem:[#allocation2 + $0x40] sm:$0xff] %vm3224_vm3, %v6810_v46  ;;  %v7000_v38 = vrot.slane %v6977_v44, 2  ;;  %v6860_v32 = vrot.slane %v6977_v44, 1  ;;  %10299 = vmatmul.msk.f32.gmra.mxu2 %vm3224_vm3, %v6977_v44  ;;  %7196 = vmatpush.msrb.mxu1 %v10319_v9  ;;  %v14344_v44 = vld [vmem:[%s17493_s7] ss:$0 sm:$0xff] }
 0x886   : > { %7254 = vmatpush.msra.mxu2 %v7134_v20 }
 0x887   : > { %v6786_v18 = vpop.f32.mrf.mxu3  ;;  %v7001_v58 = vsel %vm5200_vm10, %v6998_v33, %v7000_v38  ;;  %v6861_v0 = vsel %vm4124_vm5, %v6858_v62, %v6860_v32  ;;  %7197 = vmatpush.msrb.mxu1 %v10318_v8  ;;  %v10339_v33 = vld [vmem:[%s17492_s8 + $0x98] sm:$0xff] }
 0x888   : > { %v6787_v26 = vadd.f32 %v6786_v18, %v6749_v37  ;;  %10309 = vmatmul.msk.f32.gmra.mxu3 %vm3224_vm3, %v7001_v58  ;;  %10291 = vmatmul.msk.f32.gmra.mxu1 %vm3224_vm3, %v6861_v0  ;;  %v10317_v62 = vld [vmem:[%s17492_s8 + $0x58] sm:$0xff] }
 0x889   : > { %7255 = vmatpush.msra.mxu2 %v7133_v2  ;;  %7344 = vmatpush.msrb.mxu3 %v10339_v33 }
 0x88a   : > { %v6811_v53 = vrot.slane %v6787_v26, 7  ;;  %7198 = vmatpush.msrb.mxu1 %v10317_v62 }
 0x88b   : > { %7345 = vmatpush.msrb.mxu3 %v10338_v47 }
 0x88c   : > { %v6812_v55 = vsel %vm4482_vm11, %v6809_v35, %v6811_v53  ;;  %v6978_v39 = vld [vmem:[#allocation2 + $0x40] sm:$0xff]  ;;  %7199 = vmatpush.msrb.mxu1 %v10316_v15 }
 0x88d   : > { %6828 = vst.msk [vmem:[#allocation2 + $0x50] sm:$0xff] %vm3224_vm3, %v6812_v55  ;;  %v7002_v14 = vrot.slane %v6978_v39, 2  ;;  %v6862_v23 = vrot.slane %v6978_v39, 1  ;;  %10300 = vmatmul.msk.f32.gmra.mxu2 %vm3224_vm3, %v6978_v39  ;;  %7346 = vmatpush.msrb.mxu3 %v10337_v61  ;;  %v10314_v35 = vld [vmem:[%s17492_s8 + $0x40] sm:$0xff]  ;;  %s11009_s8 = scalar_lea.hbm %s16809_s21, 2 }
 0x88e   : > { %7200 = vmatpush.msrb.mxu1 %v10315_v41  ;;  %p11011_p1 = scmp.lt.s32.totalorder %s11009_s8, %s11005_s1 }
 0x88f   : > { %v6789_v60 = vpop.f32.mrf.mxu3  ;;  %v7003_v4 = vsel %vm5200_vm10, %v7000_v38, %v7002_v14  ;;  %v6863_v59 = vsel %vm4124_vm5, %v6860_v32, %v6862_v23  ;;  %7347 = vmatpush.msrb.mxu3 %v10336_v22 }
 0x890   : > { %v6790_v30 = vadd.f32 %v6789_v60, %v6752_v51  ;;  %10310 = vmatmul.msk.f32.gmra.mxu3 %vm3224_vm3, %v7003_v4  ;;  %10292 = vmatmul.msk.f32.gmra.mxu1 %vm3224_vm3, %v6863_v59  ;;  %p11012_p2 = por %p11011_p1, %p11010_p0 }
 0x891   : > { %7201 = vmatpush.msrb.mxu1 %v10314_v35 }
 0x892   : > { %v6813_v42 = vrot.slane %v6790_v30, 7  ;;  %p11013_p3 = pnand %p11012_p2, %p11008_p13 }
 0x894   : > { %v6814_v31 = vsel %vm4482_vm11, %v6811_v53, %v6813_v42  ;;  %v6979_v50 = vld [vmem:[#allocation2 + $0x50] sm:$0xff] }
 0x895   : > { %6829 = vst.msk [vmem:[#allocation2 + $0x60] sm:$0xff] %vm3224_vm3, %v6814_v31  ;;  %v7004_v34 = vrot.slane %v6979_v50, 2  ;;  %v6864_v48 = vrot.slane %v6979_v50, 1  ;;  %10301 = vmatmul.msk.f32.gmra.mxu2 %vm3224_vm3, %v6979_v50 }
 0x897   : > { %v7005_v21 = vsel %vm5200_vm10, %v7002_v14, %v7004_v34  ;;  %v6865_v52 = vsel %vm4124_vm5, %v6862_v23, %v6864_v48 }
 0x898   : > { %10311 = vmatmul.msk.f32.gmra.mxu3 %vm3224_vm3, %v7005_v21  ;;  %10293 = vmatmul.msk.f32.gmra.mxu1 %vm3224_vm3, %v6865_v52 }
 0x89c   : > { %v6980_v13 = vld [vmem:[#allocation2 + $0x60] sm:$0xff] }
 0x89d   : > { %v6836_v36 = vld [vmem:[#allocation2 + $0x60] sm:$0x7f]  ;;  %v7006_v17 = vrot.slane %v6980_v13, 2  ;;  %v6866_v45 = vrot.slane %v6980_v13, 1 }
 0x89e   : > { %10302 = vmatmul.msk.f32.gmra.mxu2 %vm3224_vm3, %v6836_v36 }
 0x89f   : > { %v7007_v57 = vsel %vm5200_vm10, %v7004_v34, %v7006_v17  ;;  %v6867_v12 = vsel %vm4124_vm5, %v6864_v48, %v6866_v45  ;;  %v7009_v49 = vsel %vm5200_vm10, %v7006_v17, %v7008_v11 }
 0x8a0   : > { %10312 = vmatmul.msk.f32.gmra.mxu3 %vm3224_vm3, %v7007_v57  ;;  %10294 = vmatmul.msk.f32.gmra.mxu1 %vm3224_vm3, %v6867_v12 }
 0x8a8   : > { %10313 = vmatmul.msk.f32.gmra.mxu3 %vm3224_vm3, %v7009_v49  ;;  %10295 = vmatmul.msk.f32.gmra.mxu1 %vm3224_vm3, %v6866_v45  ;;  %vm7399_vm3 = vcmask 449536  }
 0x8ef   : > { %v6953_v29 = vpop.f32.mrf.mxu2 }
 0x8f5   : > { %v6899_v24 = vpop.f32.mrf.mxu1 }
 0x8f6   : > { %v6954_v37 = vadd.f32 %v6953_v29, %v6899_v24 }
 0x8f8   : > { %v6956_v46 = vpop.f32.mrf.mxu2 }
 0x8fb   : > { %v7041_v38 = vpop.f32.mrf.mxu3 }
 0x8fc   : > { %v7062_v32 = vadd.f32 %v7041_v38, %v6954_v37 }
 0x8fd   : > { %v6902_v18 = vpop.f32.mrf.mxu1 }
 0x8fe   : > { %v7073_v58 = vadd.f32 %v14344_v44, %v7062_v32  ;;  %v6957_v3 = vadd.f32 %v6956_v46, %v6902_v18 }
 0x900   : > { %v7080_v0 = vmax.f32 %v7073_v58, 0.0  ;;  %v6959_v26 = vpop.f32.mrf.mxu2 }
 0x902   : > { %v7097_v40 = vrot.slane %v7080_v0, 7 }
 0x903   : > { %v7044_v7 = vpop.f32.mrf.mxu3 }
 0x904   : > { %7118 = vst.msk [vmem:[#allocation2] sm:$0xfe] %vm7117_vm1, %v7097_v40  ;;  %v7063_v53 = vadd.f32 %v7044_v7, %v6957_v3 }
 0x905   : > { %v6905_v55 = vpop.f32.mrf.mxu1 }
 0x906   : > { %v7074_v51 = vadd.f32 %v14344_v44, %v7063_v53  ;;  %v6960_v23 = vadd.f32 %v6959_v26, %v6905_v55 }
 0x908   : > { %v7081_v39 = vmax.f32 %v7074_v51, 0.0  ;;  %v6962_v4 = vpop.f32.mrf.mxu2 }
 0x90a   : > { %v7098_v14 = vrot.slane %v7081_v39, 7 }
 0x90b   : > { %v7047_v60 = vpop.f32.mrf.mxu3  ;;  %v7126_v59 = vld [vmem:[#allocation2] sm:$0xff] }
 0x90c   : > { %v7099_v30 = vsel %vm4482_vm11, %v7097_v40, %v7098_v14  ;;  %v7064_v42 = vadd.f32 %v7047_v60, %v6960_v23  ;;  %10329 = vmatmul.msk.f32.vlgmr.msra.gmra.mxu2 %vm7119_vm2, %v7126_v59  ;;  %7444 = vst.msk [vmem:[#allocation2] sm:$0x1] %vm7087_vm0, %v11085_v27  ;;  %v7278_v52 = vld [vmem:[#allocation2] sm:$0xfc] }
 0x90d   : > { %7120 = vst.msk [vmem:[#allocation2 + $0x10] sm:$0xff] %vm7119_vm2, %v7099_v30  ;;  %v6908_v31 = vpop.f32.mrf.mxu1  ;;  %v7141_v13 = vld [vmem:[#allocation2] sm:$0xfe]  ;;  %v7303_v12 = vrot.slane %v7278_v52, 2 }
 0x90e   : > { %v7075_v50 = vadd.f32 %v14344_v44, %v7064_v42  ;;  %v6963_v21 = vadd.f32 %v6962_v4, %v6908_v31  ;;  %v7159_v63 = vrot.slane %v7141_v13, 1 }
 0x910   : > { %v7082_v34 = vmax.f32 %v7075_v50, 0.0  ;;  %v6965_v6 = vpop.f32.mrf.mxu2 }
 0x912   : > { %v7100_v48 = vrot.slane %v7082_v34, 7 }
 0x913   : > { %v7050_v36 = vpop.f32.mrf.mxu3 }
 0x914   : > { %v7101_v17 = vsel %vm4482_vm11, %v7098_v14, %v7100_v48  ;;  %v7065_v45 = vadd.f32 %v7050_v36, %v6963_v21  ;;  %v7279_v57 = vld [vmem:[#allocation2 + $0x10] sm:$0xff] }
 0x915   : > { %7121 = vst.msk [vmem:[#allocation2 + $0x20] sm:$0xff] %vm7119_vm2, %v7101_v17  ;;  %v7304_v11 = vrot.slane %v7279_v57, 2  ;;  %v6911_v49 = vpop.f32.mrf.mxu1  ;;  %v7160_v1 = vrot.slane %v7279_v57, 1  ;;  %10330 = vmatmul.msk.f32.gmra.mxu2 %vm7119_vm2, %v7279_v57 }
 0x916   : > { %v7076_v56 = vadd.f32 %v14344_v44, %v7065_v45  ;;  %v6966_v20 = vadd.f32 %v6965_v6, %v6911_v49 }
 0x917   : > { %v7305_v16 = vsel %vm5200_vm10, %v7303_v12, %v7304_v11  ;;  %v7161_v43 = vsel %vm4124_vm5, %v7159_v63, %v7160_v1  ;;  %v7285_v12 = vld [vmem:[#allocation2 + $0x70] sm:$0x1] }
 0x918   : > { %v7083_v25 = vmax.f32 %v7076_v56, 0.0  ;;  %10344 = vmatmul.msk.f32.vlgmr.msrb.gmra.mxu3 %vm7119_vm2, %v7305_v16  ;;  %10322 = vmatmul.msk.f32.vlgmr.msrb.gmra.mxu1 %vm7119_vm2, %v7161_v43  ;;  %v6968_v62 = vpop.f32.mrf.mxu2 }
 0x91a   : > { %v7102_v10 = vrot.slane %v7083_v25, 7 }
 0x91b   : > { %v7053_v54 = vpop.f32.mrf.mxu3 }
 0x91c   : > { %v7103_v28 = vsel %vm4482_vm11, %v7100_v48, %v7102_v10  ;;  %v7066_v2 = vadd.f32 %v7053_v54, %v6966_v20  ;;  %v7280_v19 = vld [vmem:[#allocation2 + $0x20] sm:$0xff] }
 0x91d   : > { %7122 = vst.msk [vmem:[#allocation2 + $0x30] sm:$0xff] %vm7119_vm2, %v7103_v28  ;;  %v7306_v9 = vrot.slane %v7280_v19, 2  ;;  %v6914_v29 = vpop.f32.mrf.mxu1  ;;  %v7162_v5 = vrot.slane %v7280_v19, 1  ;;  %10331 = vmatmul.msk.f32.gmra.mxu2 %vm7119_vm2, %v7280_v19 }
 0x91e   : > { %v7077_v8 = vadd.f32 %v14344_v44, %v7066_v2  ;;  %v6969_v61 = vadd.f32 %v6968_v62, %v6914_v29 }
 0x91f   : > { %v7307_v33 = vsel %vm5200_vm10, %v7304_v11, %v7306_v9  ;;  %v7163_v47 = vsel %vm4124_vm5, %v7160_v1, %v7162_v5  ;;  %v7316_v11 = vrot.slane %v7285_v12, 2  ;;  %v10371_v12 = vld [vmem:[%s16799_s11 + $0xf8] sm:$0xff] }
 0x920   : > { %v7084_v15 = vmax.f32 %v7077_v8, 0.0  ;;  %10345 = vmatmul.msk.f32.gmra.mxu3 %vm7119_vm2, %v7307_v33  ;;  %10323 = vmatmul.msk.f32.gmra.mxu1 %vm7119_vm2, %v7163_v47 }
 0x921   : > { %v6971_v40 = vpop.f32.mrf.mxu2  ;;  %7561 = vmatpush.msra.mxu3 %v10371_v12 }
 0x922   : > { %v7104_v24 = vrot.slane %v7084_v15, 7 }
 0x923   : > { %v7056_v41 = vpop.f32.mrf.mxu3 }
 0x924   : > { %v7105_v22 = vsel %vm4482_vm11, %v7102_v10, %v7104_v24  ;;  %v7067_v35 = vadd.f32 %v7056_v41, %v6969_v61  ;;  %v7281_v46 = vld [vmem:[#allocation2 + $0x30] sm:$0xff] }
 0x925   : > { %7123 = vst.msk [vmem:[#allocation2 + $0x40] sm:$0xff] %vm7119_vm2, %v7105_v22  ;;  %v7308_v37 = vrot.slane %v7281_v46, 2  ;;  %v7164_v38 = vrot.slane %v7281_v46, 1  ;;  %10332 = vmatmul.msk.f32.gmra.mxu2 %vm7119_vm2, %v7281_v46  ;;  %v6917_v58 = vpop.f32.mrf.mxu1 }
 0x926   : > { %v7078_v32 = vadd.f32 %v14344_v44, %v7067_v35  ;;  %7445 = vst.msk [vmem:[#allocation2 + $0x34] sm:$0x1] %vm7087_vm0, %v11085_v27  ;;  %v6972_v7 = vadd.f32 %v6971_v40, %v6917_v58  ;;  %v10985_v35 = vld [vmem:[%s17494_s9] ss:$0 sm:$0xff] }
 0x927   : > { %v7309_v18 = vsel %vm5200_vm10, %v7306_v9, %v7308_v37  ;;  %v7165_v0 = vsel %vm4124_vm5, %v7162_v5, %v7164_v38 }
 0x928   : > { %v7085_v26 = vmax.f32 %v7078_v32, 0.0  ;;  %10346 = vmatmul.msk.f32.gmra.mxu3 %vm7119_vm2, %v7309_v18  ;;  %10324 = vmatmul.msk.f32.gmra.mxu1 %vm7119_vm2, %v7165_v0 }
 0x92a   : > { %v7106_v3 = vrot.slane %v7085_v26, 7 }
 0x92b   : > { %v7059_v53 = vpop.f32.mrf.mxu3 }
 0x92c   : > { %v7107_v55 = vsel %vm4482_vm11, %v7104_v24, %v7106_v3  ;;  %v7068_v51 = vadd.f32 %v7059_v53, %v6972_v7  ;;  %v7282_v39 = vld [vmem:[#allocation2 + $0x40] sm:$0xff] }
 0x92d   : > { %7124 = vst.msk [vmem:[#allocation2 + $0x50] sm:$0xff] %vm7119_vm2, %v7107_v55  ;;  %v7310_v14 = vrot.slane %v7282_v39, 2  ;;  %v7166_v23 = vrot.slane %v7282_v39, 1  ;;  %10333 = vmatmul.msk.f32.gmra.mxu2 %vm7119_vm2, %v7282_v39 }
 0x92e   : > { %v7079_v60 = vadd.f32 %v14344_v44, %v7068_v51 }
 0x92f   : > { %v7311_v4 = vsel %vm5200_vm10, %v7308_v37, %v7310_v14  ;;  %v7167_v59 = vsel %vm4124_vm5, %v7164_v38, %v7166_v23 }
 0x930   : > { %v7086_v30 = vmax.f32 %v7079_v60, 0.0  ;;  %10347 = vmatmul.msk.f32.gmra.mxu3 %vm7119_vm2, %v7311_v4  ;;  %10325 = vmatmul.msk.f32.gmra.mxu1 %vm7119_vm2, %v7167_v59 }
 0x932   : > { %v7108_v42 = vrot.slane %v7086_v30, 7 }
 0x934   : > { %v7109_v31 = vsel %vm4482_vm11, %v7106_v3, %v7108_v42  ;;  %v7283_v50 = vld [vmem:[#allocation2 + $0x50] sm:$0xff] }
 0x935   : > { %7125 = vst.msk [vmem:[#allocation2 + $0x60] sm:$0xff] %vm7119_vm2, %v7109_v31  ;;  %v7312_v34 = vrot.slane %v7283_v50, 2  ;;  %v7168_v48 = vrot.slane %v7283_v50, 1  ;;  %10334 = vmatmul.msk.f32.gmra.mxu2 %vm7119_vm2, %v7283_v50 }
 0x937   : > { %v7313_v44 = vsel %vm5200_vm10, %v7310_v14, %v7312_v34  ;;  %v7169_v21 = vsel %vm4124_vm5, %v7166_v23, %v7168_v48 }
 0x938   : > { %10348 = vmatmul.msk.f32.gmra.mxu3 %vm7119_vm2, %v7313_v44  ;;  %10326 = vmatmul.msk.f32.gmra.mxu1 %vm7119_vm2, %v7169_v21  ;;  %v7397_v44 = vld [vmem:[%s17495_s10 + $0x10] sm:$0xff]  ;;  %v7398_v21 = vld [vmem:[%s17495_s10 + $0x18] sm:$0x7] }
 0x93c   : > { %v7284_v52 = vld [vmem:[#allocation2 + $0x60] sm:$0xff] }
 0x93d   : > { %v7132_v13 = vld [vmem:[#allocation2 + $0x60] sm:$0x7f]  ;;  %v7314_v36 = vrot.slane %v7284_v52, 2  ;;  %v7170_v17 = vrot.slane %v7284_v52, 1  ;;  %v7484_v52 = vld [vmem:[%s16799_s11 + $0x70] sm:$0xff] }
 0x93e   : > { %10335 = vmatmul.msk.f32.gmra.mxu2 %vm7119_vm2, %v7132_v13  ;;  %v7482_v13 = vld [vmem:[%s16799_s11 + $0x60] sm:$0xff] }
 0x93f   : > { %v7315_v45 = vsel %vm5200_vm10, %v7312_v34, %v7314_v36  ;;  %v7171_v57 = vsel %vm4124_vm5, %v7168_v48, %v7170_v17  ;;  %v7317_v49 = vsel %vm5200_vm10, %v7314_v36, %v7316_v11  ;;  %v7395_v34 = vld [vmem:[%s17495_s10] sm:$0xff]  ;;  %v7396_v48 = vld [vmem:[%s17495_s10 + $0x8] sm:$0xff]  ;;  %v7480_v36 = vld [vmem:[%s16799_s11 + $0x50] sm:$0xff] }
 0x940   : > { %10349 = vmatmul.msk.f32.gmra.mxu3 %vm7119_vm2, %v7315_v45  ;;  %10327 = vmatmul.msk.f32.gmra.mxu1 %vm7119_vm2, %v7171_v57  ;;  %v7476_v45 = vld [vmem:[%s16799_s11 + $0x30] sm:$0xff]  ;;  %v7474_v57 = vld [vmem:[%s16799_s11 + $0x20] sm:$0xff] }
 0x941   : > { %v10370_v11 = vld [vmem:[%s16799_s11 + $0xf0] sm:$0xff] }
 0x942   : > { %7532 = vmatpush.msrb.mxu2 %v10370_v11 }
 0x948   : > { %10350 = vmatmul.msk.f32.gmra.mxu3 %vm7119_vm2, %v7317_v49  ;;  %10328 = vmatmul.msk.f32.gmra.mxu1 %vm7119_vm2, %v7170_v17  ;;  %v7478_v17 = vld [vmem:[%s16799_s11 + $0x40] sm:$0xff]  ;;  %v7472_v49 = vld [vmem:[%s16799_s11 + $0x10] sm:$0xff] }
 0x98f   : > { %v7257_v6 = vpop.f32.mrf.mxu2 }
 0x995   : > { %v7203_v63 = vpop.f32.mrf.mxu1 }
 0x996   : > { %v7258_v53 = vadd.f32 %v7257_v6, %v7203_v63  ;;  %v10369_v6 = vld [vmem:[%s16799_s11 + $0xe8] sm:$0xff]  ;;  %v10368_v63 = vld [vmem:[%s16799_s11 + $0xe0] sm:$0xff] }
 0x997   : > { %7562 = vmatpush.msra.mxu3 %v10369_v6  ;;  %7533 = vmatpush.msrb.mxu2 %v10368_v63 }
 0x998   : > { %v7260_v1 = vpop.f32.mrf.mxu2 }
 0x99b   : > { %v7349_v56 = vpop.f32.mrf.mxu3 }
 0x99c   : > { %v7370_v14 = vadd.f32 %v7349_v56, %v7258_v53  ;;  %v10367_v56 = vld [vmem:[%s16799_s11 + $0xd8] sm:$0xff]  ;;  %v7479_v53 = vld [vmem:[%s16799_s11 + $0x48] sm:$0xff] }
 0x99d   : > { %v7206_v16 = vpop.f32.mrf.mxu1  ;;  %7563 = vmatpush.msra.mxu3 %v10367_v56 }
 0x99e   : > { %v7261_v26 = vadd.f32 %v7260_v1, %v7206_v16  ;;  %v7381_v30 = vadd.f32 %v10985_v35, %v7370_v14  ;;  %v7470_v1 = vld [vmem:[%s16799_s11] sm:$0xff]  ;;  %v10366_v16 = vld [vmem:[%s16799_s11 + $0xd0] sm:$0xff] }
 0x99f   : > { %7534 = vmatpush.msrb.mxu2 %v10366_v16  ;;  %v10392_v14 = vld [vmem:[%s16799_s11 + $0x120] sm:$0xff] }
 0x9a0   : > { %v7263_v43 = vpop.f32.mrf.mxu2  ;;  %v7388_v50 = vmax.f32 %v7381_v30, 0.0  ;;  %v10390_v30 = vld [vmem:[%s16799_s11 + $0x110] sm:$0xff] }
 0x9a3   : > { %v7352_v25 = vpop.f32.mrf.mxu3 }
 0x9a4   : > { %v7371_v55 = vadd.f32 %v7352_v25, %v7261_v26  ;;  %v10364_v25 = vld [vmem:[%s16799_s11 + $0xc0] sm:$0xff]  ;;  %v10393_v26 = vld [vmem:[%s16799_s11 + $0x128] sm:$0xff] }
 0x9a5   : > { %v7209_v10 = vpop.f32.mrf.mxu1  ;;  %7535 = vmatpush.msrb.mxu2 %v10364_v25 }
 0x9a6   : > { %v7264_v32 = vadd.f32 %v7263_v43, %v7209_v10  ;;  %v7382_v4 = vadd.f32 %v10985_v35, %v7371_v55  ;;  %v10365_v43 = vld [vmem:[%s16799_s11 + $0xc8] sm:$0xff]  ;;  %v10363_v10 = vld [vmem:[%s16799_s11 + $0xb8] sm:$0xff] }
 0x9a7   : > { %7564 = vmatpush.msra.mxu3 %v10365_v43  ;;  %v10389_v55 = vld [vmem:[%s16799_s11 + $0x108] sm:$0xff] }
 0x9a8   : > { %v7266_v54 = vpop.f32.mrf.mxu2  ;;  %v7389_v31 = vmax.f32 %v7382_v4, 0.0 }
 0x9a9   : > { %7565 = vmatpush.msra.mxu3 %v10363_v10 }
 0x9ab   : > { %v7355_v20 = vpop.f32.mrf.mxu3 }
 0x9ac   : > { %v7372_v40 = vadd.f32 %v7355_v20, %v7264_v32  ;;  %v10362_v20 = vld [vmem:[%s16799_s11 + $0xb0] sm:$0xff] }
 0x9ad   : > { %v7212_v28 = vpop.f32.mrf.mxu1  ;;  %7536 = vmatpush.msrb.mxu2 %v10362_v20 }
 0x9ae   : > { %v7267_v46 = vadd.f32 %v7266_v54, %v7212_v28  ;;  %v7383_v23 = vadd.f32 %v10985_v35, %v7372_v40  ;;  %v10361_v54 = vld [vmem:[%s16799_s11 + $0xa8] sm:$0xff]  ;;  %v10360_v28 = vld [vmem:[%s16799_s11 + $0xa0] sm:$0xff] }
 0x9af   : > { %7566 = vmatpush.msra.mxu3 %v10361_v54  ;;  %7537 = vmatpush.msrb.mxu2 %v10360_v28 }
 0x9b0   : > { %v7269_v9 = vpop.f32.mrf.mxu2  ;;  %v7390_v42 = vmax.f32 %v7383_v23, 0.0 }
 0x9b3   : > { %v7358_v2 = vpop.f32.mrf.mxu3 }
 0x9b4   : > { %v7373_v18 = vadd.f32 %v7358_v2, %v7267_v46  ;;  %v10359_v2 = vld [vmem:[%s16799_s11 + $0x98] sm:$0xff]  ;;  %v10468_v46 = vld [vmem:[%s16801_s13 + $0x3c0] sm:$0xff] }
 0x9b5   : > { %v7215_v19 = vpop.f32.mrf.mxu1  ;;  %7567 = vmatpush.msra.mxu3 %v10359_v2  ;;  %v10442_v2 = vld [vmem:[%s16801_s13 + $0x2f0] sm:$0xff] }
 0x9b6   : > { %v7270_v24 = vadd.f32 %v7269_v9, %v7215_v19  ;;  %v7384_v51 = vadd.f32 %v10985_v35, %v7373_v18  ;;  %v10358_v19 = vld [vmem:[%s16799_s11 + $0x90] sm:$0xff]  ;;  %v10357_v9 = vld [vmem:[%s16799_s11 + $0x88] sm:$0xff] }
 0x9b7   : > { %7538 = vmatpush.msrb.mxu2 %v10358_v19  ;;  %7568 = vmatpush.msra.mxu3 %v10357_v9  ;;  %v10398_v18 = vld [vmem:[%s16799_s11 + $0x150] sm:$0xff]  ;;  %v10443_v19 = vld [vmem:[%s16801_s13 + $0x2f8] sm:$0xff]  ;;  %v10440_v9 = vld [vmem:[%s16801_s13 + $0x2e0] sm:$0xff] }
 0x9b8   : > { %v7272_v8 = vpop.f32.mrf.mxu2  ;;  %v7391_v59 = vmax.f32 %v7384_v51, 0.0  ;;  %v10394_v51 = vld [vmem:[%s16799_s11 + $0x130] sm:$0xff] }
 0x9bb   : > { %v7361_v29 = vpop.f32.mrf.mxu3 }
 0x9bc   : > { %v7374_v37 = vadd.f32 %v7361_v29, %v7270_v24  ;;  %v10356_v29 = vld [vmem:[%s16799_s11 + $0x80] sm:$0xff]  ;;  %v10395_v24 = vld [vmem:[%s16799_s11 + $0x138] sm:$0xff] }
 0x9bd   : > { %v7218_v5 = vpop.f32.mrf.mxu1  ;;  %7539 = vmatpush.msrb.mxu2 %v10356_v29  ;;  %v10474_v29 = vld [vmem:[%s16801_s13 + $0x3f0] sm:$0xff] }
 0x9be   : > { %v7273_v47 = vadd.f32 %v7272_v8, %v7218_v5  ;;  %v7385_v3 = vadd.f32 %v10985_v35, %v7374_v37  ;;  %v10403_v5 = vld [vmem:[%s16799_s11 + $0x178] sm:$0xff]  ;;  %v10401_v8 = vld [vmem:[%s16799_s11 + $0x168] sm:$0xff] }
 0x9c0   : > { %v7392_v60 = vmax.f32 %v7385_v3, 0.0  ;;  %v10396_v3 = vld [vmem:[%s16799_s11 + $0x140] sm:$0xff] }
 0x9c1   : > { %v7275_v15 = vpop.f32.mrf.mxu2 }
 0x9c3   : > { %v7364_v33 = vpop.f32.mrf.mxu3 }
 0x9c4   : > { %v7375_v61 = vadd.f32 %v7364_v33, %v7273_v47  ;;  %v10399_v47 = vld [vmem:[%s16799_s11 + $0x158] sm:$0xff] }
 0x9c5   : > { %v7221_v62 = vpop.f32.mrf.mxu1 }
 0x9c6   : > { %v7276_v41 = vadd.f32 %v7275_v15, %v7221_v62  ;;  %v7386_v58 = vadd.f32 %v10985_v35, %v7375_v61  ;;  %v10397_v15 = vld [vmem:[%s16799_s11 + $0x148] sm:$0xff]  ;;  %v10402_v61 = vld [vmem:[%s16799_s11 + $0x170] sm:$0xff] }
 0x9c7   : > { %7694 = vmatpush.msrb.mxu3 %v10402_v61  ;;  %v10470_v61 = vld [vmem:[%s16801_s13 + $0x3d0] sm:$0xff] }
 0x9c8   : > { %v7393_v39 = vmax.f32 %v7386_v58, 0.0  ;;  %v7481_v58 = vld [vmem:[%s16799_s11 + $0x58] sm:$0xff] }
 0x9cb   : > { %v7367_v22 = vpop.f32.mrf.mxu3 }
 0x9cc   : > { %v7376_v38 = vadd.f32 %v7367_v22, %v7276_v41  ;;  %v7485_v41 = vld [vmem:[%s16799_s11 + $0x78] sm:$0xff]  ;;  %v10400_v22 = vld [vmem:[%s16799_s11 + $0x160] sm:$0xff] }
 0x9cd   : > { %7629 = vmatpush.msra.mxu2 %v7485_v41  ;;  %7695 = vmatpush.msrb.mxu3 %v10400_v22  ;;  %v10437_v41 = vld [vmem:[%s16801_s13 + $0x2c8] sm:$0xff] }
 0x9ce   : > { %v7387_v0 = vadd.f32 %v10985_v35, %v7376_v38  ;;  %v17496_v35 = vlaneseq  ;;  %v7483_v38 = vld [vmem:[%s16799_s11 + $0x68] sm:$0xff] }
 0x9cf   : > { %7630 = vmatpush.msra.mxu2 %v7483_v38  ;;  %7696 = vmatpush.msrb.mxu3 %v10398_v18  ;;  %v10535_v38 = vld [vmem:[%s16801_s13 + $0x5d8] sm:$0xff] }
 0x9d0   : > { %v7394_v7 = vmax.f32 %v7387_v0, 0.0  ;;  %vm14518_vm4 = vcmp.lt.s32.totalorder %v17496_v35, 256  ;;  %v10434_v35 = vld [vmem:[%s16801_s13 + $0x2b0] sm:$0xff] }
 0x9d1   : > { %7631 = vmatpush.msra.mxu2 %v7481_v58  ;;  %7697 = vmatpush.msrb.mxu3 %v10396_v3  ;;  %v10432_v58 = vld [vmem:[%s16801_s13 + $0x2a0] sm:$0xff]  ;;  %v10430_v3 = vld [vmem:[%s16801_s13 + $0x290] sm:$0xff] }
 0x9d2   : > { %10351 = vmatpush.msk.msra.mxu1 %vm4124_vm5, %v7394_v7  ;;  %v10391_v7 = vld [vmem:[%s16799_s11 + $0x118] sm:$0xff] }
 0x9d3   : > { %7632 = vmatpush.msra.mxu2 %v7479_v53  ;;  %7698 = vmatpush.msrb.mxu3 %v10394_v51  ;;  %v10431_v53 = vld [vmem:[%s16801_s13 + $0x298] sm:$0xff]  ;;  %v10428_v51 = vld [vmem:[%s16801_s13 + $0x280] sm:$0xff] }
 0x9d4   : > { %7425 = vmatpush.msra.mxu1 %v7393_v39  ;;  %v7477_v39 = vld [vmem:[%s16799_s11 + $0x38] sm:$0xff] }
 0x9d5   : > { %7633 = vmatpush.msra.mxu2 %v7477_v39  ;;  %7699 = vmatpush.msrb.mxu3 %v10392_v14  ;;  %v10462_v39 = vld [vmem:[%s16801_s13 + $0x390] sm:$0xff]  ;;  %v10429_v14 = vld [vmem:[%s16801_s13 + $0x288] sm:$0xff] }
 0x9d6   : > { %7426 = vmatpush.msra.mxu1 %v7392_v60  ;;  %v7475_v60 = vld [vmem:[%s16799_s11 + $0x28] sm:$0xff] }
 0x9d7   : > { %7634 = vmatpush.msra.mxu2 %v7475_v60  ;;  %7700 = vmatpush.msrb.mxu3 %v10390_v30  ;;  %v10426_v60 = vld [vmem:[%s16801_s13 + $0x270] sm:$0xff] }
 0x9d8   : > { %7427 = vmatpush.msra.mxu1 %v7391_v59 }
 0x9da   : > { %7428 = vmatpush.msra.mxu1 %v7390_v42  ;;  %v7473_v42 = vld [vmem:[%s16799_s11 + $0x18] sm:$0xff] }
 0x9db   : > { %7635 = vmatpush.msra.mxu2 %v7473_v42  ;;  %v10527_v42 = vld [vmem:[%s16801_s13 + $0x598] sm:$0xff] }
 0x9dc   : > { %7429 = vmatpush.msra.mxu1 %v7389_v31 }
 0x9de   : > { %7430 = vmatpush.msra.mxu1 %v7388_v50 }
 0x9df   : > { %10352 = vmatmul.msk.f32.vlgmr.msra.gmra.mxu1 %vm7399_vm3, %v7395_v34  ;;  %v10388_v34 = vld [vmem:[%s16799_s11 + $0x100] sm:$0xff] }
 0x9e0   : > { %7600 = vmatpush.msrb.mxu1 %v7484_v52  ;;  %7701 = vmatpush.msrb.mxu3 %v10388_v34  ;;  %v10424_v34 = vld [vmem:[%s16801_s13 + $0x260] sm:$0xff] }
 0x9e2   : > { %7601 = vmatpush.msrb.mxu1 %v7482_v13 }
 0x9e4   : > { %7602 = vmatpush.msrb.mxu1 %v7480_v36 }
 0x9e6   : > { %7603 = vmatpush.msrb.mxu1 %v7478_v17 }
 0x9e7   : > { %10353 = vmatmul.msk.f32.gmra.mxu1 %vm7399_vm3, %v7396_v48 }
 0x9e8   : > { %7604 = vmatpush.msrb.mxu1 %v7476_v45 }
 0x9ea   : > { %7605 = vmatpush.msrb.mxu1 %v7474_v57 }
 0x9ec   : > { %7606 = vmatpush.msrb.mxu1 %v7472_v49 }
 0x9ee   : > { %7607 = vmatpush.msrb.mxu1 %v7470_v1 }
 0x9ef   : > { %10354 = vmatmul.msk.f32.gmra.mxu1 %vm7399_vm3, %v7397_v44 }
 0x9f0   : > { %7723 = vmatpush.msra.mxu1 %v10403_v5  ;;  %v10441_v5 = vld [vmem:[%s16801_s13 + $0x2e8] sm:$0xff] }
 0x9f2   : > { %7724 = vmatpush.msra.mxu1 %v10401_v8  ;;  %v10539_v8 = vld [vmem:[%s16801_s13 + $0x5f8] sm:$0xff] }
 0x9f3   : > { %8406 = vmatpush.msra.mxu0 %v10539_v8  ;;  %v10413_v8 = vld [vmem:[%s16801_s13 + $0x208] sm:$0xff] }
 0x9f4   : > { %7725 = vmatpush.msra.mxu1 %v10399_v47  ;;  %v10439_v47 = vld [vmem:[%s16801_s13 + $0x2d8] sm:$0xff] }
 0x9f6   : > { %7726 = vmatpush.msra.mxu1 %v10397_v15  ;;  %v10537_v15 = vld [vmem:[%s16801_s13 + $0x5e8] sm:$0xff] }
 0x9f7   : > { %10355 = vmatmul.msk.f32.gmra.mxu1 %vm7399_vm3, %v7398_v21  ;;  %v7471_v21 = vld [vmem:[%s16799_s11 + $0x8] sm:$0xff]  ;;  %8407 = vmatpush.msra.mxu0 %v10537_v15 }
 0x9f8   : > { %7727 = vmatpush.msra.mxu1 %v10395_v24  ;;  %7636 = vmatpush.msra.mxu2 %v7471_v21  ;;  %v10436_v24 = vld [vmem:[%s16801_s13 + $0x2c0] sm:$0xff]  ;;  %v10525_v21 = vld [vmem:[%s16801_s13 + $0x588] sm:$0xff] }
 0x9f9   : > { %8408 = vmatpush.msra.mxu0 %v10535_v38 }
 0x9fa   : > { %7728 = vmatpush.msra.mxu1 %v10393_v26  ;;  %v10433_v26 = vld [vmem:[%s16801_s13 + $0x2a8] sm:$0xff] }
 0x9fc   : > { %7729 = vmatpush.msra.mxu1 %v10391_v7  ;;  %v10464_v7 = vld [vmem:[%s16801_s13 + $0x3a0] sm:$0xff] }
 0x9fe   : > { %7730 = vmatpush.msra.mxu1 %v10389_v55  ;;  %v10531_v55 = vld [vmem:[%s16801_s13 + $0x5b8] sm:$0xff] }
 0xa5c   : > { %v7432_v33 = vpop.f32.mrf.mxu1 }
 0xa5d   : > { %v7450_v62 = vrot.slane %v7432_v33, 7  ;;  %v10438_v33 = vld [vmem:[%s16801_s13 + $0x2d0] sm:$0xff] }
 0xa5f   : > { %7461 = vst.msk [vmem:[#allocation2] sm:$0xfe] %vm7117_vm1, %v7450_v62 }
 0xa64   : > { %v7435_v37 = vpop.f32.mrf.mxu1 }
 0xa65   : > { %v7451_v32 = vrot.slane %v7435_v37, 7  ;;  %v10435_v37 = vld [vmem:[%s16801_s13 + $0x2b8] sm:$0xff] }
 0xa66   : > { %v14531_v0 = vld [vmem:[#allocation2] sm:$0xff] }
 0xa67   : > { %v7452_v40 = vsel %vm4482_vm11, %v7450_v62, %v7451_v32  ;;  %10380 = vmatmul.msk.f32.vlgmr.msrb.gmra.mxu1 %vm7119_vm2, %v14531_v0  ;;  %7778 = vst.msk [vmem:[#allocation2] ss:$8 sm:$0x3] %vm14518_vm4, %v11085_v27  ;;  %v7486_v59 = vld [vmem:[#allocation2] sm:$0xfe] }
 0xa68   : > { %7462 = vst.msk [vmem:[#allocation2 + $0x10] sm:$0xff] %vm7119_vm2, %v7452_v40  ;;  %v7509_v48 = vrot.slane %v7486_v59, 1  ;;  %v7650_v56 = vld [vmem:[#allocation2] sm:$0xfc]  ;;  %8050 = vmatpush.msrb.mxu1 %v10443_v19  ;;  %v10533_v40 = vld [vmem:[%s16801_s13 + $0x5c8] sm:$0xff]  ;;  %v10427_v59 = vld [vmem:[%s16801_s13 + $0x278] sm:$0xff] }
 0xa69   : > { %v7671_v43 = vrot.slane %v7650_v56, 2  ;;  %v10472_v62 = vld [vmem:[%s16801_s13 + $0x3e0] sm:$0xff]  ;;  %8409 = vmatpush.msra.mxu0 %v10533_v40  ;;  %v10415_v19 = vld [vmem:[%s16801_s13 + $0x218] sm:$0xff]  ;;  %v10473_v40 = vld [vmem:[%s16801_s13 + $0x3e8] sm:$0xff] }
 0xa6a   : > { %8051 = vmatpush.msrb.mxu1 %v10441_v5  ;;  %v10446_v5 = vld [vmem:[%s16801_s13 + $0x310] sm:$0xff] }
 0xa6b   : > { %8410 = vmatpush.msra.mxu0 %v10531_v55  ;;  %v10471_v55 = vld [vmem:[%s16801_s13 + $0x3d8] sm:$0xff] }
 0xa6c   : > { %v7438_v23 = vpop.f32.mrf.mxu1  ;;  %8052 = vmatpush.msrb.mxu1 %v10439_v47  ;;  %v10511_v47 = vld [vmem:[%s16801_s13 + $0x518] sm:$0xff] }
 0xa6d   : > { %v7453_v4 = vrot.slane %v7438_v23, 7  ;;  %v10529_v23 = vld [vmem:[%s16801_s13 + $0x5a8] sm:$0xff] }
 0xa6e   : > { %8053 = vmatpush.msrb.mxu1 %v10437_v41  ;;  %8411 = vmatpush.msra.mxu0 %v10529_v23  ;;  %v10469_v23 = vld [vmem:[%s16801_s13 + $0x3c8] sm:$0xff] }
 0xa6f   : > { %v7454_v31 = vsel %vm4482_vm11, %v7451_v32, %v7453_v4  ;;  %v7467_v50 = vld [vmem:[#allocation2 + $0x10] sm:$0xff] }
 0xa70   : > { %7463 = vst.msk [vmem:[#allocation2 + $0x20] sm:$0xff] %vm7119_vm2, %v7454_v31  ;;  %v7510_v44 = vrot.slane %v7467_v50, 1  ;;  %10381 = vmatmul.msk.f32.gmra.mxu1 %vm7119_vm2, %v7467_v50  ;;  %v7672_v16 = vrot.slane %v7467_v50, 2  ;;  %8412 = vmatpush.msra.mxu0 %v10527_v42 }
 0xa71   : > { %8054 = vmatpush.msrb.mxu1 %v10435_v37  ;;  %v7891_v37 = vld [vmem:[%s16801_s13 + $0x1f0] sm:$0xff] }
 0xa72   : > { %v7511_v52 = vsel %vm4124_vm5, %v7509_v48, %v7510_v44  ;;  %v7673_v25 = vsel %vm5200_vm10, %v7671_v43, %v7672_v16  ;;  %v10458_v48 = vld [vmem:[%s16801_s13 + $0x370] sm:$0xff]  ;;  %8413 = vmatpush.msra.mxu0 %v10525_v21  ;;  %v10416_v43 = vld [vmem:[%s16801_s13 + $0x220] sm:$0xff] }
 0xa73   : > { %10376 = vmatmul.msk.f32.vlgmr.msra.gmra.mxu3 %vm7119_vm2, %v7511_v52  ;;  %10372 = vmatmul.msk.f32.vlgmr.msrb.gmra.mxu2 %vm7119_vm2, %v7511_v52  ;;  %v10422_v52 = vld [vmem:[%s16801_s13 + $0x250] sm:$0xff] }
 0xa74   : > { %v7441_v13 = vpop.f32.mrf.mxu1  ;;  %7992 = vmatpush.msrb.mxu2 %v10442_v2  ;;  %8021 = vmatpush.msra.mxu3 %v10474_v29  ;;  %v10448_v2 = vld [vmem:[%s16801_s13 + $0x320] sm:$0xff]  ;;  %v7851_v21 = vld [vmem:[%s16801_s13 + $0xb0] sm:$0xff] }
 0xa75   : > { %v7455_v36 = vrot.slane %v7441_v13, 7  ;;  %8055 = vmatpush.msrb.mxu1 %v10433_v26  ;;  %v10456_v13 = vld [vmem:[%s16801_s13 + $0x360] sm:$0xff] }
 0xa76   : > { %7993 = vmatpush.msrb.mxu2 %v10440_v9  ;;  %8022 = vmatpush.msra.mxu3 %v10472_v62  ;;  %v10515_v9 = vld [vmem:[%s16801_s13 + $0x538] sm:$0xff]  ;;  %v10412_v29 = vld [vmem:[%s16801_s13 + $0x200] sm:$0xff] }
 0xa77   : > { %v7456_v17 = vsel %vm4482_vm11, %v7453_v4, %v7455_v36  ;;  %v7468_v45 = vld [vmem:[#allocation2 + $0x20] sm:$0xff]  ;;  %8056 = vmatpush.msrb.mxu1 %v10431_v53  ;;  %v10423_v36 = vld [vmem:[%s16801_s13 + $0x258] sm:$0xff] }
 0xa78   : > { %7465 = vst.msk [vmem:[#allocation2 + $0x30] sm:$0xf] %vm7464_vm6, %v7456_v17  ;;  %v7512_v57 = vrot.slane %v7468_v45, 1  ;;  %10382 = vmatmul.msk.f32.gmra.mxu1 %vm7119_vm2, %v7468_v45  ;;  %v7674_v10 = vrot.slane %v7468_v45, 2  ;;  %7994 = vmatpush.msrb.mxu2 %v10438_v33  ;;  %v10460_v4 = vld [vmem:[%s16801_s13 + $0x380] sm:$0xff]  ;;  %v10523_v17 = vld [vmem:[%s16801_s13 + $0x578] sm:$0xff] }
 0xa79   : > { %8023 = vmatpush.msra.mxu3 %v10470_v61  ;;  %8057 = vmatpush.msrb.mxu1 %v10429_v14  ;;  %v10513_v33 = vld [vmem:[%s16801_s13 + $0x528] sm:$0xff]  ;;  %v10444_v62 = vld [vmem:[%s16801_s13 + $0x300] sm:$0xff] }
 0xa7a   : > { %v7513_v12 = vsel %vm4124_vm5, %v7510_v44, %v7512_v57  ;;  %7995 = vmatpush.msrb.mxu2 %v10436_v24  ;;  %v10425_v44 = vld [vmem:[%s16801_s13 + $0x268] sm:$0xff]  ;;  %8414 = vmatpush.msra.mxu0 %v10523_v17  ;;  %v7885_v17 = vld [vmem:[%s16801_s13 + $0x1c0] sm:$0xff] }
 0xa7b   : > { %10377 = vmatmul.msk.f32.gmra.mxu3 %vm7119_vm2, %v7513_v12  ;;  %10373 = vmatmul.msk.f32.gmra.mxu2 %vm7119_vm2, %v7513_v12  ;;  %v10421_v12 = vld [vmem:[%s16801_s13 + $0x248] sm:$0xff] }
 0xa7c   : > { %7996 = vmatpush.msrb.mxu2 %v10434_v35  ;;  %8024 = vmatpush.msra.mxu3 %v10468_v46  ;;  %v10509_v61 = vld [vmem:[%s16801_s13 + $0x508] sm:$0xff]  ;;  %v7752_v35 = vld [vmem:[%s16800_s12] sm:$0x3]  ;;  %v10475_v46 = vld [vmem:[%s16801_s13 + $0x3f8] sm:$0xff] }
 0xa7d   : > { %8058 = vmatpush.msrb.mxu1 %v10427_v59 }
 0xa7e   : > { %7997 = vmatpush.msrb.mxu2 %v10432_v58  ;;  %v14842_v58 = vperm.slane %v7752_v35, 0 }
 0xa7f   : > { %v7487_v11 = vld [vmem:[#allocation2 + $0x30] sm:$0xf]  ;;  %8059 = vmatpush.msrb.mxu1 %v10425_v44  ;;  %v10465_v44 = vld [vmem:[%s16801_s13 + $0x3a8] sm:$0xff] }
 0xa80   : > { %v7469_v49 = vld [vmem:[#allocation2 + $0x30] sm:$0x7]  ;;  %v7514_v63 = vrot.slane %v7487_v11, 1  ;;  %7998 = vmatpush.msrb.mxu2 %v10430_v3  ;;  %v10521_v11 = vld [vmem:[%s16801_s13 + $0x568] sm:$0xff] }
 0xa81   : > { %v7651_v6 = vld [vmem:[#allocation2 + $0x30] sm:$0x1f]  ;;  %10383 = vmatmul.msk.f32.gmra.mxu1 %vm7119_vm2, %v7469_v49  ;;  %8415 = vmatpush.msra.mxu0 %v10521_v11  ;;  %v7849_v11 = vld [vmem:[%s16801_s13 + $0xa0] sm:$0xff] }
 0xa82   : > { %7781 = vst.msk [vmem:[#allocation2 + $0x34] ss:$8 sm:$0x3] %vm14518_vm4, %v11085_v27  ;;  %v7515_v1 = vsel %vm4124_vm5, %v7512_v57, %v7514_v63  ;;  %v7675_v27 = vsel %vm5200_vm10, %v7672_v16, %v7674_v10  ;;  %v7676_v20 = vrot.slane %v7651_v6, 2  ;;  %7999 = vmatpush.msrb.mxu2 %v10428_v51  ;;  %v10454_v57 = vld [vmem:[%s16801_s13 + $0x350] sm:$0xff]  ;;  %8060 = vmatpush.msrb.mxu1 %v10423_v36  ;;  %v10452_v6 = vld [vmem:[%s16801_s13 + $0x340] sm:$0xff] }
 0xa83   : > { %10378 = vmatmul.msk.f32.gmra.mxu3 %vm7119_vm2, %v7515_v1  ;;  %10374 = vmatmul.msk.f32.gmra.mxu2 %vm7119_vm2, %v7515_v1  ;;  %v10519_v1 = vld [vmem:[%s16801_s13 + $0x558] sm:$0xff]  ;;  %v7859_v3 = vld [vmem:[%s16801_s13 + $0xf0] sm:$0xff]  ;;  %v7857_v51 = vld [vmem:[%s16801_s13 + $0xe0] sm:$0xff] }
 0xa84   : > { %v7677_v54 = vsel %vm5200_vm10, %v7674_v10, %v7676_v20  ;;  %8000 = vmatpush.msrb.mxu2 %v10426_v60  ;;  %8061 = vmatpush.msrb.mxu1 %v10421_v12  ;;  %v10417_v10 = vld [vmem:[%s16801_s13 + $0x228] sm:$0xff]  ;;  %v7855_v60 = vld [vmem:[%s16801_s13 + $0xd0] sm:$0xff]  ;;  %v10463_v12 = vld [vmem:[%s16801_s13 + $0x398] sm:$0xff] }
 0xa85   : > { %8416 = vmatpush.msra.mxu0 %v10519_v1  ;;  %v7881_v1 = vld [vmem:[%s16801_s13 + $0x1a0] sm:$0xff] }
 0xa86   : > { %8001 = vmatpush.msrb.mxu2 %v10424_v34 }
 0xa88   : > { %8002 = vmatpush.msrb.mxu2 %v10422_v52 }
 0xa89   : > { %10408 = vmatmul.msk.f32.vlgmr.msra.gmra.mxu1 %vm7119_vm2, %v7673_v25 }
 0xa8b   : > { %10379 = vmatmul.msk.f32.gmra.mxu3 %vm7119_vm2, %v7514_v63  ;;  %10375 = vmatmul.msk.f32.gmra.mxu2 %vm7119_vm2, %v7514_v63  ;;  %v10419_v63 = vld [vmem:[%s16801_s13 + $0x238] sm:$0xff] }
 0xa8c   : > { %8062 = vmatpush.msrb.mxu1 %v10419_v63  ;;  %v10461_v63 = vld [vmem:[%s16801_s13 + $0x388] sm:$0xff] }
 0xa8e   : > { %8063 = vmatpush.msrb.mxu1 %v10417_v10  ;;  %v7879_v10 = vld [vmem:[%s16801_s13 + $0x190] sm:$0xff] }
 0xa90   : > { %8064 = vmatpush.msrb.mxu1 %v10415_v19  ;;  %v7845_v19 = vld [vmem:[%s16801_s13 + $0x80] sm:$0xff] }
 0xa91   : > { %10409 = vmatmul.msk.f32.gmra.mxu1 %vm7119_vm2, %v7675_v27 }
 0xa92   : > { %8065 = vmatpush.msrb.mxu1 %v10413_v8 }
 0xa93   : > { %10404 = vmatmul.msk.f32.vlgmr.msrb.gmra.mxu3 %vm7119_vm2, %v7673_v25  ;;  %10384 = vmatmul.msk.f32.vlgmr.msra.gmra.mxu2 %vm7119_vm2, %v14531_v0  ;;  %v10466_v0 = vld [vmem:[%s16801_s13 + $0x3b0] sm:$0xff] }
 0xa94   : > { %8025 = vmatpush.msra.mxu3 %v10466_v0  ;;  %v10450_v25 = vld [vmem:[%s16801_s13 + $0x330] sm:$0xff]  ;;  %8137 = vmatpush.msra.mxu1 %v7891_v37 }
 0xa96   : > { %8026 = vmatpush.msra.mxu3 %v10464_v7  ;;  %v7889_v7 = vld [vmem:[%s16801_s13 + $0x1e0] sm:$0xff] }
 0xa97   : > { %8138 = vmatpush.msra.mxu1 %v7889_v7 }
 0xa98   : > { %8027 = vmatpush.msra.mxu3 %v10462_v39  ;;  %v7887_v39 = vld [vmem:[%s16801_s13 + $0x1d0] sm:$0xff] }
 0xa99   : > { %10410 = vmatmul.msk.f32.gmra.mxu1 %vm7119_vm2, %v7677_v54 }
 0xa9a   : > { %8028 = vmatpush.msra.mxu3 %v10460_v4  ;;  %v10467_v4 = vld [vmem:[%s16801_s13 + $0x3b8] sm:$0xff]  ;;  %8139 = vmatpush.msra.mxu1 %v7887_v39  ;;  %v10453_v39 = vld [vmem:[%s16801_s13 + $0x348] sm:$0xff] }
 0xa9b   : > { %10405 = vmatmul.msk.f32.gmra.mxu3 %vm7119_vm2, %v7675_v27  ;;  %10385 = vmatmul.msk.f32.gmra.mxu2 %vm7119_vm2, %v7467_v50 }
 0xa9c   : > { %8029 = vmatpush.msra.mxu3 %v10458_v48  ;;  %v7853_v48 = vld [vmem:[%s16801_s13 + $0xc0] sm:$0xff]  ;;  %8140 = vmatpush.msra.mxu1 %v7885_v17 }
 0xa9e   : > { %8030 = vmatpush.msra.mxu3 %v10456_v13 }
 0xaa0   : > { %8031 = vmatpush.msra.mxu3 %v10454_v57 }
 0xaa1   : > { %10411 = vmatmul.msk.f32.gmra.mxu1 %vm7119_vm2, %v7676_v20 }
 0xaa2   : > { %8032 = vmatpush.msra.mxu3 %v10452_v6 }
 0xaa3   : > { %10406 = vmatmul.msk.f32.gmra.mxu3 %vm7119_vm2, %v7677_v54  ;;  %10386 = vmatmul.msk.f32.gmra.mxu2 %vm7119_vm2, %v7468_v45  ;;  %v10420_v45 = vld [vmem:[%s16801_s13 + $0x240] sm:$0xff]  ;;  %v10414_v54 = vld [vmem:[%s16801_s13 + $0x210] sm:$0xff] }
 0xaa4   : > { %8003 = vmatpush.msrb.mxu2 %v10420_v45  ;;  %8033 = vmatpush.msra.mxu3 %v10450_v25 }
 0xaa6   : > { %8034 = vmatpush.msra.mxu3 %v10448_v2  ;;  %v10459_v2 = vld [vmem:[%s16801_s13 + $0x378] sm:$0xff] }
 0xaa8   : > { %8035 = vmatpush.msra.mxu3 %v10446_v5 }
 0xaaa   : > { %8036 = vmatpush.msra.mxu3 %v10444_v62  ;;  %v10457_v62 = vld [vmem:[%s16801_s13 + $0x368] sm:$0xff] }
 0xaab   : > { %10407 = vmatmul.msk.f32.gmra.mxu3 %vm7119_vm2, %v7676_v20  ;;  %10387 = vmatmul.msk.f32.gmra.mxu2 %vm7119_vm2, %v7469_v49  ;;  %v10418_v49 = vld [vmem:[%s16801_s13 + $0x230] sm:$0xff]  ;;  %v10517_v20 = vld [vmem:[%s16801_s13 + $0x548] sm:$0xff] }
 0xaac   : > { %8004 = vmatpush.msrb.mxu2 %v10418_v49  ;;  %8417 = vmatpush.msra.mxu0 %v10517_v20 }
 0xaad   : > { %8108 = vmatpush.msrb.mxu3 %v7859_v3 }
 0xaae   : > { %8005 = vmatpush.msrb.mxu2 %v10416_v43  ;;  %8418 = vmatpush.msra.mxu0 %v10515_v9  ;;  %v7877_v9 = vld [vmem:[%s16801_s13 + $0x180] sm:$0xff] }
 0xaaf   : > { %8109 = vmatpush.msrb.mxu3 %v7857_v51 }
 0xab0   : > { %8006 = vmatpush.msrb.mxu2 %v10414_v54  ;;  %8419 = vmatpush.msra.mxu0 %v10513_v33 }
 0xab1   : > { %8110 = vmatpush.msrb.mxu3 %v7855_v60  ;;  %v7839_v60 = vld [vmem:[%s16801_s13 + $0x50] sm:$0xff] }
 0xab2   : > { %8007 = vmatpush.msrb.mxu2 %v10412_v29  ;;  %8420 = vmatpush.msra.mxu0 %v10511_v47  ;;  %v7843_v47 = vld [vmem:[%s16801_s13 + $0x70] sm:$0xff] }
 0xab3   : > { %8111 = vmatpush.msrb.mxu3 %v7853_v48 }
 0xab4   : > { %8421 = vmatpush.msra.mxu0 %v10509_v61  ;;  %8079 = vmatpush.msra.mxu2 %v10475_v46 }
 0xab5   : > { %8112 = vmatpush.msrb.mxu3 %v7851_v21  ;;  %v7837_v21 = vld [vmem:[%s16801_s13 + $0x40] sm:$0xff] }
 0xab6   : > { %8080 = vmatpush.msra.mxu2 %v10473_v40 }
 0xab7   : > { %8113 = vmatpush.msrb.mxu3 %v7849_v11  ;;  %v7835_v11 = vld [vmem:[%s16801_s13 + $0x30] sm:$0xff] }
 0xab8   : > { %8081 = vmatpush.msra.mxu2 %v10471_v55 }
 0xaba   : > { %8082 = vmatpush.msra.mxu2 %v10469_v23 }
 0xabc   : > { %8083 = vmatpush.msra.mxu2 %v10467_v4  ;;  %v7871_v4 = vld [vmem:[%s16801_s13 + $0x150] sm:$0xff] }
 0xabe   : > { %8084 = vmatpush.msra.mxu2 %v10465_v44  ;;  %v10451_v44 = vld [vmem:[%s16801_s13 + $0x338] sm:$0xff] }
 0xac0   : > { %8085 = vmatpush.msra.mxu2 %v10463_v12  ;;  %v10449_v12 = vld [vmem:[%s16801_s13 + $0x328] sm:$0xff] }
 0xac2   : > { %8086 = vmatpush.msra.mxu2 %v10461_v63 }
 0xac4   : > { %8087 = vmatpush.msra.mxu2 %v10459_v2  ;;  %v10445_v2 = vld [vmem:[%s16801_s13 + $0x308] sm:$0xff] }
 0xac6   : > { %8088 = vmatpush.msra.mxu2 %v10457_v62  ;;  %v7829_v62 = vld [vmem:[%s16801_s13] sm:$0xff] }
 0xae4   : > { %v14615_v28 = vpop.f32.mrf.mxu1 }
 0xaed   : > { %v14656_v22 = vpop.f32.mrf.mxu1 }
 0xaf5   : > { %v14719_v30 = vpop.f32.mrf.mxu1 }
 0xaf6   : > { %v14670_v32 = vpop.f32.mrf.mxu3  ;;  %v14672_v18 = vpop.f32.mrf.mxu2 }
 0xaf7   : > { %v7610_v38 = vadd.f32 %v14615_v28, %v14672_v18  ;;  %v14854_v18 = vperm.slane %v7752_v35, 1 }
 0xafe   : > { %v14724_v31 = vpop.f32.mrf.mxu3  ;;  %v14726_v50 = vpop.f32.mrf.mxu2 }
 0xaff   : > { %v14789_v27 = vpop.f32.mrf.mxu1  ;;  %v7613_v52 = vadd.f32 %v14656_v22, %v14726_v50  ;;  %v7883_v22 = vld [vmem:[%s16801_s13 + $0x1b0] sm:$0xff] }
 0xb00   : > { %8141 = vmatpush.msra.mxu1 %v7883_v22 }
 0xb02   : > { %8142 = vmatpush.msra.mxu1 %v7881_v1  ;;  %v10447_v1 = vld [vmem:[%s16801_s13 + $0x318] sm:$0xff] }
 0xb04   : > { %8143 = vmatpush.msra.mxu1 %v7879_v10 }
 0xb06   : > { %v14776_v56 = vpop.f32.mrf.mxu3  ;;  %v14778_v16 = vpop.f32.mrf.mxu2  ;;  %8144 = vmatpush.msra.mxu1 %v7877_v9 }
 0xb07   : > { %v7732_v41 = vpop.f32.mrf.mxu1  ;;  %v7616_v29 = vadd.f32 %v14719_v30, %v14778_v16  ;;  %v10455_v30 = vld [vmem:[%s16801_s13 + $0x358] sm:$0xff]  ;;  %v7841_v16 = vld [vmem:[%s16801_s13 + $0x60] sm:$0xff] }
 0xb08   : > { %8089 = vmatpush.msra.mxu2 %v10455_v30  ;;  %v7863_v30 = vld [vmem:[%s16801_s13 + $0x110] sm:$0xff] }
 0xb0a   : > { %8090 = vmatpush.msra.mxu2 %v10453_v39  ;;  %v10504_v39 = vld [vmem:[%s16801_s13 + $0x4e0] sm:$0xff] }
 0xb0c   : > { %8091 = vmatpush.msra.mxu2 %v10451_v44  ;;  %v7846_v44 = vld [vmem:[%s16801_s13 + $0x88] sm:$0xff] }
 0xb0e   : > { %v14824_v15 = vpop.f32.mrf.mxu3  ;;  %v14826_v24 = vpop.f32.mrf.mxu2  ;;  %8092 = vmatpush.msra.mxu2 %v10449_v12  ;;  %v7880_v12 = vld [vmem:[%s16801_s13 + $0x198] sm:$0xff] }
 0xb0f   : > { %v7735_v34 = vpop.f32.mrf.mxu1  ;;  %v7619_v17 = vadd.f32 %v14789_v27, %v14826_v24  ;;  %v7867_v27 = vld [vmem:[%s16801_s13 + $0x130] sm:$0xff] }
 0xb10   : > { %8093 = vmatpush.msra.mxu2 %v10447_v1  ;;  %v10494_v1 = vld [vmem:[%s16801_s13 + $0x490] sm:$0xff] }
 0xb12   : > { %8094 = vmatpush.msra.mxu2 %v10445_v2  ;;  %v7870_v2 = vld [vmem:[%s16801_s13 + $0x148] sm:$0xff] }
 0xb16   : > { %v7703_v0 = vpop.f32.mrf.mxu3  ;;  %v7638_v26 = vpop.f32.mrf.mxu2 }
 0xb17   : > { %v7744_v53 = vadd.f32 %v7703_v0, %v7610_v38  ;;  %v7639_v28 = vadd.f32 %v7638_v26, %v14670_v32  ;;  %v7738_v33 = vpop.f32.mrf.mxu1  ;;  %v7875_v26 = vld [vmem:[%s16801_s13 + $0x170] sm:$0xff] }
 0xb18   : > { %8145 = vmatpush.msra.mxu1 %v7875_v26 }
 0xb19   : > { %v7758_v14 = vadd.f32 %v14842_v58, %v7744_v53  ;;  %v7745_v32 = vadd.f32 %v7732_v41, %v7639_v28  ;;  %v7873_v53 = vld [vmem:[%s16801_s13 + $0x160] sm:$0xff] }
 0xb1a   : > { %8146 = vmatpush.msra.mxu1 %v7873_v53  ;;  %v10506_v53 = vld [vmem:[%s16801_s13 + $0x4f0] sm:$0xff] }
 0xb1b   : > { %v7766_v59 = vmax.f32 %v7758_v14, 0.0  ;;  %v7759_v42 = vadd.f32 %v14854_v18, %v7745_v32 }
 0xb1c   : > { %8147 = vmatpush.msra.mxu1 %v7871_v4  ;;  %v7882_v4 = vld [vmem:[%s16801_s13 + $0x1a8] sm:$0xff] }
 0xb1d   : > { %v7791_v13 = vrot.slane %v7766_v59, 7  ;;  %v7767_v36 = vmax.f32 %v7759_v42, 0.0 }
 0xb1e   : > { %v7706_v45 = vpop.f32.mrf.mxu3  ;;  %v7641_v57 = vpop.f32.mrf.mxu2 }
 0xb1f   : > { %7813 = vst [vmem:[#allocation2] sm:$0xfe] %v7791_v13  ;;  %v7792_v50 = vrot.slane %v7767_v36, 7  ;;  %v7746_v49 = vadd.f32 %v7706_v45, %v7613_v52  ;;  %v7642_v6 = vadd.f32 %v7641_v57, %v14724_v31  ;;  %v7847_v31 = vld [vmem:[%s16801_s13 + $0x90] sm:$0xff] }
 0xb20   : > { %8114 = vmatpush.msrb.mxu3 %v7847_v31 }
 0xb21   : > { %7814 = vst [vmem:[#allocation2 + $0x8] sm:$0xfe] %v7792_v50  ;;  %v7760_v43 = vadd.f32 %v14842_v58, %v7746_v49  ;;  %v7747_v25 = vadd.f32 %v7735_v34, %v7642_v6 }
 0xb22   : > { %8115 = vmatpush.msrb.mxu3 %v7845_v19 }
 0xb23   : > { %v7768_v20 = vmax.f32 %v7760_v43, 0.0  ;;  %v7761_v54 = vadd.f32 %v14854_v18, %v7747_v25  ;;  %v7833_v43 = vld [vmem:[%s16801_s13 + $0x20] sm:$0xff]  ;;  %v7741_v25 = vpop.f32.mrf.mxu1 }
 0xb24   : > { %8116 = vmatpush.msrb.mxu3 %v7843_v47 }
 0xb25   : > { %v14925_v5 = vrot.slane %v7768_v20, 7  ;;  %v7769_v8 = vmax.f32 %v7761_v54, 0.0 }
 0xb26   : > { %v7709_v61 = vpop.f32.mrf.mxu3  ;;  %v7644_v41 = vpop.f32.mrf.mxu2  ;;  %v7893_v35 = vld [vmem:[#allocation2] sm:$0xfe]  ;;  %8117 = vmatpush.msrb.mxu3 %v7841_v16 }
 0xb27   : > { %v14941_v46 = vsel %vm4482_vm11, %v7791_v13, %v14925_v5  ;;  %v14943_v37 = vrot.slane %v7769_v8, 7  ;;  %v7748_v38 = vadd.f32 %v7709_v61, %v7616_v29  ;;  %v7645_v0 = vadd.f32 %v7644_v41, %v14776_v56  ;;  %v7869_v13 = vld [vmem:[%s16801_s13 + $0x140] sm:$0xff]  ;;  %v7831_v29 = vld [vmem:[%s16801_s13 + $0x10] sm:$0xff] }
 0xb28   : > { %7815 = vst [vmem:[#allocation2 + $0x10] sm:$0xff] %v14941_v46  ;;  %v7970_v40 = vrot.slane %v7893_v35, 1  ;;  %v7971_v3 = vrot.slane %v14941_v46, 1  ;;  %v7894_v7 = vld [vmem:[#allocation2 + $0x8] sm:$0xfe]  ;;  %8118 = vmatpush.msrb.mxu3 %v7839_v60  ;;  %8148 = vmatpush.msra.mxu1 %v7869_v13  ;;  %v7892_v35 = vld [vmem:[%s16801_s13 + $0x1f8] sm:$0xff] }
 0xb29   : > { %v14956_v56 = vsel %vm4482_vm11, %v7792_v50, %v14943_v37  ;;  %v7762_v28 = vadd.f32 %v14842_v58, %v7748_v38  ;;  %v7749_v55 = vadd.f32 %v7738_v33, %v7645_v0  ;;  %v7973_v51 = vrot.slane %v7894_v7, 1  ;;  %v8225_v14 = vld [vmem:[#allocation2 + $0x8] sm:$0xfc]  ;;  %v7860_v33 = vld [vmem:[%s16801_s13 + $0xf8] sm:$0xff] }
 0xb2a   : > { %v7972_v32 = vsel %vm4124_vm5, %v7970_v40, %v7971_v3  ;;  %v7974_v23 = vrot.slane %v14956_v56, 1  ;;  %v8300_v59 = vrot.slane %v8225_v14, 2  ;;  %v8301_v42 = vrot.slane %v14956_v56, 2  ;;  %8119 = vmatpush.msrb.mxu3 %v7837_v21  ;;  %8149 = vmatpush.msra.mxu1 %v7867_v27  ;;  %v7890_v38 = vld [vmem:[%s16801_s13 + $0x1e8] sm:$0xff]  ;;  %v7861_v40 = vld [vmem:[%s16801_s13 + $0x100] sm:$0xff]  ;;  %v7848_v60 = vld [vmem:[%s16801_s13 + $0x98] sm:$0xff] }
 0xb2b   : > { %v7770_v34 = vmax.f32 %v7762_v28, 0.0  ;;  %v7763_v48 = vadd.f32 %v14854_v18, %v7749_v55  ;;  %8008 = vmatmul.f32.vlgmr.msrb.gmra.mxu2 %v7972_v32  ;;  %8066 = vmatmul.f32.vlgmr.msrb.gmra.mxu1 %v7972_v32  ;;  %v7888_v28 = vld [vmem:[%s16801_s13 + $0x1d8] sm:$0xff]  ;;  %v7850_v14 = vld [vmem:[%s16801_s13 + $0xa8] sm:$0xff]  ;;  %v10496_v27 = vld [vmem:[%s16801_s13 + $0x4a0] sm:$0xff] }
 0xb2c   : > { %v14979_v52 = vsel %vm4124_vm5, %v7973_v51, %v7974_v23  ;;  %v14987_v36 = vsel %vm5200_vm10, %v8300_v59, %v8301_v42  ;;  %8120 = vmatpush.msrb.mxu3 %v7835_v11  ;;  %8166 = vmatpush.msrb.mxu2 %v7860_v33  ;;  %v7852_v55 = vld [vmem:[%s16801_s13 + $0xb8] sm:$0xff]  ;;  %v7886_v51 = vld [vmem:[%s16801_s13 + $0x1c8] sm:$0xff] }
 0xb2d   : > { %v7797_v45 = vrot.slane %v7770_v34, 7  ;;  %v7771_v57 = vmax.f32 %v7763_v48, 0.0  ;;  %8037 = vmatmul.f32.vlgmr.msra.gmra.mxu3 %v14979_v52  ;;  %8422 = vmatmul.f32.vlgmr.msra.gmra.mxu0 %v14987_v36  ;;  %v7884_v32 = vld [vmem:[%s16801_s13 + $0x1b8] sm:$0xff]  ;;  %v7830_v33 = vld [vmem:[%s16801_s13 + $0x8] sm:$0xff] }
 0xb2e   : > { %v7712_v22 = vpop.f32.mrf.mxu3  ;;  %v7647_v50 = vpop.f32.mrf.mxu2  ;;  %8121 = vmatpush.msrb.mxu3 %v7833_v43  ;;  %v7844_v11 = vld [vmem:[%s16801_s13 + $0x78] sm:$0xff] }
 0xb2f   : > { %v15003_v24 = vsel %vm4482_vm11, %v14925_v5, %v7797_v45  ;;  %v7799_v49 = vrot.slane %v7771_v57, 7  ;;  %v7750_v6 = vadd.f32 %v7712_v22, %v7619_v17  ;;  %v7648_v63 = vadd.f32 %v7647_v50, %v14824_v15  ;;  %v7865_v15 = vld [vmem:[%s16801_s13 + $0x120] sm:$0xff]  ;;  %v7878_v22 = vld [vmem:[%s16801_s13 + $0x188] sm:$0xff]  ;;  %v7840_v43 = vld [vmem:[%s16801_s13 + $0x58] sm:$0xff] }
 0xb30   : > { %7817 = vst [vmem:[#allocation2 + $0x20] sm:$0xff] %v15003_v24  ;;  %v7976_v31 = vrot.slane %v15003_v24, 1  ;;  %8150 = vmatpush.msra.mxu1 %v7865_v15  ;;  %8122 = vmatpush.msrb.mxu3 %v7831_v29  ;;  %v10492_v15 = vld [vmem:[%s16801_s13 + $0x480] sm:$0xff]  ;;  %v7868_v29 = vld [vmem:[%s16801_s13 + $0x138] sm:$0xff] }
 0xb31   : > { %v15020_v10 = vsel %vm4482_vm11, %v14943_v37, %v7799_v49  ;;  %v7764_v20 = vadd.f32 %v14842_v58, %v7750_v6  ;;  %v7751_v54 = vadd.f32 %v7741_v25, %v7648_v63  ;;  %v7856_v37 = vld [vmem:[%s16801_s13 + $0xd8] sm:$0xff]  ;;  %v7842_v6 = vld [vmem:[%s16801_s13 + $0x68] sm:$0xff] }
 0xb32   : > { %v7977_v19 = vsel %vm4124_vm5, %v7971_v3, %v7976_v31  ;;  %v7978_v9 = vrot.slane %v15020_v10, 1  ;;  %v8305_v58 = vrot.slane %v15020_v10, 2  ;;  %8123 = vmatpush.msrb.mxu3 %v7829_v62  ;;  %v7854_v3 = vld [vmem:[%s16801_s13 + $0xc8] sm:$0xff]  ;;  %8151 = vmatpush.msra.mxu1 %v7863_v30  ;;  %v7876_v63 = vld [vmem:[%s16801_s13 + $0x178] sm:$0xff]  ;;  %v15219_v30 = vld [vmem:[#allocation2] sm:$0xff] }
 0xb33   : > { %v7772_v5 = vmax.f32 %v7764_v20, 0.0  ;;  %v7765_v8 = vadd.f32 %v14854_v18, %v7751_v54  ;;  %8011 = vmatmul.f32.gmra.mxu2 %v7977_v19  ;;  %v7858_v18 = vld [vmem:[%s16801_s13 + $0xe8] sm:$0xff]  ;;  %8069 = vmatmul.f32.gmra.mxu1 %v7977_v19  ;;  %v7872_v20 = vld [vmem:[%s16801_s13 + $0x158] sm:$0xff]  ;;  %v10490_v19 = vld [vmem:[%s16801_s13 + $0x470] sm:$0xff] }
 0xb34   : > { %v15044_v47 = vsel %vm4124_vm5, %v7974_v23, %v7978_v9  ;;  %v15061_v16 = vsel %vm5200_vm10, %v8301_v42, %v8305_v58  ;;  %8167 = vmatpush.msrb.mxu2 %v7858_v18  ;;  %8195 = vmatpush.msra.mxu3 %v7892_v35  ;;  %v10502_v23 = vld [vmem:[%s16801_s13 + $0x4d0] sm:$0xff]  ;;  %v10500_v42 = vld [vmem:[%s16801_s13 + $0x4c0] sm:$0xff]  ;;  %v7874_v25 = vld [vmem:[%s16801_s13 + $0x168] sm:$0xff] }
 0xb35   : > { %v7801_v61 = vrot.slane %v7772_v5, 7  ;;  %v7773_v41 = vmax.f32 %v7765_v8, 0.0  ;;  %8040 = vmatmul.f32.gmra.mxu3 %v15044_v47  ;;  %8425 = vmatmul.f32.gmra.mxu0 %v15061_v16  ;;  %v7836_v54 = vld [vmem:[%s16801_s13 + $0x38] sm:$0xff]  ;;  %v7866_v8 = vld [vmem:[%s16801_s13 + $0x128] sm:$0xff]  ;;  %v10538_v18 = vld [vmem:[%s16801_s13 + $0x5f0] sm:$0xff] }
 0xb36   : > { %8168 = vmatpush.msrb.mxu2 %v7856_v37  ;;  %8196 = vmatpush.msra.mxu3 %v7890_v38  ;;  %v7832_v5 = vld [vmem:[%s16801_s13 + $0x18] sm:$0xff]  ;;  %v15203_v62 = vld [vmem:[#allocation2 + $0x8] sm:$0xff]  ;;  %v10484_v38 = vld [vmem:[%s16801_s13 + $0x440] sm:$0xff] }
 0xb37   : > { %v7802_v0 = vsel %vm4482_vm11, %v7797_v45, %v7801_v61  ;;  %v7803_v26 = vrot.slane %v7773_v41, 7  ;;  %8152 = vmatpush.msra.mxu1 %v7861_v40  ;;  %v10498_v45 = vld [vmem:[%s16801_s13 + $0x4b0] sm:$0xff]  ;;  %v7864_v41 = vld [vmem:[%s16801_s13 + $0x118] sm:$0xff]  ;;  %v7862_v35 = vld [vmem:[%s16801_s13 + $0x108] sm:$0xff] }
 0xb38   : > { %7819 = vst [vmem:[#allocation2 + $0x30] sm:$0xf] %v7802_v0  ;;  %8169 = vmatpush.msrb.mxu2 %v7854_v3  ;;  %8197 = vmatpush.msra.mxu3 %v7888_v28  ;;  %v10486_v61 = vld [vmem:[%s16801_s13 + $0x450] sm:$0xff]  ;;  %v10507_v37 = vld [vmem:[%s16801_s13 + $0x4f8] sm:$0xff]  ;;  %v10532_v3 = vld [vmem:[%s16801_s13 + $0x5c0] sm:$0xff] }
 0xb39   : > { %v7804_v7 = vsel %vm4482_vm11, %v7799_v49, %v7803_v26  ;;  %8319 = vmatpush.msrb.mxu1 %v10506_v53  ;;  %v10534_v0 = vld [vmem:[%s16801_s13 + $0x5d0] sm:$0xff]  ;;  %v10505_v26 = vld [vmem:[%s16801_s13 + $0x4e8] sm:$0xff]  ;;  %v10503_v53 = vld [vmem:[%s16801_s13 + $0x4d8] sm:$0xff] }
 0xb3a   : > { %7820 = vst [vmem:[#allocation2 + $0x38] sm:$0xf] %v7804_v7  ;;  %8170 = vmatpush.msrb.mxu2 %v7852_v55  ;;  %8198 = vmatpush.msra.mxu3 %v7886_v51  ;;  %v10482_v40 = vld [vmem:[%s16801_s13 + $0x430] sm:$0xff]  ;;  %v10480_v7 = vld [vmem:[%s16801_s13 + $0x420] sm:$0xff]  ;;  %v10501_v55 = vld [vmem:[%s16801_s13 + $0x4c8] sm:$0xff] }
 0xb3b   : > { %8320 = vmatpush.msrb.mxu1 %v10504_v39  ;;  %v10530_v28 = vld [vmem:[%s16801_s13 + $0x5b0] sm:$0xff]  ;;  %v10528_v51 = vld [vmem:[%s16801_s13 + $0x5a0] sm:$0xff]  ;;  %v10499_v39 = vld [vmem:[%s16801_s13 + $0x4b8] sm:$0xff] }
 0xb3c   : > { %8171 = vmatpush.msrb.mxu2 %v7850_v14  ;;  %8199 = vmatpush.msra.mxu3 %v7884_v32  ;;  %v10476_v14 = vld [vmem:[%s16801_s13 + $0x400] sm:$0xff]  ;;  %v10526_v32 = vld [vmem:[%s16801_s13 + $0x590] sm:$0xff] }
 0xb3d   : > { %8321 = vmatpush.msrb.mxu1 %v10502_v23  ;;  %v10497_v23 = vld [vmem:[%s16801_s13 + $0x4a8] sm:$0xff] }
 0xb3e   : > { %8172 = vmatpush.msrb.mxu2 %v7848_v60  ;;  %8200 = vmatpush.msra.mxu3 %v7882_v4  ;;  %v10524_v60 = vld [vmem:[%s16801_s13 + $0x580] sm:$0xff]  ;;  %v10495_v4 = vld [vmem:[%s16801_s13 + $0x498] sm:$0xff] }
 0xb3f   : > { %v7895_v59 = vld [vmem:[#allocation2 + $0x30] sm:$0xf]  ;;  %8322 = vmatpush.msrb.mxu1 %v10500_v42  ;;  %v10493_v42 = vld [vmem:[%s16801_s13 + $0x488] sm:$0xff] }
 0xb40   : > { %v7980_v34 = vrot.slane %v7895_v59, 1  ;;  %8173 = vmatpush.msrb.mxu2 %v7846_v44  ;;  %8201 = vmatpush.msra.mxu3 %v7880_v12  ;;  %v10522_v59 = vld [vmem:[%s16801_s13 + $0x570] sm:$0xff]  ;;  %v8224_v12 = vld [vmem:[#allocation2] sm:$0xfc] }
 0xb41   : > { %v7896_v48 = vld [vmem:[#allocation2 + $0x38] sm:$0xf]  ;;  %8323 = vmatpush.msrb.mxu1 %v10498_v45  ;;  %v10518_v44 = vld [vmem:[%s16801_s13 + $0x550] sm:$0xff] }
 0xb42   : > { %v8227_v21 = vld [vmem:[#allocation2 + $0x38] sm:$0x1f]  ;;  %v7981_v13 = vsel %vm4124_vm5, %v7976_v31, %v7980_v34  ;;  %v15117_v17 = vrot.slane %v7896_v48, 1  ;;  %8174 = vmatpush.msrb.mxu2 %v7844_v11  ;;  %8202 = vmatpush.msra.mxu3 %v7878_v22  ;;  %v7838_v31 = vld [vmem:[%s16801_s13 + $0x48] sm:$0xff]  ;;  %v10514_v22 = vld [vmem:[%s16801_s13 + $0x530] sm:$0xff] }
 0xb43   : > { %v15122_v57 = vrot.slane %v8227_v21, 2  ;;  %8014 = vmatmul.f32.gmra.mxu2 %v7981_v13  ;;  %8072 = vmatmul.f32.gmra.mxu1 %v7981_v13  ;;  %v10491_v48 = vld [vmem:[%s16801_s13 + $0x478] sm:$0xff]  ;;  %v10489_v21 = vld [vmem:[%s16801_s13 + $0x468] sm:$0xff]  ;;  %v10516_v13 = vld [vmem:[%s16801_s13 + $0x540] sm:$0xff] }
 0xb44   : > { %v15137_v50 = vsel %vm4124_vm5, %v7978_v9, %v15117_v17  ;;  %8324 = vmatpush.msrb.mxu1 %v10496_v27  ;;  %8175 = vmatpush.msrb.mxu2 %v7842_v6  ;;  %v7834_v9 = vld [vmem:[%s16801_s13 + $0x28] sm:$0xff]  ;;  %v7828_v45 = vld [vmem:[#allocation2 + $0x38] sm:$0x7]  ;;  %v7827_v27 = vld [vmem:[#allocation2 + $0x30] sm:$0x7]  ;;  %vm8467_vm5 = vcmask 220160  }
 0xb45   : > { %v15146_v49 = vsel %vm5200_vm10, %v8305_v58, %v15122_v57  ;;  %8043 = vmatmul.f32.gmra.mxu3 %v15137_v50  ;;  %v10488_v58 = vld [vmem:[%s16801_s13 + $0x460] sm:$0xff]  ;;  %v10487_v11 = vld [vmem:[%s16801_s13 + $0x458] sm:$0xff] }
 0xb46   : > { %8428 = vmatmul.f32.gmra.mxu0 %v15146_v49  ;;  %8203 = vmatpush.msra.mxu3 %v7876_v63  ;;  %v10483_v6 = vld [vmem:[%s16801_s13 + $0x438] sm:$0xff]  ;;  %v8297_v63 = vrot.slane %v8224_v12, 2 }
 0xb47   : > { %8325 = vmatpush.msrb.mxu1 %v10494_v1  ;;  %8176 = vmatpush.msrb.mxu2 %v7840_v43  ;;  %v8298_v1 = vrot.slane %v14941_v46, 2  ;;  %v10510_v43 = vld [vmem:[%s16801_s13 + $0x510] sm:$0xff] }
 0xb48   : > { %8204 = vmatpush.msra.mxu3 %v7874_v25  ;;  %v10481_v25 = vld [vmem:[%s16801_s13 + $0x428] sm:$0xff] }
 0xb49   : > { %8177 = vmatpush.msrb.mxu2 %v7838_v31  ;;  %8326 = vmatpush.msrb.mxu1 %v10492_v15  ;;  %v10508_v31 = vld [vmem:[%s16801_s13 + $0x500] sm:$0xff]  ;;  %v8299_v15 = vsel %vm5200_vm10, %v8297_v63, %v8298_v1  ;;  %v10560_v63 = vld [vmem:[%s16804_s16 + $0x170] sm:$0xff] }
 0xb4a   : > { %8205 = vmatpush.msra.mxu3 %v7872_v20  ;;  %v10479_v20 = vld [vmem:[%s16801_s13 + $0x418] sm:$0xff] }
 0xb4b   : > { %8017 = vmatmul.f32.gmra.mxu2 %v7980_v34  ;;  %8075 = vmatmul.f32.gmra.mxu1 %v7980_v34  ;;  %v10520_v34 = vld [vmem:[%s16801_s13 + $0x560] sm:$0xff] }
 0xb4c   : > { %8178 = vmatpush.msrb.mxu2 %v7836_v54  ;;  %8206 = vmatpush.msra.mxu3 %v7870_v2  ;;  %v10477_v54 = vld [vmem:[%s16801_s13 + $0x408] sm:$0xff]  ;;  %v8303_v2 = vrot.slane %v15003_v24, 2 }
 0xb4d   : > { %8046 = vmatmul.f32.gmra.mxu3 %v15117_v17  ;;  %8327 = vmatpush.msrb.mxu1 %v10490_v19 }
 0xb4e   : > { %8431 = vmatmul.f32.gmra.mxu0 %v15122_v57  ;;  %8179 = vmatpush.msrb.mxu2 %v7834_v9  ;;  %v8304_v19 = vsel %vm5200_vm10, %v8298_v1, %v8303_v2  ;;  %v8226_v9 = vld [vmem:[#allocation2 + $0x30] sm:$0x1f]  ;;  %v10577_v1 = vld [vmem:[%s16804_s16 + $0x1f8] sm:$0xff] }
 0xb4f   : > { %8207 = vmatpush.msra.mxu3 %v7868_v29  ;;  %8328 = vmatpush.msrb.mxu1 %v10488_v58  ;;  %v8307_v29 = vrot.slane %v8226_v9, 2  ;;  %v10557_v9 = vld [vmem:[%s16804_s16 + $0x158] sm:$0xff] }
 0xb50   : > { %8180 = vmatpush.msrb.mxu2 %v7832_v5  ;;  %8617 = vmatpush.msrb.mxu0 %v10577_v1 }
 0xb51   : > { %8208 = vmatpush.msra.mxu3 %v7866_v8  ;;  %8329 = vmatpush.msrb.mxu1 %v10486_v61  ;;  %v8308_v58 = vsel %vm5200_vm10, %v8303_v2, %v8307_v29 }
 0xb52   : > { %8181 = vmatpush.msrb.mxu2 %v7830_v33 }
 0xb53   : > { %8095 = vmatmul.f32.vlgmr.msra.gmra.mxu2 %v14979_v52  ;;  %8153 = vmatmul.f32.vlgmr.msra.gmra.mxu1 %v15203_v62  ;;  %v10536_v52 = vld [vmem:[%s16801_s13 + $0x5e0] sm:$0xff] }
 0xb54   : > { %8209 = vmatpush.msra.mxu3 %v7864_v41  ;;  %8348 = vmatpush.msra.mxu2 %v10538_v18 }
 0xb55   : > { %8124 = vmatmul.f32.vlgmr.msrb.gmra.mxu3 %v15219_v30  ;;  %8330 = vmatpush.msrb.mxu1 %v10484_v38 }
 0xb56   : > { %8210 = vmatpush.msra.mxu3 %v7862_v35  ;;  %8349 = vmatpush.msra.mxu2 %v10536_v52 }
 0xb57   : > { %8331 = vmatpush.msrb.mxu1 %v10482_v40 }
 0xb58   : > { %8377 = vmatpush.msrb.mxu3 %v10507_v37  ;;  %8350 = vmatpush.msra.mxu2 %v10534_v0 }
 0xb59   : > { %8332 = vmatpush.msrb.mxu1 %v10480_v7 }
 0xb5a   : > { %8378 = vmatpush.msrb.mxu3 %v10505_v26  ;;  %8351 = vmatpush.msra.mxu2 %v10532_v3 }
 0xb5b   : > { %8098 = vmatmul.f32.gmra.mxu2 %v15044_v47  ;;  %8156 = vmatmul.f32.gmra.mxu1 %v14956_v56  ;;  %v10478_v47 = vld [vmem:[%s16801_s13 + $0x410] sm:$0xff] }
 0xb5c   : > { %8379 = vmatpush.msrb.mxu3 %v10503_v53  ;;  %8352 = vmatpush.msra.mxu2 %v10530_v28 }
 0xb5d   : > { %8127 = vmatmul.f32.gmra.mxu3 %v14941_v46  ;;  %8333 = vmatpush.msrb.mxu1 %v10478_v47 }
 0xb5e   : > { %8380 = vmatpush.msrb.mxu3 %v10501_v55  ;;  %8353 = vmatpush.msra.mxu2 %v10528_v51 }
 0xb5f   : > { %8334 = vmatpush.msrb.mxu1 %v10476_v14 }
 0xb60   : > { %8381 = vmatpush.msrb.mxu3 %v10499_v39  ;;  %8354 = vmatpush.msra.mxu2 %v10526_v32 }
 0xb62   : > { %8382 = vmatpush.msrb.mxu3 %v10497_v23  ;;  %8355 = vmatpush.msra.mxu2 %v10524_v60 }
 0xb63   : > { %8101 = vmatmul.f32.gmra.mxu2 %v15137_v50  ;;  %8159 = vmatmul.f32.gmra.mxu1 %v15020_v10  ;;  %v10485_v50 = vld [vmem:[%s16801_s13 + $0x448] sm:$0xff] }
 0xb64   : > { %8383 = vmatpush.msrb.mxu3 %v10495_v4  ;;  %8356 = vmatpush.msra.mxu2 %v10522_v59 }
 0xb65   : > { %8130 = vmatmul.f32.gmra.mxu3 %v15003_v24 }
 0xb66   : > { %8384 = vmatpush.msrb.mxu3 %v10493_v42  ;;  %8357 = vmatpush.msra.mxu2 %v10520_v34 }
 0xb68   : > { %8385 = vmatpush.msrb.mxu3 %v10491_v48  ;;  %8358 = vmatpush.msra.mxu2 %v10518_v44 }
 0xb6a   : > { %8386 = vmatpush.msrb.mxu3 %v10489_v21  ;;  %8359 = vmatpush.msra.mxu2 %v10516_v13 }
 0xb6b   : > { %8104 = vmatmul.f32.gmra.mxu2 %v15117_v17  ;;  %8162 = vmatmul.f32.gmra.mxu1 %v7828_v45  ;;  %v10512_v17 = vld [vmem:[%s16801_s13 + $0x520] sm:$0xff] }
 0xb6c   : > { %8387 = vmatpush.msrb.mxu3 %v10487_v11  ;;  %8360 = vmatpush.msra.mxu2 %v10514_v22 }
 0xb6d   : > { %8133 = vmatmul.f32.gmra.mxu3 %v7827_v27 }
 0xb6e   : > { %8388 = vmatpush.msrb.mxu3 %v10485_v50  ;;  %8361 = vmatpush.msra.mxu2 %v10512_v17 }
 0xb70   : > { %8389 = vmatpush.msrb.mxu3 %v10483_v6  ;;  %8362 = vmatpush.msra.mxu2 %v10510_v43  ;;  %v10561_v6 = vld [vmem:[%s16804_s16 + $0x178] sm:$0xff]  ;;  %v10559_v43 = vld [vmem:[%s16804_s16 + $0x168] sm:$0xff] }
 0xb72   : > { %8390 = vmatpush.msrb.mxu3 %v10481_v25  ;;  %8363 = vmatpush.msra.mxu2 %v10508_v31  ;;  %v10576_v25 = vld [vmem:[%s16804_s16 + $0x1f0] sm:$0xff]  ;;  %v10575_v31 = vld [vmem:[%s16804_s16 + $0x1e8] sm:$0xff] }
 0xb73   : > { %8182 = vmatmul.f32.vlgmr.msrb.gmra.mxu2 %v15219_v30  ;;  %8335 = vmatmul.f32.vlgmr.msrb.gmra.mxu1 %v8299_v15 }
 0xb74   : > { %8391 = vmatpush.msrb.mxu3 %v10479_v20  ;;  %v10558_v20 = vld [vmem:[%s16804_s16 + $0x160] sm:$0xff]  ;;  %8618 = vmatpush.msrb.mxu0 %v10576_v25 }
 0xb75   : > { %8211 = vmatmul.f32.vlgmr.msra.gmra.mxu3 %v15203_v62 }
 0xb76   : > { %8392 = vmatpush.msrb.mxu3 %v10477_v54  ;;  %v10574_v54 = vld [vmem:[%s16804_s16 + $0x1e0] sm:$0xff]  ;;  %8619 = vmatpush.msrb.mxu0 %v10575_v31 }
 0xb78   : > { %8597 = vmatpush.msra.mxu3 %v10561_v6  ;;  %8620 = vmatpush.msrb.mxu0 %v10574_v54  ;;  %v10567_v6 = vld [vmem:[%s16804_s16 + $0x1a8] sm:$0xff] }
 0xb7a   : > { %8598 = vmatpush.msra.mxu3 %v10560_v63 }
 0xb7b   : > { %8185 = vmatmul.f32.gmra.mxu2 %v14941_v46  ;;  %8338 = vmatmul.f32.gmra.mxu1 %v8304_v19 }
 0xb7c   : > { %8599 = vmatpush.msra.mxu3 %v10559_v43 }
 0xb7d   : > { %8214 = vmatmul.f32.gmra.mxu3 %v14956_v56 }
 0xb7e   : > { %8600 = vmatpush.msra.mxu3 %v10558_v20 }
 0xb80   : > { %8601 = vmatpush.msra.mxu3 %v10557_v9  ;;  %v10549_v9 = vld [vmem:[%s16804_s16 + $0x118] sm:$0xff] }
 0xb83   : > { %8188 = vmatmul.f32.gmra.mxu2 %v15003_v24  ;;  %8341 = vmatmul.f32.gmra.mxu1 %v8308_v58 }
 0xb85   : > { %8217 = vmatmul.f32.gmra.mxu3 %v15020_v10 }
 0xb8b   : > { %8191 = vmatmul.f32.gmra.mxu2 %v7827_v27  ;;  %8344 = vmatmul.f32.gmra.mxu1 %v8307_v29 }
 0xb8d   : > { %8220 = vmatmul.f32.gmra.mxu3 %v7828_v45 }
 0xb93   : > { %8364 = vmatmul.f32.vlgmr.msra.gmra.mxu2 %v14987_v36 }
 0xb95   : > { %8393 = vmatmul.f32.vlgmr.msrb.gmra.mxu3 %v8299_v15 }
 0xb9b   : > { %8367 = vmatmul.f32.gmra.mxu2 %v15061_v16 }
 0xb9d   : > { %8396 = vmatmul.f32.gmra.mxu3 %v8304_v19 }
 0xba3   : > { %8370 = vmatmul.f32.gmra.mxu2 %v15146_v49 }
 0xba5   : > { %8399 = vmatmul.f32.gmra.mxu3 %v8308_v58 }
 0xba8   : > { %v8067_v33 = vpop.f32.mrf.mxu1 }
 0xbaa   : > { %v15370_v45 = vpop.f32.mrf.mxu0 }
 0xbab   : > { %8373 = vmatmul.f32.gmra.mxu2 %v15122_v57 }
 0xbad   : > { %8402 = vmatmul.f32.gmra.mxu3 %v8307_v29  ;;  %v10573_v29 = vld [vmem:[%s16804_s16 + $0x1d8] sm:$0xff] }
 0xbae   : > { %v8009_v46 = vpop.f32.mrf.mxu2  ;;  %8621 = vmatpush.msrb.mxu0 %v10573_v29  ;;  %v10565_v29 = vld [vmem:[%s16804_s16 + $0x198] sm:$0xff] }
 0xbb0   : > { %v8038_v56 = vpop.f32.mrf.mxu3  ;;  %v8070_v41 = vpop.f32.mrf.mxu1 }
 0xbb1   : > { %v8039_v24 = vadd.f32 %v8038_v56, %v8009_v46  ;;  %v10556_v46 = vld [vmem:[%s16804_s16 + $0x150] sm:$0xff] }
 0xbb2   : > { %v8426_v27 = vpop.f32.mrf.mxu0  ;;  %v10572_v56 = vld [vmem:[%s16804_s16 + $0x1d0] sm:$0xff]  ;;  %8602 = vmatpush.msra.mxu3 %v10556_v46 }
 0xbb3   : > { %8622 = vmatpush.msrb.mxu0 %v10572_v56 }
 0xbb6   : > { %v8012_v5 = vpop.f32.mrf.mxu2 }
 0xbb8   : > { %v8041_v10 = vpop.f32.mrf.mxu3 }
 0xbb9   : > { %v8042_v8 = vadd.f32 %v8041_v10, %v8012_v5  ;;  %v10555_v10 = vld [vmem:[%s16804_s16 + $0x148] sm:$0xff] }
 0xbba   : > { %8603 = vmatpush.msra.mxu3 %v10555_v10 }
 0xbc0   : > { %v8073_v49 = vpop.f32.mrf.mxu1 }
 0xbc3   : > { %v8429_v19 = vpop.f32.mrf.mxu0 }
 0xbc6   : > { %v8015_v62 = vpop.f32.mrf.mxu2 }
 0xbc8   : > { %v8044_v61 = vpop.f32.mrf.mxu3  ;;  %v8076_v0 = vpop.f32.mrf.mxu1 }
 0xbc9   : > { %v8045_v36 = vadd.f32 %v8044_v61, %v8015_v62  ;;  %v10571_v62 = vld [vmem:[%s16804_s16 + $0x1c8] sm:$0xff] }
 0xbca   : > { %8623 = vmatpush.msrb.mxu0 %v10571_v62  ;;  %v10547_v62 = vld [vmem:[%s16804_s16 + $0x108] sm:$0xff] }
 0xbce   : > { %v8018_v18 = vpop.f32.mrf.mxu2 }
 0xbd0   : > { %v8047_v16 = vpop.f32.mrf.mxu3  ;;  %v8154_v55 = vpop.f32.mrf.mxu1 }
 0xbd1   : > { %v15352_v35 = vadd.f32 %v8047_v16, %v8018_v18 }
 0xbd6   : > { %v8096_v30 = vpop.f32.mrf.mxu2 }
 0xbd7   : > { %v15354_v52 = vadd.f32 %v8096_v30, %v8067_v33  ;;  %v8443_v30 = vld [vmem:[%s16802_s14] sm:$0x3] }
 0xbd8   : > { %v8125_v57 = vpop.f32.mrf.mxu3  ;;  %v15360_v14 = vpop.f32.mrf.mxu1 }
 0xbd9   : > { %v15356_v37 = vadd.f32 %v8125_v57, %v8039_v24  ;;  %v10570_v57 = vld [vmem:[%s16804_s16 + $0x1c0] sm:$0xff] }
 0xbda   : > { %8624 = vmatpush.msrb.mxu0 %v10570_v57  ;;  %v10592_v57 = vld [vmem:[%s16804_s16 + $0x270] sm:$0xff] }
 0xbdb   : > { %v8155_v18 = vadd.f32 %v8154_v55, %v15356_v37 }
 0xbde   : > { %v8099_v38 = vpop.f32.mrf.mxu2 }
 0xbdf   : > { %v8100_v26 = vadd.f32 %v8099_v38, %v8070_v41  ;;  %v10554_v41 = vld [vmem:[%s16804_s16 + $0x140] sm:$0xff] }
 0xbe0   : > { %v8128_v40 = vpop.f32.mrf.mxu3  ;;  %v8160_v60 = vpop.f32.mrf.mxu1  ;;  %8604 = vmatpush.msra.mxu3 %v10554_v41  ;;  %v10546_v41 = vld [vmem:[%s16804_s16 + $0x100] sm:$0xff] }
 0xbe1   : > { %v15358_v3 = vadd.f32 %v8128_v40, %v8042_v8 }
 0xbe6   : > { %v8102_v7 = vpop.f32.mrf.mxu2 }
 0xbe7   : > { %v8103_v53 = vadd.f32 %v8102_v7, %v8073_v49 }
 0xbe8   : > { %v8131_v28 = vpop.f32.mrf.mxu3  ;;  %v8163_v34 = vpop.f32.mrf.mxu1 }
 0xbe9   : > { %v8132_v47 = vadd.f32 %v8131_v28, %v8045_v36 }
 0xbeb   : > { %v8161_v16 = vadd.f32 %v8160_v60, %v8132_v47 }
 0xbee   : > { %v8105_v51 = vpop.f32.mrf.mxu2 }
 0xbef   : > { %v8106_v24 = vadd.f32 %v8105_v51, %v8076_v0  ;;  %v8158_v0 = vadd.f32 %v15360_v14, %v15358_v3 }
 0xbf0   : > { %v8134_v39 = vpop.f32.mrf.mxu3  ;;  %v8336_v13 = vpop.f32.mrf.mxu1 }
 0xbf1   : > { %v8135_v5 = vadd.f32 %v8134_v39, %v15352_v35 }
 0xbf6   : > { %v8183_v32 = vpop.f32.mrf.mxu2 }
 0xbf7   : > { %v8184_v38 = vadd.f32 %v8183_v32, %v15354_v52  ;;  %v10569_v52 = vld [vmem:[%s16804_s16 + $0x1b8] sm:$0xff]  ;;  %v8445_v32 = vperm.slane %v8443_v30, 0 }
 0xbf8   : > { %v15362_v23 = vpop.f32.mrf.mxu3  ;;  %v8339_v22 = vpop.f32.mrf.mxu1  ;;  %8625 = vmatpush.msrb.mxu0 %v10569_v52  ;;  %v10589_v52 = vld [vmem:[%s16804_s16 + $0x258] sm:$0xff] }
 0xbfe   : > { %v8186_v4 = vpop.f32.mrf.mxu2 }
 0xbff   : > { %v8187_v61 = vadd.f32 %v8186_v4, %v8100_v26  ;;  %v8164_v26 = vadd.f32 %v8163_v34, %v8135_v5  ;;  %v8432_v4 = vpop.f32.mrf.mxu0  ;;  %v10564_v5 = vld [vmem:[%s16804_s16 + $0x190] sm:$0xff] }
 0xc00   : > { %v15364_v59 = vpop.f32.mrf.mxu3  ;;  %v8342_v15 = vpop.f32.mrf.mxu1 }
 0xc01   : > { %v8216_v3 = vadd.f32 %v15364_v59, %v8187_v61  ;;  %v10568_v59 = vld [vmem:[%s16804_s16 + $0x1b0] sm:$0xff]  ;;  %v10563_v61 = vld [vmem:[%s16804_s16 + $0x188] sm:$0xff] }
 0xc02   : > { %8626 = vmatpush.msrb.mxu0 %v10568_v59  ;;  %v10586_v59 = vld [vmem:[%s16804_s16 + $0x240] sm:$0xff] }
 0xc04   : > { %8627 = vmatpush.msrb.mxu0 %v10567_v6  ;;  %v8532_v6 = vld [vmem:[%s16804_s16 + $0x30] sm:$0xff] }
 0xc06   : > { %v8189_v42 = vpop.f32.mrf.mxu2 }
 0xc07   : > { %v8190_v8 = vadd.f32 %v8189_v42, %v8103_v53  ;;  %v10553_v53 = vld [vmem:[%s16804_s16 + $0x138] sm:$0xff]  ;;  %v10552_v42 = vld [vmem:[%s16804_s16 + $0x130] sm:$0xff] }
 0xc08   : > { %v15366_v48 = vpop.f32.mrf.mxu3  ;;  %v8345_v37 = vpop.f32.mrf.mxu1  ;;  %8605 = vmatpush.msra.mxu3 %v10553_v53  ;;  %v8554_v53 = vld [vmem:[%s16804_s16 + $0xe0] sm:$0xff] }
 0xc09   : > { %v8219_v28 = vadd.f32 %v15366_v48, %v8190_v8 }
 0xc0a   : > { %8606 = vmatpush.msra.mxu3 %v10552_v42  ;;  %v8551_v42 = vld [vmem:[%s16804_s16 + $0xc8] sm:$0xff] }
 0xc0e   : > { %v8192_v44 = vpop.f32.mrf.mxu2 }
 0xc0f   : > { %v8193_v36 = vadd.f32 %v8192_v44, %v8106_v24  ;;  %v10548_v24 = vld [vmem:[%s16804_s16 + $0x110] sm:$0xff] }
 0xc10   : > { %v15368_v21 = vpop.f32.mrf.mxu3 }
 0xc11   : > { %v8222_v39 = vadd.f32 %v15368_v21, %v8193_v36  ;;  %v8213_v21 = vadd.f32 %v15362_v23, %v8184_v38  ;;  %v10550_v23 = vld [vmem:[%s16804_s16 + $0x120] sm:$0xff]  ;;  %v8540_v38 = vld [vmem:[%s16804_s16 + $0x70] sm:$0xff] }
 0xc16   : > { %v8365_v12 = vpop.f32.mrf.mxu2 }
 0xc17   : > { %v8366_v40 = vadd.f32 %v8365_v12, %v8336_v13  ;;  %v8446_v12 = vperm.slane %v8443_v30, 1  ;;  %v8556_v30 = vld [vmem:[%s16804_s16 + $0xf0] sm:$0xff] }
 0xc18   : > { %v15372_v11 = vpop.f32.mrf.mxu3 }
 0xc19   : > { %v8424_v14 = vadd.f32 %v15370_v45, %v15372_v11  ;;  %v8435_v45 = vadd.f32 %v8366_v40, %v8155_v18  ;;  %v10551_v11 = vld [vmem:[%s16804_s16 + $0x128] sm:$0xff]  ;;  %v8557_v18 = vld [vmem:[%s16804_s16 + $0xf8] sm:$0xff] }
 0xc1a   : > { %8607 = vmatpush.msra.mxu3 %v10551_v11  ;;  %v10591_v40 = vld [vmem:[%s16804_s16 + $0x268] sm:$0xff]  ;;  %v10585_v11 = vld [vmem:[%s16804_s16 + $0x238] sm:$0xff] }
 0xc1b   : > { %v8436_v63 = vadd.f32 %v8424_v14, %v8213_v21  ;;  %v8552_v14 = vld [vmem:[%s16804_s16 + $0xd0] sm:$0xff]  ;;  %v8534_v21 = vld [vmem:[%s16804_s16 + $0x40] sm:$0xff] }
 0xc1c   : > { %8608 = vmatpush.msra.mxu3 %v10550_v23  ;;  %v8547_v23 = vld [vmem:[%s16804_s16 + $0xa8] sm:$0xff] }
 0xc1d   : > { %v8450_v56 = vadd.f32 %v8446_v12, %v8436_v63  ;;  %v10601_v63 = vld [vmem:[%s16804_s16 + $0x2b8] sm:$0xff] }
 0xc1e   : > { %v8368_v50 = vpop.f32.mrf.mxu2  ;;  %8609 = vmatpush.msra.mxu3 %v10549_v9  ;;  %v8544_v9 = vld [vmem:[%s16804_s16 + $0x90] sm:$0xff] }
 0xc1f   : > { %v8369_v35 = vadd.f32 %v8368_v50, %v8339_v22  ;;  %v8458_v36 = vmax.f32 %v8450_v56, 0.0  ;;  %v8528_v56 = vld [vmem:[%s16804_s16 + $0x10] sm:$0xff] }
 0xc20   : > { %v8397_v17 = vpop.f32.mrf.mxu3  ;;  %8610 = vmatpush.msra.mxu3 %v10548_v24  ;;  %v8527_v24 = vld [vmem:[%s16804_s16 + $0x8] sm:$0xff] }
 0xc21   : > { %v8427_v55 = vadd.f32 %v8426_v27, %v8397_v17  ;;  %v8437_v34 = vadd.f32 %v8369_v35, %v8158_v0  ;;  %v8541_v35 = vld [vmem:[%s16804_s16 + $0x78] sm:$0xff] }
 0xc22   : > { %8611 = vmatpush.msra.mxu3 %v10547_v62  ;;  %v10609_v0 = vld [vmem:[%s16804_s16 + $0x2f8] sm:$0xff]  ;;  %v10623_v62 = vld [vmem:[%s16804_s16 + $0x368] sm:$0xff] }
 0xc23   : > { %v8438_v22 = vadd.f32 %v8427_v55, %v8216_v3  ;;  %v8451_v25 = vadd.f32 %v8445_v32, %v8437_v34  ;;  %v8538_v55 = vld [vmem:[%s16804_s16 + $0x60] sm:$0xff]  ;;  %v8537_v3 = vld [vmem:[%s16804_s16 + $0x58] sm:$0xff]  ;;  %v10587_v34 = vld [vmem:[%s16804_s16 + $0x248] sm:$0xff] }
 0xc24   : > { %8612 = vmatpush.msra.mxu3 %v10546_v41  ;;  %v10641_v41 = vld [vmem:[%s16804_s16 + $0x3f8] sm:$0xff] }
 0xc26   : > { %v8371_v2 = vpop.f32.mrf.mxu2 }
 0xc27   : > { %v8372_v33 = vadd.f32 %v8371_v2, %v8342_v15  ;;  %v10566_v15 = vld [vmem:[%s16804_s16 + $0x1a0] sm:$0xff]  ;;  %v8449_v2 = vadd.f32 %v8445_v32, %v8435_v45  ;;  %v10603_v45 = vld [vmem:[%s16804_s16 + $0x2c8] sm:$0xff] }
 0xc28   : > { %v8400_v58 = vpop.f32.mrf.mxu3  ;;  %8628 = vmatpush.msrb.mxu0 %v10566_v15  ;;  %v10582_v15 = vld [vmem:[%s16804_s16 + $0x220] sm:$0xff] }
 0xc29   : > { %v8430_v49 = vadd.f32 %v8429_v19, %v8400_v58  ;;  %v8439_v47 = vadd.f32 %v8372_v33, %v8161_v16  ;;  %v8452_v19 = vadd.f32 %v8446_v12, %v8438_v22  ;;  %v8459_v58 = vmax.f32 %v8451_v25, 0.0  ;;  %v8465_v33 = vld [vmem:[%s16803_s15] sm:$0xff]  ;;  %v10593_v16 = vld [vmem:[%s16804_s16 + $0x278] sm:$0xff]  ;;  %v10600_v25 = vld [vmem:[%s16804_s16 + $0x2b0] sm:$0xff] }
 0xc2a   : > { %8629 = vmatpush.msrb.mxu0 %v10565_v29  ;;  %v8457_v10 = vmax.f32 %v8449_v2, 0.0  ;;  %8714 = vmatpush.msrb.mxu3 %v10593_v16  ;;  %v8533_v22 = vld [vmem:[%s16804_s16 + $0x38] sm:$0xff]  ;;  %v10580_v29 = vld [vmem:[%s16804_s16 + $0x210] sm:$0xff] }
 0xc2b   : > { %v8440_v48 = vadd.f32 %v8430_v49, %v8219_v28  ;;  %v8453_v17 = vadd.f32 %v8445_v32, %v8439_v47  ;;  %v8460_v8 = vmax.f32 %v8452_v19, 0.0  ;;  %v10562_v49 = vld [vmem:[%s16804_s16 + $0x180] sm:$0xff]  ;;  %v10607_v47 = vld [vmem:[%s16804_s16 + $0x2e8] sm:$0xff]  ;;  %v8545_v2 = vld [vmem:[%s16804_s16 + $0x98] sm:$0xff] }
 0xc2c   : > { %8630 = vmatpush.msrb.mxu0 %v10564_v5  ;;  %8715 = vmatpush.msrb.mxu3 %v10592_v57  ;;  %v10590_v28 = vld [vmem:[%s16804_s16 + $0x260] sm:$0xff]  ;;  %v10581_v19 = vld [vmem:[%s16804_s16 + $0x218] sm:$0xff]  ;;  %v8466_v5 = vld [vmem:[%s16803_s15 + $0x8] sm:$0x1f] }
 0xc2d   : > { %v8454_v31 = vadd.f32 %v8446_v12, %v8440_v48  ;;  %v8461_v54 = vmax.f32 %v8453_v17, 0.0  ;;  %v8535_v48 = vld [vmem:[%s16804_s16 + $0x48] sm:$0xff]  ;;  %v10584_v17 = vld [vmem:[%s16804_s16 + $0x230] sm:$0xff]  ;;  %v10638_v57 = vld [vmem:[%s16804_s16 + $0x3e0] sm:$0xff] }
 0xc2e   : > { %v8374_v7 = vpop.f32.mrf.mxu2  ;;  %8631 = vmatpush.msrb.mxu0 %v10563_v61  ;;  %8716 = vmatpush.msrb.mxu3 %v10591_v40  ;;  %v10622_v61 = vld [vmem:[%s16804_s16 + $0x360] sm:$0xff]  ;;  %v10640_v16 = vld [vmem:[%s16804_s16 + $0x3f0] sm:$0xff] }
 0xc2f   : > { %v8375_v51 = vadd.f32 %v8374_v7, %v8345_v37  ;;  %v8462_v46 = vmax.f32 %v8454_v31, 0.0  ;;  %v8539_v37 = vld [vmem:[%s16804_s16 + $0x68] sm:$0xff]  ;;  %v10608_v7 = vld [vmem:[%s16804_s16 + $0x2f0] sm:$0xff]  ;;  %v8546_v31 = vld [vmem:[%s16804_s16 + $0xa0] sm:$0xff] }
 0xc30   : > { %v8403_v60 = vpop.f32.mrf.mxu3  ;;  %8632 = vmatpush.msrb.mxu0 %v10562_v49  ;;  %8717 = vmatpush.msrb.mxu3 %v10590_v28  ;;  %v10639_v49 = vld [vmem:[%s16804_s16 + $0x3e8] sm:$0xff]  ;;  %v10636_v40 = vld [vmem:[%s16804_s16 + $0x3d0] sm:$0xff]  ;;  %v10634_v28 = vld [vmem:[%s16804_s16 + $0x3c0] sm:$0xff] }
 0xc31   : > { %v8441_v44 = vadd.f32 %v8375_v51, %v8164_v26  ;;  %v8433_v13 = vadd.f32 %v8432_v4, %v8403_v60  ;;  %v8555_v26 = vld [vmem:[%s16804_s16 + $0xe8] sm:$0xff]  ;;  %v8553_v51 = vld [vmem:[%s16804_s16 + $0xd8] sm:$0xff]  ;;  %v8536_v60 = vld [vmem:[%s16804_s16 + $0x50] sm:$0xff] }
 0xc32   : > { %8734 = vmatpush.msra.mxu0 %v10609_v0  ;;  %8718 = vmatpush.msrb.mxu3 %v10589_v52  ;;  %v10605_v4 = vld [vmem:[%s16804_s16 + $0x2d8] sm:$0xff]  ;;  %v10632_v52 = vld [vmem:[%s16804_s16 + $0x3b0] sm:$0xff] }
 0xc33   : > { %v8455_v50 = vadd.f32 %v8445_v32, %v8441_v44  ;;  %v8442_v27 = vadd.f32 %v8433_v13, %v8222_v39  ;;  %v10606_v39 = vld [vmem:[%s16804_s16 + $0x2e0] sm:$0xff]  ;;  %v10588_v32 = vld [vmem:[%s16804_s16 + $0x250] sm:$0xff]  ;;  %v10637_v0 = vld [vmem:[%s16804_s16 + $0x3d8] sm:$0xff] }
 0xc34   : > { %8735 = vmatpush.msra.mxu0 %v10608_v7  ;;  %8719 = vmatpush.msrb.mxu3 %v10588_v32  ;;  %v10604_v44 = vld [vmem:[%s16804_s16 + $0x2d0] sm:$0xff]  ;;  %v8550_v13 = vld [vmem:[%s16804_s16 + $0xc0] sm:$0xff]  ;;  %v10635_v7 = vld [vmem:[%s16804_s16 + $0x3c8] sm:$0xff] }
 0xc35   : > { %v8463_v1 = vmax.f32 %v8455_v50, 0.0  ;;  %v8456_v43 = vadd.f32 %v8446_v12, %v8442_v27  ;;  %v8549_v12 = vld [vmem:[%s16804_s16 + $0xb8] sm:$0xff]  ;;  %v10602_v50 = vld [vmem:[%s16804_s16 + $0x2c0] sm:$0xff]  ;;  %v8548_v27 = vld [vmem:[%s16804_s16 + $0xb0] sm:$0xff] }
 0xc36   : > { %8736 = vmatpush.msra.mxu0 %v10607_v47  ;;  %8720 = vmatpush.msrb.mxu3 %v10587_v34  ;;  %v10633_v47 = vld [vmem:[%s16804_s16 + $0x3b8] sm:$0xff]  ;;  %v10578_v32 = vld [vmem:[%s16804_s16 + $0x200] sm:$0xff] }
 0xc37   : > { %v8464_v20 = vmax.f32 %v8456_v43, 0.0  ;;  %10540 = vmatpush.msk.msra.mxu1 %vm4842_vm8, %v8463_v1  ;;  %v10583_v1 = vld [vmem:[%s16804_s16 + $0x228] sm:$0xff]  ;;  %v10630_v34 = vld [vmem:[%s16804_s16 + $0x3a0] sm:$0xff] }
 0xc38   : > { %8737 = vmatpush.msra.mxu0 %v10606_v39  ;;  %8721 = vmatpush.msrb.mxu3 %v10586_v59  ;;  %v8531_v43 = vld [vmem:[%s16804_s16 + $0x28] sm:$0xff]  ;;  %v10628_v59 = vld [vmem:[%s16804_s16 + $0x390] sm:$0xff] }
 0xc39   : > { %8493 = vmatpush.msra.mxu1 %v8461_v54  ;;  %10543 = vmatpush.msk.msrb.mxu2 %vm4842_vm8, %v8464_v20  ;;  %v8530_v20 = vld [vmem:[%s16804_s16 + $0x20] sm:$0xff]  ;;  %v10599_v54 = vld [vmem:[%s16804_s16 + $0x2a8] sm:$0xff] }
 0xc3a   : > { %8738 = vmatpush.msra.mxu0 %v10605_v4  ;;  %8722 = vmatpush.msrb.mxu3 %v10585_v11  ;;  %v10579_v39 = vld [vmem:[%s16804_s16 + $0x208] sm:$0xff]  ;;  %v10626_v11 = vld [vmem:[%s16804_s16 + $0x380] sm:$0xff] }
 0xc3b   : > { %8494 = vmatpush.msra.mxu1 %v8459_v58  ;;  %8516 = vmatpush.msrb.mxu2 %v8462_v46  ;;  %v8543_v58 = vld [vmem:[%s16804_s16 + $0x88] sm:$0xff]  ;;  %v8529_v46 = vld [vmem:[%s16804_s16 + $0x18] sm:$0xff] }
 0xc3c   : > { %8739 = vmatpush.msra.mxu0 %v10604_v44  ;;  %8723 = vmatpush.msrb.mxu3 %v10584_v17  ;;  %v10631_v4 = vld [vmem:[%s16804_s16 + $0x3a8] sm:$0xff]  ;;  %v10596_v44 = vld [vmem:[%s16804_s16 + $0x290] sm:$0xff]  ;;  %v10657_v17 = vld [vmem:[%s16804_s16 + $0x478] sm:$0xff] }
 0xc3d   : > { %8495 = vmatpush.msra.mxu1 %v8457_v10  ;;  %8517 = vmatpush.msrb.mxu2 %v8460_v8  ;;  %v8526_v10 = vld [vmem:[%s16804_s16] sm:$0xff]  ;;  %v10625_v8 = vld [vmem:[%s16804_s16 + $0x378] sm:$0xff] }
 0xc3e   : > { %10541 = vmatmul.msk.f32.vlgmr.msra.gmra.mxu1 %vm8467_vm5, %v8465_v33  ;;  %8740 = vmatpush.msra.mxu0 %v10603_v45  ;;  %v10594_v45 = vld [vmem:[%s16804_s16 + $0x280] sm:$0xff] }
 0xc3f   : > { %8518 = vmatpush.msrb.mxu2 %v8458_v36  ;;  %8637 = vmatpush.msrb.mxu1 %v8541_v35  ;;  %v8542_v36 = vld [vmem:[%s16804_s16 + $0x80] sm:$0xff]  ;;  %v10620_v35 = vld [vmem:[%s16804_s16 + $0x350] sm:$0xff] }
 0xc40   : > { %10544 = vmatmul.msk.f32.vlgmr.msrb.gmra.mxu2 %vm8467_vm5, %v8465_v33  ;;  %8741 = vmatpush.msra.mxu0 %v10602_v50  ;;  %v10624_v33 = vld [vmem:[%s16804_s16 + $0x370] sm:$0xff] }
 0xc41   : > { %8657 = vmatpush.msra.mxu2 %v8557_v18  ;;  %8638 = vmatpush.msrb.mxu1 %v8540_v38  ;;  %v10621_v18 = vld [vmem:[%s16804_s16 + $0x358] sm:$0xff]  ;;  %v10618_v38 = vld [vmem:[%s16804_s16 + $0x340] sm:$0xff] }
 0xc42   : > { %8742 = vmatpush.msra.mxu0 %v10601_v63  ;;  %8724 = vmatpush.msrb.mxu3 %v10583_v1  ;;  %v10656_v63 = vld [vmem:[%s16804_s16 + $0x470] sm:$0xff]  ;;  %v10655_v1 = vld [vmem:[%s16804_s16 + $0x468] sm:$0xff] }
 0xc43   : > { %8658 = vmatpush.msra.mxu2 %v8556_v30  ;;  %8639 = vmatpush.msrb.mxu1 %v8539_v37  ;;  %v10619_v30 = vld [vmem:[%s16804_s16 + $0x348] sm:$0xff]  ;;  %v10616_v37 = vld [vmem:[%s16804_s16 + $0x330] sm:$0xff] }
 0xc44   : > { %8743 = vmatpush.msra.mxu0 %v10600_v25  ;;  %8725 = vmatpush.msrb.mxu3 %v10582_v15  ;;  %v10654_v25 = vld [vmem:[%s16804_s16 + $0x460] sm:$0xff] }
 0xc45   : > { %8659 = vmatpush.msra.mxu2 %v8555_v26  ;;  %8640 = vmatpush.msrb.mxu1 %v8538_v55  ;;  %v10617_v26 = vld [vmem:[%s16804_s16 + $0x338] sm:$0xff]  ;;  %v10614_v55 = vld [vmem:[%s16804_s16 + $0x320] sm:$0xff] }
 0xc46   : > { %8744 = vmatpush.msra.mxu0 %v10599_v54  ;;  %8726 = vmatpush.msrb.mxu3 %v10581_v19  ;;  %v10653_v19 = vld [vmem:[%s16804_s16 + $0x458] sm:$0xff] }
 0xc47   : > { %8660 = vmatpush.msra.mxu2 %v8554_v53  ;;  %8641 = vmatpush.msrb.mxu1 %v8537_v3  ;;  %v10615_v53 = vld [vmem:[%s16804_s16 + $0x328] sm:$0xff]  ;;  %v10612_v3 = vld [vmem:[%s16804_s16 + $0x310] sm:$0xff] }
 0xc48   : > { %8727 = vmatpush.msrb.mxu3 %v10580_v29  ;;  %10542 = vmatmul.msk.f32.gmra.mxu1 %vm8467_vm5, %v8466_v5  ;;  %v10704_v29 = vld [vmem:[%s16804_s16 + $0x5f0] sm:$0xff] }
 0xc49   : > { %8661 = vmatpush.msra.mxu2 %v8553_v51  ;;  %8642 = vmatpush.msrb.mxu1 %v8536_v60  ;;  %v10613_v51 = vld [vmem:[%s16804_s16 + $0x318] sm:$0xff] }
 0xc4a   : > { %10545 = vmatmul.msk.f32.gmra.mxu2 %vm8467_vm5, %v8466_v5  ;;  %8728 = vmatpush.msrb.mxu3 %v10579_v39  ;;  %v10597_v60 = vld [vmem:[%s16804_s16 + $0x298] sm:$0xff]  ;;  %v10684_v5 = vld [vmem:[%s16804_s16 + $0x550] sm:$0xff] }
 0xc4b   : > { %8662 = vmatpush.msra.mxu2 %v8552_v14  ;;  %8643 = vmatpush.msrb.mxu1 %v8535_v48  ;;  %v10598_v14 = vld [vmem:[%s16804_s16 + $0x2a0] sm:$0xff]  ;;  %v10696_v39 = vld [vmem:[%s16804_s16 + $0x5b0] sm:$0xff] }
 0xc4c   : > { %8745 = vmatpush.msra.mxu0 %v10598_v14  ;;  %8729 = vmatpush.msrb.mxu3 %v10578_v32  ;;  %v10610_v48 = vld [vmem:[%s16804_s16 + $0x300] sm:$0xff]  ;;  %v10664_v32 = vld [vmem:[%s16804_s16 + $0x4b0] sm:$0xff] }
 0xc4d   : > { %8663 = vmatpush.msra.mxu2 %v8551_v42  ;;  %8644 = vmatpush.msrb.mxu1 %v8534_v21  ;;  %v10611_v42 = vld [vmem:[%s16804_s16 + $0x308] sm:$0xff]  ;;  %v10678_v14 = vld [vmem:[%s16804_s16 + $0x520] sm:$0xff] }
 0xc4e   : > { %8746 = vmatpush.msra.mxu0 %v10597_v60  ;;  %v10595_v21 = vld [vmem:[%s16804_s16 + $0x288] sm:$0xff]  ;;  %v10644_v60 = vld [vmem:[%s16804_s16 + $0x410] sm:$0xff] }
 0xc4f   : > { %8664 = vmatpush.msra.mxu2 %v8550_v13  ;;  %8645 = vmatpush.msrb.mxu1 %v8533_v22  ;;  %v10629_v13 = vld [vmem:[%s16804_s16 + $0x398] sm:$0xff] }
 0xc50   : > { %8747 = vmatpush.msra.mxu0 %v10596_v44  ;;  %v10689_v22 = vld [vmem:[%s16804_s16 + $0x578] sm:$0xff]  ;;  %v10694_v44 = vld [vmem:[%s16804_s16 + $0x5a0] sm:$0xff] }
 0xc51   : > { %8665 = vmatpush.msra.mxu2 %v8549_v12  ;;  %8646 = vmatpush.msrb.mxu1 %v8532_v6  ;;  %v10627_v12 = vld [vmem:[%s16804_s16 + $0x388] sm:$0xff]  ;;  %v10688_v6 = vld [vmem:[%s16804_s16 + $0x570] sm:$0xff] }
 0xc52   : > { %8748 = vmatpush.msra.mxu0 %v10595_v21  ;;  %v10642_v21 = vld [vmem:[%s16804_s16 + $0x400] sm:$0xff] }
 0xc53   : > { %8666 = vmatpush.msra.mxu2 %v8548_v27  ;;  %8647 = vmatpush.msrb.mxu1 %v8531_v43  ;;  %v10686_v43 = vld [vmem:[%s16804_s16 + $0x560] sm:$0xff] }
 0xc54   : > { %8749 = vmatpush.msra.mxu0 %v10594_v45  ;;  %v10721_v45 = vld [vmem:[%s16804_s16 + $0x678] sm:$0xff] }
 0xc55   : > { %8667 = vmatpush.msra.mxu2 %v8547_v23  ;;  %8648 = vmatpush.msrb.mxu1 %v8530_v20  ;;  %v10687_v23 = vld [vmem:[%s16804_s16 + $0x568] sm:$0xff] }
 0xc57   : > { %8668 = vmatpush.msra.mxu2 %v8546_v31  ;;  %8649 = vmatpush.msrb.mxu1 %v8529_v46  ;;  %v10705_v31 = vld [vmem:[%s16804_s16 + $0x5f8] sm:$0xff]  ;;  %v10672_v46 = vld [vmem:[%s16804_s16 + $0x4f0] sm:$0xff] }
 0xc59   : > { %8669 = vmatpush.msra.mxu2 %v8545_v2  ;;  %8650 = vmatpush.msrb.mxu1 %v8528_v56  ;;  %v10673_v2 = vld [vmem:[%s16804_s16 + $0x4f8] sm:$0xff]  ;;  %v10652_v56 = vld [vmem:[%s16804_s16 + $0x450] sm:$0xff] }
 0xc5b   : > { %8670 = vmatpush.msra.mxu2 %v8544_v9  ;;  %8651 = vmatpush.msrb.mxu1 %v8527_v24  ;;  %v10703_v24 = vld [vmem:[%s16804_s16 + $0x5e8] sm:$0xff] }
 0xc5d   : > { %8671 = vmatpush.msra.mxu2 %v8543_v58  ;;  %8652 = vmatpush.msrb.mxu1 %v8526_v10  ;;  %v10685_v58 = vld [vmem:[%s16804_s16 + $0x558] sm:$0xff]  ;;  %v10671_v10 = vld [vmem:[%s16804_s16 + $0x4e8] sm:$0xff] }
 0xc5f   : > { %8792 = vmatpush.msra.mxu1 %v10625_v8  ;;  %8672 = vmatpush.msra.mxu2 %v8542_v36  ;;  %v10651_v8 = vld [vmem:[%s16804_s16 + $0x448] sm:$0xff]  ;;  %v10650_v36 = vld [vmem:[%s16804_s16 + $0x440] sm:$0xff] }
 0xc61   : > { %8793 = vmatpush.msra.mxu1 %v10624_v33  ;;  %8812 = vmatpush.msrb.mxu2 %v10641_v41  ;;  %v10702_v33 = vld [vmem:[%s16804_s16 + $0x5e0] sm:$0xff]  ;;  %v10701_v41 = vld [vmem:[%s16804_s16 + $0x5d8] sm:$0xff] }
 0xc63   : > { %8794 = vmatpush.msra.mxu1 %v10623_v62  ;;  %8813 = vmatpush.msrb.mxu2 %v10640_v16  ;;  %v10683_v62 = vld [vmem:[%s16804_s16 + $0x548] sm:$0xff]  ;;  %v10649_v16 = vld [vmem:[%s16804_s16 + $0x438] sm:$0xff] }
 0xc65   : > { %8795 = vmatpush.msra.mxu1 %v10622_v61  ;;  %8814 = vmatpush.msrb.mxu2 %v10639_v49  ;;  %v10670_v61 = vld [vmem:[%s16804_s16 + $0x4e0] sm:$0xff]  ;;  %v10700_v49 = vld [vmem:[%s16804_s16 + $0x5d0] sm:$0xff] }
 0xc67   : > { %8796 = vmatpush.msra.mxu1 %v10621_v18  ;;  %8815 = vmatpush.msrb.mxu2 %v10638_v57  ;;  %v10669_v18 = vld [vmem:[%s16804_s16 + $0x4d8] sm:$0xff]  ;;  %v10668_v57 = vld [vmem:[%s16804_s16 + $0x4d0] sm:$0xff] }
 0xc69   : > { %8797 = vmatpush.msra.mxu1 %v10620_v35  ;;  %8816 = vmatpush.msrb.mxu2 %v10637_v0  ;;  %v10699_v0 = vld [vmem:[%s16804_s16 + $0x5c8] sm:$0xff] }
 0xc6b   : > { %8798 = vmatpush.msra.mxu1 %v10619_v30  ;;  %8817 = vmatpush.msrb.mxu2 %v10636_v40  ;;  %v10682_v30 = vld [vmem:[%s16804_s16 + $0x540] sm:$0xff]  ;;  %v10667_v40 = vld [vmem:[%s16804_s16 + $0x4c8] sm:$0xff] }
 0xc6d   : > { %8799 = vmatpush.msra.mxu1 %v10618_v38  ;;  %8818 = vmatpush.msrb.mxu2 %v10635_v7  ;;  %v10648_v38 = vld [vmem:[%s16804_s16 + $0x430] sm:$0xff]  ;;  %v10698_v7 = vld [vmem:[%s16804_s16 + $0x5c0] sm:$0xff] }
 0xc6f   : > { %8800 = vmatpush.msra.mxu1 %v10617_v26  ;;  %8819 = vmatpush.msrb.mxu2 %v10634_v28  ;;  %v10681_v26 = vld [vmem:[%s16804_s16 + $0x538] sm:$0xff]  ;;  %v10666_v28 = vld [vmem:[%s16804_s16 + $0x4c0] sm:$0xff] }
 0xc71   : > { %8801 = vmatpush.msra.mxu1 %v10616_v37  ;;  %8820 = vmatpush.msrb.mxu2 %v10633_v47  ;;  %v10647_v37 = vld [vmem:[%s16804_s16 + $0x428] sm:$0xff]  ;;  %v10697_v47 = vld [vmem:[%s16804_s16 + $0x5b8] sm:$0xff] }
 0xc73   : > { %8802 = vmatpush.msra.mxu1 %v10615_v53  ;;  %8821 = vmatpush.msrb.mxu2 %v10632_v52  ;;  %v10680_v53 = vld [vmem:[%s16804_s16 + $0x530] sm:$0xff]  ;;  %v10665_v52 = vld [vmem:[%s16804_s16 + $0x4b8] sm:$0xff] }
 0xc75   : > { %8803 = vmatpush.msra.mxu1 %v10614_v55  ;;  %8822 = vmatpush.msrb.mxu2 %v10631_v4  ;;  %v10646_v55 = vld [vmem:[%s16804_s16 + $0x420] sm:$0xff]  ;;  %v10695_v4 = vld [vmem:[%s16804_s16 + $0x5a8] sm:$0xff] }
 0xc77   : > { %8804 = vmatpush.msra.mxu1 %v10613_v51  ;;  %8823 = vmatpush.msrb.mxu2 %v10630_v34  ;;  %v10679_v51 = vld [vmem:[%s16804_s16 + $0x528] sm:$0xff] }
 0xc78   : > { %v10663_v34 = vld [vmem:[%s16804_s16 + $0x4a8] sm:$0xff] }
 0xc79   : > { %8805 = vmatpush.msra.mxu1 %v10612_v3  ;;  %8824 = vmatpush.msrb.mxu2 %v10629_v13  ;;  %v10645_v3 = vld [vmem:[%s16804_s16 + $0x418] sm:$0xff]  ;;  %v10676_v13 = vld [vmem:[%s16804_s16 + $0x510] sm:$0xff] }
 0xc7b   : > { %8806 = vmatpush.msra.mxu1 %v10611_v42  ;;  %8825 = vmatpush.msrb.mxu2 %v10628_v59  ;;  %v10677_v42 = vld [vmem:[%s16804_s16 + $0x518] sm:$0xff]  ;;  %v10662_v59 = vld [vmem:[%s16804_s16 + $0x4a0] sm:$0xff] }
 0xc7d   : > { %8807 = vmatpush.msra.mxu1 %v10610_v48  ;;  %8826 = vmatpush.msrb.mxu2 %v10627_v12  ;;  %v10643_v48 = vld [vmem:[%s16804_s16 + $0x408] sm:$0xff]  ;;  %v10693_v12 = vld [vmem:[%s16804_s16 + $0x598] sm:$0xff] }
 0xc7f   : > { %8827 = vmatpush.msrb.mxu2 %v10626_v11  ;;  %v10661_v11 = vld [vmem:[%s16804_s16 + $0x498] sm:$0xff] }
 0xcbb   : > { %v15787_v50 = vpop.f32.mrf.mxu1 }
 0xcbc   : > { %v8593_v27 = vrot.slane %v15787_v50, 1  ;;  %8653 = vmatmul.f32.vlgmr.msrb.gmra.mxu1 %v15787_v50  ;;  %v8788_v15 = vrot.slane %v15787_v50, 3  ;;  %v8710_v9 = vrot.slane %v15787_v50, 2 }
 0xcbd   : > { %8948 = vmatpush.msrb.mxu1 %v10689_v22  ;;  %v10720_v22 = vld [vmem:[%s16804_s16 + $0x670] sm:$0xff] }
 0xcbe   : > { %8613 = vmatmul.f32.vlgmr.msra.gmra.mxu3 %v8593_v27  ;;  %v10692_v27 = vld [vmem:[%s16804_s16 + $0x590] sm:$0xff] }
 0xcbf   : > { %8870 = vmatpush.msra.mxu3 %v10657_v17  ;;  %8949 = vmatpush.msrb.mxu1 %v10688_v6  ;;  %v10660_v6 = vld [vmem:[%s16804_s16 + $0x490] sm:$0xff] }
 0xcc1   : > { %8871 = vmatpush.msra.mxu3 %v10656_v63  ;;  %8950 = vmatpush.msrb.mxu1 %v10687_v23  ;;  %v10719_v63 = vld [vmem:[%s16804_s16 + $0x668] sm:$0xff] }
 0xcc2   : > { %v10691_v23 = vld [vmem:[%s16804_s16 + $0x588] sm:$0xff] }
 0xcc3   : > { %v15816_v20 = vpop.f32.mrf.mxu2  ;;  %8872 = vmatpush.msra.mxu3 %v10655_v1  ;;  %8951 = vmatpush.msrb.mxu1 %v10686_v43  ;;  %v8866_v1 = vrot.slane %v15787_v50, 4  ;;  %v10659_v43 = vld [vmem:[%s16804_s16 + $0x488] sm:$0xff] }
 0xcc4   : > { %v8594_v54 = vrot.slane %v15816_v20, 1  ;;  %8673 = vmatmul.f32.vlgmr.msra.gmra.mxu2 %v15816_v20  ;;  %8808 = vmatmul.f32.vlgmr.msra.gmra.mxu1 %v8788_v15  ;;  %v8711_v35 = vrot.slane %v15816_v20, 2  ;;  %v8789_v17 = vrot.slane %v15816_v20, 3  ;;  %v10690_v15 = vld [vmem:[%s16804_s16 + $0x580] sm:$0xff] }
 0xcc5   : > { %8873 = vmatpush.msra.mxu3 %v10654_v25  ;;  %8968 = vmatpush.msra.mxu2 %v10705_v31  ;;  %v10675_v25 = vld [vmem:[%s16804_s16 + $0x508] sm:$0xff]  ;;  %v10718_v31 = vld [vmem:[%s16804_s16 + $0x660] sm:$0xff] }
 0xcc6   : > { %8633 = vmatmul.f32.vlgmr.msrb.gmra.mxu0 %v8594_v54  ;;  %8730 = vmatmul.f32.vlgmr.msrb.gmra.mxu3 %v8710_v9  ;;  %v10658_v54 = vld [vmem:[%s16804_s16 + $0x480] sm:$0xff]  ;;  %v10717_v9 = vld [vmem:[%s16804_s16 + $0x658] sm:$0xff] }
 0xcc7   : > { %8890 = vmatpush.msrb.mxu0 %v10673_v2  ;;  %8874 = vmatpush.msra.mxu3 %v10653_v19  ;;  %v10769_v2 = vld [vmem:[%s16804_s16 + $0x7f8] sm:$0xff] }
 0xcc8   : > { %8969 = vmatpush.msra.mxu2 %v10704_v29  ;;  %8952 = vmatpush.msrb.mxu1 %v10685_v58  ;;  %v10737_v19 = vld [vmem:[%s16804_s16 + $0x6f8] sm:$0xff]  ;;  %v10768_v29 = vld [vmem:[%s16804_s16 + $0x7f0] sm:$0xff]  ;;  %v10674_v58 = vld [vmem:[%s16804_s16 + $0x500] sm:$0xff] }
 0xcc9   : > { %8891 = vmatpush.msrb.mxu0 %v10672_v46  ;;  %8875 = vmatpush.msra.mxu3 %v10652_v56  ;;  %v10736_v46 = vld [vmem:[%s16804_s16 + $0x6f0] sm:$0xff] }
 0xcca   : > { %8970 = vmatpush.msra.mxu2 %v10703_v24  ;;  %8953 = vmatpush.msrb.mxu1 %v10684_v5  ;;  %v10716_v56 = vld [vmem:[%s16804_s16 + $0x650] sm:$0xff]  ;;  %v10767_v24 = vld [vmem:[%s16804_s16 + $0x7e8] sm:$0xff]  ;;  %v10753_v5 = vld [vmem:[%s16804_s16 + $0x778] sm:$0xff] }
 0xccb   : > { %8892 = vmatpush.msrb.mxu0 %v10671_v10  ;;  %8876 = vmatpush.msra.mxu3 %v10651_v8  ;;  %v10735_v10 = vld [vmem:[%s16804_s16 + $0x6e8] sm:$0xff] }
 0xccc   : > { %8971 = vmatpush.msra.mxu2 %v10702_v33  ;;  %8954 = vmatpush.msrb.mxu1 %v10683_v62  ;;  %v10715_v8 = vld [vmem:[%s16804_s16 + $0x648] sm:$0xff]  ;;  %v10766_v33 = vld [vmem:[%s16804_s16 + $0x7e0] sm:$0xff] }
 0xccd   : > { %8893 = vmatpush.msrb.mxu0 %v10670_v61  ;;  %8877 = vmatpush.msra.mxu3 %v10650_v36  ;;  %v10734_v62 = vld [vmem:[%s16804_s16 + $0x6e0] sm:$0xff]  ;;  %v8867_v36 = vrot.slane %v15816_v20, 4 }
 0xcce   : > { %8750 = vmatmul.f32.vlgmr.msra.gmra.mxu0 %v8711_v35  ;;  %8972 = vmatpush.msra.mxu2 %v10701_v41  ;;  %v10714_v61 = vld [vmem:[%s16804_s16 + $0x640] sm:$0xff]  ;;  %v10752_v41 = vld [vmem:[%s16804_s16 + $0x770] sm:$0xff]  ;;  %v10713_v35 = vld [vmem:[%s16804_s16 + $0x638] sm:$0xff] }
 0xccf   : > { %8894 = vmatpush.msrb.mxu0 %v10669_v18  ;;  %8878 = vmatpush.msra.mxu3 %v10649_v16  ;;  %v10765_v18 = vld [vmem:[%s16804_s16 + $0x7d8] sm:$0xff] }
 0xcd0   : > { %8973 = vmatpush.msra.mxu2 %v10700_v49  ;;  %8955 = vmatpush.msrb.mxu1 %v10682_v30  ;;  %v10733_v16 = vld [vmem:[%s16804_s16 + $0x6d8] sm:$0xff]  ;;  %v10751_v49 = vld [vmem:[%s16804_s16 + $0x768] sm:$0xff]  ;;  %v10764_v30 = vld [vmem:[%s16804_s16 + $0x7d0] sm:$0xff] }
 0xcd1   : > { %8895 = vmatpush.msrb.mxu0 %v10668_v57  ;;  %8879 = vmatpush.msra.mxu3 %v10648_v38  ;;  %v10732_v57 = vld [vmem:[%s16804_s16 + $0x6d0] sm:$0xff] }
 0xcd2   : > { %8974 = vmatpush.msra.mxu2 %v10699_v0  ;;  %8956 = vmatpush.msrb.mxu1 %v10681_v26  ;;  %v10712_v38 = vld [vmem:[%s16804_s16 + $0x630] sm:$0xff]  ;;  %v10750_v0 = vld [vmem:[%s16804_s16 + $0x760] sm:$0xff]  ;;  %v10763_v26 = vld [vmem:[%s16804_s16 + $0x7c8] sm:$0xff] }
 0xcd3   : > { %8896 = vmatpush.msrb.mxu0 %v10667_v40  ;;  %8880 = vmatpush.msra.mxu3 %v10647_v37  ;;  %v10731_v40 = vld [vmem:[%s16804_s16 + $0x6c8] sm:$0xff] }
 0xcd4   : > { %8975 = vmatpush.msra.mxu2 %v10698_v7  ;;  %8957 = vmatpush.msrb.mxu1 %v10680_v53  ;;  %v10711_v37 = vld [vmem:[%s16804_s16 + $0x628] sm:$0xff]  ;;  %v10749_v7 = vld [vmem:[%s16804_s16 + $0x758] sm:$0xff]  ;;  %v10762_v53 = vld [vmem:[%s16804_s16 + $0x7c0] sm:$0xff] }
 0xcd5   : > { %8897 = vmatpush.msrb.mxu0 %v10666_v28  ;;  %8881 = vmatpush.msra.mxu3 %v10646_v55  ;;  %v10730_v28 = vld [vmem:[%s16804_s16 + $0x6c0] sm:$0xff] }
 0xcd6   : > { %8976 = vmatpush.msra.mxu2 %v10697_v47  ;;  %8958 = vmatpush.msrb.mxu1 %v10679_v51  ;;  %v10710_v55 = vld [vmem:[%s16804_s16 + $0x620] sm:$0xff]  ;;  %v10748_v47 = vld [vmem:[%s16804_s16 + $0x750] sm:$0xff]  ;;  %v10761_v51 = vld [vmem:[%s16804_s16 + $0x7b8] sm:$0xff] }
 0xcd7   : > { %8898 = vmatpush.msrb.mxu0 %v10665_v52  ;;  %8882 = vmatpush.msra.mxu3 %v10645_v3  ;;  %v10729_v52 = vld [vmem:[%s16804_s16 + $0x6b8] sm:$0xff] }
 0xcd8   : > { %8977 = vmatpush.msra.mxu2 %v10696_v39  ;;  %8959 = vmatpush.msrb.mxu1 %v10678_v14  ;;  %v10709_v3 = vld [vmem:[%s16804_s16 + $0x618] sm:$0xff]  ;;  %v10747_v39 = vld [vmem:[%s16804_s16 + $0x748] sm:$0xff]  ;;  %v10760_v14 = vld [vmem:[%s16804_s16 + $0x7b0] sm:$0xff] }
 0xcd9   : > { %8899 = vmatpush.msrb.mxu0 %v10664_v32  ;;  %8883 = vmatpush.msra.mxu3 %v10644_v60  ;;  %v10728_v32 = vld [vmem:[%s16804_s16 + $0x6b0] sm:$0xff] }
 0xcda   : > { %8978 = vmatpush.msra.mxu2 %v10695_v4  ;;  %8960 = vmatpush.msrb.mxu1 %v10677_v42  ;;  %v10708_v60 = vld [vmem:[%s16804_s16 + $0x610] sm:$0xff]  ;;  %v10746_v4 = vld [vmem:[%s16804_s16 + $0x740] sm:$0xff]  ;;  %v10759_v42 = vld [vmem:[%s16804_s16 + $0x7a8] sm:$0xff] }
 0xcdb   : > { %8900 = vmatpush.msrb.mxu0 %v10663_v34  ;;  %8884 = vmatpush.msra.mxu3 %v10643_v48  ;;  %v10727_v34 = vld [vmem:[%s16804_s16 + $0x6a8] sm:$0xff] }
 0xcdc   : > { %8979 = vmatpush.msra.mxu2 %v10694_v44  ;;  %8961 = vmatpush.msrb.mxu1 %v10676_v13  ;;  %v10707_v48 = vld [vmem:[%s16804_s16 + $0x608] sm:$0xff]  ;;  %v10745_v44 = vld [vmem:[%s16804_s16 + $0x738] sm:$0xff]  ;;  %v10758_v13 = vld [vmem:[%s16804_s16 + $0x7a0] sm:$0xff] }
 0xcdd   : > { %8901 = vmatpush.msrb.mxu0 %v10662_v59  ;;  %8885 = vmatpush.msra.mxu3 %v10642_v21  ;;  %v10726_v59 = vld [vmem:[%s16804_s16 + $0x6a0] sm:$0xff] }
 0xcde   : > { %8980 = vmatpush.msra.mxu2 %v10693_v12  ;;  %8886 = vmatmul.f32.vlgmr.msra.gmra.mxu3 %v8866_v1  ;;  %v10706_v21 = vld [vmem:[%s16804_s16 + $0x600] sm:$0xff]  ;;  %v10744_v12 = vld [vmem:[%s16804_s16 + $0x730] sm:$0xff] }
 0xcdf   : > { %9026 = vmatpush.msrb.mxu3 %v10721_v45  ;;  %8902 = vmatpush.msrb.mxu0 %v10661_v11  ;;  %v10785_v45 = vld [vmem:[%s16804_s16 + $0x878] sm:$0xff]  ;;  %v10742_v1 = vld [vmem:[%s16804_s16 + $0x720] sm:$0xff] }
 0xce0   : > { %8828 = vmatmul.f32.vlgmr.msrb.gmra.mxu2 %v8789_v17  ;;  %8962 = vmatpush.msrb.mxu1 %v10675_v25  ;;  %v10725_v11 = vld [vmem:[%s16804_s16 + $0x698] sm:$0xff]  ;;  %v10743_v17 = vld [vmem:[%s16804_s16 + $0x728] sm:$0xff] }
 0xce1   : > { %9027 = vmatpush.msrb.mxu3 %v10720_v22  ;;  %8981 = vmatpush.msra.mxu2 %v10692_v27  ;;  %v10757_v22 = vld [vmem:[%s16804_s16 + $0x798] sm:$0xff]  ;;  %v10784_v27 = vld [vmem:[%s16804_s16 + $0x870] sm:$0xff]  ;;  %v10755_v25 = vld [vmem:[%s16804_s16 + $0x788] sm:$0xff] }
 0xce2   : > { %8903 = vmatpush.msrb.mxu0 %v10660_v6  ;;  %8963 = vmatpush.msrb.mxu1 %v10674_v58  ;;  %v10724_v6 = vld [vmem:[%s16804_s16 + $0x690] sm:$0xff] }
 0xce3   : > { %9028 = vmatpush.msrb.mxu3 %v10719_v63  ;;  %8982 = vmatpush.msra.mxu2 %v10691_v23  ;;  %v10756_v63 = vld [vmem:[%s16804_s16 + $0x790] sm:$0xff]  ;;  %v10783_v23 = vld [vmem:[%s16804_s16 + $0x868] sm:$0xff] }
 0xce4   : > { %8904 = vmatpush.msrb.mxu0 %v10659_v43  ;;  %9104 = vmatpush.msra.mxu1 %v10753_v5  ;;  %v10723_v43 = vld [vmem:[%s16804_s16 + $0x688] sm:$0xff]  ;;  %v10800_v58 = vld [vmem:[%s16804_s16 + $0x8f0] sm:$0xff] }
 0xce5   : > { %9029 = vmatpush.msrb.mxu3 %v10718_v31  ;;  %8983 = vmatpush.msra.mxu2 %v10690_v15  ;;  %v10782_v31 = vld [vmem:[%s16804_s16 + $0x860] sm:$0xff]  ;;  %v10741_v15 = vld [vmem:[%s16804_s16 + $0x718] sm:$0xff]  ;;  %v10799_v5 = vld [vmem:[%s16804_s16 + $0x8e8] sm:$0xff] }
 0xce6   : > { %8905 = vmatpush.msrb.mxu0 %v10658_v54  ;;  %9105 = vmatpush.msra.mxu1 %v10752_v41  ;;  %v10722_v54 = vld [vmem:[%s16804_s16 + $0x680] sm:$0xff]  ;;  %v10831_v41 = vld [vmem:[%s16804_s16 + $0x9e8] sm:$0xff] }
 0xce7   : > { %9124 = vmatpush.msrb.mxu2 %v10769_v2  ;;  %9030 = vmatpush.msrb.mxu3 %v10717_v9  ;;  %v10754_v2 = vld [vmem:[%s16804_s16 + $0x780] sm:$0xff]  ;;  %v10781_v9 = vld [vmem:[%s16804_s16 + $0x858] sm:$0xff] }
 0xce8   : > { %9046 = vmatpush.msra.mxu0 %v10737_v19  ;;  %9106 = vmatpush.msra.mxu1 %v10751_v49  ;;  %v10801_v19 = vld [vmem:[%s16804_s16 + $0x8f8] sm:$0xff]  ;;  %v10830_v49 = vld [vmem:[%s16804_s16 + $0x9e0] sm:$0xff] }
 0xce9   : > { %9125 = vmatpush.msrb.mxu2 %v10768_v29  ;;  %9031 = vmatpush.msrb.mxu3 %v10716_v56  ;;  %v10740_v29 = vld [vmem:[%s16804_s16 + $0x710] sm:$0xff]  ;;  %v8945_v56 = vrot.slane %v15816_v20, 5 }
 0xcea   : > { %9047 = vmatpush.msra.mxu0 %v10736_v46  ;;  %9107 = vmatpush.msra.mxu1 %v10750_v0  ;;  %v10780_v46 = vld [vmem:[%s16804_s16 + $0x850] sm:$0xff]  ;;  %v10817_v0 = vld [vmem:[%s16804_s16 + $0x978] sm:$0xff] }
 0xceb   : > { %9126 = vmatpush.msrb.mxu2 %v10767_v24  ;;  %9032 = vmatpush.msrb.mxu3 %v10715_v8  ;;  %v10833_v24 = vld [vmem:[%s16804_s16 + $0x9f8] sm:$0xff]  ;;  %v9022_v8 = vrot.slane %v15787_v50, 6 }
 0xcec   : > { %9048 = vmatpush.msra.mxu0 %v10735_v10  ;;  %9108 = vmatpush.msra.mxu1 %v10749_v7  ;;  %v10779_v10 = vld [vmem:[%s16804_s16 + $0x848] sm:$0xff]  ;;  %v10816_v7 = vld [vmem:[%s16804_s16 + $0x970] sm:$0xff] }
 0xced   : > { %9127 = vmatpush.msrb.mxu2 %v10766_v33  ;;  %8906 = vmatmul.f32.vlgmr.msrb.gmra.mxu0 %v8867_v36  ;;  %v10832_v33 = vld [vmem:[%s16804_s16 + $0x9f0] sm:$0xff]  ;;  %v10778_v36 = vld [vmem:[%s16804_s16 + $0x840] sm:$0xff] }
 0xcee   : > { %9049 = vmatpush.msra.mxu0 %v10734_v62  ;;  %9033 = vmatpush.msrb.mxu3 %v10714_v61  ;;  %v10739_v62 = vld [vmem:[%s16804_s16 + $0x708] sm:$0xff]  ;;  %v10798_v61 = vld [vmem:[%s16804_s16 + $0x8e0] sm:$0xff] }
 0xcef   : > { %9128 = vmatpush.msrb.mxu2 %v10765_v18  ;;  %9109 = vmatpush.msra.mxu1 %v10748_v47  ;;  %v10738_v18 = vld [vmem:[%s16804_s16 + $0x700] sm:$0xff]  ;;  %v10815_v47 = vld [vmem:[%s16804_s16 + $0x968] sm:$0xff] }
 0xcf0   : > { %9050 = vmatpush.msra.mxu0 %v10733_v16  ;;  %9034 = vmatpush.msrb.mxu3 %v10713_v35  ;;  %v10797_v16 = vld [vmem:[%s16804_s16 + $0x8d8] sm:$0xff] }
 0xcf1   : > { %9129 = vmatpush.msrb.mxu2 %v10764_v30  ;;  %9110 = vmatpush.msra.mxu1 %v10747_v39  ;;  %v10777_v35 = vld [vmem:[%s16804_s16 + $0x838] sm:$0xff]  ;;  %v10796_v30 = vld [vmem:[%s16804_s16 + $0x8d0] sm:$0xff]  ;;  %v10814_v39 = vld [vmem:[%s16804_s16 + $0x960] sm:$0xff] }
 0xcf2   : > { %9051 = vmatpush.msra.mxu0 %v10732_v57  ;;  %9035 = vmatpush.msrb.mxu3 %v10712_v38  ;;  %v10776_v57 = vld [vmem:[%s16804_s16 + $0x830] sm:$0xff]  ;;  %v8944_v38 = vrot.slane %v15787_v50, 5 }
 0xcf3   : > { %9130 = vmatpush.msrb.mxu2 %v10763_v26  ;;  %9111 = vmatpush.msra.mxu1 %v10746_v4  ;;  %v10795_v26 = vld [vmem:[%s16804_s16 + $0x8c8] sm:$0xff]  ;;  %v10813_v4 = vld [vmem:[%s16804_s16 + $0x958] sm:$0xff] }
 0xcf4   : > { %9052 = vmatpush.msra.mxu0 %v10731_v40  ;;  %9036 = vmatpush.msrb.mxu3 %v10711_v37  ;;  %v10775_v40 = vld [vmem:[%s16804_s16 + $0x828] sm:$0xff]  ;;  %v9023_v37 = vrot.slane %v15816_v20, 6 }
 0xcf5   : > { %9131 = vmatpush.msrb.mxu2 %v10762_v53  ;;  %9112 = vmatpush.msra.mxu1 %v10745_v44  ;;  %v10829_v53 = vld [vmem:[%s16804_s16 + $0x9d8] sm:$0xff]  ;;  %v10812_v44 = vld [vmem:[%s16804_s16 + $0x950] sm:$0xff] }
 0xcf6   : > { %9053 = vmatpush.msra.mxu0 %v10730_v28  ;;  %9037 = vmatpush.msrb.mxu3 %v10710_v55  ;;  %v10794_v28 = vld [vmem:[%s16804_s16 + $0x8c0] sm:$0xff] }
 0xcf7   : > { %9132 = vmatpush.msrb.mxu2 %v10761_v51  ;;  %9113 = vmatpush.msra.mxu1 %v10744_v12  ;;  %v10774_v55 = vld [vmem:[%s16804_s16 + $0x820] sm:$0xff]  ;;  %v10828_v51 = vld [vmem:[%s16804_s16 + $0x9d0] sm:$0xff]  ;;  %v10811_v12 = vld [vmem:[%s16804_s16 + $0x948] sm:$0xff] }
 0xcf8   : > { %9054 = vmatpush.msra.mxu0 %v10729_v52  ;;  %9038 = vmatpush.msrb.mxu3 %v10709_v3  ;;  %v10793_v52 = vld [vmem:[%s16804_s16 + $0x8b8] sm:$0xff] }
 0xcf9   : > { %9133 = vmatpush.msrb.mxu2 %v10760_v14  ;;  %9114 = vmatpush.msra.mxu1 %v10743_v17  ;;  %v10773_v3 = vld [vmem:[%s16804_s16 + $0x818] sm:$0xff]  ;;  %v10827_v14 = vld [vmem:[%s16804_s16 + $0x9c8] sm:$0xff]  ;;  %v10810_v17 = vld [vmem:[%s16804_s16 + $0x940] sm:$0xff] }
 0xcfa   : > { %9055 = vmatpush.msra.mxu0 %v10728_v32  ;;  %9039 = vmatpush.msrb.mxu3 %v10708_v60  ;;  %v10792_v32 = vld [vmem:[%s16804_s16 + $0x8b0] sm:$0xff] }
 0xcfb   : > { %9134 = vmatpush.msrb.mxu2 %v10759_v42  ;;  %9115 = vmatpush.msra.mxu1 %v10742_v1  ;;  %v10772_v60 = vld [vmem:[%s16804_s16 + $0x810] sm:$0xff]  ;;  %v10826_v42 = vld [vmem:[%s16804_s16 + $0x9c0] sm:$0xff]  ;;  %v10809_v1 = vld [vmem:[%s16804_s16 + $0x938] sm:$0xff] }
 0xcfc   : > { %9056 = vmatpush.msra.mxu0 %v10727_v34  ;;  %9040 = vmatpush.msrb.mxu3 %v10707_v48  ;;  %v10791_v34 = vld [vmem:[%s16804_s16 + $0x8a8] sm:$0xff] }
 0xcfd   : > { %9135 = vmatpush.msrb.mxu2 %v10758_v13  ;;  %9116 = vmatpush.msra.mxu1 %v10741_v15  ;;  %v10771_v48 = vld [vmem:[%s16804_s16 + $0x808] sm:$0xff]  ;;  %v10825_v13 = vld [vmem:[%s16804_s16 + $0x9b8] sm:$0xff]  ;;  %v10808_v15 = vld [vmem:[%s16804_s16 + $0x930] sm:$0xff] }
 0xcfe   : > { %9057 = vmatpush.msra.mxu0 %v10726_v59  ;;  %9041 = vmatpush.msrb.mxu3 %v10706_v21  ;;  %v10790_v59 = vld [vmem:[%s16804_s16 + $0x8a0] sm:$0xff] }
 0xcff   : > { %9136 = vmatpush.msrb.mxu2 %v10757_v22  ;;  %9117 = vmatpush.msra.mxu1 %v10740_v29  ;;  %v10770_v21 = vld [vmem:[%s16804_s16 + $0x800] sm:$0xff]  ;;  %v10824_v22 = vld [vmem:[%s16804_s16 + $0x9b0] sm:$0xff]  ;;  %v10807_v29 = vld [vmem:[%s16804_s16 + $0x928] sm:$0xff] }
 0xd00   : > { %9178 = vmatpush.msra.mxu3 %v10785_v45  ;;  %9058 = vmatpush.msra.mxu0 %v10725_v11  ;;  %v10849_v45 = vld [vmem:[%s16804_s16 + $0xa78] sm:$0xff] }
 0xd01   : > { %9137 = vmatpush.msrb.mxu2 %v10756_v63  ;;  %9042 = vmatmul.f32.vlgmr.msrb.gmra.mxu3 %v9022_v8  ;;  %v10789_v11 = vld [vmem:[%s16804_s16 + $0x898] sm:$0xff]  ;;  %v10823_v63 = vld [vmem:[%s16804_s16 + $0x9a8] sm:$0xff] }
 0xd02   : > { %9179 = vmatpush.msra.mxu3 %v10784_v27  ;;  %9059 = vmatpush.msra.mxu0 %v10724_v6  ;;  %v10848_v27 = vld [vmem:[%s16804_s16 + $0xa70] sm:$0xff]  ;;  %v10843_v8 = vld [vmem:[%s16804_s16 + $0xa48] sm:$0xff] }
 0xd03   : > { %9138 = vmatpush.msrb.mxu2 %v10755_v25  ;;  %9118 = vmatpush.msra.mxu1 %v10739_v62  ;;  %v10788_v6 = vld [vmem:[%s16804_s16 + $0x890] sm:$0xff]  ;;  %v10822_v25 = vld [vmem:[%s16804_s16 + $0x9a0] sm:$0xff] }
 0xd04   : > { %9180 = vmatpush.msra.mxu3 %v10783_v23  ;;  %9060 = vmatpush.msra.mxu0 %v10723_v43  ;;  %v10847_v23 = vld [vmem:[%s16804_s16 + $0xa68] sm:$0xff]  ;;  %v10818_v62 = vld [vmem:[%s16804_s16 + $0x980] sm:$0xff] }
 0xd05   : > { %9139 = vmatpush.msrb.mxu2 %v10754_v2  ;;  %9119 = vmatpush.msra.mxu1 %v10738_v18  ;;  %v10787_v43 = vld [vmem:[%s16804_s16 + $0x888] sm:$0xff]  ;;  %v10821_v2 = vld [vmem:[%s16804_s16 + $0x998] sm:$0xff] }
 0xd06   : > { %9181 = vmatpush.msra.mxu3 %v10782_v31  ;;  %9061 = vmatpush.msra.mxu0 %v10722_v54  ;;  %v10846_v31 = vld [vmem:[%s16804_s16 + $0xa60] sm:$0xff]  ;;  %v10861_v18 = vld [vmem:[%s16804_s16 + $0xad8] sm:$0xff] }
 0xd07   : > { %8984 = vmatmul.f32.vlgmr.msra.gmra.mxu2 %v8945_v56  ;;  %8964 = vmatmul.f32.vlgmr.msrb.gmra.mxu1 %v8944_v38  ;;  %v10786_v54 = vld [vmem:[%s16804_s16 + $0x880] sm:$0xff]  ;;  %v10844_v56 = vld [vmem:[%s16804_s16 + $0xa50] sm:$0xff] }
 0xd08   : > { %9198 = vmatpush.msrb.mxu0 %v10801_v19  ;;  %9182 = vmatpush.msra.mxu3 %v10781_v9  ;;  %v10865_v19 = vld [vmem:[%s16804_s16 + $0xaf8] sm:$0xff]  ;;  %v10840_v38 = vld [vmem:[%s16804_s16 + $0xa30] sm:$0xff] }
 0xd09   : > { %9278 = vmatpush.msra.mxu2 %v10833_v24  ;;  %9258 = vmatpush.msrb.mxu1 %v10817_v0  ;;  %v10845_v9 = vld [vmem:[%s16804_s16 + $0xa58] sm:$0xff]  ;;  %v10806_v24 = vld [vmem:[%s16804_s16 + $0x920] sm:$0xff]  ;;  %v10803_v0 = vld [vmem:[%s16804_s16 + $0x908] sm:$0xff] }
 0xd0a   : > { %9199 = vmatpush.msrb.mxu0 %v10800_v58  ;;  %9183 = vmatpush.msra.mxu3 %v10780_v46  ;;  %v10820_v58 = vld [vmem:[%s16804_s16 + $0x990] sm:$0xff] }
 0xd0b   : > { %9279 = vmatpush.msra.mxu2 %v10832_v33  ;;  %9062 = vmatmul.f32.vlgmr.msra.gmra.mxu0 %v9023_v37  ;;  %v10864_v46 = vld [vmem:[%s16804_s16 + $0xaf0] sm:$0xff]  ;;  %v10805_v33 = vld [vmem:[%s16804_s16 + $0x918] sm:$0xff]  ;;  %v10895_v37 = vld [vmem:[%s16804_s16 + $0xbe8] sm:$0xff] }
 0xd0c   : > { %9200 = vmatpush.msrb.mxu0 %v10799_v5  ;;  %9184 = vmatpush.msra.mxu3 %v10779_v10  ;;  %v10819_v5 = vld [vmem:[%s16804_s16 + $0x988] sm:$0xff] }
 0xd0d   : > { %9280 = vmatpush.msra.mxu2 %v10831_v41  ;;  %9259 = vmatpush.msrb.mxu1 %v10816_v7  ;;  %v10863_v10 = vld [vmem:[%s16804_s16 + $0xae8] sm:$0xff]  ;;  %v10804_v41 = vld [vmem:[%s16804_s16 + $0x910] sm:$0xff]  ;;  %v10802_v7 = vld [vmem:[%s16804_s16 + $0x900] sm:$0xff] }
 0xd0e   : > { %9201 = vmatpush.msrb.mxu0 %v10798_v61  ;;  %9185 = vmatpush.msra.mxu3 %v10778_v36  ;;  %v10862_v61 = vld [vmem:[%s16804_s16 + $0xae0] sm:$0xff] }
 0xd0f   : > { %9281 = vmatpush.msra.mxu2 %v10830_v49  ;;  %9260 = vmatpush.msrb.mxu1 %v10815_v47  ;;  %v10842_v36 = vld [vmem:[%s16804_s16 + $0xa40] sm:$0xff]  ;;  %v10897_v49 = vld [vmem:[%s16804_s16 + $0xbf8] sm:$0xff] }
 0xd10   : > { %9202 = vmatpush.msrb.mxu0 %v10797_v16  ;;  %9186 = vmatpush.msra.mxu3 %v10777_v35  ;;  %v10841_v16 = vld [vmem:[%s16804_s16 + $0xa38] sm:$0xff]  ;;  %v9101_v35 = vrot.slane %v15816_v20, 7  ;;  %v10896_v20 = vld [vmem:[%s16804_s16 + $0xbf0] sm:$0xff] }
 0xd11   : > { %9282 = vmatpush.msra.mxu2 %v10829_v53  ;;  %9261 = vmatpush.msrb.mxu1 %v10814_v39  ;;  %v10858_v53 = vld [vmem:[%s16804_s16 + $0xac0] sm:$0xff]  ;;  %v10857_v47 = vld [vmem:[%s16804_s16 + $0xab8] sm:$0xff]  ;;  %v10856_v39 = vld [vmem:[%s16804_s16 + $0xab0] sm:$0xff] }
 0xd12   : > { %9203 = vmatpush.msrb.mxu0 %v10796_v30  ;;  %9187 = vmatpush.msra.mxu3 %v10776_v57  ;;  %v16418_v30 = vpop.f32.mrf.mxu1  ;;  %v10860_v57 = vld [vmem:[%s16804_s16 + $0xad0] sm:$0xff] }
 0xd13   : > { %9283 = vmatpush.msra.mxu2 %v10828_v51  ;;  %9262 = vmatpush.msrb.mxu1 %v10813_v4  ;;  %v10837_v51 = vld [vmem:[%s16804_s16 + $0xa18] sm:$0xff]  ;;  %v10855_v4 = vld [vmem:[%s16804_s16 + $0xaa8] sm:$0xff] }
 0xd14   : > { %9204 = vmatpush.msrb.mxu0 %v10795_v26  ;;  %9188 = vmatpush.msra.mxu3 %v10775_v40  ;;  %v10859_v26 = vld [vmem:[%s16804_s16 + $0xac8] sm:$0xff] }
 0xd15   : > { %9284 = vmatpush.msra.mxu2 %v10827_v14  ;;  %9263 = vmatpush.msrb.mxu1 %v10812_v44  ;;  %v10839_v40 = vld [vmem:[%s16804_s16 + $0xa28] sm:$0xff]  ;;  %v10836_v14 = vld [vmem:[%s16804_s16 + $0xa10] sm:$0xff]  ;;  %v10854_v44 = vld [vmem:[%s16804_s16 + $0xaa0] sm:$0xff] }
 0xd16   : > { %9205 = vmatpush.msrb.mxu0 %v10794_v28  ;;  %9189 = vmatpush.msra.mxu3 %v10774_v55  ;;  %v10838_v28 = vld [vmem:[%s16804_s16 + $0xa20] sm:$0xff] }
 0xd17   : > { %9285 = vmatpush.msra.mxu2 %v10826_v42  ;;  %9264 = vmatpush.msrb.mxu1 %v10811_v12  ;;  %v10894_v55 = vld [vmem:[%s16804_s16 + $0xbe0] sm:$0xff]  ;;  %v10835_v42 = vld [vmem:[%s16804_s16 + $0xa08] sm:$0xff] }
 0xd18   : > { %9206 = vmatpush.msrb.mxu0 %v10793_v52  ;;  %9190 = vmatpush.msra.mxu3 %v10773_v3  ;;  %v9100_v52 = vrot.slane %v15787_v50, 7  ;;  %v10881_v3 = vld [vmem:[%s16804_s16 + $0xb78] sm:$0xff]  ;;  %v10880_v50 = vld [vmem:[%s16804_s16 + $0xb70] sm:$0xff]  ;;  %v10891_v12 = vld [vmem:[%s16804_s16 + $0xbc8] sm:$0xff] }
 0xd19   : > { %9286 = vmatpush.msra.mxu2 %v10825_v13  ;;  %9265 = vmatpush.msrb.mxu1 %v10810_v17  ;;  %v10834_v13 = vld [vmem:[%s16804_s16 + $0xa00] sm:$0xff] }
 0xd1a   : > { %9207 = vmatpush.msrb.mxu0 %v10792_v32  ;;  %9191 = vmatpush.msra.mxu3 %v10772_v60  ;;  %v16470_v32 = vpop.f32.mrf.mxu2  ;;  %v10893_v60 = vld [vmem:[%s16804_s16 + $0xbd8] sm:$0xff]  ;;  %v10890_v17 = vld [vmem:[%s16804_s16 + $0xbc0] sm:$0xff] }
 0xd1b   : > { %9287 = vmatpush.msra.mxu2 %v10824_v22  ;;  %9266 = vmatpush.msrb.mxu1 %v10809_v1  ;;  %v10877_v22 = vld [vmem:[%s16804_s16 + $0xb58] sm:$0xff] }
 0xd1c   : > { %9208 = vmatpush.msrb.mxu0 %v10791_v34  ;;  %9192 = vmatpush.msra.mxu3 %v10771_v48  ;;  %v10879_v34 = vld [vmem:[%s16804_s16 + $0xb68] sm:$0xff]  ;;  %v10892_v48 = vld [vmem:[%s16804_s16 + $0xbd0] sm:$0xff]  ;;  %v10889_v1 = vld [vmem:[%s16804_s16 + $0xbb8] sm:$0xff] }
 0xd1d   : > { %9288 = vmatpush.msra.mxu2 %v10823_v63  ;;  %9267 = vmatpush.msrb.mxu1 %v10808_v15  ;;  %v10876_v63 = vld [vmem:[%s16804_s16 + $0xb50] sm:$0xff] }
 0xd1e   : > { %9209 = vmatpush.msrb.mxu0 %v10790_v59  ;;  %9193 = vmatpush.msra.mxu3 %v10770_v21  ;;  %v10913_v59 = vld [vmem:[%s16804_s16 + $0xc78] sm:$0xff]  ;;  %v10878_v21 = vld [vmem:[%s16804_s16 + $0xb60] sm:$0xff]  ;;  %v10888_v15 = vld [vmem:[%s16804_s16 + $0xbb0] sm:$0xff] }
 0xd1f   : > { %9289 = vmatpush.msra.mxu2 %v10822_v25  ;;  %9268 = vmatpush.msrb.mxu1 %v10807_v29  ;;  %v10875_v25 = vld [vmem:[%s16804_s16 + $0xb48] sm:$0xff]  ;;  %v10928_v29 = vld [vmem:[%s16804_s16 + $0xcf0] sm:$0xff] }
 0xd20   : > { %9336 = vmatpush.msrb.mxu3 %v10849_v45  ;;  %9210 = vmatpush.msrb.mxu0 %v10789_v11  ;;  %v10853_v45 = vld [vmem:[%s16804_s16 + $0xa98] sm:$0xff]  ;;  %v10912_v11 = vld [vmem:[%s16804_s16 + $0xc70] sm:$0xff] }
 0xd21   : > { %9290 = vmatpush.msra.mxu2 %v10821_v2  ;;  %9269 = vmatpush.msrb.mxu1 %v10806_v24  ;;  %v10909_v2 = vld [vmem:[%s16804_s16 + $0xc58] sm:$0xff]  ;;  %v9255_v24 = vrot.slane %v16470_v32, 1 }
 0xd22   : > { %9337 = vmatpush.msrb.mxu3 %v10848_v27  ;;  %9211 = vmatpush.msrb.mxu0 %v10788_v6  ;;  %v10852_v27 = vld [vmem:[%s16804_s16 + $0xa90] sm:$0xff]  ;;  %v10911_v6 = vld [vmem:[%s16804_s16 + $0xc68] sm:$0xff] }
 0xd23   : > { %9291 = vmatpush.msra.mxu2 %v10820_v58  ;;  %9270 = vmatpush.msrb.mxu1 %v10805_v33  ;;  %v10908_v58 = vld [vmem:[%s16804_s16 + $0xc50] sm:$0xff]  ;;  %v9332_v33 = vrot.slane %v16418_v30, 2 }
 0xd24   : > { %9338 = vmatpush.msrb.mxu3 %v10847_v23  ;;  %9212 = vmatpush.msrb.mxu0 %v10787_v43  ;;  %v10851_v23 = vld [vmem:[%s16804_s16 + $0xa88] sm:$0xff]  ;;  %v10910_v43 = vld [vmem:[%s16804_s16 + $0xc60] sm:$0xff] }
 0xd25   : > { %9292 = vmatpush.msra.mxu2 %v10819_v5  ;;  %9271 = vmatpush.msrb.mxu1 %v10804_v41  ;;  %v10927_v5 = vld [vmem:[%s16804_s16 + $0xce8] sm:$0xff]  ;;  %v10925_v41 = vld [vmem:[%s16804_s16 + $0xcd8] sm:$0xff] }
 0xd26   : > { %9339 = vmatpush.msrb.mxu3 %v10846_v31  ;;  %9213 = vmatpush.msrb.mxu0 %v10786_v54  ;;  %v10850_v31 = vld [vmem:[%s16804_s16 + $0xa80] sm:$0xff]  ;;  %v10929_v54 = vld [vmem:[%s16804_s16 + $0xcf8] sm:$0xff] }
 0xd27   : > { %9293 = vmatpush.msra.mxu2 %v10818_v62  ;;  %9194 = vmatmul.f32.vlgmr.msra.gmra.mxu3 %v16418_v30  ;;  %v10926_v62 = vld [vmem:[%s16804_s16 + $0xce0] sm:$0xff] }
 0xd28   : > { %9356 = vmatpush.msra.mxu0 %v10865_v19  ;;  %9340 = vmatpush.msrb.mxu3 %v10845_v9  ;;  %v10874_v19 = vld [vmem:[%s16804_s16 + $0xb40] sm:$0xff]  ;;  %v10887_v9 = vld [vmem:[%s16804_s16 + $0xba8] sm:$0xff] }
 0xd29   : > { %9140 = vmatmul.f32.vlgmr.msrb.gmra.mxu2 %v9101_v35  ;;  %9272 = vmatpush.msrb.mxu1 %v10803_v0  ;;  %v10884_v35 = vld [vmem:[%s16804_s16 + $0xb90] sm:$0xff]  ;;  %v9254_v0 = vrot.slane %v16418_v30, 1 }
 0xd2a   : > { %9357 = vmatpush.msra.mxu0 %v10864_v46  ;;  %9341 = vmatpush.msrb.mxu3 %v10844_v56  ;;  %v10873_v46 = vld [vmem:[%s16804_s16 + $0xb38] sm:$0xff]  ;;  %v10886_v56 = vld [vmem:[%s16804_s16 + $0xba0] sm:$0xff] }
 0xd2b   : > { %9434 = vmatpush.msrb.mxu2 %v10897_v49  ;;  %9273 = vmatpush.msrb.mxu1 %v10802_v7  ;;  %v10924_v49 = vld [vmem:[%s16804_s16 + $0xcd0] sm:$0xff]  ;;  %v9333_v7 = vrot.slane %v16470_v32, 2 }
 0xd2c   : > { %9358 = vmatpush.msra.mxu0 %v10863_v10  ;;  %9342 = vmatpush.msrb.mxu3 %v10843_v8  ;;  %v10907_v10 = vld [vmem:[%s16804_s16 + $0xc48] sm:$0xff]  ;;  %v10872_v8 = vld [vmem:[%s16804_s16 + $0xb30] sm:$0xff] }
 0xd2d   : > { %9435 = vmatpush.msrb.mxu2 %v10896_v20  ;;  %9120 = vmatmul.f32.vlgmr.msra.gmra.mxu1 %v9100_v52  ;;  %v10883_v20 = vld [vmem:[%s16804_s16 + $0xb88] sm:$0xff]  ;;  %v10901_v52 = vld [vmem:[%s16804_s16 + $0xc18] sm:$0xff] }
 0xd2e   : > { %9359 = vmatpush.msra.mxu0 %v10862_v61  ;;  %9343 = vmatpush.msrb.mxu3 %v10842_v36  ;;  %v10906_v61 = vld [vmem:[%s16804_s16 + $0xc40] sm:$0xff]  ;;  %v10885_v36 = vld [vmem:[%s16804_s16 + $0xb98] sm:$0xff] }
 0xd2f   : > { %9436 = vmatpush.msrb.mxu2 %v10895_v37  ;;  %9414 = vmatpush.msra.mxu1 %v10881_v3  ;;  %v10882_v37 = vld [vmem:[%s16804_s16 + $0xb80] sm:$0xff]  ;;  %v10868_v3 = vld [vmem:[%s16804_s16 + $0xb10] sm:$0xff] }
 0xd30   : > { %9360 = vmatpush.msra.mxu0 %v10861_v18  ;;  %9344 = vmatpush.msrb.mxu3 %v10841_v16  ;;  %v10905_v18 = vld [vmem:[%s16804_s16 + $0xc38] sm:$0xff]  ;;  %v10871_v16 = vld [vmem:[%s16804_s16 + $0xb28] sm:$0xff] }
 0xd31   : > { %9437 = vmatpush.msrb.mxu2 %v10894_v55  ;;  %9214 = vmatmul.f32.vlgmr.msrb.gmra.mxu0 %v16470_v32  ;;  %v10869_v55 = vld [vmem:[%s16804_s16 + $0xb18] sm:$0xff] }
 0xd32   : > { %9361 = vmatpush.msra.mxu0 %v10860_v57  ;;  %9345 = vmatpush.msrb.mxu3 %v10840_v38  ;;  %v10904_v57 = vld [vmem:[%s16804_s16 + $0xc30] sm:$0xff]  ;;  %v10870_v38 = vld [vmem:[%s16804_s16 + $0xb20] sm:$0xff] }
 0xd33   : > { %9415 = vmatpush.msra.mxu1 %v10880_v50  ;;  %9438 = vmatpush.msrb.mxu2 %v10893_v60  ;;  %v10867_v50 = vld [vmem:[%s16804_s16 + $0xb08] sm:$0xff] }
 0xd34   : > { %9362 = vmatpush.msra.mxu0 %v10859_v26  ;;  %9346 = vmatpush.msrb.mxu3 %v10839_v40  ;;  %v10923_v26 = vld [vmem:[%s16804_s16 + $0xcc8] sm:$0xff] }
 0xd35   : > { %9416 = vmatpush.msra.mxu1 %v10879_v34  ;;  %9439 = vmatpush.msrb.mxu2 %v10892_v48  ;;  %v10903_v40 = vld [vmem:[%s16804_s16 + $0xc28] sm:$0xff]  ;;  %v9410_v34 = vrot.slane %v16418_v30, 3  ;;  %v10918_v48 = vld [vmem:[%s16804_s16 + $0xca0] sm:$0xff] }
 0xd36   : > { %9363 = vmatpush.msra.mxu0 %v10858_v53  ;;  %9347 = vmatpush.msrb.mxu3 %v10838_v28  ;;  %v10922_v53 = vld [vmem:[%s16804_s16 + $0xcc0] sm:$0xff]  ;;  %v10919_v60 = vld [vmem:[%s16804_s16 + $0xca8] sm:$0xff] }
 0xd37   : > { %9417 = vmatpush.msra.mxu1 %v10878_v21  ;;  %9440 = vmatpush.msrb.mxu2 %v10891_v12  ;;  %v10902_v28 = vld [vmem:[%s16804_s16 + $0xc20] sm:$0xff]  ;;  %v10916_v21 = vld [vmem:[%s16804_s16 + $0xc90] sm:$0xff]  ;;  %v9489_v12 = vrot.slane %v16470_v32, 4 }
 0xd38   : > { %9364 = vmatpush.msra.mxu0 %v10857_v47  ;;  %9348 = vmatpush.msrb.mxu3 %v10837_v51  ;;  %v9411_v47 = vrot.slane %v16470_v32, 3  ;;  %v10921_v51 = vld [vmem:[%s16804_s16 + $0xcb8] sm:$0xff]  ;;  %v9548_v32 = vld [vmem:[%s16806_s18 + $0x60] sm:$0xff] }
 0xd39   : > { %9418 = vmatpush.msra.mxu1 %v10877_v22  ;;  %9441 = vmatpush.msrb.mxu2 %v10890_v17  ;;  %v9550_v22 = vld [vmem:[%s16806_s18 + $0x70] sm:$0xff]  ;;  %v9547_v17 = vld [vmem:[%s16806_s18 + $0x58] sm:$0xff] }
 0xd3a   : > { %9365 = vmatpush.msra.mxu0 %v10856_v39  ;;  %9349 = vmatpush.msrb.mxu3 %v10836_v14  ;;  %v10920_v39 = vld [vmem:[%s16804_s16 + $0xcb0] sm:$0xff] }
 0xd3b   : > { %9419 = vmatpush.msra.mxu1 %v10876_v63  ;;  %9442 = vmatpush.msrb.mxu2 %v10889_v1  ;;  %v10900_v14 = vld [vmem:[%s16804_s16 + $0xc10] sm:$0xff] }
 0xd3c   : > { %9366 = vmatpush.msra.mxu0 %v10855_v4  ;;  %9350 = vmatpush.msrb.mxu3 %v10835_v42  ;;  %v10899_v4 = vld [vmem:[%s16804_s16 + $0xc08] sm:$0xff]  ;;  %v10866_v42 = vld [vmem:[%s16804_s16 + $0xb00] sm:$0xff] }
 0xd3d   : > { %9420 = vmatpush.msra.mxu1 %v10875_v25  ;;  %9443 = vmatpush.msrb.mxu2 %v10888_v15  ;;  %v8654_v25 = vpop.f32.mrf.mxu1  ;;  %v9543_v15 = vld [vmem:[%s16806_s18 + $0x38] sm:$0xff] }
 0xd3e   : > { %9367 = vmatpush.msra.mxu0 %v10854_v44  ;;  %9351 = vmatpush.msrb.mxu3 %v10834_v13  ;;  %v10898_v44 = vld [vmem:[%s16804_s16 + $0xc00] sm:$0xff]  ;;  %v9488_v13 = vrot.slane %v16418_v30, 4 }
 0xd3f   : > { %9421 = vmatpush.msra.mxu1 %v10874_v19  ;;  %9444 = vmatpush.msrb.mxu2 %v10887_v9  ;;  %v10914_v30 = vld [vmem:[%s16804_s16 + $0xc80] sm:$0xff] }
 0xd40   : > { %9492 = vmatpush.msra.mxu3 %v10913_v59  ;;  %9368 = vmatpush.msra.mxu0 %v10853_v45  ;;  %v10917_v59 = vld [vmem:[%s16804_s16 + $0xc98] sm:$0xff]  ;;  %v10915_v45 = vld [vmem:[%s16804_s16 + $0xc88] sm:$0xff] }
 0xd41   : > { %9422 = vmatpush.msra.mxu1 %v10873_v46  ;;  %9445 = vmatpush.msrb.mxu2 %v10886_v56  ;;  %v8614_v63 = vpop.f32.mrf.mxu3 }
 0xd42   : > { %9493 = vmatpush.msra.mxu3 %v10912_v11  ;;  %9369 = vmatpush.msra.mxu0 %v10852_v27  ;;  %v9551_v11 = vld [vmem:[%s16806_s18 + $0x78] sm:$0xff]  ;;  %v9549_v27 = vld [vmem:[%s16806_s18 + $0x68] sm:$0xff] }
 0xd43   : > { %9294 = vmatmul.f32.vlgmr.msra.gmra.mxu2 %v9255_v24  ;;  %9423 = vmatpush.msra.mxu1 %v10872_v8  ;;  %v9540_v8 = vld [vmem:[%s16806_s18 + $0x20] sm:$0xff] }
 0xd44   : > { %9494 = vmatpush.msra.mxu3 %v10911_v6  ;;  %9370 = vmatpush.msra.mxu0 %v10851_v23  ;;  %v9546_v6 = vld [vmem:[%s16806_s18 + $0x50] sm:$0xff]  ;;  %v8634_v23 = vpop.f32.mrf.mxu0 }
 0xd45   : > { %9446 = vmatpush.msrb.mxu2 %v10885_v36  ;;  %9352 = vmatmul.f32.vlgmr.msrb.gmra.mxu3 %v9332_v33  ;;  %v9539_v33 = vld [vmem:[%s16806_s18 + $0x18] sm:$0xff] }
 0xd46   : > { %9495 = vmatpush.msra.mxu3 %v10910_v43  ;;  %9371 = vmatpush.msra.mxu0 %v10850_v31  ;;  %v9545_v43 = vld [vmem:[%s16806_s18 + $0x48] sm:$0xff]  ;;  %v9544_v31 = vld [vmem:[%s16806_s18 + $0x40] sm:$0xff] }
 0xd47   : > { %9424 = vmatpush.msra.mxu1 %v10871_v16  ;;  %9447 = vmatpush.msrb.mxu2 %v10884_v35  ;;  %v8674_v1 = vpop.f32.mrf.mxu2  ;;  %v9537_v35 = vld [vmem:[%s16806_s18 + $0x8] sm:$0xff] }
 0xd48   : > { %9512 = vmatpush.msrb.mxu0 %v10929_v54  ;;  %9496 = vmatpush.msra.mxu3 %v10909_v2  ;;  %v9542_v54 = vld [vmem:[%s16806_s18 + $0x30] sm:$0xff] }
 0xd49   : > { %9425 = vmatpush.msra.mxu1 %v10870_v38  ;;  %9448 = vmatpush.msrb.mxu2 %v10883_v20  ;;  %v8731_v2 = vpop.f32.mrf.mxu3  ;;  %v9536_v20 = vld [vmem:[%s16806_s18] sm:$0xff] }
 0xd4a   : > { %9513 = vmatpush.msrb.mxu0 %v10928_v29  ;;  %9497 = vmatpush.msra.mxu3 %v10908_v58  ;;  %v9541_v29 = vld [vmem:[%s16806_s18 + $0x28] sm:$0xff]  ;;  %v8809_v58 = vpop.f32.mrf.mxu1 }
 0xd4b   : > { %9274 = vmatmul.f32.vlgmr.msrb.gmra.mxu1 %v9254_v0  ;;  %9449 = vmatpush.msrb.mxu2 %v10882_v37 }
 0xd4c   : > { %9514 = vmatpush.msrb.mxu0 %v10927_v5  ;;  %9498 = vmatpush.msra.mxu3 %v10907_v10  ;;  %v8751_v19 = vpop.f32.mrf.mxu0  ;;  %v8635_v10 = vadd.f32 %v8634_v23, %v8614_v63 }
 0xd4d   : > { %9426 = vmatpush.msra.mxu1 %v10869_v55  ;;  %9372 = vmatmul.f32.vlgmr.msra.gmra.mxu0 %v9333_v7  ;;  %v8752_v16 = vadd.f32 %v8751_v19, %v8731_v2 }
 0xd4e   : > { %9515 = vmatpush.msrb.mxu0 %v10926_v62  ;;  %9499 = vmatpush.msra.mxu3 %v10906_v61  ;;  %v8655_v36 = vadd.f32 %v8654_v25, %v8635_v10 }
 0xd4f   : > { %9450 = vmatmul.f32.vlgmr.msrb.gmra.mxu2 %v9411_v47  ;;  %9427 = vmatpush.msra.mxu1 %v10868_v3 }
 0xd50   : > { %9516 = vmatpush.msrb.mxu0 %v10925_v41  ;;  %9500 = vmatpush.msra.mxu3 %v10905_v18  ;;  %v9538_v41 = vld [vmem:[%s16806_s18 + $0x10] sm:$0xff] }
 0xd51   : > { %9428 = vmatpush.msra.mxu1 %v10867_v50 }
 0xd52   : > { %9517 = vmatpush.msrb.mxu0 %v10924_v49  ;;  %9501 = vmatpush.msra.mxu3 %v10904_v57  ;;  %v8675_v57 = vadd.f32 %v8674_v1, %v8655_v36 }
 0xd53   : > { %9429 = vmatpush.msra.mxu1 %v10866_v42 }
 0xd54   : > { %9518 = vmatpush.msrb.mxu0 %v10923_v26  ;;  %9502 = vmatpush.msra.mxu3 %v10903_v40  ;;  %v8754_v0 = vadd.f32 %v8752_v16, %v8675_v57 }
 0xd55   : > { %9430 = vmatmul.f32.vlgmr.msra.gmra.mxu1 %v9410_v34 }
 0xd56   : > { %9519 = vmatpush.msrb.mxu0 %v10922_v53  ;;  %9503 = vmatpush.msra.mxu3 %v10902_v28 }
 0xd57   : > { %9553 = vmatpush.msrb.mxu1 %v9551_v11 }
 0xd58   : > { %9520 = vmatpush.msrb.mxu0 %v10921_v51  ;;  %9504 = vmatpush.msra.mxu3 %v10901_v52 }
 0xd59   : > { %9554 = vmatpush.msrb.mxu1 %v9550_v22 }
 0xd5a   : > { %9521 = vmatpush.msrb.mxu0 %v10920_v39  ;;  %9505 = vmatpush.msra.mxu3 %v10900_v14 }
 0xd5b   : > { %9555 = vmatpush.msrb.mxu1 %v9549_v27  ;;  %v9533_v27 = vld [vmem:[%s16805_s17] sm:$0x1] }
 0xd5c   : > { %9522 = vmatpush.msrb.mxu0 %v10919_v60  ;;  %9506 = vmatpush.msra.mxu3 %v10899_v4 }
 0xd5d   : > { %9556 = vmatpush.msrb.mxu1 %v9548_v32 }
 0xd5e   : > { %9523 = vmatpush.msrb.mxu0 %v10918_v48  ;;  %9507 = vmatpush.msra.mxu3 %v10898_v44 }
 0xd5f   : > { %9508 = vmatmul.f32.vlgmr.msra.gmra.mxu3 %v9488_v13  ;;  %9557 = vmatpush.msrb.mxu1 %v9547_v17 }
 0xd60   : > { %9524 = vmatpush.msrb.mxu0 %v10917_v59 }
 0xd61   : > { %9558 = vmatpush.msrb.mxu1 %v9546_v6  ;;  %v8887_v46 = vpop.f32.mrf.mxu3 }
 0xd62   : > { %9525 = vmatpush.msrb.mxu0 %v10916_v21 }
 0xd63   : > { %9559 = vmatpush.msrb.mxu1 %v9545_v43  ;;  %v8829_v9 = vpop.f32.mrf.mxu2 }
 0xd64   : > { %9526 = vmatpush.msrb.mxu0 %v10915_v45  ;;  %v8830_v38 = vadd.f32 %v8829_v9, %v8809_v58 }
 0xd65   : > { %9560 = vmatpush.msrb.mxu1 %v9544_v31 }
 0xd66   : > { %9527 = vmatpush.msrb.mxu0 %v10914_v30  ;;  %v8832_v7 = vadd.f32 %v8830_v38, %v8754_v0 }
 0xd67   : > { %9528 = vmatmul.f32.vlgmr.msrb.gmra.mxu0 %v9489_v12  ;;  %9561 = vmatpush.msrb.mxu1 %v9543_v15 }
 0xd69   : > { %9562 = vmatpush.msrb.mxu1 %v9542_v54 }
 0xd6a   : > { %v8907_v56 = vpop.f32.mrf.mxu0 }
 0xd6b   : > { %9563 = vmatpush.msrb.mxu1 %v9541_v29  ;;  %v8908_v26 = vadd.f32 %v8907_v56, %v8887_v46 }
 0xd6d   : > { %9564 = vmatpush.msrb.mxu1 %v9540_v8  ;;  %v8910_v55 = vadd.f32 %v8908_v26, %v8832_v7 }
 0xd6f   : > { %9565 = vmatpush.msrb.mxu1 %v9539_v33 }
 0xd71   : > { %9566 = vmatpush.msrb.mxu1 %v9538_v41 }
 0xd73   : > { %9567 = vmatpush.msrb.mxu1 %v9537_v35 }
 0xd75   : > { %9568 = vmatpush.msrb.mxu1 %v9536_v20 }
 0xd84   : > { %v8965_v5 = vpop.f32.mrf.mxu1  ;;  %v9043_v62 = vpop.f32.mrf.mxu3 }
 0xd88   : > { %v9063_v61 = vpop.f32.mrf.mxu0 }
 0xd89   : > { %v9064_v47 = vadd.f32 %v9063_v61, %v9043_v62 }
 0xd8a   : > { %v8985_v24 = vpop.f32.mrf.mxu2 }
 0xd8b   : > { %v8986_v53 = vadd.f32 %v8985_v24, %v8965_v5 }
 0xd8d   : > { %v8988_v52 = vadd.f32 %v8986_v53, %v8910_v55 }
 0xd8f   : > { %v9066_v39 = vadd.f32 %v9064_v47, %v8988_v52 }
 0xdaa   : > { %v9121_v49 = vpop.f32.mrf.mxu1  ;;  %v9195_v40 = vpop.f32.mrf.mxu3 }
 0xdac   : > { %v9141_v18 = vpop.f32.mrf.mxu2 }
 0xdad   : > { %v9142_v3 = vadd.f32 %v9141_v18, %v9121_v49 }
 0xdae   : > { %v9215_v37 = vpop.f32.mrf.mxu0 }
 0xdaf   : > { %v9216_v14 = vadd.f32 %v9215_v37, %v9195_v40  ;;  %v9144_v4 = vadd.f32 %v9142_v3, %v9066_v39 }
 0xdb1   : > { %v9218_v48 = vadd.f32 %v9216_v14, %v9144_v4 }
 0xdc6   : > { %v9295_v28 = vpop.f32.mrf.mxu2 }
 0xdc8   : > { %v9275_v51 = vpop.f32.mrf.mxu1  ;;  %v9353_v50 = vpop.f32.mrf.mxu3 }
 0xdc9   : > { %v9296_v42 = vadd.f32 %v9295_v28, %v9275_v51 }
 0xdca   : > { %v9373_v60 = vpop.f32.mrf.mxu0 }
 0xdcb   : > { %v9374_v44 = vadd.f32 %v9373_v60, %v9353_v50  ;;  %v9298_v59 = vadd.f32 %v9296_v42, %v9218_v48 }
 0xdcd   : > { %v9376_v45 = vadd.f32 %v9374_v44, %v9298_v59 }
 0xdd2   : > { %v9451_v34 = vpop.f32.mrf.mxu2  ;;  %v9431_v13 = vpop.f32.mrf.mxu1 }
 0xdd3   : > { %v9452_v21 = vadd.f32 %v9451_v34, %v9431_v13 }
 0xdd5   : > { %v9454_v11 = vadd.f32 %v9452_v21, %v9376_v45 }
 0xde2   : > { %v9509_v30 = vpop.f32.mrf.mxu3 }
 0xde4   : > { %v9529_v12 = vpop.f32.mrf.mxu0 }
 0xde5   : > { %v9530_v22 = vadd.f32 %v9529_v12, %v9509_v30 }
 0xde7   : > { %v9532_v32 = vadd.f32 %v9530_v22, %v9454_v11 }
 0xde9   : > { %v9534_v17 = vadd.f32 %v9533_v27, %v9532_v32 }
 0xdeb   : > { %v9535_v6 = vmax.f32 %v9534_v17, 0.0 }
 0xded   : > { %9569 = vmatmul.f32.vlgmr.msrb.gmra.mxu1 %v9535_v6  ;;  %9573 = vst [vmem:[%s658_s28] sm:$0x1] %v9535_v6 }
 0xdee   : > { %11016 = shalt.err (!%p11013_p3)
}
 0xdef   : > { %10938 = dma.vmem_to_hbm [thread:$0]  (%p11234_p5), %s9605_s26, 16, %s9607_s22, %s9581_s23   ;;  %v9552_v63 = vld [vmem:[%s16807_s19] sm:$0x1]  ;;  %vm9574_vm7 = vcmask 32768  }
 0xdf0   : > { %s9589_s0 = scalar_lea.hbm %s16808_s20, %s11217_s3  ;;  %s652_s9 = scalar_lea.vmem [#allocation3], %s16734_s24 }
 0xdf1   : > { %s9591_s8 = sshll.u32 %s652_s9, 4  ;;  %s9593_s10 = sshll.u32 %s9589_s0, 4  ;;  %s9592_s8 = int_to_ptr.vmem [resolvable:$true] %s9591_s8  ;;  %s9594_s10 = int_to_ptr.hbm [resolvable:$true] %s9593_s10 }
 0xdf2   : > { %s9577_s4 = scalar_lea.sflag [#allocation4], %s16734_s24  ;;  %s11031_s26 = sshra.s32 %s9594_s10, 4  ;;  %s11032_s26 = int_to_ptr.hbm [resolvable:$true] %s11031_s26 }
 0xdf3   : > { %s11033_s22 = scalar_lea.hbm %s11032_s26, 1  ;;  %s11037_s30 = scalar_lea.hbm %s16808_s20, 2 }
 0xdf4   : > { %p11034_p4 = scmp.ne.s32.totalorder %s11032_s26, %s11033_s22  ;;  %p11038_p9 = scmp.lt.s32.totalorder %s11032_s26, %s16808_s20 }
 0xdf5   : > { %p11039_p10 = scmp.lt.s32.totalorder %s11037_s30, %s11033_s22 }
 0xdf6   : > { %p11035_p7 = pnand %p11034_p4, %p11234_p5 }
 0xdf7   : > { %p11040_p11 = por %p11039_p10, %p11038_p9 }
 0xdf8   : > { %p11036_p8 = pneg %p11035_p7 }
 0xdfa   : > { %p11041_p12 = pnand %p11040_p11, %p11036_p8 }
 0xe6a   : > { %v9570_v23 = vpop.f32.mrf.mxu1 }
 0xe6b   : > { %v9571_v1 = vadd.f32 %v9570_v23, %v9552_v63 }
 0xe6d   : > { %9575 = vst.msk [vmem:[%s652_s9] sm:$0x1] %vm9574_vm7, %v9571_v1 }
 0xe6e   : > { %11044 = shalt.err (!%p11041_p12)
}
 0xe6f   : > { %10937 = dma.vmem_to_hbm [thread:$0]  (%p11234_p5), %s9592_s8, 16, %s9594_s10, %s9577_s4  }
 0xe70 PF: > { %s17499_s24 = sld [smem:[#allocation9_spill]]  ;;  %p10948_p13 = scmp.ge.s32.totalorder %s11083_s27, 2 }
 0xe72   : > { %p10942_p0 = pnand %p10948_p13, %p11238_p6 }
 0xe74   : > { %p10943_p1 = pneg %p10942_p0 }
 0xe76   : > { %s9618_s0 = sand.u32 1, %s17499_s24  }
 0xe77   : > { %s9619_s6 = scalar_lea.sflag [#allocation4], %s9618_s0 }
 0xe78   : > { %11062 = dma.done.wait (%p10943_p1), %s9619_s6, 16  }
 0xe79   : > { %11064 = vsyncadd (%p10943_p1), %s9619_s6, 4294967280  ;;  %s9628_s7 = scalar_lea.sflag [#allocation6], %s9618_s0 }
 0xe7a   : > { %11066 = dma.done.wait (%p10943_p1), %s9628_s7, 16  }
 0xe7b   : > { %11068 = vsyncadd (%p10943_p1), %s9628_s7, 4294967280  ;;  %s17501_s27 = sld [smem:[#allocation11_spill]]  ;;  %s17504_s2 = smov %s11075_s25 }
 0xe7c   : > { %s17502_s9 = sld [smem:[#allocation10_spill]] }
 0xe7d   : > { %s17503_s26 = sld [smem:[#allocation12_spill]] }
 0xe81   : > { %p35_p5 = scmp.ge.s32.totalorder %s17501_s27, 4  }
 0xe82   : > { %s17505_s25 = smov %s17502_s9 }
 0xe83   :  { %37 = sbr.rel (!%p35_p5) target bundleno = 17 (0x11), region = 182 }
 0xe88   :  { %9633 = vsyncpa [#allocation4], 1 }
 0xe89   :  { %9635 = vsyncpa [#allocation4 + $0x1], 1 }
 0xe8a   :  { %9636 = vsyncpa [#allocation6], 1 }
 0xe8b   :  { %9638 = vsyncpa [#allocation6 + $0x1], 1 }

</bundles_post_ra>
